<compile_context>
chip_gen: v7x
topology: tpu7x:2x2x1
jax: 0.10.0
libtpu: 0.0.40
codegen_flags: <defaults>
</compile_context>

<pallas_src>
import functools

import numpy as np
import jax
import jax.numpy as jnp
from jax.experimental import pallas as pl
from jax.experimental.pallas import tpu as pltpu

_EPS = 1e-5


def _pad8(c):
    return ((c + 7) // 8) * 8


# --------------------------- host-side plumbing -------------------------------
# Padded-flat layout: flat index = n*Hp*Wp + py*Wp + px with Hp=H+2, Wp=W+2;
# interior (valid) positions are 1 <= py <= H, 1 <= px <= W.

def _interior_mask(N, Hr, Wr):
    Hp, Wp = Hr + 2, Wr + 2
    m = np.zeros((N, Hp, Wp), np.float32)
    m[:, 1:Hr + 1, 1:Wr + 1] = 1.0
    return m.reshape(1, N * Hp * Wp)


def _pool_select(N, Hr, Wr):
    # (S_hi, S_lo): picks the 2x2 window-max located at hi (n,1+2oy,1+2ox) and
    # drops it at lo (n,1+oy,1+ox).  Output halo columns stay all-zero.
    Hp, Wp = Hr + 2, Wr + 2
    Ho, Wo = Hr // 2, Wr // 2
    Hq, Wq = Ho + 2, Wo + 2
    P = np.zeros((N * Hp * Wp, N * Hq * Wq), np.float32)
    for n in range(N):
        for oy in range(Ho):
            for ox in range(Wo):
                P[n * Hp * Wp + (1 + 2 * oy) * Wp + (1 + 2 * ox),
                  n * Hq * Wq + (1 + oy) * Wq + (1 + ox)] = 1.0
    return P


def _upsample_scatter(N, Hlo, Wlo):
    # (4, S_lo, S_hi): tap k = dy*2+dx scatters lo (n,1+iy,1+ix) to
    # hi (n,1+2iy+dy,1+2ix+dx).  Output halo columns stay all-zero.
    Hp, Wp = Hlo + 2, Wlo + 2
    Hq, Wq = 2 * Hlo + 2, 2 * Wlo + 2
    S = np.zeros((4, N * Hp * Wp, N * Hq * Wq), np.float32)
    for k in range(4):
        dy, dx = k // 2, k % 2
        for n in range(N):
            for iy in range(Hlo):
                for ix in range(Wlo):
                    S[k,
                      n * Hp * Wp + (1 + iy) * Wp + (1 + ix),
                      n * Hq * Wq + (1 + 2 * iy + dy) * Wq + (1 + 2 * ix + dx)] = 1.0
    return S


def build_plumbing(N, H, W, features):
    L = len(features)
    masks = [jnp.asarray(_interior_mask(N, H >> r, W >> r)) for r in range(L + 1)]
    pools = [jnp.asarray(_pool_select(N, H >> r, W >> r), jnp.bfloat16)
             for r in range(L)]
    scats = [jnp.asarray(_upsample_scatter(N, H >> (L - u), W >> (L - u)),
                         jnp.bfloat16) for u in range(L)]
    return dict(masks=masks, pools=pools, scats=scats)


# ----------------------------- in-kernel helpers ------------------------------

def _shifted_taps(a, offsets, guard):
    """shift(a, o)[:, q] = a[:, q+o].  Out-of-range reads hit the zero guard or
    a neighboring image; those values only land on halo positions that are
    masked downstream."""
    C, S = a.shape
    z = jnp.zeros((C, guard), a.dtype)
    ag = jnp.concatenate([z, a, z], axis=1)
    return [ag[:, guard + o: guard + o + S] for o in offsets]


def _conv3x3(a, w_ref, wp, guard):
    """3x3 'same' conv: a (Cin, S) f32 -> (Cout, S) f32 via one bf16 matmul.
    w_ref: (Cout, 9*Cin), column k*Cin+ci = torch weight [cout, ci, dy, dx],
    tap k = dy*3 + dx."""
    offs = [(dy - 1) * wp + (dx - 1) for dy in range(3) for dx in range(3)]
    taps = _shifted_taps(a.astype(jnp.bfloat16), offs, guard)
    slab = jnp.concatenate(taps, axis=0)                       # (9*Cin, S)
    return jnp.dot(w_ref[...], slab, preferred_element_type=jnp.float32)


def _bn_relu(y, gamma, beta, mask, count):
    """Training-mode BatchNorm (biased batch var over valid pixels) + ReLU.
    Halo positions are forced back to exactly 0 so they keep acting as the zero
    padding of the next conv."""
    inv = 1.0 / count
    mean = jnp.sum(y * mask, axis=1, keepdims=True) * inv
    c = (y - mean) * mask
    var = jnp.sum(c * c, axis=1, keepdims=True) * inv
    scale = gamma * jax.lax.rsqrt(var + _EPS)
    return jnp.maximum(c * scale + beta, 0.0) * mask


def _double_conv(a, w1_ref, w2_ref, bn_ref, mask, count, wp, guard):
    bn = bn_ref[...]                                           # (C, 4): g1,b1,g2,b2
    y1 = _conv3x3(a, w1_ref, wp, guard)
    a1 = _bn_relu(y1, bn[:, 0:1], bn[:, 1:2], mask, count)
    y2 = _conv3x3(a1, w2_ref, wp, guard)
    return _bn_relu(y2, bn[:, 2:3], bn[:, 3:4], mask, count)


def _maxpool2x2(a, pool_ref, wp, guard):
    taps = _shifted_taps(a, (0, 1, wp, wp + 1), guard)         # a >= 0, halo = 0
    m = jnp.maximum(jnp.maximum(taps[0], taps[1]),
                    jnp.maximum(taps[2], taps[3]))
    return jnp.dot(m.astype(jnp.bfloat16), pool_ref[...],
                   preferred_element_type=jnp.float32)


def _conv_transpose2x2(a, wt_ref, bt_ref, scat_ref, mask_hi):
    """ConvTranspose2d(k=2, s=2): wt_ref (4, Cout, Cin) with tap k = dy*2+dx,
    scat_ref (4, S_lo, S_hi) 0/1 scatter matrices."""
    a16 = a.astype(jnp.bfloat16)
    out = None
    for k in range(4):
        y = jnp.dot(wt_ref[k], a16, preferred_element_type=jnp.float32)
        y = jnp.dot(y.astype(jnp.bfloat16), scat_ref[k],
                    preferred_element_type=jnp.float32)
        out = y if out is None else out + y
    return out + bt_ref[...] * mask_hi                          # bias on interior only


# ------------------------------ forward wrapper --------------------------------

def unet_forward(x_nchw, params, plumbing, features):
    N, Cin, H, W = x_nchw.shape
    L = len(features)
    out_ch = params["final"]["w"].shape[0]
    cin_pad = _pad8(Cin)

    # per-resolution geometry: (Hr, Wr, Wp, S)
    geom = [(H >> r, W >> r, (W >> r) + 2, N * ((H >> r) + 2) * ((W >> r) + 2))
            for r in range(L + 1)]

    def kernel(*refs):
        it = iter(refs)
        x_ref = next(it)
        mask_refs = [next(it) for _ in range(L + 1)]
        pool_refs = [next(it) for _ in range(L)]
        scat_refs = [next(it) for _ in range(L)]
        down_refs = [(next(it), next(it), next(it)) for _ in range(L)]
        bott_refs = (next(it), next(it), next(it))
        up_refs = [(next(it), next(it), next(it), next(it), next(it))
                   for _ in range(L)]
        wf_ref, bf_ref = next(it), next(it)
        out_ref = next(it)

        masks = [m[...] for m in mask_refs]

        x = x_ref[...]
        skips = []
        for l in range(L):                                     # encoder
            Hr, Wr, wp, _ = geom[l]
            w1, w2, bn = down_refs[l]
            a = _double_conv(x, w1, w2, bn, masks[l],
                             float(N * Hr * Wr), wp, wp + 1)
            skips.append(a)
            x = _maxpool2x2(a, pool_refs[l], wp, wp + 1)

        Hr, Wr, wp, _ = geom[L]                                # bottleneck
        w1, w2, bn = bott_refs
        x = _double_conv(x, w1, w2, bn, masks[L],
                         float(N * Hr * Wr), wp, wp + 1)

        for u in range(L):                                     # decoder
            r = L - 1 - u
            Hr, Wr, wp, _ = geom[r]
            wt, bt, w1, w2, bn = up_refs[u]
            xup = _conv_transpose2x2(x, wt, bt, scat_refs[u], masks[r])
            # TODO(synk): TF.resize branch (shape mismatch) not implemented.
            cat = jnp.concatenate([skips[r], xup], axis=0)     # torch.cat((skip, x), ch)
            x = _double_conv(cat, w1, w2, bn, masks[r],
                             float(N * Hr * Wr), wp, wp + 1)

        y = jnp.dot(wf_ref[...], x.astype(jnp.bfloat16),       # final 1x1 conv
                    preferred_element_type=jnp.float32) + bf_ref[...]
        out_ref[...] = y

    # input: pad channels to a multiple of 8, zero-pad spatial by 1, flatten
    # to the padded-flat (C, N*Hp*Wp) layout (channels on sublanes, spatial on lanes).
    xp = jnp.pad(x_nchw, ((0, 0), (0, cin_pad - Cin), (1, 1), (1, 1)))
    x_flat = xp.transpose(1, 0, 2, 3).reshape(cin_pad, geom[0][3])

    bf16 = jnp.bfloat16
    args = [x_flat] + list(plumbing["masks"]) + list(plumbing["pools"]) \
           + list(plumbing["scats"])
    for p in params["downs"]:
        args += [p["w1"].astype(bf16), p["w2"].astype(bf16), p["bn"]]
    p = params["bottleneck"]
    args += [p["w1"].astype(bf16), p["w2"].astype(bf16), p["bn"]]
    for p in params["ups"]:
        args += [p["wt"].astype(bf16), p["bt"], p["w1"].astype(bf16),
                 p["w2"].astype(bf16), p["bn"]]
    args += [params["final"]["w"].astype(bf16), params["final"]["b"]]

    def _fs(shape):
        zeros = (0,) * len(shape)
        return pl.BlockSpec(shape, lambda i, _z=zeros: _z)

    s0 = geom[0][3]
    out = pl.pallas_call(
        kernel,
        out_shape=jax.ShapeDtypeStruct((out_ch, s0), jnp.float32),
        grid=(1,),
        in_specs=[_fs(a.shape) for a in args],
        out_specs=_fs((out_ch, s0)),
        compiler_params=pltpu.CompilerParams(
            dimension_semantics=("arbitrary",),
            vmem_limit_bytes=32 * 1024 * 1024),
    )(*args)

    # (out_ch, N*Hp*Wp) padded-flat -> NCHW interior (tiny wrapper-side slice).
    Hp, Wp = H + 2, W + 2
    y = out.reshape(out_ch, N, Hp, Wp)[:, :, 1:H + 1, 1:W + 1]
    return jnp.transpose(y, (1, 0, 2, 3))


# ----------------------------- parameter setup --------------------------------

def _init_double_conv(key, cin, cout):
    k1, k2 = jax.random.split(key)
    return dict(
        # (Cout, 9*Cin): column k*Cin + ci holds torch weight [cout, ci, dy, dx],
        # with tap index k = dy*3 + dx.
        w1=0.1 * jax.random.normal(k1, (cout, 9 * cin), jnp.float32),
        w2=0.1 * jax.random.normal(k2, (cout, 9 * cout), jnp.float32),
        # bn columns: gamma1, beta1, gamma2, beta2 (PyTorch init: gamma=1, beta=0)
        bn=jnp.concatenate([jnp.ones((cout, 1)), jnp.zeros((cout, 1)),
                            jnp.ones((cout, 1)), jnp.zeros((cout, 1))], axis=1),
    )


def init_unet(key, in_channels=3, out_channels=1, features=(8, 16)):
    L = len(features)
    cin_pad = _pad8(in_channels)
    keys = iter(jax.random.split(key, 3 * L + 4))
    downs, c = [], cin_pad
    for i, f in enumerate(features):
        p = _init_double_conv(next(keys), c, f)
        if i == 0 and cin_pad != in_channels:
            # zero the weight columns that multiply the zero-padded input channels
            w = p["w1"].reshape(f, 9, cin_pad)
            p["w1"] = w.at[:, :, in_channels:].set(0.0).reshape(f, 9 * cin_pad)
        downs.append(p)
        c = f
    ups = []
    for f in reversed(features):
        k1, k2 = jax.random.split(next(keys))
        ups.append(dict(
            # wt[k, co, ci] = torch ConvTranspose2d weight [ci, co, dy, dx], k=dy*2+dx
            wt=0.1 * jax.random.normal(k1, (4, f, 2 * f), jnp.float32),
            bt=0.1 * jax.random.normal(k2, (f, 1), jnp.float32),
            **_init_double_conv(next(keys), 2 * f, f)))
    bottleneck = _init_double_conv(next(keys), features[-1], features[-1] * 2)
    k1, k2 = jax.random.split(next(keys))
    final = dict(
        w=0.1 * jax.random.normal(k1, (out_channels, features[0]), jnp.float32),
        b=0.1 * jax.random.normal(k2, (out_channels, 1), jnp.float32))
    return dict(downs=downs, ups=ups, bottleneck=bottleneck, final=final)


# ----------------------------------- main --------------------------------------

if __name__ == "__main__":
    key = jax.random.PRNGKey(0)
    kx, kp = jax.random.split(key)

    in_channels, out_channels = 3, 1
    features = (8, 16)          # small UNET consistent with the module API
    N, H, W = 2, 16, 16

    x = jax.random.normal(kx, (N, in_channels, H, W), jnp.float32)   # NCHW input
    params = init_unet(kp, in_channels, out_channels, features)
    plumbing = build_plumbing(N, H, W, features)

    fwd = jax.jit(functools.partial(unet_forward, features=features))
    y = jax.block_until_ready(fwd(x, params, plumbing))

    assert y.shape == (N, out_channels, H, W), y.shape
    assert bool(jnp.all(jnp.isfinite(y)))
    print("KERNEL_OK")
</pallas_src>

<mosaic_0001>
module attributes {stable_mosaic.version = 11 : i64} {
  func.func @kernel(%arg0: i32, %arg1: memref<8x648xf32, #tpu.memory_space<vmem>>, %arg2: memref<1x648xf32, #tpu.memory_space<vmem>>, %arg3: memref<1x200xf32, #tpu.memory_space<vmem>>, %arg4: memref<1x72xf32, #tpu.memory_space<vmem>>, %arg5: memref<648x200xbf16, #tpu.memory_space<vmem>>, %arg6: memref<200x72xbf16, #tpu.memory_space<vmem>>, %arg7: memref<4x72x200xbf16, #tpu.memory_space<vmem>>, %arg8: memref<4x200x648xbf16, #tpu.memory_space<vmem>>, %arg9: memref<8x72xbf16, #tpu.memory_space<vmem>>, %arg10: memref<8x72xbf16, #tpu.memory_space<vmem>>, %arg11: memref<8x4xf32, #tpu.memory_space<vmem>>, %arg12: memref<16x72xbf16, #tpu.memory_space<vmem>>, %arg13: memref<16x144xbf16, #tpu.memory_space<vmem>>, %arg14: memref<16x4xf32, #tpu.memory_space<vmem>>, %arg15: memref<32x144xbf16, #tpu.memory_space<vmem>>, %arg16: memref<32x288xbf16, #tpu.memory_space<vmem>>, %arg17: memref<32x4xf32, #tpu.memory_space<vmem>>, %arg18: memref<4x16x32xbf16, #tpu.memory_space<vmem>>, %arg19: memref<16x1xf32, #tpu.memory_space<vmem>>, %arg20: memref<16x288xbf16, #tpu.memory_space<vmem>>, %arg21: memref<16x144xbf16, #tpu.memory_space<vmem>>, %arg22: memref<16x4xf32, #tpu.memory_space<vmem>>, %arg23: memref<4x8x16xbf16, #tpu.memory_space<vmem>>, %arg24: memref<8x1xf32, #tpu.memory_space<vmem>>, %arg25: memref<8x144xbf16, #tpu.memory_space<vmem>>, %arg26: memref<8x72xbf16, #tpu.memory_space<vmem>>, %arg27: memref<8x4xf32, #tpu.memory_space<vmem>>, %arg28: memref<1x8xbf16, #tpu.memory_space<vmem>>, %arg29: memref<1x1xf32, #tpu.memory_space<vmem>>, %arg30: memref<1x648xf32, #tpu.memory_space<vmem>>) attributes {dimension_semantics = [#tpu.dimension_semantics<arbitrary>], iteration_bounds = array<i64: 1>, scalar_prefetch = 0 : i64, scratch_operands = 0 : i64, tpu.core_type = #tpu.core_type<tc>, window_params = [{pipeline_mode = #tpu.pipeline_mode<synchronous>, transform_indices = @transform_0, window_bounds = array<i64: 8, 648>}, {pipeline_mode = #tpu.pipeline_mode<synchronous>, transform_indices = @transform_1, window_bounds = array<i64: 1, 648>}, {pipeline_mode = #tpu.pipeline_mode<synchronous>, transform_indices = @transform_2, window_bounds = array<i64: 1, 200>}, {pipeline_mode = #tpu.pipeline_mode<synchronous>, transform_indices = @transform_3, window_bounds = array<i64: 1, 72>}, {pipeline_mode = #tpu.pipeline_mode<synchronous>, transform_indices = @transform_4, window_bounds = array<i64: 648, 200>}, {pipeline_mode = #tpu.pipeline_mode<synchronous>, transform_indices = @transform_5, window_bounds = array<i64: 200, 72>}, {pipeline_mode = #tpu.pipeline_mode<synchronous>, transform_indices = @transform_6, window_bounds = array<i64: 4, 72, 200>}, {pipeline_mode = #tpu.pipeline_mode<synchronous>, transform_indices = @transform_7, window_bounds = array<i64: 4, 200, 648>}, {pipeline_mode = #tpu.pipeline_mode<synchronous>, transform_indices = @transform_8, window_bounds = array<i64: 8, 72>}, {pipeline_mode = #tpu.pipeline_mode<synchronous>, transform_indices = @transform_9, window_bounds = array<i64: 8, 72>}, {pipeline_mode = #tpu.pipeline_mode<synchronous>, transform_indices = @transform_10, window_bounds = array<i64: 8, 4>}, {pipeline_mode = #tpu.pipeline_mode<synchronous>, transform_indices = @transform_11, window_bounds = array<i64: 16, 72>}, {pipeline_mode = #tpu.pipeline_mode<synchronous>, transform_indices = @transform_12, window_bounds = array<i64: 16, 144>}, {pipeline_mode = #tpu.pipeline_mode<synchronous>, transform_indices = @transform_13, window_bounds = array<i64: 16, 4>}, {pipeline_mode = #tpu.pipeline_mode<synchronous>, transform_indices = @transform_14, window_bounds = array<i64: 32, 144>}, {pipeline_mode = #tpu.pipeline_mode<synchronous>, transform_indices = @transform_15, window_bounds = array<i64: 32, 288>}, {pipeline_mode = #tpu.pipeline_mode<synchronous>, transform_indices = @transform_16, window_bounds = array<i64: 32, 4>}, {pipeline_mode = #tpu.pipeline_mode<synchronous>, transform_indices = @transform_17, window_bounds = array<i64: 4, 16, 32>}, {pipeline_mode = #tpu.pipeline_mode<synchronous>, transform_indices = @transform_18, window_bounds = array<i64: 16, 1>}, {pipeline_mode = #tpu.pipeline_mode<synchronous>, transform_indices = @transform_19, window_bounds = array<i64: 16, 288>}, {pipeline_mode = #tpu.pipeline_mode<synchronous>, transform_indices = @transform_20, window_bounds = array<i64: 16, 144>}, {pipeline_mode = #tpu.pipeline_mode<synchronous>, transform_indices = @transform_21, window_bounds = array<i64: 16, 4>}, {pipeline_mode = #tpu.pipeline_mode<synchronous>, transform_indices = @transform_22, window_bounds = array<i64: 4, 8, 16>}, {pipeline_mode = #tpu.pipeline_mode<synchronous>, transform_indices = @transform_23, window_bounds = array<i64: 8, 1>}, {pipeline_mode = #tpu.pipeline_mode<synchronous>, transform_indices = @transform_24, window_bounds = array<i64: 8, 144>}, {pipeline_mode = #tpu.pipeline_mode<synchronous>, transform_indices = @transform_25, window_bounds = array<i64: 8, 72>}, {pipeline_mode = #tpu.pipeline_mode<synchronous>, transform_indices = @transform_26, window_bounds = array<i64: 8, 4>}, {pipeline_mode = #tpu.pipeline_mode<synchronous>, transform_indices = @transform_27, window_bounds = array<i64: 1, 8>}, {pipeline_mode = #tpu.pipeline_mode<synchronous>, transform_indices = @transform_28, window_bounds = array<i64: 1, 1>}, {pipeline_mode = #tpu.pipeline_mode<synchronous>, transform_indices = @transform_29, window_bounds = array<i64: 1, 648>}]} {
    %c0 = arith.constant 0 : index
    %c0_0 = arith.constant 0 : index
    %0 = vector.load %arg2[%c0, %c0_0] : memref<1x648xf32, #tpu.memory_space<vmem>>, vector<1x648xf32>
    %c0_1 = arith.constant 0 : index
    %c0_2 = arith.constant 0 : index
    %1 = vector.load %arg3[%c0_1, %c0_2] : memref<1x200xf32, #tpu.memory_space<vmem>>, vector<1x200xf32>
    %c0_3 = arith.constant 0 : index
    %c0_4 = arith.constant 0 : index
    %2 = vector.load %arg4[%c0_3, %c0_4] : memref<1x72xf32, #tpu.memory_space<vmem>>, vector<1x72xf32>
    %c0_5 = arith.constant 0 : index
    %c0_6 = arith.constant 0 : index
    %3 = vector.load %arg1[%c0_5, %c0_6] : memref<8x648xf32, #tpu.memory_space<vmem>>, vector<8x648xf32>
    %c0_7 = arith.constant 0 : index
    %c0_8 = arith.constant 0 : index
    %4 = vector.load %arg11[%c0_7, %c0_8] : memref<8x4xf32, #tpu.memory_space<vmem>>, vector<8x4xf32>
    %5 = arith.truncf %3 : vector<8x648xf32> to vector<8x648xbf16>
    %cst = arith.constant 0.000000e+00 : bf16
    %6 = vector.broadcast %cst : bf16 to vector<8x19xbf16>
    %7 = tpu.concatenate %6, %5, %6 in 1 : vector<8x19xbf16>, vector<8x648xbf16>, vector<8x19xbf16> -> vector<8x686xbf16>
    %8 = vector.extract_strided_slice %7 {offsets = [0, 0], sizes = [8, 648], strides = [1, 1]} : vector<8x686xbf16> to vector<8x648xbf16>
    %9 = vector.extract_strided_slice %7 {offsets = [0, 1], sizes = [8, 648], strides = [1, 1]} : vector<8x686xbf16> to vector<8x648xbf16>
    %10 = vector.extract_strided_slice %7 {offsets = [0, 2], sizes = [8, 648], strides = [1, 1]} : vector<8x686xbf16> to vector<8x648xbf16>
    %11 = vector.extract_strided_slice %7 {offsets = [0, 18], sizes = [8, 648], strides = [1, 1]} : vector<8x686xbf16> to vector<8x648xbf16>
    %12 = vector.extract_strided_slice %7 {offsets = [0, 19], sizes = [8, 648], strides = [1, 1]} : vector<8x686xbf16> to vector<8x648xbf16>
    %13 = vector.extract_strided_slice %7 {offsets = [0, 20], sizes = [8, 648], strides = [1, 1]} : vector<8x686xbf16> to vector<8x648xbf16>
    %14 = vector.extract_strided_slice %7 {offsets = [0, 36], sizes = [8, 648], strides = [1, 1]} : vector<8x686xbf16> to vector<8x648xbf16>
    %15 = vector.extract_strided_slice %7 {offsets = [0, 37], sizes = [8, 648], strides = [1, 1]} : vector<8x686xbf16> to vector<8x648xbf16>
    %16 = vector.extract_strided_slice %7 {offsets = [0, 38], sizes = [8, 648], strides = [1, 1]} : vector<8x686xbf16> to vector<8x648xbf16>
    %17 = tpu.concatenate %8, %9, %10, %11, %12, %13, %14, %15, %16 in 0 : vector<8x648xbf16>, vector<8x648xbf16>, vector<8x648xbf16>, vector<8x648xbf16>, vector<8x648xbf16>, vector<8x648xbf16>, vector<8x648xbf16>, vector<8x648xbf16>, vector<8x648xbf16> -> vector<72x648xbf16>
    %c0_9 = arith.constant 0 : index
    %c0_10 = arith.constant 0 : index
    %18 = vector.load %arg9[%c0_9, %c0_10] : memref<8x72xbf16, #tpu.memory_space<vmem>>, vector<8x72xbf16>
    %cst_11 = arith.constant dense<0.000000e+00> : vector<8x648xf32>
    %19 = tpu.matmul %18, %17, %cst_11 {dimension_numbers = #tpu.dot_dimension_numbers<[1], [0], [0], [1], [0, 0, 1, 1], [], []>} : vector<8x72xbf16>, vector<72x648xbf16>, vector<8x648xf32> -> vector<8x648xf32>
    %20 = vector.extract_strided_slice %4 {offsets = [0, 0], sizes = [8, 1], strides = [1, 1]} : vector<8x4xf32> to vector<8x1xf32>
    %21 = vector.extract_strided_slice %4 {offsets = [0, 1], sizes = [8, 1], strides = [1, 1]} : vector<8x4xf32> to vector<8x1xf32>
    %22 = vector.broadcast %0 : vector<1x648xf32> to vector<8x648xf32>
    %23 = arith.mulf %19, %22 : vector<8x648xf32>
    %cst_12 = arith.constant dense<0.000000e+00> : vector<8xf32>
    %24 = vector.multi_reduction <add>, %23, %cst_12 [1] : vector<8x648xf32> to vector<8xf32>
    %25 = vector.shape_cast %24 : vector<8xf32> to vector<8x1xf32>
    %cst_13 = arith.constant 0.001953125 : f32
    %26 = vector.broadcast %cst_13 : f32 to vector<8x1xf32>
    %27 = arith.mulf %25, %26 : vector<8x1xf32>
    %28 = vector.broadcast %27 : vector<8x1xf32> to vector<8x648xf32>
    %29 = arith.subf %19, %28 : vector<8x648xf32>
    %30 = vector.broadcast %0 : vector<1x648xf32> to vector<8x648xf32>
    %31 = arith.mulf %29, %30 : vector<8x648xf32>
    %32 = arith.mulf %31, %31 : vector<8x648xf32>
    %cst_14 = arith.constant dense<0.000000e+00> : vector<8xf32>
    %33 = vector.multi_reduction <add>, %32, %cst_14 [1] : vector<8x648xf32> to vector<8xf32>
    %34 = vector.shape_cast %33 : vector<8xf32> to vector<8x1xf32>
    %cst_15 = arith.constant 0.001953125 : f32
    %35 = vector.broadcast %cst_15 : f32 to vector<8x1xf32>
    %36 = arith.mulf %34, %35 : vector<8x1xf32>
    %cst_16 = arith.constant 9.99999974E-6 : f32
    %37 = vector.broadcast %cst_16 : f32 to vector<8x1xf32>
    %38 = arith.addf %36, %37 : vector<8x1xf32>
    %39 = math.rsqrt %38 : vector<8x1xf32>
    %40 = arith.mulf %20, %39 : vector<8x1xf32>
    %41 = vector.broadcast %40 : vector<8x1xf32> to vector<8x648xf32>
    %42 = arith.mulf %31, %41 : vector<8x648xf32>
    %43 = vector.broadcast %21 : vector<8x1xf32> to vector<8x648xf32>
    %44 = arith.addf %42, %43 : vector<8x648xf32>
    %cst_17 = arith.constant 0.000000e+00 : f32
    %45 = vector.broadcast %cst_17 : f32 to vector<8x648xf32>
    %46 = arith.maximumf %44, %45 : vector<8x648xf32>
    %47 = vector.broadcast %0 : vector<1x648xf32> to vector<8x648xf32>
    %48 = arith.mulf %46, %47 : vector<8x648xf32>
    %49 = arith.truncf %48 : vector<8x648xf32> to vector<8x648xbf16>
    %cst_18 = arith.constant 0.000000e+00 : bf16
    %50 = vector.broadcast %cst_18 : bf16 to vector<8x19xbf16>
    %51 = tpu.concatenate %50, %49, %50 in 1 : vector<8x19xbf16>, vector<8x648xbf16>, vector<8x19xbf16> -> vector<8x686xbf16>
    %52 = vector.extract_strided_slice %51 {offsets = [0, 0], sizes = [8, 648], strides = [1, 1]} : vector<8x686xbf16> to vector<8x648xbf16>
    %53 = vector.extract_strided_slice %51 {offsets = [0, 1], sizes = [8, 648], strides = [1, 1]} : vector<8x686xbf16> to vector<8x648xbf16>
    %54 = vector.extract_strided_slice %51 {offsets = [0, 2], sizes = [8, 648], strides = [1, 1]} : vector<8x686xbf16> to vector<8x648xbf16>
    %55 = vector.extract_strided_slice %51 {offsets = [0, 18], sizes = [8, 648], strides = [1, 1]} : vector<8x686xbf16> to vector<8x648xbf16>
    %56 = vector.extract_strided_slice %51 {offsets = [0, 19], sizes = [8, 648], strides = [1, 1]} : vector<8x686xbf16> to vector<8x648xbf16>
    %57 = vector.extract_strided_slice %51 {offsets = [0, 20], sizes = [8, 648], strides = [1, 1]} : vector<8x686xbf16> to vector<8x648xbf16>
    %58 = vector.extract_strided_slice %51 {offsets = [0, 36], sizes = [8, 648], strides = [1, 1]} : vector<8x686xbf16> to vector<8x648xbf16>
    %59 = vector.extract_strided_slice %51 {offsets = [0, 37], sizes = [8, 648], strides = [1, 1]} : vector<8x686xbf16> to vector<8x648xbf16>
    %60 = vector.extract_strided_slice %51 {offsets = [0, 38], sizes = [8, 648], strides = [1, 1]} : vector<8x686xbf16> to vector<8x648xbf16>
    %61 = tpu.concatenate %52, %53, %54, %55, %56, %57, %58, %59, %60 in 0 : vector<8x648xbf16>, vector<8x648xbf16>, vector<8x648xbf16>, vector<8x648xbf16>, vector<8x648xbf16>, vector<8x648xbf16>, vector<8x648xbf16>, vector<8x648xbf16>, vector<8x648xbf16> -> vector<72x648xbf16>
    %c0_19 = arith.constant 0 : index
    %c0_20 = arith.constant 0 : index
    %62 = vector.load %arg10[%c0_19, %c0_20] : memref<8x72xbf16, #tpu.memory_space<vmem>>, vector<8x72xbf16>
    %cst_21 = arith.constant dense<0.000000e+00> : vector<8x648xf32>
    %63 = tpu.matmul %62, %61, %cst_21 {dimension_numbers = #tpu.dot_dimension_numbers<[1], [0], [0], [1], [0, 0, 1, 1], [], []>} : vector<8x72xbf16>, vector<72x648xbf16>, vector<8x648xf32> -> vector<8x648xf32>
    %64 = vector.extract_strided_slice %4 {offsets = [0, 2], sizes = [8, 1], strides = [1, 1]} : vector<8x4xf32> to vector<8x1xf32>
    %65 = vector.extract_strided_slice %4 {offsets = [0, 3], sizes = [8, 1], strides = [1, 1]} : vector<8x4xf32> to vector<8x1xf32>
    %66 = vector.broadcast %0 : vector<1x648xf32> to vector<8x648xf32>
    %67 = arith.mulf %63, %66 : vector<8x648xf32>
    %cst_22 = arith.constant dense<0.000000e+00> : vector<8xf32>
    %68 = vector.multi_reduction <add>, %67, %cst_22 [1] : vector<8x648xf32> to vector<8xf32>
    %69 = vector.shape_cast %68 : vector<8xf32> to vector<8x1xf32>
    %cst_23 = arith.constant 0.001953125 : f32
    %70 = vector.broadcast %cst_23 : f32 to vector<8x1xf32>
    %71 = arith.mulf %69, %70 : vector<8x1xf32>
    %72 = vector.broadcast %71 : vector<8x1xf32> to vector<8x648xf32>
    %73 = arith.subf %63, %72 : vector<8x648xf32>
    %74 = vector.broadcast %0 : vector<1x648xf32> to vector<8x648xf32>
    %75 = arith.mulf %73, %74 : vector<8x648xf32>
    %76 = arith.mulf %75, %75 : vector<8x648xf32>
    %cst_24 = arith.constant dense<0.000000e+00> : vector<8xf32>
    %77 = vector.multi_reduction <add>, %76, %cst_24 [1] : vector<8x648xf32> to vector<8xf32>
    %78 = vector.shape_cast %77 : vector<8xf32> to vector<8x1xf32>
    %cst_25 = arith.constant 0.001953125 : f32
    %79 = vector.broadcast %cst_25 : f32 to vector<8x1xf32>
    %80 = arith.mulf %78, %79 : vector<8x1xf32>
    %cst_26 = arith.constant 9.99999974E-6 : f32
    %81 = vector.broadcast %cst_26 : f32 to vector<8x1xf32>
    %82 = arith.addf %80, %81 : vector<8x1xf32>
    %83 = math.rsqrt %82 : vector<8x1xf32>
    %84 = arith.mulf %64, %83 : vector<8x1xf32>
    %85 = vector.broadcast %84 : vector<8x1xf32> to vector<8x648xf32>
    %86 = arith.mulf %75, %85 : vector<8x648xf32>
    %87 = vector.broadcast %65 : vector<8x1xf32> to vector<8x648xf32>
    %88 = arith.addf %86, %87 : vector<8x648xf32>
    %cst_27 = arith.constant 0.000000e+00 : f32
    %89 = vector.broadcast %cst_27 : f32 to vector<8x648xf32>
    %90 = arith.maximumf %88, %89 : vector<8x648xf32>
    %91 = vector.broadcast %0 : vector<1x648xf32> to vector<8x648xf32>
    %92 = arith.mulf %90, %91 : vector<8x648xf32>
    %cst_28 = arith.constant 0.000000e+00 : f32
    %93 = vector.broadcast %cst_28 : f32 to vector<8x19xf32>
    %94 = tpu.concatenate %93, %92, %93 in 1 : vector<8x19xf32>, vector<8x648xf32>, vector<8x19xf32> -> vector<8x686xf32>
    %95 = vector.extract_strided_slice %94 {offsets = [0, 19], sizes = [8, 648], strides = [1, 1]} : vector<8x686xf32> to vector<8x648xf32>
    %96 = vector.extract_strided_slice %94 {offsets = [0, 20], sizes = [8, 648], strides = [1, 1]} : vector<8x686xf32> to vector<8x648xf32>
    %97 = vector.extract_strided_slice %94 {offsets = [0, 37], sizes = [8, 648], strides = [1, 1]} : vector<8x686xf32> to vector<8x648xf32>
    %98 = vector.extract_strided_slice %94 {offsets = [0, 38], sizes = [8, 648], strides = [1, 1]} : vector<8x686xf32> to vector<8x648xf32>
    %99 = arith.maximumf %95, %96 : vector<8x648xf32>
    %100 = arith.maximumf %97, %98 : vector<8x648xf32>
    %101 = arith.maximumf %99, %100 : vector<8x648xf32>
    %102 = arith.truncf %101 : vector<8x648xf32> to vector<8x648xbf16>
    %c0_29 = arith.constant 0 : index
    %c0_30 = arith.constant 0 : index
    %103 = vector.load %arg5[%c0_29, %c0_30] : memref<648x200xbf16, #tpu.memory_space<vmem>>, vector<648x200xbf16>
    %cst_31 = arith.constant dense<0.000000e+00> : vector<8x200xf32>
    %104 = tpu.matmul %102, %103, %cst_31 {dimension_numbers = #tpu.dot_dimension_numbers<[1], [0], [0], [1], [0, 0, 1, 1], [], []>} : vector<8x648xbf16>, vector<648x200xbf16>, vector<8x200xf32> -> vector<8x200xf32>
    %c0_32 = arith.constant 0 : index
    %c0_33 = arith.constant 0 : index
    %105 = vector.load %arg14[%c0_32, %c0_33] : memref<16x4xf32, #tpu.memory_space<vmem>>, vector<16x4xf32>
    %106 = arith.truncf %104 : vector<8x200xf32> to vector<8x200xbf16>
    %cst_34 = arith.constant 0.000000e+00 : bf16
    %107 = vector.broadcast %cst_34 : bf16 to vector<8x11xbf16>
    %108 = tpu.concatenate %107, %106, %107 in 1 : vector<8x11xbf16>, vector<8x200xbf16>, vector<8x11xbf16> -> vector<8x222xbf16>
    %109 = vector.extract_strided_slice %108 {offsets = [0, 0], sizes = [8, 200], strides = [1, 1]} : vector<8x222xbf16> to vector<8x200xbf16>
    %110 = vector.extract_strided_slice %108 {offsets = [0, 1], sizes = [8, 200], strides = [1, 1]} : vector<8x222xbf16> to vector<8x200xbf16>
    %111 = vector.extract_strided_slice %108 {offsets = [0, 2], sizes = [8, 200], strides = [1, 1]} : vector<8x222xbf16> to vector<8x200xbf16>
    %112 = vector.extract_strided_slice %108 {offsets = [0, 10], sizes = [8, 200], strides = [1, 1]} : vector<8x222xbf16> to vector<8x200xbf16>
    %113 = vector.extract_strided_slice %108 {offsets = [0, 11], sizes = [8, 200], strides = [1, 1]} : vector<8x222xbf16> to vector<8x200xbf16>
    %114 = vector.extract_strided_slice %108 {offsets = [0, 12], sizes = [8, 200], strides = [1, 1]} : vector<8x222xbf16> to vector<8x200xbf16>
    %115 = vector.extract_strided_slice %108 {offsets = [0, 20], sizes = [8, 200], strides = [1, 1]} : vector<8x222xbf16> to vector<8x200xbf16>
    %116 = vector.extract_strided_slice %108 {offsets = [0, 21], sizes = [8, 200], strides = [1, 1]} : vector<8x222xbf16> to vector<8x200xbf16>
    %117 = vector.extract_strided_slice %108 {offsets = [0, 22], sizes = [8, 200], strides = [1, 1]} : vector<8x222xbf16> to vector<8x200xbf16>
    %118 = tpu.concatenate %109, %110, %111, %112, %113, %114, %115, %116, %117 in 0 : vector<8x200xbf16>, vector<8x200xbf16>, vector<8x200xbf16>, vector<8x200xbf16>, vector<8x200xbf16>, vector<8x200xbf16>, vector<8x200xbf16>, vector<8x200xbf16>, vector<8x200xbf16> -> vector<72x200xbf16>
    %c0_35 = arith.constant 0 : index
    %c0_36 = arith.constant 0 : index
    %119 = vector.load %arg12[%c0_35, %c0_36] : memref<16x72xbf16, #tpu.memory_space<vmem>>, vector<16x72xbf16>
    %cst_37 = arith.constant dense<0.000000e+00> : vector<16x200xf32>
    %120 = tpu.matmul %119, %118, %cst_37 {dimension_numbers = #tpu.dot_dimension_numbers<[1], [0], [0], [1], [0, 0, 1, 1], [], []>} : vector<16x72xbf16>, vector<72x200xbf16>, vector<16x200xf32> -> vector<16x200xf32>
    %121 = vector.extract_strided_slice %105 {offsets = [0, 0], sizes = [16, 1], strides = [1, 1]} : vector<16x4xf32> to vector<16x1xf32>
    %122 = vector.extract_strided_slice %105 {offsets = [0, 1], sizes = [16, 1], strides = [1, 1]} : vector<16x4xf32> to vector<16x1xf32>
    %123 = vector.broadcast %1 : vector<1x200xf32> to vector<16x200xf32>
    %124 = arith.mulf %120, %123 : vector<16x200xf32>
    %cst_38 = arith.constant dense<0.000000e+00> : vector<16xf32>
    %125 = vector.multi_reduction <add>, %124, %cst_38 [1] : vector<16x200xf32> to vector<16xf32>
    %126 = vector.shape_cast %125 : vector<16xf32> to vector<16x1xf32>
    %cst_39 = arith.constant 7.812500e-03 : f32
    %127 = vector.broadcast %cst_39 : f32 to vector<16x1xf32>
    %128 = arith.mulf %126, %127 : vector<16x1xf32>
    %129 = vector.broadcast %128 : vector<16x1xf32> to vector<16x200xf32>
    %130 = arith.subf %120, %129 : vector<16x200xf32>
    %131 = vector.broadcast %1 : vector<1x200xf32> to vector<16x200xf32>
    %132 = arith.mulf %130, %131 : vector<16x200xf32>
    %133 = arith.mulf %132, %132 : vector<16x200xf32>
    %cst_40 = arith.constant dense<0.000000e+00> : vector<16xf32>
    %134 = vector.multi_reduction <add>, %133, %cst_40 [1] : vector<16x200xf32> to vector<16xf32>
    %135 = vector.shape_cast %134 : vector<16xf32> to vector<16x1xf32>
    %cst_41 = arith.constant 7.812500e-03 : f32
    %136 = vector.broadcast %cst_41 : f32 to vector<16x1xf32>
    %137 = arith.mulf %135, %136 : vector<16x1xf32>
    %cst_42 = arith.constant 9.99999974E-6 : f32
    %138 = vector.broadcast %cst_42 : f32 to vector<16x1xf32>
    %139 = arith.addf %137, %138 : vector<16x1xf32>
    %140 = math.rsqrt %139 : vector<16x1xf32>
    %141 = arith.mulf %121, %140 : vector<16x1xf32>
    %142 = vector.broadcast %141 : vector<16x1xf32> to vector<16x200xf32>
    %143 = arith.mulf %132, %142 : vector<16x200xf32>
    %144 = vector.broadcast %122 : vector<16x1xf32> to vector<16x200xf32>
    %145 = arith.addf %143, %144 : vector<16x200xf32>
    %cst_43 = arith.constant 0.000000e+00 : f32
    %146 = vector.broadcast %cst_43 : f32 to vector<16x200xf32>
    %147 = arith.maximumf %145, %146 : vector<16x200xf32>
    %148 = vector.broadcast %1 : vector<1x200xf32> to vector<16x200xf32>
    %149 = arith.mulf %147, %148 : vector<16x200xf32>
    %150 = arith.truncf %149 : vector<16x200xf32> to vector<16x200xbf16>
    %cst_44 = arith.constant 0.000000e+00 : bf16
    %151 = vector.broadcast %cst_44 : bf16 to vector<16x11xbf16>
    %152 = tpu.concatenate %151, %150, %151 in 1 : vector<16x11xbf16>, vector<16x200xbf16>, vector<16x11xbf16> -> vector<16x222xbf16>
    %153 = vector.extract_strided_slice %152 {offsets = [0, 0], sizes = [16, 200], strides = [1, 1]} : vector<16x222xbf16> to vector<16x200xbf16>
    %154 = vector.extract_strided_slice %152 {offsets = [0, 1], sizes = [16, 200], strides = [1, 1]} : vector<16x222xbf16> to vector<16x200xbf16>
    %155 = vector.extract_strided_slice %152 {offsets = [0, 2], sizes = [16, 200], strides = [1, 1]} : vector<16x222xbf16> to vector<16x200xbf16>
    %156 = vector.extract_strided_slice %152 {offsets = [0, 10], sizes = [16, 200], strides = [1, 1]} : vector<16x222xbf16> to vector<16x200xbf16>
    %157 = vector.extract_strided_slice %152 {offsets = [0, 11], sizes = [16, 200], strides = [1, 1]} : vector<16x222xbf16> to vector<16x200xbf16>
    %158 = vector.extract_strided_slice %152 {offsets = [0, 12], sizes = [16, 200], strides = [1, 1]} : vector<16x222xbf16> to vector<16x200xbf16>
    %159 = vector.extract_strided_slice %152 {offsets = [0, 20], sizes = [16, 200], strides = [1, 1]} : vector<16x222xbf16> to vector<16x200xbf16>
    %160 = vector.extract_strided_slice %152 {offsets = [0, 21], sizes = [16, 200], strides = [1, 1]} : vector<16x222xbf16> to vector<16x200xbf16>
    %161 = vector.extract_strided_slice %152 {offsets = [0, 22], sizes = [16, 200], strides = [1, 1]} : vector<16x222xbf16> to vector<16x200xbf16>
    %162 = tpu.concatenate %153, %154, %155, %156, %157, %158, %159, %160, %161 in 0 : vector<16x200xbf16>, vector<16x200xbf16>, vector<16x200xbf16>, vector<16x200xbf16>, vector<16x200xbf16>, vector<16x200xbf16>, vector<16x200xbf16>, vector<16x200xbf16>, vector<16x200xbf16> -> vector<144x200xbf16>
    %c0_45 = arith.constant 0 : index
    %c0_46 = arith.constant 0 : index
    %163 = vector.load %arg13[%c0_45, %c0_46] : memref<16x144xbf16, #tpu.memory_space<vmem>>, vector<16x144xbf16>
    %cst_47 = arith.constant dense<0.000000e+00> : vector<16x200xf32>
    %164 = tpu.matmul %163, %162, %cst_47 {dimension_numbers = #tpu.dot_dimension_numbers<[1], [0], [0], [1], [0, 0, 1, 1], [], []>} : vector<16x144xbf16>, vector<144x200xbf16>, vector<16x200xf32> -> vector<16x200xf32>
    %165 = vector.extract_strided_slice %105 {offsets = [0, 2], sizes = [16, 1], strides = [1, 1]} : vector<16x4xf32> to vector<16x1xf32>
    %166 = vector.extract_strided_slice %105 {offsets = [0, 3], sizes = [16, 1], strides = [1, 1]} : vector<16x4xf32> to vector<16x1xf32>
    %167 = vector.broadcast %1 : vector<1x200xf32> to vector<16x200xf32>
    %168 = arith.mulf %164, %167 : vector<16x200xf32>
    %cst_48 = arith.constant dense<0.000000e+00> : vector<16xf32>
    %169 = vector.multi_reduction <add>, %168, %cst_48 [1] : vector<16x200xf32> to vector<16xf32>
    %170 = vector.shape_cast %169 : vector<16xf32> to vector<16x1xf32>
    %cst_49 = arith.constant 7.812500e-03 : f32
    %171 = vector.broadcast %cst_49 : f32 to vector<16x1xf32>
    %172 = arith.mulf %170, %171 : vector<16x1xf32>
    %173 = vector.broadcast %172 : vector<16x1xf32> to vector<16x200xf32>
    %174 = arith.subf %164, %173 : vector<16x200xf32>
    %175 = vector.broadcast %1 : vector<1x200xf32> to vector<16x200xf32>
    %176 = arith.mulf %174, %175 : vector<16x200xf32>
    %177 = arith.mulf %176, %176 : vector<16x200xf32>
    %cst_50 = arith.constant dense<0.000000e+00> : vector<16xf32>
    %178 = vector.multi_reduction <add>, %177, %cst_50 [1] : vector<16x200xf32> to vector<16xf32>
    %179 = vector.shape_cast %178 : vector<16xf32> to vector<16x1xf32>
    %cst_51 = arith.constant 7.812500e-03 : f32
    %180 = vector.broadcast %cst_51 : f32 to vector<16x1xf32>
    %181 = arith.mulf %179, %180 : vector<16x1xf32>
    %cst_52 = arith.constant 9.99999974E-6 : f32
    %182 = vector.broadcast %cst_52 : f32 to vector<16x1xf32>
    %183 = arith.addf %181, %182 : vector<16x1xf32>
    %184 = math.rsqrt %183 : vector<16x1xf32>
    %185 = arith.mulf %165, %184 : vector<16x1xf32>
    %186 = vector.broadcast %185 : vector<16x1xf32> to vector<16x200xf32>
    %187 = arith.mulf %176, %186 : vector<16x200xf32>
    %188 = vector.broadcast %166 : vector<16x1xf32> to vector<16x200xf32>
    %189 = arith.addf %187, %188 : vector<16x200xf32>
    %cst_53 = arith.constant 0.000000e+00 : f32
    %190 = vector.broadcast %cst_53 : f32 to vector<16x200xf32>
    %191 = arith.maximumf %189, %190 : vector<16x200xf32>
    %192 = vector.broadcast %1 : vector<1x200xf32> to vector<16x200xf32>
    %193 = arith.mulf %191, %192 : vector<16x200xf32>
    %cst_54 = arith.constant 0.000000e+00 : f32
    %194 = vector.broadcast %cst_54 : f32 to vector<16x11xf32>
    %195 = tpu.concatenate %194, %193, %194 in 1 : vector<16x11xf32>, vector<16x200xf32>, vector<16x11xf32> -> vector<16x222xf32>
    %196 = vector.extract_strided_slice %195 {offsets = [0, 11], sizes = [16, 200], strides = [1, 1]} : vector<16x222xf32> to vector<16x200xf32>
    %197 = vector.extract_strided_slice %195 {offsets = [0, 12], sizes = [16, 200], strides = [1, 1]} : vector<16x222xf32> to vector<16x200xf32>
    %198 = vector.extract_strided_slice %195 {offsets = [0, 21], sizes = [16, 200], strides = [1, 1]} : vector<16x222xf32> to vector<16x200xf32>
    %199 = vector.extract_strided_slice %195 {offsets = [0, 22], sizes = [16, 200], strides = [1, 1]} : vector<16x222xf32> to vector<16x200xf32>
    %200 = arith.maximumf %196, %197 : vector<16x200xf32>
    %201 = arith.maximumf %198, %199 : vector<16x200xf32>
    %202 = arith.maximumf %200, %201 : vector<16x200xf32>
    %203 = arith.truncf %202 : vector<16x200xf32> to vector<16x200xbf16>
    %c0_55 = arith.constant 0 : index
    %c0_56 = arith.constant 0 : index
    %204 = vector.load %arg6[%c0_55, %c0_56] : memref<200x72xbf16, #tpu.memory_space<vmem>>, vector<200x72xbf16>
    %cst_57 = arith.constant dense<0.000000e+00> : vector<16x72xf32>
    %205 = tpu.matmul %203, %204, %cst_57 {dimension_numbers = #tpu.dot_dimension_numbers<[1], [0], [0], [1], [0, 0, 1, 1], [], []>} : vector<16x200xbf16>, vector<200x72xbf16>, vector<16x72xf32> -> vector<16x72xf32>
    %c0_58 = arith.constant 0 : index
    %c0_59 = arith.constant 0 : index
    %206 = vector.load %arg17[%c0_58, %c0_59] : memref<32x4xf32, #tpu.memory_space<vmem>>, vector<32x4xf32>
    %207 = arith.truncf %205 : vector<16x72xf32> to vector<16x72xbf16>
    %cst_60 = arith.constant 0.000000e+00 : bf16
    %208 = vector.broadcast %cst_60 : bf16 to vector<16x7xbf16>
    %209 = tpu.concatenate %208, %207, %208 in 1 : vector<16x7xbf16>, vector<16x72xbf16>, vector<16x7xbf16> -> vector<16x86xbf16>
    %210 = vector.extract_strided_slice %209 {offsets = [0, 0], sizes = [16, 72], strides = [1, 1]} : vector<16x86xbf16> to vector<16x72xbf16>
    %211 = vector.extract_strided_slice %209 {offsets = [0, 1], sizes = [16, 72], strides = [1, 1]} : vector<16x86xbf16> to vector<16x72xbf16>
    %212 = vector.extract_strided_slice %209 {offsets = [0, 2], sizes = [16, 72], strides = [1, 1]} : vector<16x86xbf16> to vector<16x72xbf16>
    %213 = vector.extract_strided_slice %209 {offsets = [0, 6], sizes = [16, 72], strides = [1, 1]} : vector<16x86xbf16> to vector<16x72xbf16>
    %214 = vector.extract_strided_slice %209 {offsets = [0, 7], sizes = [16, 72], strides = [1, 1]} : vector<16x86xbf16> to vector<16x72xbf16>
    %215 = vector.extract_strided_slice %209 {offsets = [0, 8], sizes = [16, 72], strides = [1, 1]} : vector<16x86xbf16> to vector<16x72xbf16>
    %216 = vector.extract_strided_slice %209 {offsets = [0, 12], sizes = [16, 72], strides = [1, 1]} : vector<16x86xbf16> to vector<16x72xbf16>
    %217 = vector.extract_strided_slice %209 {offsets = [0, 13], sizes = [16, 72], strides = [1, 1]} : vector<16x86xbf16> to vector<16x72xbf16>
    %218 = vector.extract_strided_slice %209 {offsets = [0, 14], sizes = [16, 72], strides = [1, 1]} : vector<16x86xbf16> to vector<16x72xbf16>
    %219 = tpu.concatenate %210, %211, %212, %213, %214, %215, %216, %217, %218 in 0 : vector<16x72xbf16>, vector<16x72xbf16>, vector<16x72xbf16>, vector<16x72xbf16>, vector<16x72xbf16>, vector<16x72xbf16>, vector<16x72xbf16>, vector<16x72xbf16>, vector<16x72xbf16> -> vector<144x72xbf16>
    %c0_61 = arith.constant 0 : index
    %c0_62 = arith.constant 0 : index
    %220 = vector.load %arg15[%c0_61, %c0_62] : memref<32x144xbf16, #tpu.memory_space<vmem>>, vector<32x144xbf16>
    %cst_63 = arith.constant dense<0.000000e+00> : vector<32x72xf32>
    %221 = tpu.matmul %220, %219, %cst_63 {dimension_numbers = #tpu.dot_dimension_numbers<[1], [0], [0], [1], [0, 0, 1, 1], [], []>} : vector<32x144xbf16>, vector<144x72xbf16>, vector<32x72xf32> -> vector<32x72xf32>
    %222 = vector.extract_strided_slice %206 {offsets = [0, 0], sizes = [32, 1], strides = [1, 1]} : vector<32x4xf32> to vector<32x1xf32>
    %223 = vector.extract_strided_slice %206 {offsets = [0, 1], sizes = [32, 1], strides = [1, 1]} : vector<32x4xf32> to vector<32x1xf32>
    %224 = vector.broadcast %2 : vector<1x72xf32> to vector<32x72xf32>
    %225 = arith.mulf %221, %224 : vector<32x72xf32>
    %cst_64 = arith.constant dense<0.000000e+00> : vector<32xf32>
    %226 = vector.multi_reduction <add>, %225, %cst_64 [1] : vector<32x72xf32> to vector<32xf32>
    %227 = vector.shape_cast %226 : vector<32xf32> to vector<32x1xf32>
    %cst_65 = arith.constant 3.125000e-02 : f32
    %228 = vector.broadcast %cst_65 : f32 to vector<32x1xf32>
    %229 = arith.mulf %227, %228 : vector<32x1xf32>
    %230 = vector.broadcast %229 : vector<32x1xf32> to vector<32x72xf32>
    %231 = arith.subf %221, %230 : vector<32x72xf32>
    %232 = vector.broadcast %2 : vector<1x72xf32> to vector<32x72xf32>
    %233 = arith.mulf %231, %232 : vector<32x72xf32>
    %234 = arith.mulf %233, %233 : vector<32x72xf32>
    %cst_66 = arith.constant dense<0.000000e+00> : vector<32xf32>
    %235 = vector.multi_reduction <add>, %234, %cst_66 [1] : vector<32x72xf32> to vector<32xf32>
    %236 = vector.shape_cast %235 : vector<32xf32> to vector<32x1xf32>
    %cst_67 = arith.constant 3.125000e-02 : f32
    %237 = vector.broadcast %cst_67 : f32 to vector<32x1xf32>
    %238 = arith.mulf %236, %237 : vector<32x1xf32>
    %cst_68 = arith.constant 9.99999974E-6 : f32
    %239 = vector.broadcast %cst_68 : f32 to vector<32x1xf32>
    %240 = arith.addf %238, %239 : vector<32x1xf32>
    %241 = math.rsqrt %240 : vector<32x1xf32>
    %242 = arith.mulf %222, %241 : vector<32x1xf32>
    %243 = vector.broadcast %242 : vector<32x1xf32> to vector<32x72xf32>
    %244 = arith.mulf %233, %243 : vector<32x72xf32>
    %245 = vector.broadcast %223 : vector<32x1xf32> to vector<32x72xf32>
    %246 = arith.addf %244, %245 : vector<32x72xf32>
    %cst_69 = arith.constant 0.000000e+00 : f32
    %247 = vector.broadcast %cst_69 : f32 to vector<32x72xf32>
    %248 = arith.maximumf %246, %247 : vector<32x72xf32>
    %249 = vector.broadcast %2 : vector<1x72xf32> to vector<32x72xf32>
    %250 = arith.mulf %248, %249 : vector<32x72xf32>
    %251 = arith.truncf %250 : vector<32x72xf32> to vector<32x72xbf16>
    %cst_70 = arith.constant 0.000000e+00 : bf16
    %252 = vector.broadcast %cst_70 : bf16 to vector<32x7xbf16>
    %253 = tpu.concatenate %252, %251, %252 in 1 : vector<32x7xbf16>, vector<32x72xbf16>, vector<32x7xbf16> -> vector<32x86xbf16>
    %254 = vector.extract_strided_slice %253 {offsets = [0, 0], sizes = [32, 72], strides = [1, 1]} : vector<32x86xbf16> to vector<32x72xbf16>
    %255 = vector.extract_strided_slice %253 {offsets = [0, 1], sizes = [32, 72], strides = [1, 1]} : vector<32x86xbf16> to vector<32x72xbf16>
    %256 = vector.extract_strided_slice %253 {offsets = [0, 2], sizes = [32, 72], strides = [1, 1]} : vector<32x86xbf16> to vector<32x72xbf16>
    %257 = vector.extract_strided_slice %253 {offsets = [0, 6], sizes = [32, 72], strides = [1, 1]} : vector<32x86xbf16> to vector<32x72xbf16>
    %258 = vector.extract_strided_slice %253 {offsets = [0, 7], sizes = [32, 72], strides = [1, 1]} : vector<32x86xbf16> to vector<32x72xbf16>
    %259 = vector.extract_strided_slice %253 {offsets = [0, 8], sizes = [32, 72], strides = [1, 1]} : vector<32x86xbf16> to vector<32x72xbf16>
    %260 = vector.extract_strided_slice %253 {offsets = [0, 12], sizes = [32, 72], strides = [1, 1]} : vector<32x86xbf16> to vector<32x72xbf16>
    %261 = vector.extract_strided_slice %253 {offsets = [0, 13], sizes = [32, 72], strides = [1, 1]} : vector<32x86xbf16> to vector<32x72xbf16>
    %262 = vector.extract_strided_slice %253 {offsets = [0, 14], sizes = [32, 72], strides = [1, 1]} : vector<32x86xbf16> to vector<32x72xbf16>
    %263 = tpu.concatenate %254, %255, %256, %257, %258, %259, %260, %261, %262 in 0 : vector<32x72xbf16>, vector<32x72xbf16>, vector<32x72xbf16>, vector<32x72xbf16>, vector<32x72xbf16>, vector<32x72xbf16>, vector<32x72xbf16>, vector<32x72xbf16>, vector<32x72xbf16> -> vector<288x72xbf16>
    %c0_71 = arith.constant 0 : index
    %c0_72 = arith.constant 0 : index
    %264 = vector.load %arg16[%c0_71, %c0_72] : memref<32x288xbf16, #tpu.memory_space<vmem>>, vector<32x288xbf16>
    %cst_73 = arith.constant dense<0.000000e+00> : vector<32x72xf32>
    %265 = tpu.matmul %264, %263, %cst_73 {dimension_numbers = #tpu.dot_dimension_numbers<[1], [0], [0], [1], [0, 0, 1, 1], [], []>} : vector<32x288xbf16>, vector<288x72xbf16>, vector<32x72xf32> -> vector<32x72xf32>
    %266 = vector.extract_strided_slice %206 {offsets = [0, 2], sizes = [32, 1], strides = [1, 1]} : vector<32x4xf32> to vector<32x1xf32>
    %267 = vector.extract_strided_slice %206 {offsets = [0, 3], sizes = [32, 1], strides = [1, 1]} : vector<32x4xf32> to vector<32x1xf32>
    %268 = vector.broadcast %2 : vector<1x72xf32> to vector<32x72xf32>
    %269 = arith.mulf %265, %268 : vector<32x72xf32>
    %cst_74 = arith.constant dense<0.000000e+00> : vector<32xf32>
    %270 = vector.multi_reduction <add>, %269, %cst_74 [1] : vector<32x72xf32> to vector<32xf32>
    %271 = vector.shape_cast %270 : vector<32xf32> to vector<32x1xf32>
    %cst_75 = arith.constant 3.125000e-02 : f32
    %272 = vector.broadcast %cst_75 : f32 to vector<32x1xf32>
    %273 = arith.mulf %271, %272 : vector<32x1xf32>
    %274 = vector.broadcast %273 : vector<32x1xf32> to vector<32x72xf32>
    %275 = arith.subf %265, %274 : vector<32x72xf32>
    %276 = vector.broadcast %2 : vector<1x72xf32> to vector<32x72xf32>
    %277 = arith.mulf %275, %276 : vector<32x72xf32>
    %278 = arith.mulf %277, %277 : vector<32x72xf32>
    %cst_76 = arith.constant dense<0.000000e+00> : vector<32xf32>
    %279 = vector.multi_reduction <add>, %278, %cst_76 [1] : vector<32x72xf32> to vector<32xf32>
    %280 = vector.shape_cast %279 : vector<32xf32> to vector<32x1xf32>
    %cst_77 = arith.constant 3.125000e-02 : f32
    %281 = vector.broadcast %cst_77 : f32 to vector<32x1xf32>
    %282 = arith.mulf %280, %281 : vector<32x1xf32>
    %cst_78 = arith.constant 9.99999974E-6 : f32
    %283 = vector.broadcast %cst_78 : f32 to vector<32x1xf32>
    %284 = arith.addf %282, %283 : vector<32x1xf32>
    %285 = math.rsqrt %284 : vector<32x1xf32>
    %286 = arith.mulf %266, %285 : vector<32x1xf32>
    %287 = vector.broadcast %286 : vector<32x1xf32> to vector<32x72xf32>
    %288 = arith.mulf %277, %287 : vector<32x72xf32>
    %289 = vector.broadcast %267 : vector<32x1xf32> to vector<32x72xf32>
    %290 = arith.addf %288, %289 : vector<32x72xf32>
    %cst_79 = arith.constant 0.000000e+00 : f32
    %291 = vector.broadcast %cst_79 : f32 to vector<32x72xf32>
    %292 = arith.maximumf %290, %291 : vector<32x72xf32>
    %293 = vector.broadcast %2 : vector<1x72xf32> to vector<32x72xf32>
    %294 = arith.mulf %292, %293 : vector<32x72xf32>
    %295 = arith.truncf %294 : vector<32x72xf32> to vector<32x72xbf16>
    %c0_80 = arith.constant 0 : index
    %c0_81 = arith.constant 0 : index
    %c0_82 = arith.constant 0 : index
    %296 = vector.load %arg18[%c0_80, %c0_81, %c0_82] : memref<4x16x32xbf16, #tpu.memory_space<vmem>>, vector<1x16x32xbf16>
    %297 = vector.shape_cast %296 : vector<1x16x32xbf16> to vector<16x32xbf16>
    %cst_83 = arith.constant dense<0.000000e+00> : vector<16x72xf32>
    %298 = tpu.matmul %297, %295, %cst_83 {dimension_numbers = #tpu.dot_dimension_numbers<[1], [0], [0], [1], [0, 0, 1, 1], [], []>} : vector<16x32xbf16>, vector<32x72xbf16>, vector<16x72xf32> -> vector<16x72xf32>
    %299 = arith.truncf %298 : vector<16x72xf32> to vector<16x72xbf16>
    %c0_84 = arith.constant 0 : index
    %c0_85 = arith.constant 0 : index
    %c0_86 = arith.constant 0 : index
    %300 = vector.load %arg7[%c0_84, %c0_85, %c0_86] : memref<4x72x200xbf16, #tpu.memory_space<vmem>>, vector<1x72x200xbf16>
    %301 = vector.shape_cast %300 : vector<1x72x200xbf16> to vector<72x200xbf16>
    %cst_87 = arith.constant dense<0.000000e+00> : vector<16x200xf32>
    %302 = tpu.matmul %299, %301, %cst_87 {dimension_numbers = #tpu.dot_dimension_numbers<[1], [0], [0], [1], [0, 0, 1, 1], [], []>} : vector<16x72xbf16>, vector<72x200xbf16>, vector<16x200xf32> -> vector<16x200xf32>
    %c1 = arith.constant 1 : index
    %c0_88 = arith.constant 0 : index
    %c0_89 = arith.constant 0 : index
    %303 = vector.load %arg18[%c1, %c0_88, %c0_89] : memref<4x16x32xbf16, #tpu.memory_space<vmem>>, vector<1x16x32xbf16>
    %304 = vector.shape_cast %303 : vector<1x16x32xbf16> to vector<16x32xbf16>
    %cst_90 = arith.constant dense<0.000000e+00> : vector<16x72xf32>
    %305 = tpu.matmul %304, %295, %cst_90 {dimension_numbers = #tpu.dot_dimension_numbers<[1], [0], [0], [1], [0, 0, 1, 1], [], []>} : vector<16x32xbf16>, vector<32x72xbf16>, vector<16x72xf32> -> vector<16x72xf32>
    %306 = arith.truncf %305 : vector<16x72xf32> to vector<16x72xbf16>
    %c1_91 = arith.constant 1 : index
    %c0_92 = arith.constant 0 : index
    %c0_93 = arith.constant 0 : index
    %307 = vector.load %arg7[%c1_91, %c0_92, %c0_93] : memref<4x72x200xbf16, #tpu.memory_space<vmem>>, vector<1x72x200xbf16>
    %308 = vector.shape_cast %307 : vector<1x72x200xbf16> to vector<72x200xbf16>
    %cst_94 = arith.constant dense<0.000000e+00> : vector<16x200xf32>
    %309 = tpu.matmul %306, %308, %cst_94 {dimension_numbers = #tpu.dot_dimension_numbers<[1], [0], [0], [1], [0, 0, 1, 1], [], []>} : vector<16x72xbf16>, vector<72x200xbf16>, vector<16x200xf32> -> vector<16x200xf32>
    %310 = arith.addf %302, %309 : vector<16x200xf32>
    %c2 = arith.constant 2 : index
    %c0_95 = arith.constant 0 : index
    %c0_96 = arith.constant 0 : index
    %311 = vector.load %arg18[%c2, %c0_95, %c0_96] : memref<4x16x32xbf16, #tpu.memory_space<vmem>>, vector<1x16x32xbf16>
    %312 = vector.shape_cast %311 : vector<1x16x32xbf16> to vector<16x32xbf16>
    %cst_97 = arith.constant dense<0.000000e+00> : vector<16x72xf32>
    %313 = tpu.matmul %312, %295, %cst_97 {dimension_numbers = #tpu.dot_dimension_numbers<[1], [0], [0], [1], [0, 0, 1, 1], [], []>} : vector<16x32xbf16>, vector<32x72xbf16>, vector<16x72xf32> -> vector<16x72xf32>
    %314 = arith.truncf %313 : vector<16x72xf32> to vector<16x72xbf16>
    %c2_98 = arith.constant 2 : index
    %c0_99 = arith.constant 0 : index
    %c0_100 = arith.constant 0 : index
    %315 = vector.load %arg7[%c2_98, %c0_99, %c0_100] : memref<4x72x200xbf16, #tpu.memory_space<vmem>>, vector<1x72x200xbf16>
    %316 = vector.shape_cast %315 : vector<1x72x200xbf16> to vector<72x200xbf16>
    %cst_101 = arith.constant dense<0.000000e+00> : vector<16x200xf32>
    %317 = tpu.matmul %314, %316, %cst_101 {dimension_numbers = #tpu.dot_dimension_numbers<[1], [0], [0], [1], [0, 0, 1, 1], [], []>} : vector<16x72xbf16>, vector<72x200xbf16>, vector<16x200xf32> -> vector<16x200xf32>
    %318 = arith.addf %310, %317 : vector<16x200xf32>
    %c3 = arith.constant 3 : index
    %c0_102 = arith.constant 0 : index
    %c0_103 = arith.constant 0 : index
    %319 = vector.load %arg18[%c3, %c0_102, %c0_103] : memref<4x16x32xbf16, #tpu.memory_space<vmem>>, vector<1x16x32xbf16>
    %320 = vector.shape_cast %319 : vector<1x16x32xbf16> to vector<16x32xbf16>
    %cst_104 = arith.constant dense<0.000000e+00> : vector<16x72xf32>
    %321 = tpu.matmul %320, %295, %cst_104 {dimension_numbers = #tpu.dot_dimension_numbers<[1], [0], [0], [1], [0, 0, 1, 1], [], []>} : vector<16x32xbf16>, vector<32x72xbf16>, vector<16x72xf32> -> vector<16x72xf32>
    %322 = arith.truncf %321 : vector<16x72xf32> to vector<16x72xbf16>
    %c3_105 = arith.constant 3 : index
    %c0_106 = arith.constant 0 : index
    %c0_107 = arith.constant 0 : index
    %323 = vector.load %arg7[%c3_105, %c0_106, %c0_107] : memref<4x72x200xbf16, #tpu.memory_space<vmem>>, vector<1x72x200xbf16>
    %324 = vector.shape_cast %323 : vector<1x72x200xbf16> to vector<72x200xbf16>
    %cst_108 = arith.constant dense<0.000000e+00> : vector<16x200xf32>
    %325 = tpu.matmul %322, %324, %cst_108 {dimension_numbers = #tpu.dot_dimension_numbers<[1], [0], [0], [1], [0, 0, 1, 1], [], []>} : vector<16x72xbf16>, vector<72x200xbf16>, vector<16x200xf32> -> vector<16x200xf32>
    %326 = arith.addf %318, %325 : vector<16x200xf32>
    %c0_109 = arith.constant 0 : index
    %c0_110 = arith.constant 0 : index
    %327 = vector.load %arg19[%c0_109, %c0_110] : memref<16x1xf32, #tpu.memory_space<vmem>>, vector<16x1xf32>
    %328 = vector.broadcast %327 : vector<16x1xf32> to vector<16x200xf32>
    %329 = vector.broadcast %1 : vector<1x200xf32> to vector<16x200xf32>
    %330 = arith.mulf %328, %329 : vector<16x200xf32>
    %331 = arith.addf %326, %330 : vector<16x200xf32>
    %332 = tpu.concatenate %193, %331 in 0 : vector<16x200xf32>, vector<16x200xf32> -> vector<32x200xf32>
    %c0_111 = arith.constant 0 : index
    %c0_112 = arith.constant 0 : index
    %333 = vector.load %arg22[%c0_111, %c0_112] : memref<16x4xf32, #tpu.memory_space<vmem>>, vector<16x4xf32>
    %334 = arith.truncf %332 : vector<32x200xf32> to vector<32x200xbf16>
    %cst_113 = arith.constant 0.000000e+00 : bf16
    %335 = vector.broadcast %cst_113 : bf16 to vector<32x11xbf16>
    %336 = tpu.concatenate %335, %334, %335 in 1 : vector<32x11xbf16>, vector<32x200xbf16>, vector<32x11xbf16> -> vector<32x222xbf16>
    %337 = vector.extract_strided_slice %336 {offsets = [0, 0], sizes = [32, 200], strides = [1, 1]} : vector<32x222xbf16> to vector<32x200xbf16>
    %338 = vector.extract_strided_slice %336 {offsets = [0, 1], sizes = [32, 200], strides = [1, 1]} : vector<32x222xbf16> to vector<32x200xbf16>
    %339 = vector.extract_strided_slice %336 {offsets = [0, 2], sizes = [32, 200], strides = [1, 1]} : vector<32x222xbf16> to vector<32x200xbf16>
    %340 = vector.extract_strided_slice %336 {offsets = [0, 10], sizes = [32, 200], strides = [1, 1]} : vector<32x222xbf16> to vector<32x200xbf16>
    %341 = vector.extract_strided_slice %336 {offsets = [0, 11], sizes = [32, 200], strides = [1, 1]} : vector<32x222xbf16> to vector<32x200xbf16>
    %342 = vector.extract_strided_slice %336 {offsets = [0, 12], sizes = [32, 200], strides = [1, 1]} : vector<32x222xbf16> to vector<32x200xbf16>
    %343 = vector.extract_strided_slice %336 {offsets = [0, 20], sizes = [32, 200], strides = [1, 1]} : vector<32x222xbf16> to vector<32x200xbf16>
    %344 = vector.extract_strided_slice %336 {offsets = [0, 21], sizes = [32, 200], strides = [1, 1]} : vector<32x222xbf16> to vector<32x200xbf16>
    %345 = vector.extract_strided_slice %336 {offsets = [0, 22], sizes = [32, 200], strides = [1, 1]} : vector<32x222xbf16> to vector<32x200xbf16>
    %346 = tpu.concatenate %337, %338, %339, %340, %341, %342, %343, %344, %345 in 0 : vector<32x200xbf16>, vector<32x200xbf16>, vector<32x200xbf16>, vector<32x200xbf16>, vector<32x200xbf16>, vector<32x200xbf16>, vector<32x200xbf16>, vector<32x200xbf16>, vector<32x200xbf16> -> vector<288x200xbf16>
    %c0_114 = arith.constant 0 : index
    %c0_115 = arith.constant 0 : index
    %347 = vector.load %arg20[%c0_114, %c0_115] : memref<16x288xbf16, #tpu.memory_space<vmem>>, vector<16x288xbf16>
    %cst_116 = arith.constant dense<0.000000e+00> : vector<16x200xf32>
    %348 = tpu.matmul %347, %346, %cst_116 {dimension_numbers = #tpu.dot_dimension_numbers<[1], [0], [0], [1], [0, 0, 1, 1], [], []>} : vector<16x288xbf16>, vector<288x200xbf16>, vector<16x200xf32> -> vector<16x200xf32>
    %349 = vector.extract_strided_slice %333 {offsets = [0, 0], sizes = [16, 1], strides = [1, 1]} : vector<16x4xf32> to vector<16x1xf32>
    %350 = vector.extract_strided_slice %333 {offsets = [0, 1], sizes = [16, 1], strides = [1, 1]} : vector<16x4xf32> to vector<16x1xf32>
    %351 = vector.broadcast %1 : vector<1x200xf32> to vector<16x200xf32>
    %352 = arith.mulf %348, %351 : vector<16x200xf32>
    %cst_117 = arith.constant dense<0.000000e+00> : vector<16xf32>
    %353 = vector.multi_reduction <add>, %352, %cst_117 [1] : vector<16x200xf32> to vector<16xf32>
    %354 = vector.shape_cast %353 : vector<16xf32> to vector<16x1xf32>
    %cst_118 = arith.constant 7.812500e-03 : f32
    %355 = vector.broadcast %cst_118 : f32 to vector<16x1xf32>
    %356 = arith.mulf %354, %355 : vector<16x1xf32>
    %357 = vector.broadcast %356 : vector<16x1xf32> to vector<16x200xf32>
    %358 = arith.subf %348, %357 : vector<16x200xf32>
    %359 = vector.broadcast %1 : vector<1x200xf32> to vector<16x200xf32>
    %360 = arith.mulf %358, %359 : vector<16x200xf32>
    %361 = arith.mulf %360, %360 : vector<16x200xf32>
    %cst_119 = arith.constant dense<0.000000e+00> : vector<16xf32>
    %362 = vector.multi_reduction <add>, %361, %cst_119 [1] : vector<16x200xf32> to vector<16xf32>
    %363 = vector.shape_cast %362 : vector<16xf32> to vector<16x1xf32>
    %cst_120 = arith.constant 7.812500e-03 : f32
    %364 = vector.broadcast %cst_120 : f32 to vector<16x1xf32>
    %365 = arith.mulf %363, %364 : vector<16x1xf32>
    %cst_121 = arith.constant 9.99999974E-6 : f32
    %366 = vector.broadcast %cst_121 : f32 to vector<16x1xf32>
    %367 = arith.addf %365, %366 : vector<16x1xf32>
    %368 = math.rsqrt %367 : vector<16x1xf32>
    %369 = arith.mulf %349, %368 : vector<16x1xf32>
    %370 = vector.broadcast %369 : vector<16x1xf32> to vector<16x200xf32>
    %371 = arith.mulf %360, %370 : vector<16x200xf32>
    %372 = vector.broadcast %350 : vector<16x1xf32> to vector<16x200xf32>
    %373 = arith.addf %371, %372 : vector<16x200xf32>
    %cst_122 = arith.constant 0.000000e+00 : f32
    %374 = vector.broadcast %cst_122 : f32 to vector<16x200xf32>
    %375 = arith.maximumf %373, %374 : vector<16x200xf32>
    %376 = vector.broadcast %1 : vector<1x200xf32> to vector<16x200xf32>
    %377 = arith.mulf %375, %376 : vector<16x200xf32>
    %378 = arith.truncf %377 : vector<16x200xf32> to vector<16x200xbf16>
    %cst_123 = arith.constant 0.000000e+00 : bf16
    %379 = vector.broadcast %cst_123 : bf16 to vector<16x11xbf16>
    %380 = tpu.concatenate %379, %378, %379 in 1 : vector<16x11xbf16>, vector<16x200xbf16>, vector<16x11xbf16> -> vector<16x222xbf16>
    %381 = vector.extract_strided_slice %380 {offsets = [0, 0], sizes = [16, 200], strides = [1, 1]} : vector<16x222xbf16> to vector<16x200xbf16>
    %382 = vector.extract_strided_slice %380 {offsets = [0, 1], sizes = [16, 200], strides = [1, 1]} : vector<16x222xbf16> to vector<16x200xbf16>
    %383 = vector.extract_strided_slice %380 {offsets = [0, 2], sizes = [16, 200], strides = [1, 1]} : vector<16x222xbf16> to vector<16x200xbf16>
    %384 = vector.extract_strided_slice %380 {offsets = [0, 10], sizes = [16, 200], strides = [1, 1]} : vector<16x222xbf16> to vector<16x200xbf16>
    %385 = vector.extract_strided_slice %380 {offsets = [0, 11], sizes = [16, 200], strides = [1, 1]} : vector<16x222xbf16> to vector<16x200xbf16>
    %386 = vector.extract_strided_slice %380 {offsets = [0, 12], sizes = [16, 200], strides = [1, 1]} : vector<16x222xbf16> to vector<16x200xbf16>
    %387 = vector.extract_strided_slice %380 {offsets = [0, 20], sizes = [16, 200], strides = [1, 1]} : vector<16x222xbf16> to vector<16x200xbf16>
    %388 = vector.extract_strided_slice %380 {offsets = [0, 21], sizes = [16, 200], strides = [1, 1]} : vector<16x222xbf16> to vector<16x200xbf16>
    %389 = vector.extract_strided_slice %380 {offsets = [0, 22], sizes = [16, 200], strides = [1, 1]} : vector<16x222xbf16> to vector<16x200xbf16>
    %390 = tpu.concatenate %381, %382, %383, %384, %385, %386, %387, %388, %389 in 0 : vector<16x200xbf16>, vector<16x200xbf16>, vector<16x200xbf16>, vector<16x200xbf16>, vector<16x200xbf16>, vector<16x200xbf16>, vector<16x200xbf16>, vector<16x200xbf16>, vector<16x200xbf16> -> vector<144x200xbf16>
    %c0_124 = arith.constant 0 : index
    %c0_125 = arith.constant 0 : index
    %391 = vector.load %arg21[%c0_124, %c0_125] : memref<16x144xbf16, #tpu.memory_space<vmem>>, vector<16x144xbf16>
    %cst_126 = arith.constant dense<0.000000e+00> : vector<16x200xf32>
    %392 = tpu.matmul %391, %390, %cst_126 {dimension_numbers = #tpu.dot_dimension_numbers<[1], [0], [0], [1], [0, 0, 1, 1], [], []>} : vector<16x144xbf16>, vector<144x200xbf16>, vector<16x200xf32> -> vector<16x200xf32>
    %393 = vector.extract_strided_slice %333 {offsets = [0, 2], sizes = [16, 1], strides = [1, 1]} : vector<16x4xf32> to vector<16x1xf32>
    %394 = vector.extract_strided_slice %333 {offsets = [0, 3], sizes = [16, 1], strides = [1, 1]} : vector<16x4xf32> to vector<16x1xf32>
    %395 = vector.broadcast %1 : vector<1x200xf32> to vector<16x200xf32>
    %396 = arith.mulf %392, %395 : vector<16x200xf32>
    %cst_127 = arith.constant dense<0.000000e+00> : vector<16xf32>
    %397 = vector.multi_reduction <add>, %396, %cst_127 [1] : vector<16x200xf32> to vector<16xf32>
    %398 = vector.shape_cast %397 : vector<16xf32> to vector<16x1xf32>
    %cst_128 = arith.constant 7.812500e-03 : f32
    %399 = vector.broadcast %cst_128 : f32 to vector<16x1xf32>
    %400 = arith.mulf %398, %399 : vector<16x1xf32>
    %401 = vector.broadcast %400 : vector<16x1xf32> to vector<16x200xf32>
    %402 = arith.subf %392, %401 : vector<16x200xf32>
    %403 = vector.broadcast %1 : vector<1x200xf32> to vector<16x200xf32>
    %404 = arith.mulf %402, %403 : vector<16x200xf32>
    %405 = arith.mulf %404, %404 : vector<16x200xf32>
    %cst_129 = arith.constant dense<0.000000e+00> : vector<16xf32>
    %406 = vector.multi_reduction <add>, %405, %cst_129 [1] : vector<16x200xf32> to vector<16xf32>
    %407 = vector.shape_cast %406 : vector<16xf32> to vector<16x1xf32>
    %cst_130 = arith.constant 7.812500e-03 : f32
    %408 = vector.broadcast %cst_130 : f32 to vector<16x1xf32>
    %409 = arith.mulf %407, %408 : vector<16x1xf32>
    %cst_131 = arith.constant 9.99999974E-6 : f32
    %410 = vector.broadcast %cst_131 : f32 to vector<16x1xf32>
    %411 = arith.addf %409, %410 : vector<16x1xf32>
    %412 = math.rsqrt %411 : vector<16x1xf32>
    %413 = arith.mulf %393, %412 : vector<16x1xf32>
    %414 = vector.broadcast %413 : vector<16x1xf32> to vector<16x200xf32>
    %415 = arith.mulf %404, %414 : vector<16x200xf32>
    %416 = vector.broadcast %394 : vector<16x1xf32> to vector<16x200xf32>
    %417 = arith.addf %415, %416 : vector<16x200xf32>
    %cst_132 = arith.constant 0.000000e+00 : f32
    %418 = vector.broadcast %cst_132 : f32 to vector<16x200xf32>
    %419 = arith.maximumf %417, %418 : vector<16x200xf32>
    %420 = vector.broadcast %1 : vector<1x200xf32> to vector<16x200xf32>
    %421 = arith.mulf %419, %420 : vector<16x200xf32>
    %422 = arith.truncf %421 : vector<16x200xf32> to vector<16x200xbf16>
    %c0_133 = arith.constant 0 : index
    %c0_134 = arith.constant 0 : index
    %c0_135 = arith.constant 0 : index
    %423 = vector.load %arg23[%c0_133, %c0_134, %c0_135] : memref<4x8x16xbf16, #tpu.memory_space<vmem>>, vector<1x8x16xbf16>
    %424 = vector.shape_cast %423 : vector<1x8x16xbf16> to vector<8x16xbf16>
    %cst_136 = arith.constant dense<0.000000e+00> : vector<8x200xf32>
    %425 = tpu.matmul %424, %422, %cst_136 {dimension_numbers = #tpu.dot_dimension_numbers<[1], [0], [0], [1], [0, 0, 1, 1], [], []>} : vector<8x16xbf16>, vector<16x200xbf16>, vector<8x200xf32> -> vector<8x200xf32>
    %426 = arith.truncf %425 : vector<8x200xf32> to vector<8x200xbf16>
    %c0_137 = arith.constant 0 : index
    %c0_138 = arith.constant 0 : index
    %c0_139 = arith.constant 0 : index
    %427 = vector.load %arg8[%c0_137, %c0_138, %c0_139] : memref<4x200x648xbf16, #tpu.memory_space<vmem>>, vector<1x200x648xbf16>
    %428 = vector.shape_cast %427 : vector<1x200x648xbf16> to vector<200x648xbf16>
    %cst_140 = arith.constant dense<0.000000e+00> : vector<8x648xf32>
    %429 = tpu.matmul %426, %428, %cst_140 {dimension_numbers = #tpu.dot_dimension_numbers<[1], [0], [0], [1], [0, 0, 1, 1], [], []>} : vector<8x200xbf16>, vector<200x648xbf16>, vector<8x648xf32> -> vector<8x648xf32>
    %c1_141 = arith.constant 1 : index
    %c0_142 = arith.constant 0 : index
    %c0_143 = arith.constant 0 : index
    %430 = vector.load %arg23[%c1_141, %c0_142, %c0_143] : memref<4x8x16xbf16, #tpu.memory_space<vmem>>, vector<1x8x16xbf16>
    %431 = vector.shape_cast %430 : vector<1x8x16xbf16> to vector<8x16xbf16>
    %cst_144 = arith.constant dense<0.000000e+00> : vector<8x200xf32>
    %432 = tpu.matmul %431, %422, %cst_144 {dimension_numbers = #tpu.dot_dimension_numbers<[1], [0], [0], [1], [0, 0, 1, 1], [], []>} : vector<8x16xbf16>, vector<16x200xbf16>, vector<8x200xf32> -> vector<8x200xf32>
    %433 = arith.truncf %432 : vector<8x200xf32> to vector<8x200xbf16>
    %c1_145 = arith.constant 1 : index
    %c0_146 = arith.constant 0 : index
    %c0_147 = arith.constant 0 : index
    %434 = vector.load %arg8[%c1_145, %c0_146, %c0_147] : memref<4x200x648xbf16, #tpu.memory_space<vmem>>, vector<1x200x648xbf16>
    %435 = vector.shape_cast %434 : vector<1x200x648xbf16> to vector<200x648xbf16>
    %cst_148 = arith.constant dense<0.000000e+00> : vector<8x648xf32>
    %436 = tpu.matmul %433, %435, %cst_148 {dimension_numbers = #tpu.dot_dimension_numbers<[1], [0], [0], [1], [0, 0, 1, 1], [], []>} : vector<8x200xbf16>, vector<200x648xbf16>, vector<8x648xf32> -> vector<8x648xf32>
    %437 = arith.addf %429, %436 : vector<8x648xf32>
    %c2_149 = arith.constant 2 : index
    %c0_150 = arith.constant 0 : index
    %c0_151 = arith.constant 0 : index
    %438 = vector.load %arg23[%c2_149, %c0_150, %c0_151] : memref<4x8x16xbf16, #tpu.memory_space<vmem>>, vector<1x8x16xbf16>
    %439 = vector.shape_cast %438 : vector<1x8x16xbf16> to vector<8x16xbf16>
    %cst_152 = arith.constant dense<0.000000e+00> : vector<8x200xf32>
    %440 = tpu.matmul %439, %422, %cst_152 {dimension_numbers = #tpu.dot_dimension_numbers<[1], [0], [0], [1], [0, 0, 1, 1], [], []>} : vector<8x16xbf16>, vector<16x200xbf16>, vector<8x200xf32> -> vector<8x200xf32>
    %441 = arith.truncf %440 : vector<8x200xf32> to vector<8x200xbf16>
    %c2_153 = arith.constant 2 : index
    %c0_154 = arith.constant 0 : index
    %c0_155 = arith.constant 0 : index
    %442 = vector.load %arg8[%c2_153, %c0_154, %c0_155] : memref<4x200x648xbf16, #tpu.memory_space<vmem>>, vector<1x200x648xbf16>
    %443 = vector.shape_cast %442 : vector<1x200x648xbf16> to vector<200x648xbf16>
    %cst_156 = arith.constant dense<0.000000e+00> : vector<8x648xf32>
    %444 = tpu.matmul %441, %443, %cst_156 {dimension_numbers = #tpu.dot_dimension_numbers<[1], [0], [0], [1], [0, 0, 1, 1], [], []>} : vector<8x200xbf16>, vector<200x648xbf16>, vector<8x648xf32> -> vector<8x648xf32>
    %445 = arith.addf %437, %444 : vector<8x648xf32>
    %c3_157 = arith.constant 3 : index
    %c0_158 = arith.constant 0 : index
    %c0_159 = arith.constant 0 : index
    %446 = vector.load %arg23[%c3_157, %c0_158, %c0_159] : memref<4x8x16xbf16, #tpu.memory_space<vmem>>, vector<1x8x16xbf16>
    %447 = vector.shape_cast %446 : vector<1x8x16xbf16> to vector<8x16xbf16>
    %cst_160 = arith.constant dense<0.000000e+00> : vector<8x200xf32>
    %448 = tpu.matmul %447, %422, %cst_160 {dimension_numbers = #tpu.dot_dimension_numbers<[1], [0], [0], [1], [0, 0, 1, 1], [], []>} : vector<8x16xbf16>, vector<16x200xbf16>, vector<8x200xf32> -> vector<8x200xf32>
    %449 = arith.truncf %448 : vector<8x200xf32> to vector<8x200xbf16>
    %c3_161 = arith.constant 3 : index
    %c0_162 = arith.constant 0 : index
    %c0_163 = arith.constant 0 : index
    %450 = vector.load %arg8[%c3_161, %c0_162, %c0_163] : memref<4x200x648xbf16, #tpu.memory_space<vmem>>, vector<1x200x648xbf16>
    %451 = vector.shape_cast %450 : vector<1x200x648xbf16> to vector<200x648xbf16>
    %cst_164 = arith.constant dense<0.000000e+00> : vector<8x648xf32>
    %452 = tpu.matmul %449, %451, %cst_164 {dimension_numbers = #tpu.dot_dimension_numbers<[1], [0], [0], [1], [0, 0, 1, 1], [], []>} : vector<8x200xbf16>, vector<200x648xbf16>, vector<8x648xf32> -> vector<8x648xf32>
    %453 = arith.addf %445, %452 : vector<8x648xf32>
    %c0_165 = arith.constant 0 : index
    %c0_166 = arith.constant 0 : index
    %454 = vector.load %arg24[%c0_165, %c0_166] : memref<8x1xf32, #tpu.memory_space<vmem>>, vector<8x1xf32>
    %455 = vector.broadcast %454 : vector<8x1xf32> to vector<8x648xf32>
    %456 = vector.broadcast %0 : vector<1x648xf32> to vector<8x648xf32>
    %457 = arith.mulf %455, %456 : vector<8x648xf32>
    %458 = arith.addf %453, %457 : vector<8x648xf32>
    %459 = tpu.concatenate %92, %458 in 0 : vector<8x648xf32>, vector<8x648xf32> -> vector<16x648xf32>
    %c0_167 = arith.constant 0 : index
    %c0_168 = arith.constant 0 : index
    %460 = vector.load %arg27[%c0_167, %c0_168] : memref<8x4xf32, #tpu.memory_space<vmem>>, vector<8x4xf32>
    %461 = arith.truncf %459 : vector<16x648xf32> to vector<16x648xbf16>
    %cst_169 = arith.constant 0.000000e+00 : bf16
    %462 = vector.broadcast %cst_169 : bf16 to vector<16x19xbf16>
    %463 = tpu.concatenate %462, %461, %462 in 1 : vector<16x19xbf16>, vector<16x648xbf16>, vector<16x19xbf16> -> vector<16x686xbf16>
    %464 = vector.extract_strided_slice %463 {offsets = [0, 0], sizes = [16, 648], strides = [1, 1]} : vector<16x686xbf16> to vector<16x648xbf16>
    %465 = vector.extract_strided_slice %463 {offsets = [0, 1], sizes = [16, 648], strides = [1, 1]} : vector<16x686xbf16> to vector<16x648xbf16>
    %466 = vector.extract_strided_slice %463 {offsets = [0, 2], sizes = [16, 648], strides = [1, 1]} : vector<16x686xbf16> to vector<16x648xbf16>
    %467 = vector.extract_strided_slice %463 {offsets = [0, 18], sizes = [16, 648], strides = [1, 1]} : vector<16x686xbf16> to vector<16x648xbf16>
    %468 = vector.extract_strided_slice %463 {offsets = [0, 19], sizes = [16, 648], strides = [1, 1]} : vector<16x686xbf16> to vector<16x648xbf16>
    %469 = vector.extract_strided_slice %463 {offsets = [0, 20], sizes = [16, 648], strides = [1, 1]} : vector<16x686xbf16> to vector<16x648xbf16>
    %470 = vector.extract_strided_slice %463 {offsets = [0, 36], sizes = [16, 648], strides = [1, 1]} : vector<16x686xbf16> to vector<16x648xbf16>
    %471 = vector.extract_strided_slice %463 {offsets = [0, 37], sizes = [16, 648], strides = [1, 1]} : vector<16x686xbf16> to vector<16x648xbf16>
    %472 = vector.extract_strided_slice %463 {offsets = [0, 38], sizes = [16, 648], strides = [1, 1]} : vector<16x686xbf16> to vector<16x648xbf16>
    %473 = tpu.concatenate %464, %465, %466, %467, %468, %469, %470, %471, %472 in 0 : vector<16x648xbf16>, vector<16x648xbf16>, vector<16x648xbf16>, vector<16x648xbf16>, vector<16x648xbf16>, vector<16x648xbf16>, vector<16x648xbf16>, vector<16x648xbf16>, vector<16x648xbf16> -> vector<144x648xbf16>
    %c0_170 = arith.constant 0 : index
    %c0_171 = arith.constant 0 : index
    %474 = vector.load %arg25[%c0_170, %c0_171] : memref<8x144xbf16, #tpu.memory_space<vmem>>, vector<8x144xbf16>
    %cst_172 = arith.constant dense<0.000000e+00> : vector<8x648xf32>
    %475 = tpu.matmul %474, %473, %cst_172 {dimension_numbers = #tpu.dot_dimension_numbers<[1], [0], [0], [1], [0, 0, 1, 1], [], []>} : vector<8x144xbf16>, vector<144x648xbf16>, vector<8x648xf32> -> vector<8x648xf32>
    %476 = vector.extract_strided_slice %460 {offsets = [0, 0], sizes = [8, 1], strides = [1, 1]} : vector<8x4xf32> to vector<8x1xf32>
    %477 = vector.extract_strided_slice %460 {offsets = [0, 1], sizes = [8, 1], strides = [1, 1]} : vector<8x4xf32> to vector<8x1xf32>
    %478 = vector.broadcast %0 : vector<1x648xf32> to vector<8x648xf32>
    %479 = arith.mulf %475, %478 : vector<8x648xf32>
    %cst_173 = arith.constant dense<0.000000e+00> : vector<8xf32>
    %480 = vector.multi_reduction <add>, %479, %cst_173 [1] : vector<8x648xf32> to vector<8xf32>
    %481 = vector.shape_cast %480 : vector<8xf32> to vector<8x1xf32>
    %cst_174 = arith.constant 0.001953125 : f32
    %482 = vector.broadcast %cst_174 : f32 to vector<8x1xf32>
    %483 = arith.mulf %481, %482 : vector<8x1xf32>
    %484 = vector.broadcast %483 : vector<8x1xf32> to vector<8x648xf32>
    %485 = arith.subf %475, %484 : vector<8x648xf32>
    %486 = vector.broadcast %0 : vector<1x648xf32> to vector<8x648xf32>
    %487 = arith.mulf %485, %486 : vector<8x648xf32>
    %488 = arith.mulf %487, %487 : vector<8x648xf32>
    %cst_175 = arith.constant dense<0.000000e+00> : vector<8xf32>
    %489 = vector.multi_reduction <add>, %488, %cst_175 [1] : vector<8x648xf32> to vector<8xf32>
    %490 = vector.shape_cast %489 : vector<8xf32> to vector<8x1xf32>
    %cst_176 = arith.constant 0.001953125 : f32
    %491 = vector.broadcast %cst_176 : f32 to vector<8x1xf32>
    %492 = arith.mulf %490, %491 : vector<8x1xf32>
    %cst_177 = arith.constant 9.99999974E-6 : f32
    %493 = vector.broadcast %cst_177 : f32 to vector<8x1xf32>
    %494 = arith.addf %492, %493 : vector<8x1xf32>
    %495 = math.rsqrt %494 : vector<8x1xf32>
    %496 = arith.mulf %476, %495 : vector<8x1xf32>
    %497 = vector.broadcast %496 : vector<8x1xf32> to vector<8x648xf32>
    %498 = arith.mulf %487, %497 : vector<8x648xf32>
    %499 = vector.broadcast %477 : vector<8x1xf32> to vector<8x648xf32>
    %500 = arith.addf %498, %499 : vector<8x648xf32>
    %cst_178 = arith.constant 0.000000e+00 : f32
    %501 = vector.broadcast %cst_178 : f32 to vector<8x648xf32>
    %502 = arith.maximumf %500, %501 : vector<8x648xf32>
    %503 = vector.broadcast %0 : vector<1x648xf32> to vector<8x648xf32>
    %504 = arith.mulf %502, %503 : vector<8x648xf32>
    %505 = arith.truncf %504 : vector<8x648xf32> to vector<8x648xbf16>
    %cst_179 = arith.constant 0.000000e+00 : bf16
    %506 = vector.broadcast %cst_179 : bf16 to vector<8x19xbf16>
    %507 = tpu.concatenate %506, %505, %506 in 1 : vector<8x19xbf16>, vector<8x648xbf16>, vector<8x19xbf16> -> vector<8x686xbf16>
    %508 = vector.extract_strided_slice %507 {offsets = [0, 0], sizes = [8, 648], strides = [1, 1]} : vector<8x686xbf16> to vector<8x648xbf16>
    %509 = vector.extract_strided_slice %507 {offsets = [0, 1], sizes = [8, 648], strides = [1, 1]} : vector<8x686xbf16> to vector<8x648xbf16>
    %510 = vector.extract_strided_slice %507 {offsets = [0, 2], sizes = [8, 648], strides = [1, 1]} : vector<8x686xbf16> to vector<8x648xbf16>
    %511 = vector.extract_strided_slice %507 {offsets = [0, 18], sizes = [8, 648], strides = [1, 1]} : vector<8x686xbf16> to vector<8x648xbf16>
    %512 = vector.extract_strided_slice %507 {offsets = [0, 19], sizes = [8, 648], strides = [1, 1]} : vector<8x686xbf16> to vector<8x648xbf16>
    %513 = vector.extract_strided_slice %507 {offsets = [0, 20], sizes = [8, 648], strides = [1, 1]} : vector<8x686xbf16> to vector<8x648xbf16>
    %514 = vector.extract_strided_slice %507 {offsets = [0, 36], sizes = [8, 648], strides = [1, 1]} : vector<8x686xbf16> to vector<8x648xbf16>
    %515 = vector.extract_strided_slice %507 {offsets = [0, 37], sizes = [8, 648], strides = [1, 1]} : vector<8x686xbf16> to vector<8x648xbf16>
    %516 = vector.extract_strided_slice %507 {offsets = [0, 38], sizes = [8, 648], strides = [1, 1]} : vector<8x686xbf16> to vector<8x648xbf16>
    %517 = tpu.concatenate %508, %509, %510, %511, %512, %513, %514, %515, %516 in 0 : vector<8x648xbf16>, vector<8x648xbf16>, vector<8x648xbf16>, vector<8x648xbf16>, vector<8x648xbf16>, vector<8x648xbf16>, vector<8x648xbf16>, vector<8x648xbf16>, vector<8x648xbf16> -> vector<72x648xbf16>
    %c0_180 = arith.constant 0 : index
    %c0_181 = arith.constant 0 : index
    %518 = vector.load %arg26[%c0_180, %c0_181] : memref<8x72xbf16, #tpu.memory_space<vmem>>, vector<8x72xbf16>
    %cst_182 = arith.constant dense<0.000000e+00> : vector<8x648xf32>
    %519 = tpu.matmul %518, %517, %cst_182 {dimension_numbers = #tpu.dot_dimension_numbers<[1], [0], [0], [1], [0, 0, 1, 1], [], []>} : vector<8x72xbf16>, vector<72x648xbf16>, vector<8x648xf32> -> vector<8x648xf32>
    %520 = vector.extract_strided_slice %460 {offsets = [0, 2], sizes = [8, 1], strides = [1, 1]} : vector<8x4xf32> to vector<8x1xf32>
    %521 = vector.extract_strided_slice %460 {offsets = [0, 3], sizes = [8, 1], strides = [1, 1]} : vector<8x4xf32> to vector<8x1xf32>
    %522 = vector.broadcast %0 : vector<1x648xf32> to vector<8x648xf32>
    %523 = arith.mulf %519, %522 : vector<8x648xf32>
    %cst_183 = arith.constant dense<0.000000e+00> : vector<8xf32>
    %524 = vector.multi_reduction <add>, %523, %cst_183 [1] : vector<8x648xf32> to vector<8xf32>
    %525 = vector.shape_cast %524 : vector<8xf32> to vector<8x1xf32>
    %cst_184 = arith.constant 0.001953125 : f32
    %526 = vector.broadcast %cst_184 : f32 to vector<8x1xf32>
    %527 = arith.mulf %525, %526 : vector<8x1xf32>
    %528 = vector.broadcast %527 : vector<8x1xf32> to vector<8x648xf32>
    %529 = arith.subf %519, %528 : vector<8x648xf32>
    %530 = vector.broadcast %0 : vector<1x648xf32> to vector<8x648xf32>
    %531 = arith.mulf %529, %530 : vector<8x648xf32>
    %532 = arith.mulf %531, %531 : vector<8x648xf32>
    %cst_185 = arith.constant dense<0.000000e+00> : vector<8xf32>
    %533 = vector.multi_reduction <add>, %532, %cst_185 [1] : vector<8x648xf32> to vector<8xf32>
    %534 = vector.shape_cast %533 : vector<8xf32> to vector<8x1xf32>
    %cst_186 = arith.constant 0.001953125 : f32
    %535 = vector.broadcast %cst_186 : f32 to vector<8x1xf32>
    %536 = arith.mulf %534, %535 : vector<8x1xf32>
    %cst_187 = arith.constant 9.99999974E-6 : f32
    %537 = vector.broadcast %cst_187 : f32 to vector<8x1xf32>
    %538 = arith.addf %536, %537 : vector<8x1xf32>
    %539 = math.rsqrt %538 : vector<8x1xf32>
    %540 = arith.mulf %520, %539 : vector<8x1xf32>
    %541 = vector.broadcast %540 : vector<8x1xf32> to vector<8x648xf32>
    %542 = arith.mulf %531, %541 : vector<8x648xf32>
    %543 = vector.broadcast %521 : vector<8x1xf32> to vector<8x648xf32>
    %544 = arith.addf %542, %543 : vector<8x648xf32>
    %cst_188 = arith.constant 0.000000e+00 : f32
    %545 = vector.broadcast %cst_188 : f32 to vector<8x648xf32>
    %546 = arith.maximumf %544, %545 : vector<8x648xf32>
    %547 = vector.broadcast %0 : vector<1x648xf32> to vector<8x648xf32>
    %548 = arith.mulf %546, %547 : vector<8x648xf32>
    %c0_189 = arith.constant 0 : index
    %c0_190 = arith.constant 0 : index
    %549 = vector.load %arg28[%c0_189, %c0_190] : memref<1x8xbf16, #tpu.memory_space<vmem>>, vector<1x8xbf16>
    %550 = arith.truncf %548 : vector<8x648xf32> to vector<8x648xbf16>
    %cst_191 = arith.constant dense<0.000000e+00> : vector<1x648xf32>
    %551 = tpu.matmul %549, %550, %cst_191 {dimension_numbers = #tpu.dot_dimension_numbers<[1], [0], [0], [1], [0, 0, 1, 1], [], []>} : vector<1x8xbf16>, vector<8x648xbf16>, vector<1x648xf32> -> vector<1x648xf32>
    %c0_192 = arith.constant 0 : index
    %c0_193 = arith.constant 0 : index
    %552 = vector.load %arg29[%c0_192, %c0_193] : memref<1x1xf32, #tpu.memory_space<vmem>>, vector<1x1xf32>
    %553 = vector.broadcast %552 : vector<1x1xf32> to vector<1x648xf32>
    %554 = arith.addf %551, %553 : vector<1x648xf32>
    %c0_194 = arith.constant 0 : index
    %c0_195 = arith.constant 0 : index
    %555 = vector.load %arg30[%c0_194, %c0_195] : memref<1x648xf32, #tpu.memory_space<vmem>>, vector<1x648xf32>
    tpu.vector_store %arg30[%c0_194, %c0_195], %554 {strides = array<i32>} : memref<1x648xf32, #tpu.memory_space<vmem>>, vector<1x648xf32>,
    return
  }
  func.func @transform_0(%arg0: i32) -> (i32, i32) {
    %c0_i32 = arith.constant 0 : i32
    %c0_i32_0 = arith.constant 0 : i32
    %c0_i32_1 = arith.constant 0 : i32
    return %c0_i32, %c0_i32_0 : i32, i32
  }
  func.func @transform_1(%arg0: i32) -> (i32, i32) {
    %c0_i32 = arith.constant 0 : i32
    %c0_i32_0 = arith.constant 0 : i32
    %c0_i32_1 = arith.constant 0 : i32
    return %c0_i32, %c0_i32_0 : i32, i32
  }
  func.func @transform_2(%arg0: i32) -> (i32, i32) {
    %c0_i32 = arith.constant 0 : i32
    %c0_i32_0 = arith.constant 0 : i32
    %c0_i32_1 = arith.constant 0 : i32
    return %c0_i32, %c0_i32_0 : i32, i32
  }
  func.func @transform_3(%arg0: i32) -> (i32, i32) {
    %c0_i32 = arith.constant 0 : i32
    %c0_i32_0 = arith.constant 0 : i32
    %c0_i32_1 = arith.constant 0 : i32
    return %c0_i32, %c0_i32_0 : i32, i32
  }
  func.func @transform_4(%arg0: i32) -> (i32, i32) {
    %c0_i32 = arith.constant 0 : i32
    %c0_i32_0 = arith.constant 0 : i32
    %c0_i32_1 = arith.constant 0 : i32
    return %c0_i32, %c0_i32_0 : i32, i32
  }
  func.func @transform_5(%arg0: i32) -> (i32, i32) {
    %c0_i32 = arith.constant 0 : i32
    %c0_i32_0 = arith.constant 0 : i32
    %c0_i32_1 = arith.constant 0 : i32
    return %c0_i32, %c0_i32_0 : i32, i32
  }
  func.func @transform_6(%arg0: i32) -> (i32, i32, i32) {
    %c0_i32 = arith.constant 0 : i32
    %c0_i32_0 = arith.constant 0 : i32
    %c0_i32_1 = arith.constant 0 : i32
    %c0_i32_2 = arith.constant 0 : i32
    return %c0_i32, %c0_i32_0, %c0_i32_1 : i32, i32, i32
  }
  func.func @transform_7(%arg0: i32) -> (i32, i32, i32) {
    %c0_i32 = arith.constant 0 : i32
    %c0_i32_0 = arith.constant 0 : i32
    %c0_i32_1 = arith.constant 0 : i32
    %c0_i32_2 = arith.constant 0 : i32
    return %c0_i32, %c0_i32_0, %c0_i32_1 : i32, i32, i32
  }
  func.func @transform_8(%arg0: i32) -> (i32, i32) {
    %c0_i32 = arith.constant 0 : i32
    %c0_i32_0 = arith.constant 0 : i32
    %c0_i32_1 = arith.constant 0 : i32
    return %c0_i32, %c0_i32_0 : i32, i32
  }
  func.func @transform_9(%arg0: i32) -> (i32, i32) {
    %c0_i32 = arith.constant 0 : i32
    %c0_i32_0 = arith.constant 0 : i32
    %c0_i32_1 = arith.constant 0 : i32
    return %c0_i32, %c0_i32_0 : i32, i32
  }
  func.func @transform_10(%arg0: i32) -> (i32, i32) {
    %c0_i32 = arith.constant 0 : i32
    %c0_i32_0 = arith.constant 0 : i32
    %c0_i32_1 = arith.constant 0 : i32
    return %c0_i32, %c0_i32_0 : i32, i32
  }
  func.func @transform_11(%arg0: i32) -> (i32, i32) {
    %c0_i32 = arith.constant 0 : i32
    %c0_i32_0 = arith.constant 0 : i32
    %c0_i32_1 = arith.constant 0 : i32
    return %c0_i32, %c0_i32_0 : i32, i32
  }
  func.func @transform_12(%arg0: i32) -> (i32, i32) {
    %c0_i32 = arith.constant 0 : i32
    %c0_i32_0 = arith.constant 0 : i32
    %c0_i32_1 = arith.constant 0 : i32
    return %c0_i32, %c0_i32_0 : i32, i32
  }
  func.func @transform_13(%arg0: i32) -> (i32, i32) {
    %c0_i32 = arith.constant 0 : i32
    %c0_i32_0 = arith.constant 0 : i32
    %c0_i32_1 = arith.constant 0 : i32
    return %c0_i32, %c0_i32_0 : i32, i32
  }
  func.func @transform_14(%arg0: i32) -> (i32, i32) {
    %c0_i32 = arith.constant 0 : i32
    %c0_i32_0 = arith.constant 0 : i32
    %c0_i32_1 = arith.constant 0 : i32
    return %c0_i32, %c0_i32_0 : i32, i32
  }
  func.func @transform_15(%arg0: i32) -> (i32, i32) {
    %c0_i32 = arith.constant 0 : i32
    %c0_i32_0 = arith.constant 0 : i32
    %c0_i32_1 = arith.constant 0 : i32
    return %c0_i32, %c0_i32_0 : i32, i32
  }
  func.func @transform_16(%arg0: i32) -> (i32, i32) {
    %c0_i32 = arith.constant 0 : i32
    %c0_i32_0 = arith.constant 0 : i32
    %c0_i32_1 = arith.constant 0 : i32
    return %c0_i32, %c0_i32_0 : i32, i32
  }
  func.func @transform_17(%arg0: i32) -> (i32, i32, i32) {
    %c0_i32 = arith.constant 0 : i32
    %c0_i32_0 = arith.constant 0 : i32
    %c0_i32_1 = arith.constant 0 : i32
    %c0_i32_2 = arith.constant 0 : i32
    return %c0_i32, %c0_i32_0, %c0_i32_1 : i32, i32, i32
  }
  func.func @transform_18(%arg0: i32) -> (i32, i32) {
    %c0_i32 = arith.constant 0 : i32
    %c0_i32_0 = arith.constant 0 : i32
    %c0_i32_1 = arith.constant 0 : i32
    return %c0_i32, %c0_i32_0 : i32, i32
  }
  func.func @transform_19(%arg0: i32) -> (i32, i32) {
    %c0_i32 = arith.constant 0 : i32
    %c0_i32_0 = arith.constant 0 : i32
    %c0_i32_1 = arith.constant 0 : i32
    return %c0_i32, %c0_i32_0 : i32, i32
  }
  func.func @transform_20(%arg0: i32) -> (i32, i32) {
    %c0_i32 = arith.constant 0 : i32
    %c0_i32_0 = arith.constant 0 : i32
    %c0_i32_1 = arith.constant 0 : i32
    return %c0_i32, %c0_i32_0 : i32, i32
  }
  func.func @transform_21(%arg0: i32) -> (i32, i32) {
    %c0_i32 = arith.constant 0 : i32
    %c0_i32_0 = arith.constant 0 : i32
    %c0_i32_1 = arith.constant 0 : i32
    return %c0_i32, %c0_i32_0 : i32, i32
  }
  func.func @transform_22(%arg0: i32) -> (i32, i32, i32) {
    %c0_i32 = arith.constant 0 : i32
    %c0_i32_0 = arith.constant 0 : i32
    %c0_i32_1 = arith.constant 0 : i32
    %c0_i32_2 = arith.constant 0 : i32
    return %c0_i32, %c0_i32_0, %c0_i32_1 : i32, i32, i32
  }
  func.func @transform_23(%arg0: i32) -> (i32, i32) {
    %c0_i32 = arith.constant 0 : i32
    %c0_i32_0 = arith.constant 0 : i32
    %c0_i32_1 = arith.constant 0 : i32
    return %c0_i32, %c0_i32_0 : i32, i32
  }
  func.func @transform_24(%arg0: i32) -> (i32, i32) {
    %c0_i32 = arith.constant 0 : i32
    %c0_i32_0 = arith.constant 0 : i32
    %c0_i32_1 = arith.constant 0 : i32
    return %c0_i32, %c0_i32_0 : i32, i32
  }
  func.func @transform_25(%arg0: i32) -> (i32, i32) {
    %c0_i32 = arith.constant 0 : i32
    %c0_i32_0 = arith.constant 0 : i32
    %c0_i32_1 = arith.constant 0 : i32
    return %c0_i32, %c0_i32_0 : i32, i32
  }
  func.func @transform_26(%arg0: i32) -> (i32, i32) {
    %c0_i32 = arith.constant 0 : i32
    %c0_i32_0 = arith.constant 0 : i32
    %c0_i32_1 = arith.constant 0 : i32
    return %c0_i32, %c0_i32_0 : i32, i32
  }
  func.func @transform_27(%arg0: i32) -> (i32, i32) {
    %c0_i32 = arith.constant 0 : i32
    %c0_i32_0 = arith.constant 0 : i32
    %c0_i32_1 = arith.constant 0 : i32
    return %c0_i32, %c0_i32_0 : i32, i32
  }
  func.func @transform_28(%arg0: i32) -> (i32, i32) {
    %c0_i32 = arith.constant 0 : i32
    %c0_i32_0 = arith.constant 0 : i32
    %c0_i32_1 = arith.constant 0 : i32
    return %c0_i32, %c0_i32_0 : i32, i32
  }
  func.func @transform_29(%arg0: i32) -> (i32, i32) {
    %c0_i32 = arith.constant 0 : i32
    %c0_i32_0 = arith.constant 0 : i32
    %c0_i32_1 = arith.constant 0 : i32
    return %c0_i32, %c0_i32_0 : i32, i32
  }
}

</mosaic_0001>

<bundles_post_ra>
// kernel: unet_forward.1
= control target key start
LH: loop header
LB: loop body
LE: loop exit
PB: predicated region body
PF: predicated region fallthrough
CT: control target
= control target key end

     0   :  { %s9949_s6 = smov 19   ;;  %vm12446_vm0 = vcmask 154624   ;;  %s9950_s7 = smov 126   ;;  %vm12445_vm1 = vcmask 220160   ;;  %v9958_v30 = vmov 0   ;;  %vm192_vm2 = vcmask 1039360   ;;  %s12438_s0 = inlined_call_operand.smem [shape: u32[30], index: -1, kind: input, shape index: {}] }
   0x1   :  { %s1_s5 = sld [smem:[%s12438_s0]]   ;;  %s9951_s8 = smov 109   ;;  %474 = vmatprep.mubr.bf16.mxu0 %v9958_v30  ;;  %515 = vmatprep.mubr.bf16.mxu1 %v9958_v30  ;;  %vm324_vm3 = vcmask 1043456   ;;  %vm210_vm4 = vcmask 1031168   ;;  %vm12444_vm5 = vcmask 900096   ;;  %vm12443_vm6 = vcmask 891904  }
   0x2   :  { %s9952_s9 = smov 92   ;;  %s9953_s10 = smov 90   ;;  %9133 = vset.pattern.permute.xlu0 %v9958_v30  ;;  %vm264_vm7 = vcmask 883712   ;;  %vm12442_vm8 = vcmask 752640   ;;  %vm12441_vm9 = vcmask 744448   ;;  %vm12440_vm10 = vcmask 736256  }
   0x3   :  { %s9954_s11 = smov 127   ;;  %s9955_s12 = smov 110   ;;  %vm420_vm11 = vcmask 588800   ;;  %vm12439_vm12 = vcmask 64512   ;;  %vm1931_vm13 = vcmask 89088   ;;  %vm1936_vm14 = vcmask 678912  }
   0x4   :  { %s9956_s13 = smov 108   ;;  %s9957_s14 = smov 91   ;;  %vm1957_vm15 = vcmask 965632  }
   0x5   :  { %s9959_s15 = smov 8   ;;  %s9960_s19 = smov 1  }
   0x6   :  { %s8122_s18 = sld [smem:[%s12438_s0 + %s9959_s15]]   ;;  %s9961_s23 = smov 10  }
   0x7   :  { %v130_v0 = vld [vmem:[%s1_s5 + $0x10] sm:$0xff]  ;;  %v128_v1 = vld [vmem:[%s1_s5] sm:$0xff]  ;;  %v131_v2 = vld [vmem:[%s1_s5 + $0x18] sm:$0xff]  ;;  %s8115_s22 = sld [smem:[%s12438_s0 + %s9960_s19]]   ;;  %s9963_s27 = smov 9  }
   0x8   :  { %v137_v3 = vpack.c.bf16 %v130_v0, %v130_v0  ;;  %v135_v4 = vpack.c.bf16 %v128_v1, %v128_v1  ;;  %v129_v5 = vld [vmem:[%s1_s5 + $0x8] sm:$0xff]  ;;  %v138_v6 = vpack.c.bf16 %v131_v2, %v131_v2  ;;  %v132_v8 = vld [vmem:[%s1_s5 + $0x20] sm:$0xff]  ;;  %s8124_s26 = sld [smem:[%s12438_s0 + %s9961_s23]]   ;;  %s9966_s1 = smov 4  }
   0x9   :  { %v136_v7 = vpack.c.bf16 %v129_v5, %v129_v5  ;;  %v133_v9 = vld [vmem:[%s1_s5 + $0x28] sm:$0xff]  ;;  %v139_v10 = vpack.c.bf16 %v132_v8, %v132_v8  ;;  %s8123_s30 = sld [smem:[%s12438_s0 + %s9963_s27]]   ;;  %s9967_s5 = smov 11  }
   0xa   :  { %151 = vrot.lane.b32.xlu1 %v137_v3, %s9949_s6  ;;  %147 = vrot.lane.b32.xlu0 %v135_v4, %s9949_s6  ;;  %v140_v11 = vpack.c.bf16 %v133_v9, %v133_v9  ;;  %s10663_s4 = sld [smem:[%s12438_s0 + %s9966_s1]]   ;;  %s9968_s15 = smov 117  }
   0xb   :  { %s9969_s19 = smov 118   ;;  %s9970_s20 = smov 116  }
   0xc   :  { %s9971_s21 = smov 107   ;;  %s9973_s23 = smov 2  }
   0xd   :  { %s9974_s27 = smov 13   ;;  %s9975_s1 = smov 12  }
   0xe   :  { %153 = vrot.lane.b32.xlu1 %v138_v6, %s9949_s6  ;;  %149 = vrot.lane.b32.xlu0 %v136_v7, %s9949_s6  ;;  %s9976_s16 = smov 5   ;;  %s9977_s24 = smov 7  }
   0xf   :  { %s9978_s28 = smov 121   ;;  %s9979_s29 = smov 122  }
  0x10   :  { %s9983_s17 = smov 115   ;;  %s9991_s3 = smov 6  }
  0x12   :  { %155 = vrot.lane.b32.xlu0 %v139_v10, %s9949_s6  ;;  %157 = vrot.lane.b32.xlu1 %v140_v11, %s9949_s6 }
  0x7c   :  { %v148_v12 = vpop.permute.xlu0 %147  ;;  %v152_v13 = vpop.permute.xlu1 %151 }
  0x7d   :  { %v10028_v17 = vsel %vm12446_vm0, 0, %v148_v12 }
  0x7e   :  { %v174_v23 = vrot.slane %v10028_v17, 4 }
  0x80   :  { %v150_v14 = vpop.permute.xlu0 %149  ;;  %v154_v18 = vpop.permute.xlu1 %153 }
  0x81   :  { %v10018_v15 = vsel %vm12446_vm0, %v148_v12, %v150_v14  ;;  %v10021_v16 = vsel %vm12446_vm0, %v150_v14, %v152_v13  ;;  %v10043_v19 = vsel %vm12446_vm0, %v152_v13, %v154_v18 }
  0x82   :  { %202 = vrot.lane.b32.xlu0 %v10021_v16, %s9950_s7  ;;  %200 = vrot.lane.b32.xlu1 %v10018_v15, %s9950_s7  ;;  %v175_v22 = vrot.slane %v10018_v15, 4  ;;  %v176_v24 = vrot.slane %v10021_v16, 4  ;;  %v177_v29 = vrot.slane %v10043_v19, 4 }
  0x84   :  { %v156_v20 = vpop.permute.xlu0 %155  ;;  %v158_v25 = vpop.permute.xlu1 %157 }
  0x85   :  { %v10050_v21 = vsel %vm12446_vm0, %v154_v18, %v156_v20  ;;  %v164_v26 = vsel %vm12446_vm0, %v156_v20, %v158_v25 }
  0x86   :  { %238 = vrot.lane.b32.xlu0 %v10021_v16, %s9951_s8  ;;  %198 = vrot.lane.b32.xlu1 %v10028_v17, %s9950_s7  ;;  %v10077_v27 = vsel %vm12445_vm1, %v164_v26, 0  ;;  %v178_v28 = vrot.slane %v10050_v21, 4 }
  0x87   :  { %v179_v31 = vrot.slane %v10077_v27, 4 }
  0x8a   :  { %274 = vrot.lane.b32.xlu0 %v10021_v16, %s9952_s9  ;;  %236 = vrot.lane.b32.xlu1 %v10018_v15, %s9951_s8 }
  0x8e   :  { %308 = vrot.lane.b32.xlu0 %v10018_v15, %s9953_s10  ;;  %234 = vrot.lane.b32.xlu1 %v10028_v17, %s9951_s8 }
  0x92   :  { %204 = vrot.lane.b32.xlu0 %v10043_v19, %s9950_s7  ;;  %272 = vrot.lane.b32.xlu1 %v10018_v15, %s9952_s9 }
  0x96   :  { %270 = vrot.lane.b32.xlu1 %v10028_v17, %s9952_s9  ;;  %242 = vrot.lane.b32.xlu0 %v10050_v21, %s9951_s8 }
  0x9a   :  { %306 = vrot.lane.b32.xlu1 %v10028_v17, %s9953_s10  ;;  %278 = vrot.lane.b32.xlu0 %v10050_v21, %s9952_s9 }
  0x9e   :  { %310 = vrot.lane.b32.xlu1 %v10021_v16, %s9953_s10  ;;  %182 = vrot.lane.b32.xlu0 %v175_v22, %s9954_s11 }
  0xa2   :  { %180 = vrot.lane.b32.xlu0 %v174_v23, %s9954_s11  ;;  %206 = vrot.lane.b32.xlu1 %v10050_v21, %s9950_s7 }
  0xa6   :  { %220 = vrot.lane.b32.xlu0 %v176_v24, %s9955_s12  ;;  %240 = vrot.lane.b32.xlu1 %v10043_v19, %s9951_s8 }
  0xaa   :  { %216 = vrot.lane.b32.xlu0 %v174_v23, %s9955_s12  ;;  %276 = vrot.lane.b32.xlu1 %v10043_v19, %s9952_s9 }
  0xae   :  { %256 = vrot.lane.b32.xlu0 %v176_v24, %s9956_s13  ;;  %208 = vrot.lane.b32.xlu1 %v10077_v27, %s9950_s7 }
  0xb2   :  { %252 = vrot.lane.b32.xlu0 %v174_v23, %s9956_s13  ;;  %244 = vrot.lane.b32.xlu1 %v10077_v27, %s9951_s8 }
  0xb6   :  { %292 = vrot.lane.b32.xlu0 %v176_v24, %s9957_s14  ;;  %184 = vrot.lane.b32.xlu1 %v176_v24, %s9954_s11 }
  0xba   :  { %288 = vrot.lane.b32.xlu0 %v174_v23, %s9957_s14  ;;  %218 = vrot.lane.b32.xlu1 %v175_v22, %s9955_s12 }
  0xbe   :  { %254 = vrot.lane.b32.xlu1 %v175_v22, %s9956_s13  ;;  %188 = vrot.lane.b32.xlu0 %v178_v28, %s9954_s11 }
  0xc2   :  { %290 = vrot.lane.b32.xlu1 %v175_v22, %s9957_s14  ;;  %222 = vrot.lane.b32.xlu0 %v177_v29, %s9955_s12 }
  0xc6   :  { %186 = vrot.lane.b32.xlu1 %v177_v29, %s9954_s11  ;;  %260 = vrot.lane.b32.xlu0 %v178_v28, %s9956_s13 }
  0xca   :  { %224 = vrot.lane.b32.xlu1 %v178_v28, %s9955_s12  ;;  %296 = vrot.lane.b32.xlu0 %v178_v28, %s9957_s14 }
  0xce   :  { %258 = vrot.lane.b32.xlu1 %v177_v29, %s9956_s13  ;;  %190 = vrot.lane.b32.xlu0 %v179_v31, %s9954_s11 }
  0xd2   :  { %294 = vrot.lane.b32.xlu1 %v177_v29, %s9957_s14  ;;  %226 = vrot.lane.b32.xlu0 %v179_v31, %s9955_s12 }
  0xd6   :  { %280 = vrot.lane.b32.xlu1 %v10077_v27, %s9952_s9  ;;  %262 = vrot.lane.b32.xlu0 %v179_v31, %s9956_s13 }
  0xda   :  { %312 = vrot.lane.b32.xlu1 %v10043_v19, %s9953_s10  ;;  %298 = vrot.lane.b32.xlu0 %v179_v31, %s9957_s14 }
  0xde   :  { %316 = vrot.lane.b32.xlu1 %v10077_v27, %s9953_s10  ;;  %314 = vrot.lane.b32.xlu0 %v10050_v21, %s9953_s10 }
  0xf4   :  { %v201_v32 = vpop.permute.xlu1 %200  ;;  %v10117_v33 = vpop.permute.xlu0 %202 }
  0xf5   :  { %v212_v2 = vsel %vm210_vm4, %v201_v32, %v10117_v33 }
  0xf8   :  { %v199_v34 = vpop.permute.xlu1 %198  ;;  %v10119_v35 = vpop.permute.xlu0 %238 }
  0xf9   :  { %v211_v3 = vsel %vm210_vm4, %v199_v34, %v201_v32 }
  0xfc   :  { %v237_v36 = vpop.permute.xlu1 %236  ;;  %v10121_v37 = vpop.permute.xlu0 %274 }
  0xfd   :  { %v248_v10 = vsel %vm12443_vm6, %v237_v36, %v10119_v35 }
 0x100   :  { %v235_v38 = vpop.permute.xlu1 %234  ;;  %v10123_v39 = vpop.permute.xlu0 %308 }
 0x101   :  { %v247_v11 = vsel %vm12443_vm6, %v235_v38, %v237_v36 }
 0x104   :  { %v273_v40 = vpop.permute.xlu1 %272  ;;  %v10125_v41 = vpop.permute.xlu0 %204 }
 0x105   :  { %v284_v20 = vsel %vm12442_vm8, %v273_v40, %v10121_v37 }
 0x108   :  { %v271_v42 = vpop.permute.xlu1 %270  ;;  %v10127_v43 = vpop.permute.xlu0 %242 }
 0x109   :  { %v283_v22 = vsel %vm12442_vm8, %v271_v42, %v273_v40 }
 0x10c   :  { %v10129_v44 = vpop.permute.xlu1 %306  ;;  %v10131_v45 = vpop.permute.xlu0 %278 }
 0x10d   :  { %v319_v28 = vsel %vm12440_vm10, %v10129_v44, %v10123_v39 }
 0x10e   :  { %v425_v42 = vsel %vm324_vm3, %v319_v28, 0  ;;  %v125_v28 = vld [vmem:[%s8115_s22] sm:$0x3f]  ;;  %s9972_s22 = smov 106  }
 0x110   :  { %v10133_v46 = vpop.permute.xlu1 %310  ;;  %v183_v47 = vpop.permute.xlu0 %182 }
 0x111   :  { %v320_v32 = vsel %vm12440_vm10, %v10123_v39, %v10133_v46 }
 0x114   :  { %v10135_v48 = vpop.permute.xlu1 %206  ;;  %v181_v49 = vpop.permute.xlu0 %180 }
 0x115   :  { %v193_v58 = vsel %vm192_vm2, %v181_v49, %v183_v47  ;;  %v10200_v49 = vld [vmem:[%s8122_s18] sm:$0xf]  ;;  %s10804_s18 = sld [smem:[%s12438_s0 + %s9967_s5]]  }
 0x116   :  { %v326_v63 = vsel %vm324_vm3, %v10028_v17, %v193_v58 }
 0x118   :  { %v10137_v50 = vpop.permute.xlu1 %240  ;;  %v10139_v51 = vpop.permute.xlu0 %220 }
 0x119   :  { %v249_v58 = vsel %vm12443_vm6, %v10119_v35, %v10137_v50 }
 0x11c   :  { %v10141_v52 = vpop.permute.xlu1 %276  ;;  %v217_v53 = vpop.permute.xlu0 %216 }
 0x120   :  { %v10143_v54 = vpop.permute.xlu1 %208  ;;  %v10145_v55 = vpop.permute.xlu0 %256 }
 0x124   :  { %v10147_v56 = vpop.permute.xlu1 %244  ;;  %v253_v57 = vpop.permute.xlu0 %252 }
 0x128   :  { %v185_v59 = vpop.permute.xlu1 %184  ;;  %v10150_v60 = vpop.permute.xlu0 %292 }
 0x129   :  { %v194_v61 = vsel %vm192_vm2, %v183_v47, %v185_v59 }
 0x12a   :  { %v330_v62 = vsel %vm324_vm3, %v10018_v15, %v194_v61 }
 0x12b   :  { %442 = vmatprep.subr.bf16.mxu0 %v330_v62 }
 0x12c   :  { %v219_v0 = vpop.permute.xlu1 %218  ;;  %443 = vmatpush1.bf16.msra.mxu0 %v326_v63  ;;  %v289_v1 = vpop.permute.xlu0 %288 }
 0x12d   :  { %v229_v4 = vsel %vm12444_vm5, %v217_v53, %v219_v0  ;;  %v230_v5 = vsel %vm12444_vm5, %v219_v0, %v10139_v51 }
 0x12e   :  { %v353_v6 = vsel %vm324_vm3, %v212_v2, %v230_v5  ;;  %v349_v7 = vsel %vm324_vm3, %v211_v3, %v229_v4  ;;  %v286_v2 = vsel %vm12442_vm8, %v10141_v52, %v10131_v45 }
 0x12f   :  { %444 = vmatprep.subr.bf16.mxu0 %v353_v6 }
 0x130   :  { %v255_v8 = vpop.permute.xlu1 %254  ;;  %445 = vmatpush1.bf16.msra.mxu0 %v349_v7  ;;  %v189_v9 = vpop.permute.xlu0 %188 }
 0x131   :  { %v265_v12 = vsel %vm264_vm7, %v253_v57, %v255_v8  ;;  %v266_v13 = vsel %vm264_vm7, %v255_v8, %v10145_v55 }
 0x132   :  { %v377_v14 = vsel %vm324_vm3, %v248_v10, %v266_v13  ;;  %v373_v15 = vsel %vm324_vm3, %v247_v11, %v265_v12 }
 0x133   :  { %446 = vmatprep.subr.bf16.mxu0 %v377_v14 }
 0x134   :  { %v291_v17 = vpop.permute.xlu1 %290  ;;  %447 = vmatpush1.bf16.msra.mxu0 %v373_v15  ;;  %v223_v18 = vpop.permute.xlu0 %222 }
 0x135   :  { %v301_v23 = vsel %vm12441_vm9, %v289_v1, %v291_v17  ;;  %v302_v24 = vsel %vm12441_vm9, %v291_v17, %v10150_v60  ;;  %v231_v44 = vsel %vm12444_vm5, %v10139_v51, %v223_v18 }
 0x136   :  { %v401_v25 = vsel %vm324_vm3, %v284_v20, %v302_v24  ;;  %v397_v26 = vsel %vm324_vm3, %v283_v22, %v301_v23 }
 0x137   :  { %448 = vmatprep.subr.bf16.mxu0 %v401_v25 }
 0x138   :  { %v187_v29 = vpop.permute.xlu1 %186  ;;  %449 = vmatpush1.bf16.msra.mxu0 %v397_v26  ;;  %v261_v31 = vpop.permute.xlu0 %260 }
 0x139   :  { %8144 = vmatprep.subr.msk.bf16.mxu0 %vm324_vm3, %v320_v32  ;;  %v196_v34 = vsel %vm192_vm2, %v187_v29, %v189_v9  ;;  %v195_v36 = vsel %vm192_vm2, %v185_v59, %v187_v29  ;;  %v250_v59 = vsel %vm12443_vm6, %v10137_v50, %v10127_v43 }
 0x13a   :  { %v338_v38 = vsel %vm324_vm3, %v10043_v19, %v196_v34  ;;  %v334_v40 = vsel %vm324_vm3, %v10021_v16, %v195_v36  ;;  %v214_v19 = vsel %vm210_vm4, %v10125_v41, %v10135_v48  ;;  %v213_v16 = vsel %vm210_vm4, %v10117_v33, %v10125_v41 }
 0x13b   :  { %483 = vmatprep.subr.bf16.mxu1 %v338_v38  ;;  %v357_v51 = vsel %vm324_vm3, %v213_v16, %v231_v44 }
 0x13c   :  { %v225_v47 = vpop.permute.xlu1 %224  ;;  %451 = vmatpush1.bf16.msra.mxu0 %v425_v42  ;;  %484 = vmatpush1.bf16.msra.mxu1 %v334_v40  ;;  %v297_v39 = vpop.permute.xlu0 %296 }
 0x13d   :  { %v232_v53 = vsel %vm12444_vm5, %v223_v18, %v225_v47 }
 0x13e   :  { %v361_v57 = vsel %vm324_vm3, %v214_v19, %v232_v53 }
 0x13f   :  { %485 = vmatprep.subr.bf16.mxu1 %v361_v57  ;;  %8145 = vmatmul.mubr.msk.bf16.vlgmr.msra.gmra.mrb[0].mxu0 %vm420_vm11, %v10200_v49 }
 0x140   :  { %v259_v61 = vpop.permute.xlu1 %258  ;;  %486 = vmatpush1.bf16.msra.mxu1 %v357_v51  ;;  %v191_v62 = vpop.permute.xlu0 %190  ;;  %556 = vmatprep.mubr.bf16.mxu0 %v9958_v30 }
 0x141   :  { %v267_v33 = vsel %vm264_vm7, %v10145_v55, %v259_v61  ;;  %v268_v41 = vsel %vm264_vm7, %v259_v61, %v261_v31  ;;  %v197_v63 = vsel %vm192_vm2, %v189_v9, %v191_v62  ;;  %v345_v0 = vsel %vm324_vm3, %v10077_v27, %v191_v62 }
 0x142   :  { %524 = vmatprep.subr.bf16.mxu0 %v345_v0  ;;  %v385_v35 = vsel %vm324_vm3, %v250_v59, %v268_v41  ;;  %v342_v50 = vsel %vm324_vm3, %v10050_v21, %v197_v63  ;;  %v381_v1 = vsel %vm324_vm3, %v249_v58, %v267_v33  ;;  %v285_v55 = vsel %vm12442_vm8, %v10121_v37, %v10141_v52 }
 0x143   :  { %487 = vmatprep.subr.bf16.mxu1 %v385_v35  ;;  %525 = vmatpush1.bf16.msra.mxu0 %v342_v50  ;;  %v215_v27 = vsel %vm210_vm4, %v10135_v48, %v10143_v54 }
 0x144   :  { %v295_v3 = vpop.permute.xlu1 %294  ;;  %488 = vmatpush1.bf16.msra.mxu1 %v381_v1  ;;  %v227_v4 = vpop.permute.xlu0 %226 }
 0x145   :  { %v303_v21 = vsel %vm12441_vm9, %v10150_v60, %v295_v3  ;;  %v304_v5 = vsel %vm12441_vm9, %v295_v3, %v297_v39  ;;  %v233_v6 = vsel %vm12444_vm5, %v225_v47, %v227_v4  ;;  %v369_v37 = vsel %vm324_vm3, %v10143_v54, %v227_v4 }
 0x146   :  { %526 = vmatprep.subr.bf16.mxu0 %v369_v37  ;;  %v409_v52 = vsel %vm324_vm3, %v286_v2, %v304_v5  ;;  %v365_v7 = vsel %vm324_vm3, %v215_v27, %v233_v6  ;;  %v405_v48 = vsel %vm324_vm3, %v285_v55, %v303_v21  ;;  %v251_v60 = vsel %vm12443_vm6, %v10127_v43, %v10147_v56 }
 0x147   :  { %489 = vmatprep.subr.bf16.mxu1 %v409_v52  ;;  %527 = vmatpush1.bf16.msra.mxu0 %v365_v7 }
 0x148   :  { %v281_v8 = vpop.permute.xlu1 %280  ;;  %490 = vmatpush1.bf16.msra.mxu1 %v405_v48  ;;  %v263_v9 = vpop.permute.xlu0 %262 }
 0x149   :  { %v269_v10 = vsel %vm264_vm7, %v261_v31, %v263_v9  ;;  %v393_v54 = vsel %vm324_vm3, %v10147_v56, %v263_v9  ;;  %v287_v14 = vsel %vm12442_vm8, %v10131_v45, %v281_v8 }
 0x14a   :  { %528 = vmatprep.subr.bf16.mxu0 %v393_v54  ;;  %v389_v11 = vsel %vm324_vm3, %v251_v60, %v269_v10 }
 0x14b   :  { %529 = vmatpush1.bf16.msra.mxu0 %v389_v11 }
 0x14c   :  { %v313_v12 = vpop.permute.xlu1 %312  ;;  %v299_v13 = vpop.permute.xlu0 %298 }
 0x14d   :  { %v305_v15 = vsel %vm12441_vm9, %v297_v39, %v299_v13  ;;  %v417_v17 = vsel %vm324_vm3, %v281_v8, %v299_v13  ;;  %v321_v56 = vsel %vm12440_vm10, %v10133_v46, %v313_v12  ;;  %v566_v46 = vlaneseq }
 0x14e   :  { %530 = vmatprep.subr.bf16.mxu0 %v417_v17  ;;  %v413_v43 = vsel %vm324_vm3, %v287_v14, %v305_v15  ;;  %v431_v45 = vsel %vm324_vm3, %v321_v56, 0 }
 0x14f   :  { %531 = vmatpush1.bf16.msra.mxu0 %v413_v43  ;;  %v10278_v25 = vshrl.u32 %v566_v46, 7 }
 0x150   :  { %v317_v18 = vpop.permute.xlu1 %316  ;;  %v315_v20 = vpop.permute.xlu0 %314 }
 0x151   :  { %v323_v22 = vsel %vm12440_vm10, %v315_v20, %v317_v18  ;;  %8148 = vmatprep.subr.msk.bf16.mxu0 %vm324_vm3, %v317_v18  ;;  %v322_v23 = vsel %vm12440_vm10, %v313_v12, %v315_v20  ;;  %v10281_v26 = vsub.s32 0, %v10278_v25  ;;  %v572_v29 = vsub.s32 1, %v10278_v25 }
 0x152   :  { %8146 = vmatprep.subr.msk.bf16.mxu1 %vm324_vm3, %v322_v23  ;;  %v437_v24 = vsel %vm324_vm3, %v323_v22, 0  ;;  %v576_v39 = vsub.s32 2, %v10278_v25  ;;  %v588_v19 = vsub.s32 5, %v10278_v25  ;;  %v584_v53 = vsub.s32 4, %v10278_v25 }
 0x153   :  { %492 = vmatpush1.bf16.msra.mxu1 %v431_v45  ;;  %533 = vmatpush1.bf16.msra.mxu0 %v437_v24  ;;  %v10285_v31 = vrot.slane %v125_v28, %v10281_v26  ;;  %v10289_v32 = vrot.slane %v125_v28, %v572_v29 }
 0x154   :  { %v10297_v16 = vrot.slane %v125_v28, %v576_v39  ;;  %v10301_v51 = vrot.slane %v125_v28, %v588_v19  ;;  %v10303_v58 = vrot.slane %v125_v28, %v584_v53 }
 0x156   :  { %8147 = vmatmul.mubr.msk.bf16.vlgmr.msra.gmra.mrb[0].mxu1 %vm420_vm11, %v10200_v49  ;;  %8149 = vmatmul.mubr.msk.bf16.vlgmr.msra.gmra.mrb[4].mxu0 %vm420_vm11, %v10200_v49  ;;  %v580_v49 = vsub.s32 3, %v10278_v25 }
 0x157   :  { %1001 = vmatprep.mubr.bf16.mxu1 %v9958_v30  ;;  %1042 = vmatprep.mubr.bf16.mxu0 %v9958_v30 }
 0x158   :  { %v10299_v57 = vrot.slane %v125_v28, %v580_v49 }
 0x212   :  { %v476_v34 = vpop.f32.mrb[0].mxu0 }
 0x213   :  { %v596_v36 = vmul.f32 %v10285_v31, %v476_v34  ;;  %v478_v38 = vpop.f32.mrb[1].mxu0 }
 0x214   :  { %v597_v40 = vmul.f32 %v10289_v32, %v478_v38  ;;  %v480_v42 = vpop.f32.mrb[2].mxu0 }
 0x215   :  { %v481_v44 = vpop.f32.mrb[3].mxu0 }
 0x216   :  { %v602_v47 = vadd.f32 %v597_v40, %v596_v36  ;;  %v10320_v36 = vld [vmem:[%s8124_s26] sm:$0xff]  ;;  %s8116_s26 = sld [smem:[%s12438_s0 + %s9973_s23]]  }
 0x217   :  { %s10977_s23 = sld [smem:[%s12438_s0 + %s9976_s16]]   ;;  %s9982_s16 = smov 114  }
 0x229   :  { %v517_v59 = vpop.f32.mrb[0].mxu1  ;;  %v558_v61 = vpop.f32.mrb[4].mxu0 }
 0x22a   :  { %v598_v62 = vmul.f32 %v10297_v16, %v517_v59  ;;  %v519_v33 = vpop.f32.mrb[1].mxu1  ;;  %v560_v41 = vpop.f32.mrb[5].mxu0  ;;  %v600_v55 = vmul.f32 %v10303_v58, %v558_v61 }
 0x22b   :  { %v599_v63 = vmul.f32 %v10299_v57, %v519_v33  ;;  %v521_v0 = vpop.f32.mrb[2].mxu1  ;;  %v601_v35 = vmul.f32 %v10301_v51, %v560_v41  ;;  %v562_v50 = vpop.f32.mrb[6].mxu0 }
 0x22c   :  { %v603_v1 = vadd.f32 %v602_v47, %v598_v62  ;;  %v522_v2 = vpop.f32.mrb[3].mxu1  ;;  %v563_v27 = vpop.f32.mrb[7].mxu0 }
 0x22d   :  { %v607_v4 = vsel %vm12439_vm12, %v601_v35, 0.0 }
 0x22e   :  { %v604_v3 = vadd.f32 %v603_v1, %v599_v63 }
 0x230   :  { %v605_v21 = vadd.f32 %v604_v3, %v600_v55 }
 0x232   :  { %v608_v5 = vadd.f32 %v607_v4, %v605_v21 }
 0x234   :  { %609 = vadd.xlane.f32.xlu0 %v608_v5 }
 0x2c1   :  { %v610_v6 = vpop.xlane.xlu0 %609 }
 0x2c2   :  { %v611_v37 = vmul.f32 0.001953125, %v610_v6 }
 0x2c4   :  { %v612_v52 = vsub.f32 %v476_v34, %v611_v37  ;;  %v613_v7 = vsub.f32 %v478_v38, %v611_v37  ;;  %v614_v48 = vsub.f32 %v517_v59, %v611_v37  ;;  %v615_v8 = vsub.f32 %v519_v33, %v611_v37 }
 0x2c5   :  { %v617_v9 = vsub.f32 %v560_v41, %v611_v37  ;;  %v616_v60 = vsub.f32 %v558_v61, %v611_v37  ;;  %v9962_v38 = vmov 1  }
 0x2c6   :  { %v618_v10 = vmul.f32 %v612_v52, %v10285_v31  ;;  %v619_v54 = vmul.f32 %v613_v7, %v10289_v32  ;;  %v620_v11 = vmul.f32 %v614_v48, %v10297_v16  ;;  %v621_v12 = vmul.f32 %v615_v8, %v10299_v57  ;;  %9134 = vset.pattern.permute.xlu1 %v9962_v38 }
 0x2c7   :  { %v623_v15 = vmul.f32 %v617_v9, %v10301_v51  ;;  %v622_v17 = vmul.f32 %v616_v60, %v10303_v58 }
 0x2c8   :  { %v624_v13 = vmul.f32 %v618_v10, %v618_v10  ;;  %v625_v14 = vmul.f32 %v619_v54, %v619_v54  ;;  %v626_v43 = vmul.f32 %v620_v11, %v620_v11  ;;  %v627_v18 = vmul.f32 %v621_v12, %v621_v12 }
 0x2c9   :  { %v629_v22 = vmul.f32 %v623_v15, %v623_v15  ;;  %v628_v23 = vmul.f32 %v622_v17, %v622_v17 }
 0x2ca   :  { %v630_v56 = vadd.f32 %v625_v14, %v624_v13 }
 0x2cb   :  { %v634_v28 = vsel %vm12439_vm12, %v629_v22, 0.0 }
 0x2cc   :  { %v631_v20 = vadd.f32 %v630_v56, %v626_v43 }
 0x2ce   :  { %v632_v45 = vadd.f32 %v631_v20, %v627_v18 }
 0x2d0   :  { %v633_v24 = vadd.f32 %v632_v45, %v628_v23 }
 0x2d2   :  { %v635_v34 = vadd.f32 %v634_v28, %v633_v24 }
 0x2d4   :  { %636 = vadd.xlane.f32.xlu1 %v635_v34 }
 0x2e5   :  { %655 = vperm.xlu1 %9134, %v10320_v36  }
 0x361   :  { %v637_v40 = vpop.xlane.xlu1 %636 }
 0x362   :  { %v638_v42 = vmul.f32 0.001953125, %v637_v40 }
 0x364   :  { %v639_v44 = vadd.f32 1e-05, %v638_v42 }
 0x365   :  { %v656_v19 = vpop.permute.xlu1 %655 }
 0x366   :  { %9909 = vrsqrt.f32 %v639_v44 }
 0x370   :  { %v9910_v47 = vpop.eup %9909 }
 0x371   :  { %v641_v39 = vmul.f32 %v9910_v47, %v10320_v36 }
 0x373   :  { %644 = vperm.xlu0 %9133, %v641_v39  }
 0x3f2   :  { %v645_v49 = vpop.permute.xlu0 %644 }
 0x3f3   :  { %v647_v53 = vmul.f32 %v645_v49, %v618_v10  ;;  %v648_v59 = vmul.f32 %v645_v49, %v619_v54  ;;  %v649_v61 = vmul.f32 %v645_v49, %v620_v11  ;;  %v650_v35 = vmul.f32 %v645_v49, %v621_v12 }
 0x3f4   :  { %v651_v1 = vmul.f32 %v645_v49, %v622_v17  ;;  %v652_v4 = vmul.f32 %v645_v49, %v623_v15 }
 0x3f5   :  { %v658_v62 = vadd.f32 %v656_v19, %v647_v53  ;;  %v659_v33 = vadd.f32 %v656_v19, %v648_v59  ;;  %v660_v0 = vadd.f32 %v656_v19, %v649_v61  ;;  %v661_v3 = vadd.f32 %v656_v19, %v650_v35 }
 0x3f6   :  { %v662_v37 = vadd.f32 %v656_v19, %v651_v1  ;;  %v663_v8 = vadd.f32 %v656_v19, %v652_v4 }
 0x3f7   :  { %v664_v41 = vmax.f32 %v658_v62, 0.0  ;;  %v665_v63 = vmax.f32 %v659_v33, 0.0  ;;  %v666_v27 = vmax.f32 %v660_v0, 0.0  ;;  %v667_v6 = vmax.f32 %v661_v3, 0.0 }
 0x3f8   :  { %v668_v48 = vmax.f32 %v662_v37, 0.0  ;;  %v669_v10 = vmax.f32 %v663_v8, 0.0 }
 0x3f9   :  { %v670_v50 = vmul.f32 %v664_v41, %v10285_v31  ;;  %v671_v2 = vmul.f32 %v665_v63, %v10289_v32  ;;  %v672_v5 = vmul.f32 %v666_v27, %v10297_v16  ;;  %v673_v7 = vmul.f32 %v667_v6, %v10299_v57 }
 0x3fa   :  { %v674_v60 = vmul.f32 %v668_v48, %v10303_v58  ;;  %v675_v11 = vmul.f32 %v669_v10, %v10301_v51 }
 0x3fb   :  { %v676_v55 = vpack.c.bf16 %v670_v50, %v670_v50  ;;  %v677_v21 = vpack.c.bf16 %v671_v2, %v671_v2  ;;  %v678_v52 = vpack.c.bf16 %v672_v5, %v672_v5  ;;  %v679_v9 = vpack.c.bf16 %v673_v7, %v673_v7 }
 0x3fc   :  { %v680_v54 = vpack.c.bf16 %v674_v60, %v674_v60  ;;  %v681_v12 = vpack.c.bf16 %v675_v11, %v675_v11 }
 0x3fd   :  { %688 = vrot.lane.b32.xlu1 %v676_v55, %s9949_s6 }
 0x401   :  { %690 = vrot.lane.b32.xlu1 %v677_v21, %s9949_s6 }
 0x405   :  { %692 = vrot.lane.b32.xlu1 %v678_v52, %s9949_s6 }
 0x409   :  { %694 = vrot.lane.b32.xlu1 %v679_v9, %s9949_s6 }
 0x40d   :  { %696 = vrot.lane.b32.xlu1 %v680_v54, %s9949_s6 }
 0x411   :  { %698 = vrot.lane.b32.xlu1 %v681_v12, %s9949_s6 }
 0x46f   :  { %v689_v13 = vpop.permute.xlu1 %688 }
 0x470   :  { %v10343_v43 = vsel %vm12446_vm0, 0, %v689_v13 }
 0x471   :  { %v711_v24 = vrot.slane %v10343_v43, 4 }
 0x473   :  { %v691_v14 = vpop.permute.xlu1 %690 }
 0x474   :  { %v10338_v15 = vsel %vm12446_vm0, %v689_v13, %v691_v14 }
 0x475   :  { %736 = vrot.lane.b32.xlu1 %v10338_v15, %s9950_s7  ;;  %v712_v45 = vrot.slane %v10338_v15, 4 }
 0x477   :  { %v693_v17 = vpop.permute.xlu1 %692 }
 0x478   :  { %v10346_v56 = vsel %vm12446_vm0, %v691_v14, %v693_v17 }
 0x479   :  { %734 = vrot.lane.b32.xlu1 %v10343_v43, %s9950_s7  ;;  %738 = vrot.lane.b32.xlu0 %v10346_v56, %s9950_s7  ;;  %v713_v34 = vrot.slane %v10346_v56, 4 }
 0x47b   :  { %v695_v18 = vpop.permute.xlu1 %694 }
 0x47c   :  { %v10365_v20 = vsel %vm12446_vm0, %v693_v17, %v695_v18 }
 0x47d   :  { %770 = vrot.lane.b32.xlu1 %v10338_v15, %s9951_s8  ;;  %772 = vrot.lane.b32.xlu0 %v10346_v56, %s9951_s8  ;;  %v714_v47 = vrot.slane %v10365_v20, 4 }
 0x47f   :  { %v697_v22 = vpop.permute.xlu1 %696 }
 0x480   :  { %v10372_v23 = vsel %vm12446_vm0, %v695_v18, %v697_v22 }
 0x481   :  { %768 = vrot.lane.b32.xlu1 %v10343_v43, %s9951_s8  ;;  %806 = vrot.lane.b32.xlu0 %v10346_v56, %s9952_s9  ;;  %v715_v44 = vrot.slane %v10372_v23, 4 }
 0x483   :  { %v699_v28 = vpop.permute.xlu1 %698 }
 0x484   :  { %v704_v40 = vsel %vm12446_vm0, %v697_v22, %v699_v28 }
 0x485   :  { %804 = vrot.lane.b32.xlu1 %v10338_v15, %s9952_s9  ;;  %838 = vrot.lane.b32.xlu0 %v10338_v15, %s9953_s10  ;;  %v10396_v42 = vsel %vm12445_vm1, %v704_v40, 0 }
 0x486   :  { %v716_v39 = vrot.slane %v10396_v42, 4 }
 0x489   :  { %802 = vrot.lane.b32.xlu1 %v10343_v43, %s9952_s9  ;;  %740 = vrot.lane.b32.xlu0 %v10365_v20, %s9950_s7 }
 0x48d   :  { %836 = vrot.lane.b32.xlu1 %v10343_v43, %s9953_s10  ;;  %776 = vrot.lane.b32.xlu0 %v10372_v23, %s9951_s8 }
 0x491   :  { %840 = vrot.lane.b32.xlu1 %v10346_v56, %s9953_s10  ;;  %810 = vrot.lane.b32.xlu0 %v10372_v23, %s9952_s9 }
 0x495   :  { %719 = vrot.lane.b32.xlu0 %v712_v45, %s9954_s11  ;;  %742 = vrot.lane.b32.xlu1 %v10372_v23, %s9950_s7 }
 0x499   :  { %717 = vrot.lane.b32.xlu0 %v711_v24, %s9954_s11  ;;  %774 = vrot.lane.b32.xlu1 %v10365_v20, %s9951_s8 }
 0x49d   :  { %755 = vrot.lane.b32.xlu0 %v713_v34, %s9955_s12  ;;  %808 = vrot.lane.b32.xlu1 %v10365_v20, %s9952_s9 }
 0x4a1   :  { %751 = vrot.lane.b32.xlu0 %v711_v24, %s9955_s12  ;;  %744 = vrot.lane.b32.xlu1 %v10396_v42, %s9950_s7 }
 0x4a5   :  { %789 = vrot.lane.b32.xlu0 %v713_v34, %s9956_s13  ;;  %778 = vrot.lane.b32.xlu1 %v10396_v42, %s9951_s8 }
 0x4a9   :  { %785 = vrot.lane.b32.xlu0 %v711_v24, %s9956_s13  ;;  %721 = vrot.lane.b32.xlu1 %v713_v34, %s9954_s11 }
 0x4ad   :  { %823 = vrot.lane.b32.xlu0 %v713_v34, %s9957_s14  ;;  %753 = vrot.lane.b32.xlu1 %v712_v45, %s9955_s12 }
 0x4b1   :  { %819 = vrot.lane.b32.xlu0 %v711_v24, %s9957_s14  ;;  %787 = vrot.lane.b32.xlu1 %v712_v45, %s9956_s13 }
 0x4b5   :  { %725 = vrot.lane.b32.xlu0 %v715_v44, %s9954_s11  ;;  %821 = vrot.lane.b32.xlu1 %v712_v45, %s9957_s14 }
 0x4b9   :  { %757 = vrot.lane.b32.xlu0 %v714_v47, %s9955_s12  ;;  %723 = vrot.lane.b32.xlu1 %v714_v47, %s9954_s11 }
 0x4bd   :  { %793 = vrot.lane.b32.xlu0 %v715_v44, %s9956_s13  ;;  %759 = vrot.lane.b32.xlu1 %v715_v44, %s9955_s12 }
 0x4c1   :  { %827 = vrot.lane.b32.xlu0 %v715_v44, %s9957_s14  ;;  %791 = vrot.lane.b32.xlu1 %v714_v47, %s9956_s13 }
 0x4c5   :  { %825 = vrot.lane.b32.xlu1 %v714_v47, %s9957_s14  ;;  %727 = vrot.lane.b32.xlu0 %v716_v39, %s9954_s11 }
 0x4c9   :  { %812 = vrot.lane.b32.xlu1 %v10396_v42, %s9952_s9  ;;  %761 = vrot.lane.b32.xlu0 %v716_v39, %s9955_s12 }
 0x4cd   :  { %842 = vrot.lane.b32.xlu1 %v10365_v20, %s9953_s10  ;;  %795 = vrot.lane.b32.xlu0 %v716_v39, %s9956_s13 }
 0x4d1   :  { %846 = vrot.lane.b32.xlu1 %v10396_v42, %s9953_s10  ;;  %829 = vrot.lane.b32.xlu0 %v716_v39, %s9957_s14 }
 0x4d5   :  { %844 = vrot.lane.b32.xlu0 %v10372_v23, %s9953_s10 }
 0x4e7   :  { %v737_v49 = vpop.permute.xlu1 %736 }
 0x4eb   :  { %v10434_v19 = vpop.permute.xlu0 %738  ;;  %v735_v53 = vpop.permute.xlu1 %734 }
 0x4ec   :  { %v747_v14 = vsel %vm210_vm4, %v737_v49, %v10434_v19  ;;  %v746_v17 = vsel %vm210_vm4, %v735_v53, %v737_v49 }
 0x4ef   :  { %v10436_v59 = vpop.permute.xlu0 %772  ;;  %v771_v61 = vpop.permute.xlu1 %770 }
 0x4f0   :  { %v781_v28 = vsel %vm12443_vm6, %v771_v61, %v10436_v59 }
 0x4f3   :  { %v10438_v62 = vpop.permute.xlu0 %806  ;;  %v769_v33 = vpop.permute.xlu1 %768 }
 0x4f4   :  { %v780_v34 = vsel %vm12443_vm6, %v769_v33, %v771_v61 }
 0x4f7   :  { %v839_v41 = vpop.permute.xlu0 %838  ;;  %v805_v63 = vpop.permute.xlu1 %804 }
 0x4f8   :  { %v815_v61 = vsel %vm12442_vm8, %v805_v63, %v10438_v62 }
 0x4fb   :  { %v10440_v0 = vpop.permute.xlu0 %740  ;;  %v803_v35 = vpop.permute.xlu1 %802 }
 0x4fc   :  { %v814_v33 = vsel %vm12442_vm8, %v803_v35, %v805_v63 }
 0x4ff   :  { %v10442_v50 = vpop.permute.xlu0 %776  ;;  %v837_v1 = vpop.permute.xlu1 %836 }
 0x503   :  { %v10444_v55 = vpop.permute.xlu0 %810  ;;  %v10446_v2 = vpop.permute.xlu1 %840 }
 0x507   :  { %v720_v27 = vpop.permute.xlu0 %719  ;;  %v10448_v3 = vpop.permute.xlu1 %742 }
 0x50b   :  { %v718_v4 = vpop.permute.xlu0 %717  ;;  %v10450_v21 = vpop.permute.xlu1 %774 }
 0x50c   :  { %v729_v8 = vsel %vm192_vm2, %v718_v4, %v720_v27 }
 0x50d   :  { %v854_v11 = vsel %vm324_vm3, %v10343_v43, %v729_v8 }
 0x50f   :  { %v756_v5 = vpop.permute.xlu0 %755  ;;  %v10452_v6 = vpop.permute.xlu1 %808 }
 0x513   :  { %v752_v37 = vpop.permute.xlu0 %751  ;;  %v10454_v52 = vpop.permute.xlu1 %744 }
 0x517   :  { %v10456_v7 = vpop.permute.xlu0 %789  ;;  %v10458_v48 = vpop.permute.xlu1 %778 }
 0x51b   :  { %v786_v9 = vpop.permute.xlu0 %785  ;;  %v722_v60 = vpop.permute.xlu1 %721 }
 0x51c   :  { %v730_v10 = vsel %vm192_vm2, %v720_v27, %v722_v60 }
 0x51d   :  { %v858_v54 = vsel %vm324_vm3, %v10338_v15, %v730_v10 }
 0x51e   :  { %969 = vmatprep.subr.bf16.mxu1 %v858_v54 }
 0x51f   :  { %v10466_v12 = vpop.permute.xlu0 %823  ;;  %970 = vmatpush1.bf16.msra.mxu1 %v854_v11  ;;  %v754_v13 = vpop.permute.xlu1 %753  ;;  %v849_v11 = vsel %vm12440_vm10, %v839_v41, %v10446_v2 }
 0x520   :  { %v763_v18 = vsel %vm12444_vm5, %v752_v37, %v754_v13  ;;  %v764_v22 = vsel %vm12444_vm5, %v754_v13, %v756_v5 }
 0x521   :  { %v881_v45 = vsel %vm324_vm3, %v747_v14, %v764_v22  ;;  %v877_v15 = vsel %vm324_vm3, %v746_v17, %v763_v18  ;;  %v749_v22 = vsel %vm210_vm4, %v10440_v0, %v10448_v3 }
 0x522   :  { %971 = vmatprep.subr.bf16.mxu1 %v881_v45 }
 0x523   :  { %v820_v24 = vpop.permute.xlu0 %819  ;;  %972 = vmatpush1.bf16.msra.mxu1 %v877_v15  ;;  %v788_v43 = vpop.permute.xlu1 %787 }
 0x524   :  { %v797_v40 = vsel %vm264_vm7, %v786_v9, %v788_v43  ;;  %v798_v44 = vsel %vm264_vm7, %v788_v43, %v10456_v7  ;;  %v848_v9 = vsel %vm12440_vm10, %v837_v1, %v839_v41  ;;  %v782_v43 = vsel %vm12443_vm6, %v10436_v59, %v10450_v21 }
 0x525   :  { %v905_v47 = vsel %vm324_vm3, %v781_v28, %v798_v44  ;;  %v901_v39 = vsel %vm324_vm3, %v780_v34, %v797_v40  ;;  %v952_v1 = vsel %vm324_vm3, %v848_v9, 0  ;;  %v816_v44 = vsel %vm12442_vm8, %v10438_v62, %v10452_v6 }
 0x526   :  { %973 = vmatprep.subr.bf16.mxu1 %v905_v47  ;;  %v817_v59 = vsel %vm12442_vm8, %v10452_v6, %v10444_v55 }
 0x527   :  { %v726_v49 = vpop.permute.xlu0 %725  ;;  %974 = vmatpush1.bf16.msra.mxu1 %v901_v39  ;;  %v822_v53 = vpop.permute.xlu1 %821 }
 0x528   :  { %v831_v27 = vsel %vm12441_vm9, %v820_v24, %v822_v53  ;;  %v832_v4 = vsel %vm12441_vm9, %v822_v53, %v10466_v12 }
 0x529   :  { %v929_v37 = vsel %vm324_vm3, %v815_v61, %v832_v4  ;;  %v925_v8 = vsel %vm324_vm3, %v814_v33, %v831_v27 }
 0x52a   :  { %975 = vmatprep.subr.bf16.mxu1 %v929_v37 }
 0x52b   :  { %v758_v10 = vpop.permute.xlu0 %757  ;;  %976 = vmatpush1.bf16.msra.mxu1 %v925_v8  ;;  %v724_v54 = vpop.permute.xlu1 %723  ;;  %v784_v8 = vsel %vm12443_vm6, %v10442_v50, %v10458_v48 }
 0x52c   :  { %v731_v63 = vsel %vm192_vm2, %v722_v60, %v724_v54  ;;  %v732_v35 = vsel %vm192_vm2, %v724_v54, %v726_v49  ;;  %8150 = vmatprep.subr.msk.bf16.mxu1 %vm324_vm3, %v849_v11  ;;  %v765_v17 = vsel %vm12444_vm5, %v756_v5, %v758_v10  ;;  %v10506_v60 = vld [vmem:[%s8123_s30] sm:$0xf]  ;;  %s8127_s30 = sld [smem:[%s12438_s0 + %s9974_s27]]  }
 0x52d   :  { %v866_v13 = vsel %vm324_vm3, %v10365_v20, %v732_v35  ;;  %v862_v14 = vsel %vm324_vm3, %v10346_v56, %v731_v63  ;;  %v748_v56 = vsel %vm210_vm4, %v10434_v19, %v10440_v0  ;;  %v783_v19 = vsel %vm12443_vm6, %v10450_v21, %v10442_v50  ;;  %s11019_s27 = sld [smem:[%s12438_s0 + %s9977_s24]]  }
 0x52e   :  { %1010 = vmatprep.subr.bf16.mxu0 %v866_v13  ;;  %v885_v5 = vsel %vm324_vm3, %v748_v56, %v765_v17 }
 0x52f   :  { %v794_v18 = vpop.permute.xlu0 %793  ;;  %978 = vmatpush1.bf16.msra.mxu1 %v952_v1  ;;  %1011 = vmatpush1.bf16.msra.mxu0 %v862_v14  ;;  %v760_v41 = vpop.permute.xlu1 %759 }
 0x530   :  { %v766_v20 = vsel %vm12444_vm5, %v758_v10, %v760_v41 }
 0x531   :  { %v889_v45 = vsel %vm324_vm3, %v749_v22, %v766_v20 }
 0x532   :  { %1012 = vmatprep.subr.bf16.mxu0 %v889_v45  ;;  %8151 = vmatmul.mubr.msk.bf16.vlgmr.msra.gmra.mrb[4].mxu1 %vm420_vm11, %v10506_v60 }
 0x533   :  { %v828_v15 = vpop.permute.xlu0 %827  ;;  %1013 = vmatpush1.bf16.msra.mxu0 %v885_v5  ;;  %v792_v24 = vpop.permute.xlu1 %791  ;;  %1083 = vmatprep.mubr.bf16.mxu1 %v9958_v30 }
 0x534   :  { %v799_v0 = vsel %vm264_vm7, %v10456_v7, %v792_v24  ;;  %v800_v28 = vsel %vm264_vm7, %v792_v24, %v794_v18 }
 0x535   :  { %v913_v34 = vsel %vm324_vm3, %v783_v19, %v800_v28  ;;  %v909_v40 = vsel %vm324_vm3, %v782_v43, %v799_v0 }
 0x536   :  { %1014 = vmatprep.subr.bf16.mxu0 %v913_v34 }
 0x537   :  { %v728_v47 = vpop.permute.xlu0 %727  ;;  %1015 = vmatpush1.bf16.msra.mxu0 %v909_v40  ;;  %v826_v21 = vpop.permute.xlu1 %825 }
 0x538   :  { %v733_v7 = vsel %vm192_vm2, %v726_v49, %v728_v47  ;;  %v833_v39 = vsel %vm12441_vm9, %v10466_v12, %v826_v21  ;;  %v834_v53 = vsel %vm12441_vm9, %v826_v21, %v828_v15  ;;  %v873_v61 = vsel %vm324_vm3, %v10396_v42, %v728_v47 }
 0x539   :  { %1051 = vmatprep.subr.bf16.mxu1 %v873_v61  ;;  %v937_v62 = vsel %vm324_vm3, %v817_v59, %v834_v53  ;;  %v870_v33 = vsel %vm324_vm3, %v10372_v23, %v733_v7  ;;  %v933_v6 = vsel %vm324_vm3, %v816_v44, %v833_v39  ;;  %v750_v12 = vsel %vm210_vm4, %v10448_v3, %v10454_v52 }
 0x53a   :  { %1016 = vmatprep.subr.bf16.mxu0 %v937_v62  ;;  %1052 = vmatpush1.bf16.msra.mxu1 %v870_v33 }
 0x53b   :  { %v762_v27 = vpop.permute.xlu0 %761  ;;  %1017 = vmatpush1.bf16.msra.mxu0 %v933_v6  ;;  %v813_v49 = vpop.permute.xlu1 %812 }
 0x53c   :  { %v767_v4 = vsel %vm12444_vm5, %v760_v41, %v762_v27  ;;  %v897_v42 = vsel %vm324_vm3, %v10454_v52, %v762_v27  ;;  %v818_v11 = vsel %vm12442_vm8, %v10444_v55, %v813_v49  ;;  %vm1986_vm8 = vcmask 867328  }
 0x53d   :  { %1053 = vmatprep.subr.bf16.mxu1 %v897_v42  ;;  %v893_v37 = vsel %vm324_vm3, %v750_v12, %v767_v4 }
 0x53e   :  { %1054 = vmatpush1.bf16.msra.mxu1 %v893_v37 }
 0x53f   :  { %v796_v23 = vpop.permute.xlu0 %795  ;;  %v843_v10 = vpop.permute.xlu1 %842 }
 0x540   :  { %v801_v9 = vsel %vm264_vm7, %v794_v18, %v796_v23  ;;  %v921_v3 = vsel %vm324_vm3, %v10458_v48, %v796_v23  ;;  %v850_v13 = vsel %vm12440_vm10, %v10446_v2, %v843_v10 }
 0x541   :  { %1055 = vmatprep.subr.bf16.mxu1 %v921_v3  ;;  %v917_v54 = vsel %vm324_vm3, %v784_v8, %v801_v9  ;;  %v958_v55 = vsel %vm324_vm3, %v850_v13, 0 }
 0x542   :  { %1056 = vmatpush1.bf16.msra.mxu1 %v917_v54 }
 0x543   :  { %v830_v52 = vpop.permute.xlu0 %829  ;;  %v847_v14 = vpop.permute.xlu1 %846 }
 0x544   :  { %v835_v63 = vsel %vm12441_vm9, %v828_v15, %v830_v52  ;;  %v945_v35 = vsel %vm324_vm3, %v813_v49, %v830_v52  ;;  %vm1980_vm9 = vcmask 875520  }
 0x545   :  { %1057 = vmatprep.subr.bf16.mxu1 %v945_v35  ;;  %v941_v50 = vsel %vm324_vm3, %v818_v11, %v835_v63 }
 0x546   :  { %1058 = vmatpush1.bf16.msra.mxu1 %v941_v50 }
 0x547   :  { %v845_v48 = vpop.permute.xlu0 %844  ;;  %8154 = vmatprep.subr.msk.bf16.mxu1 %vm324_vm3, %v847_v14 }
 0x548   :  { %v852_v1 = vsel %vm12440_vm10, %v845_v48, %v847_v14  ;;  %v851_v17 = vsel %vm12440_vm10, %v843_v10, %v845_v48  ;;  %vm1969_vm10 = vcmask 949248  }
 0x549   :  { %8152 = vmatprep.subr.msk.bf16.mxu0 %vm324_vm3, %v851_v17  ;;  %v964_v18 = vsel %vm324_vm3, %v852_v1, 0 }
 0x54a   :  { %1019 = vmatpush1.bf16.msra.mxu0 %v958_v55  ;;  %1060 = vmatpush1.bf16.msra.mxu1 %v964_v18  ;;  %v9964_v18 = vmov 2  }
 0x54b   :  { %9135 = vset.pattern.permute.xlu0 %v9964_v18 }
 0x54d   :  { %8153 = vmatmul.mubr.msk.bf16.vlgmr.msra.gmra.mrb[8].mxu0 %vm420_vm11, %v10506_v60  ;;  %8155 = vmatmul.mubr.msk.bf16.vlgmr.msra.gmra.mrb[8].mxu1 %vm420_vm11, %v10506_v60 }
 0x54e   :  { %2066 = vmatprep.mubr.bf16.mxu1 %v9958_v30 }
 0x605   :  { %v1003_v2 = vpop.f32.mrb[4].mxu1 }
 0x606   :  { %v1092_v41 = vmul.f32 %v1003_v2, %v10285_v31  ;;  %v1005_v22 = vpop.f32.mrb[5].mxu1 }
 0x607   :  { %v1093_v20 = vmul.f32 %v1005_v22, %v10289_v32  ;;  %v1007_v56 = vpop.f32.mrb[6].mxu1 }
 0x608   :  { %v1008_v45 = vpop.f32.mrb[7].mxu1 }
 0x609   :  { %v1098_v5 = vadd.f32 %v1093_v20, %v1092_v41 }
 0x620   :  { %v1044_v15 = vpop.f32.mrb[8].mxu0  ;;  %v1085_v24 = vpop.f32.mrb[8].mxu1 }
 0x621   :  { %v1094_v43 = vmul.f32 %v1044_v15, %v10297_v16  ;;  %v1046_v19 = vpop.f32.mrb[9].mxu0  ;;  %v1087_v0 = vpop.f32.mrb[9].mxu1  ;;  %v1096_v59 = vmul.f32 %v1085_v24, %v10303_v58 }
 0x622   :  { %v1095_v28 = vmul.f32 %v1046_v19, %v10299_v57  ;;  %v1048_v60 = vpop.f32.mrb[10].mxu0  ;;  %v1097_v34 = vmul.f32 %v1087_v0, %v10301_v51  ;;  %v1089_v40 = vpop.f32.mrb[10].mxu1 }
 0x623   :  { %v1099_v44 = vadd.f32 %v1098_v5, %v1094_v43  ;;  %v1049_v47 = vpop.f32.mrb[11].mxu0  ;;  %v1090_v21 = vpop.f32.mrb[11].mxu1 }
 0x624   :  { %v1102_v39 = vsel %vm12439_vm12, %v1097_v34, 0.0 }
 0x625   :  { %v1100_v7 = vadd.f32 %v1099_v44, %v1095_v28 }
 0x627   :  { %v1101_v53 = vadd.f32 %v1100_v7, %v1096_v59 }
 0x629   :  { %v1103_v61 = vadd.f32 %v1102_v39, %v1101_v53 }
 0x62b   :  { %1104 = vadd.xlane.f32.xlu0 %v1103_v61 }
 0x6b8   :  { %v1105_v62 = vpop.xlane.xlu0 %1104 }
 0x6b9   :  { %v1106_v33 = vmul.f32 0.001953125, %v1105_v62 }
 0x6bb   :  { %v1107_v6 = vsub.f32 %v1003_v2, %v1106_v33  ;;  %v1108_v27 = vsub.f32 %v1005_v22, %v1106_v33  ;;  %v1109_v49 = vsub.f32 %v1044_v15, %v1106_v33  ;;  %v1110_v12 = vsub.f32 %v1046_v19, %v1106_v33 }
 0x6bc   :  { %v1112_v4 = vsub.f32 %v1087_v0, %v1106_v33  ;;  %v1111_v42 = vsub.f32 %v1085_v24, %v1106_v33  ;;  %v9965_v2 = vmov 3  }
 0x6bd   :  { %v1113_v37 = vmul.f32 %v1107_v6, %v10285_v31  ;;  %v1114_v23 = vmul.f32 %v1108_v27, %v10289_v32  ;;  %v1115_v8 = vmul.f32 %v1109_v49, %v10297_v16  ;;  %v1116_v9 = vmul.f32 %v1110_v12, %v10299_v57  ;;  %9136 = vset.pattern.permute.xlu1 %v9965_v2 }
 0x6be   :  { %v1118_v54 = vmul.f32 %v1112_v4, %v10301_v51  ;;  %v1117_v52 = vmul.f32 %v1111_v42, %v10303_v58 }
 0x6bf   :  { %v1119_v10 = vmul.f32 %v1113_v37, %v1113_v37  ;;  %v1120_v3 = vmul.f32 %v1114_v23, %v1114_v23  ;;  %v1121_v11 = vmul.f32 %v1115_v8, %v1115_v8  ;;  %v1122_v35 = vmul.f32 %v1116_v9, %v1116_v9 }
 0x6c0   :  { %v1124_v13 = vmul.f32 %v1118_v54, %v1118_v54  ;;  %v1123_v14 = vmul.f32 %v1117_v52, %v1117_v52 }
 0x6c1   :  { %v1125_v63 = vadd.f32 %v1120_v3, %v1119_v10 }
 0x6c2   :  { %v1129_v17 = vsel %vm12439_vm12, %v1124_v13, 0.0 }
 0x6c3   :  { %v1126_v50 = vadd.f32 %v1125_v63, %v1121_v11 }
 0x6c5   :  { %v1127_v48 = vadd.f32 %v1126_v50, %v1122_v35 }
 0x6c7   :  { %v1128_v1 = vadd.f32 %v1127_v48, %v1123_v14 }
 0x6c9   :  { %v1130_v55 = vadd.f32 %v1129_v17, %v1128_v1 }
 0x6cb   :  { %1131 = vadd.xlane.f32.xlu1 %v1130_v55 }
 0x6dc   :  { %1149 = vperm.xlu1 %9136, %v10320_v36  }
 0x6e0   :  { %9172 = vset.pattern.permute.xlu1 %v9958_v30 }
 0x758   :  { %v1132_v41 = vpop.xlane.xlu1 %1131 }
 0x759   :  { %v1133_v22 = vmul.f32 0.001953125, %v1132_v41 }
 0x75b   :  { %v1134_v20 = vadd.f32 1e-05, %v1133_v22 }
 0x75c   :  { %v1150_v15 = vpop.permute.xlu1 %1149 }
 0x75d   :  { %9911 = vrsqrt.f32 %v1134_v20 }
 0x767   :  { %v9912_v56 = vpop.eup %9911 }
 0x768   :  { %v1136_v45 = vmul.f32 %v9912_v56, %v10320_v36 }
 0x76a   :  { %1139 = vperm.xlu0 %9135, %v1136_v45  }
 0x76e   :  { %9173 = vset.pattern.permute.xlu0 %v9958_v30 }
 0x7e9   :  { %v1140_v5 = vpop.permute.xlu0 %1139 }
 0x7ea   :  { %v1142_v24 = vmul.f32 %v1140_v5, %v1113_v37  ;;  %v1143_v43 = vmul.f32 %v1140_v5, %v1114_v23  ;;  %v1144_v19 = vmul.f32 %v1140_v5, %v1115_v8  ;;  %v1145_v0 = vmul.f32 %v1140_v5, %v1116_v9 }
 0x7eb   :  { %v1146_v44 = vmul.f32 %v1140_v5, %v1117_v52  ;;  %v1147_v8 = vmul.f32 %v1140_v5, %v1118_v54 }
 0x7ec   :  { %v1152_v28 = vadd.f32 %v1150_v15, %v1142_v24  ;;  %v1153_v60 = vadd.f32 %v1150_v15, %v1143_v43  ;;  %v1154_v34 = vadd.f32 %v1150_v15, %v1144_v19  ;;  %v1155_v40 = vadd.f32 %v1150_v15, %v1145_v0 }
 0x7ed   :  { %v1156_v33 = vadd.f32 %v1150_v15, %v1146_v44  ;;  %v1157_v35 = vadd.f32 %v1150_v15, %v1147_v8  ;;  %v9251_v8 = vld [vmem:[%s10663_s4 + $0x64] ss:$8 sps:$4 sm:$0xff]  }
 0x7ee   :  { %v1158_v59 = vmax.f32 %v1152_v28, 0.0  ;;  %v1159_v47 = vmax.f32 %v1153_v60, 0.0  ;;  %v1160_v21 = vmax.f32 %v1154_v34, 0.0  ;;  %v1161_v7 = vmax.f32 %v1155_v40, 0.0 }
 0x7ef   :  { %v1162_v27 = vmax.f32 %v1156_v33, 0.0  ;;  %v1163_v48 = vmax.f32 %v1157_v35, 0.0  ;;  %v9239_v33 = vld [vmem:[%s10663_s4 + $0x24] ss:$8 sps:$4 sm:$0xff]   ;;  %v9258_v35 = vld [vmem:[%s10663_s4 + $0x90] ss:$8 sps:$4 sm:$0xff]  }
 0x7f0   :  { %v10600_v36 = vmul.f32 %v1158_v59, %v10285_v31  ;;  %v10603_v39 = vmul.f32 %v1159_v47, %v10289_v32  ;;  %v10608_v61 = vmul.f32 %v1160_v21, %v10297_v16  ;;  %v10611_v62 = vmul.f32 %v1161_v7, %v10299_v57  ;;  %v9231_v47 = vld [vmem:[%s10663_s4] ss:$8 sps:$4 sm:$0xff]   ;;  %v9233_v21 = vld [vmem:[%s10663_s4 + $0x4] ss:$8 sps:$4 sm:$0xff]   ;;  %v9236_v7 = vld [vmem:[%s10663_s4 + $0x14] ss:$8 sps:$4 sm:$0xff]  }
 0x7f1   :  { %v10618_v49 = vmul.f32 %v1162_v27, %v10303_v58  ;;  %v10634_v54 = vmul.f32 %v1163_v48, %v10301_v51  ;;  %1798 = vmatprep.subr.bf16.mxu0 %v9233_v21  ;;  %v9242_v27 = vld [vmem:[%s10663_s4 + $0x34] ss:$8 sps:$4 sm:$0xff]  }
 0x7f2   :  { %v9137_v53 = vpack.i.bf16 %v10603_v39, %v10600_v36  ;;  %v9142_v6 = vpack.i.bf16 %v10611_v62, %v10608_v61  ;;  %1799 = vmatpush1.bf16.msra.mxu0 %v9231_v47  ;;  %v9266_v48 = vld [vmem:[%s10663_s4 + $0xb4] ss:$8 sps:$4 sm:$0xff]  }
 0x7f3   :  { %1800 = vmatprep.subr.bf16.mxu0 %v9236_v7 }
 0x7f4   :  { %9138 = vrot.lane.b32.xlu1 %v9137_v53, %s9949_s6  ;;  %v9234_v53 = vld [vmem:[%s10663_s4 + $0x10] ss:$8 sps:$4 sm:$0xff]  }
 0x7f6   :  { %1801 = vmatpush1.bf16.msra.mxu0 %v9234_v53 }
 0x7f7   :  { %1802 = vmatprep.subr.bf16.mxu0 %v9239_v33 }
 0x7f8   :  { %9143 = vrot.lane.b32.xlu1 %v9142_v6, %s9949_s6  ;;  %v9237_v6 = vld [vmem:[%s10663_s4 + $0x20] ss:$8 sps:$4 sm:$0xff]  }
 0x7fa   :  { %1803 = vmatpush1.bf16.msra.mxu0 %v9237_v6 }
 0x7fb   :  { %1804 = vmatprep.subr.bf16.mxu0 %v9242_v27 }
 0x7fc   :  { %1184 = vrot.lane.b32.xlu1 %v10618_v49, %s9949_s6 }
 0x866   :  { %v9139_v12 = vpop.permute.xlu1 %9138 }
 0x867   :  { %v9140_v4 = vunpack.i.l.bf16 %v9139_v12  ;;  %v9141_v42 = vunpack.i.h.bf16 %v9139_v12  ;;  %v9240_v12 = vld [vmem:[%s10663_s4 + $0x30] ss:$8 sps:$4 sm:$0xff]  }
 0x868   :  { %1805 = vmatpush1.bf16.msra.mxu0 %v9240_v12 }
 0x869   :  { %v1199_v37 = vsel %vm12446_vm0, 0.0, %v9140_v4  ;;  %v1188_v10 = vsel %vm12446_vm0, %v9140_v4, %v9141_v42  ;;  %v9245_v4 = vld [vmem:[%s10663_s4 + $0x44] ss:$8 sps:$4 sm:$0xff]  }
 0x86a   :  { %v9144_v23 = vpop.permute.xlu1 %9143  ;;  %1203 = vrot.lane.b32.xlu0 %v1199_v37, %s9954_s11  ;;  %1806 = vmatprep.subr.bf16.mxu0 %v9245_v4 }
 0x86b   :  { %v9145_v9 = vunpack.i.l.bf16 %v9144_v23  ;;  %v9146_v3 = vunpack.i.h.bf16 %v9144_v23  ;;  %v9246_v23 = vld [vmem:[%s10663_s4 + $0x50] ss:$8 sps:$4 sm:$0xff]  }
 0x86d   :  { %v1189_v52 = vsel %vm12446_vm0, %v9141_v42, %v9145_v9  ;;  %v1190_v13 = vsel %vm12446_vm0, %v9145_v9, %v9146_v3  ;;  %v9243_v42 = vld [vmem:[%s10663_s4 + $0x40] ss:$8 sps:$4 sm:$0xff]  }
 0x86e   :  { %v1185_v11 = vpop.permute.xlu1 %1184  ;;  %v9147_v63 = vpack.i.bf16 %v1189_v52, %v1188_v10  ;;  %1807 = vmatpush1.bf16.msra.mxu0 %v9243_v42  ;;  %v9249_v9 = vld [vmem:[%s10663_s4 + $0x60] ss:$8 sps:$4 sm:$0xff]  }
 0x86f   :  { %v10627_v50 = vsel %vm12446_vm0, %v9146_v3, %v1185_v11  ;;  %v9252_v3 = vld [vmem:[%s10663_s4 + $0x70] ss:$8 sps:$4 sm:$0xff]  }
 0x870   :  { %9148 = vrot.lane.b32.xlu1 %v9147_v63, %s9954_s11  ;;  %v9152_v14 = vpack.i.bf16 %v10627_v50, %v1190_v13  ;;  %v9260_v63 = vld [vmem:[%s10663_s4 + $0x94] ss:$8 sps:$4 sm:$0xff]  }
 0x874   :  { %9153 = vrot.lane.b32.xlu1 %v9152_v14, %s9954_s11  ;;  %v9261_v14 = vld [vmem:[%s10663_s4 + $0xa0] ss:$8 sps:$4 sm:$0xff]  }
 0x878   :  { %1186 = vrot.lane.b32.xlu1 %v10634_v54, %s9949_s6 }
 0x8dc   :  { %v1204_v41 = vpop.permute.xlu0 %1203 }
 0x8e2   :  { %v9149_v1 = vpop.permute.xlu1 %9148 }
 0x8e3   :  { %v9151_v17 = vunpack.i.h.bf16 %v9149_v1  ;;  %v9150_v55 = vunpack.i.l.bf16 %v9149_v1  ;;  %v9264_v1 = vld [vmem:[%s10663_s4 + $0xb0] ss:$8 sps:$4 sm:$0xff]  }
 0x8e5   :  { %v1216_v20 = vsel %vm192_vm2, %v1204_v41, %v9150_v55  ;;  %v1217_v56 = vsel %vm192_vm2, %v9150_v55, %v9151_v17  ;;  %v9267_v55 = vld [vmem:[%s10663_s4 + $0xc0] ss:$8 sps:$4 sm:$0xff]   ;;  %v9272_v41 = vld [vmem:[%s10663_s4 + $0xd4] ss:$8 sps:$4 sm:$0xff]  }
 0x8e6   :  { %v10638_v22 = vpop.permute.xlu1 %9153  ;;  %v10648_v43 = vmax.f32 %v1199_v37, %v1216_v20  ;;  %v10650_v19 = vmax.f32 %v1188_v10, %v1217_v56  ;;  %v9248_v37 = vld [vmem:[%s10663_s4 + $0x54] ss:$8 sps:$4 sm:$0xff]   ;;  %v9270_v20 = vld [vmem:[%s10663_s4 + $0xd0] ss:$8 sps:$4 sm:$0xff]   ;;  %v9275_v56 = vld [vmem:[%s10663_s4 + $0xe4] ss:$8 sps:$4 sm:$0xff]  }
 0x8e7   :  { %v9156_v45 = vunpack.i.h.bf16 %v10638_v22  ;;  %v9155_v5 = vunpack.i.l.bf16 %v10638_v22  ;;  %1808 = vmatprep.subr.bf16.mxu0 %v9248_v37  ;;  %v9254_v10 = vld [vmem:[%s10663_s4 + $0x74] ss:$8 sps:$4 sm:$0xff]  }
 0x8e8   :  { %1809 = vmatpush1.bf16.msra.mxu0 %v9246_v23 }
 0x8e9   :  { %v1218_v15 = vsel %vm192_vm2, %v9151_v17, %v9155_v5  ;;  %v1219_v24 = vsel %vm192_vm2, %v9155_v5, %v9156_v45  ;;  %1810 = vmatprep.subr.bf16.mxu0 %v9251_v8  ;;  %v9269_v17 = vld [vmem:[%s10663_s4 + $0xc4] ss:$8 sps:$4 sm:$0xff]   ;;  %v9273_v5 = vld [vmem:[%s10663_s4 + $0xe0] ss:$8 sps:$4 sm:$0xff]  }
 0x8ea   :  { %v10652_v0 = vmax.f32 %v1189_v52, %v1218_v15  ;;  %v10654_v28 = vmax.f32 %v1190_v13, %v1219_v24  ;;  %v1187_v60 = vpop.permute.xlu1 %1186  ;;  %v9257_v52 = vld [vmem:[%s10663_s4 + $0x84] ss:$8 sps:$4 sm:$0xff]   ;;  %v9276_v15 = vld [vmem:[%s10663_s4 + $0xf0] ss:$8 sps:$4 sm:$0xff]   ;;  %v9278_v24 = vld [vmem:[%s10663_s4 + $0xf4] ss:$8 sps:$4 sm:$0xff]  }
 0x8eb   :  { %v1192_v44 = vsel %vm12446_vm0, %v1185_v11, %v1187_v60  ;;  %v9255_v11 = vld [vmem:[%s10663_s4 + $0x80] ss:$8 sps:$4 sm:$0xff]   ;;  %v9263_v13 = vld [vmem:[%s10663_s4 + $0xa4] ss:$8 sps:$4 sm:$0xff]   ;;  %vm2608_vm0 = vcmask 646144  }
 0x8ec   :  { %v9157_v34 = vpack.i.bf16 %v10652_v0, %v10650_v19  ;;  %v9162_v40 = vpack.i.bf16 %v10648_v43, %v10654_v28  ;;  %v10669_v59 = vsel %vm12445_vm1, %v1192_v44, 0.0  ;;  %1811 = vmatpush1.bf16.msra.mxu0 %v9249_v9  ;;  %vm2605_vm1 = vcmask 56320  }
 0x8ed   :  { %1812 = vmatprep.subr.bf16.mxu0 %v9254_v10  ;;  %v9281_v10 = vld [vmem:[%s10663_s4 + $0x104] ss:$8 sps:$4 sm:$0xff]  }
 0x8ee   :  { %9158 = vrot.lane.b32.xlu0 %v9157_v34, %s9955_s12  ;;  %9163 = vrot.lane.b32.xlu1 %v9162_v40, %s9955_s12 }
 0x8f0   :  { %1813 = vmatpush1.bf16.msra.mxu0 %v9252_v3 }
 0x8f1   :  { %1814 = vmatprep.subr.bf16.mxu0 %v9257_v52  ;;  %v9284_v52 = vld [vmem:[%s10663_s4 + $0x114] ss:$8 sps:$4 sm:$0xff]  }
 0x8f2   :  { %1213 = vrot.lane.b32.xlu0 %v10669_v59, %s9954_s11 }
 0x8f4   :  { %1815 = vmatpush1.bf16.msra.mxu0 %v9255_v11 }
 0x8f5   :  { %1816 = vmatprep.subr.bf16.mxu0 %v9260_v63 }
 0x8f8   :  { %1817 = vmatpush1.bf16.msra.mxu0 %v9258_v35 }
 0x8f9   :  { %1818 = vmatprep.subr.bf16.mxu0 %v9263_v13 }
 0x8fc   :  { %1819 = vmatpush1.bf16.msra.mxu0 %v9261_v14 }
 0x8fd   :  { %1820 = vmatprep.subr.bf16.mxu0 %v9266_v48  ;;  %v9282_v48 = vld [vmem:[%s10663_s4 + $0x110] ss:$8 sps:$4 sm:$0xff]  }
 0x900   :  { %1821 = vmatpush1.bf16.msra.mxu0 %v9264_v1 }
 0x901   :  { %1822 = vmatprep.subr.bf16.mxu0 %v9269_v17 }
 0x904   :  { %1823 = vmatpush1.bf16.msra.mxu0 %v9267_v55  ;;  %v9287_v55 = vld [vmem:[%s10663_s4 + $0x124] ss:$8 sps:$4 sm:$0xff]  }
 0x905   :  { %1824 = vmatprep.subr.bf16.mxu0 %v9272_v41 }
 0x908   :  { %1825 = vmatpush1.bf16.msra.mxu0 %v9270_v20 }
 0x909   :  { %1826 = vmatprep.subr.bf16.mxu0 %v9275_v56 }
 0x90c   :  { %1827 = vmatpush1.bf16.msra.mxu0 %v9273_v5  ;;  %v9285_v5 = vld [vmem:[%s10663_s4 + $0x120] ss:$8 sps:$4 sm:$0xff]  }
 0x90d   :  { %1828 = vmatprep.subr.bf16.mxu0 %v9278_v24  ;;  %v9288_v24 = vld [vmem:[%s10663_s4 + $0x130] ss:$8 sps:$4 sm:$0xff]  }
 0x910   :  { %1829 = vmatpush1.bf16.msra.mxu0 %v9276_v15  ;;  %v9290_v15 = vld [vmem:[%s10663_s4 + $0x134] ss:$8 sps:$4 sm:$0xff]  }
 0x911   :  { %1839 = vmatprep.subr.bf16.mxu0 %v9281_v10  ;;  %v9323_v10 = vld [vmem:[%s10663_s4 + $0x1e4] ss:$8 sps:$4 sm:$0xff]  }
 0x960   :  { %v9159_v60 = vpop.permute.xlu0 %9158  ;;  %v9164_v34 = vpop.permute.xlu1 %9163 }
 0x961   :  { %v9161_v40 = vunpack.i.h.bf16 %v9159_v60  ;;  %v9160_v44 = vunpack.i.l.bf16 %v9159_v60  ;;  %v9166_v47 = vunpack.i.h.bf16 %v9164_v34  ;;  %v9165_v21 = vunpack.i.l.bf16 %v9164_v34  ;;  %v9293_v60 = vld [vmem:[%s10663_s4 + $0x144] ss:$8 sps:$4 sm:$0xff]   ;;  %v9291_v34 = vld [vmem:[%s10663_s4 + $0x140] ss:$8 sps:$4 sm:$0xff]  }
 0x963   :  { %v1253_v7 = vsel %vm12444_vm5, %v9160_v44, %v9161_v40  ;;  %v1252_v53 = vsel %vm12444_vm5, %v9166_v47, %v9160_v44  ;;  %v1254_v33 = vsel %vm12444_vm5, %v9161_v40, %v9165_v21  ;;  %v9296_v40 = vld [vmem:[%s10663_s4 + $0x154] ss:$8 sps:$4 sm:$0xff]   ;;  %v9294_v44 = vld [vmem:[%s10663_s4 + $0x150] ss:$8 sps:$4 sm:$0xff]   ;;  %v9299_v47 = vld [vmem:[%s10663_s4 + $0x164] ss:$8 sps:$4 sm:$0xff]  }
 0x964   :  { %v1214_v6 = vpop.permute.xlu0 %1213  ;;  %v1264_v27 = vmax.f32 %v10650_v19, %v1253_v7  ;;  %v1265_v12 = vmax.f32 %v10652_v0, %v1254_v33  ;;  %v1263_v42 = vmax.f32 %v10648_v43, %v1252_v53  ;;  %v9279_v43 = vld [vmem:[%s10663_s4 + $0x100] ss:$8 sps:$4 sm:$0xff]   ;;  %v9302_v7 = vld [vmem:[%s10663_s4 + $0x174] ss:$8 sps:$4 sm:$0xff]   ;;  %v9300_v53 = vld [vmem:[%s10663_s4 + $0x170] ss:$8 sps:$4 sm:$0xff]  }
 0x965   :  { %v1220_v4 = vsel %vm192_vm2, %v9156_v45, %v1214_v6  ;;  %v1232_v23 = vmax.f32 %v10669_v59, %v1214_v6  ;;  %v9305_v33 = vld [vmem:[%s10663_s4 + $0x184] ss:$8 sps:$4 sm:$0xff]   ;;  %v9303_v6 = vld [vmem:[%s10663_s4 + $0x180] ss:$8 sps:$4 sm:$0xff]  }
 0x966   :  { %v1231_v37 = vmax.f32 %v10627_v50, %v1220_v4  ;;  %v1270_v8 = vpack.c.bf16 %v1264_v27, %v1264_v27  ;;  %v1271_v9 = vpack.c.bf16 %v1265_v12, %v1265_v12  ;;  %v1269_v0 = vpack.c.bf16 %v1263_v42, %v1263_v42  ;;  %v9308_v27 = vld [vmem:[%s10663_s4 + $0x194] ss:$8 sps:$4 sm:$0xff]   ;;  %v9306_v12 = vld [vmem:[%s10663_s4 + $0x190] ss:$8 sps:$4 sm:$0xff]   ;;  %v9311_v4 = vld [vmem:[%s10663_s4 + $0x1a4] ss:$8 sps:$4 sm:$0xff]  }
 0x967   :  { %v9309_v42 = vld [vmem:[%s10663_s4 + $0x1a0] ss:$8 sps:$4 sm:$0xff]  }
 0x968   :  { %1364 = vrot.lane.b32.xlu1 %v1270_v8, %s9951_s8  ;;  %1366 = vrot.lane.b32.xlu0 %v1271_v9, %s9951_s8  ;;  %v9167_v19 = vpack.i.bf16 %v1232_v23, %v1231_v37  ;;  %v9317_v8 = vld [vmem:[%s10663_s4 + $0x1c4] ss:$8 sps:$4 sm:$0xff]   ;;  %v9315_v9 = vld [vmem:[%s10663_s4 + $0x1c0] ss:$8 sps:$4 sm:$0xff]  }
 0x96c   :  { %9168 = vrot.lane.b32.xlu1 %v9167_v19, %s9955_s12  ;;  %1362 = vrot.lane.b32.xlu0 %v1269_v0, %s9951_s8  ;;  %v9320_v19 = vld [vmem:[%s10663_s4 + $0x1d4] ss:$8 sps:$4 sm:$0xff]   ;;  %v9318_v0 = vld [vmem:[%s10663_s4 + $0x1d0] ss:$8 sps:$4 sm:$0xff]  }
 0x9da   :  { %v1365_v50 = vpop.permute.xlu1 %1364  ;;  %v10721_v22 = vpop.permute.xlu0 %1366 }
 0x9db   :  { %v1375_v45 = vsel %vm12443_vm6, %v1365_v50, %v10721_v22 }
 0x9dc   :  { %1830 = vmatprep.mubr.bf16.mxu0 %v1375_v45  ;;  %v9326_v45 = vld [vmem:[%s10663_s4 + $0x1f4] ss:$8 sps:$4 sm:$0xff]  }
 0x9de   :  { %v9169_v59 = vpop.permute.xlu1 %9168  ;;  %v1363_v3 = vpop.permute.xlu0 %1362 }
 0x9df   :  { %v9171_v11 = vunpack.i.h.bf16 %v9169_v59  ;;  %v9170_v63 = vunpack.i.l.bf16 %v9169_v59  ;;  %v1374_v35 = vsel %vm12443_vm6, %v1363_v3, %v1365_v50  ;;  %v9321_v50 = vld [vmem:[%s10663_s4 + $0x1e0] ss:$8 sps:$4 sm:$0xff]   ;;  %v9329_v59 = vld [vmem:[%s10663_s4 + $0x204] ss:$8 sps:$4 sm:$0xff]  }
 0x9e0   :  { %1831 = vmatmul.mubr.bf16.vlgmr.msra.gmra.mrb[12].mxu0 %v1374_v35 }
 0x9e1   :  { %v1255_v13 = vsel %vm12444_vm5, %v9165_v21, %v9170_v63  ;;  %v1256_v14 = vsel %vm12444_vm5, %v9170_v63, %v9171_v11  ;;  %1840 = vmatpush1.bf16.msra.mxu0 %v9279_v43  ;;  %v1268_v41 = vmax.f32 %v1232_v23, %v9171_v11  ;;  %v9297_v21 = vld [vmem:[%s10663_s4 + $0x160] ss:$8 sps:$4 sm:$0xff]   ;;  %v9312_v23 = vld [vmem:[%s10663_s4 + $0x1b0] ss:$8 sps:$4 sm:$0xff]   ;;  %vm2250_vm5 = vcmask 130048  }
 0x9e2   :  { %v1266_v1 = vmax.f32 %v10654_v28, %v1255_v13  ;;  %v1267_v17 = vmax.f32 %v1231_v37, %v1256_v14  ;;  %1841 = vmatprep.subr.bf16.mxu0 %v9284_v52  ;;  %v9314_v37 = vld [vmem:[%s10663_s4 + $0x1b4] ss:$8 sps:$4 sm:$0xff]   ;;  %v9324_v43 = vld [vmem:[%s10663_s4 + $0x1f0] ss:$8 sps:$4 sm:$0xff]   ;;  %v9327_v11 = vld [vmem:[%s10663_s4 + $0x200] ss:$8 sps:$4 sm:$0xff]  }
 0x9e3   :  { %v1274_v28 = vpack.c.bf16 %v1268_v41, %v1268_v41  ;;  %v9332_v13 = vld [vmem:[%s10663_s4 + $0x214] ss:$8 sps:$4 sm:$0xff]   ;;  %v9341_v41 = vld [vmem:[%s10663_s4 + $0x244] ss:$8 sps:$4 sm:$0xff]  }
 0x9e4   :  { %v1272_v20 = vpack.c.bf16 %v1266_v1, %v1266_v1  ;;  %v1273_v56 = vpack.c.bf16 %v1267_v17, %v1267_v17  ;;  %v9335_v1 = vld [vmem:[%s10663_s4 + $0x224] ss:$8 sps:$4 sm:$0xff]   ;;  %v9333_v17 = vld [vmem:[%s10663_s4 + $0x220] ss:$8 sps:$4 sm:$0xff]  }
 0x9e5   :  { %1842 = vmatpush1.bf16.msra.mxu0 %v9282_v48  ;;  %v9330_v48 = vld [vmem:[%s10663_s4 + $0x210] ss:$8 sps:$4 sm:$0xff]  }
 0x9e6   :  { %1368 = vrot.lane.b32.xlu1 %v1272_v20, %s9951_s8  ;;  %1370 = vrot.lane.b32.xlu0 %v1273_v56, %s9951_s8  ;;  %v9339_v20 = vld [vmem:[%s10663_s4 + $0x240] ss:$8 sps:$4 sm:$0xff]   ;;  %v9344_v56 = vld [vmem:[%s10663_s4 + $0x254] ss:$8 sps:$4 sm:$0xff]  }
 0x9e7   :  { %1843 = vmatprep.subr.bf16.mxu0 %v9287_v55  ;;  %v9336_v55 = vld [vmem:[%s10663_s4 + $0x230] ss:$8 sps:$4 sm:$0xff]  }
 0x9e9   :  { %1844 = vmatpush1.bf16.msra.mxu0 %v9285_v5  ;;  %v9342_v5 = vld [vmem:[%s10663_s4 + $0x250] ss:$8 sps:$4 sm:$0xff]  }
 0x9ea   :  { %1372 = vrot.lane.b32.xlu1 %v1274_v28, %s9951_s8  ;;  %1845 = vmatprep.subr.bf16.mxu0 %v9290_v15  ;;  %v9347_v15 = vld [vmem:[%s10663_s4 + $0x264] ss:$8 sps:$4 sm:$0xff]   ;;  %v9345_v28 = vld [vmem:[%s10663_s4 + $0x260] ss:$8 sps:$4 sm:$0xff]  }
 0x9ed   :  { %1846 = vmatpush1.bf16.msra.mxu0 %v9288_v24  ;;  %v9350_v24 = vld [vmem:[%s10663_s4 + $0x274] ss:$8 sps:$4 sm:$0xff]  }
 0x9ee   :  { %1847 = vmatprep.subr.bf16.mxu0 %v9293_v60  ;;  %v1355_v60 = vld [vmem:[%s10663_s4 + $0x280] sm:$0xff] }
 0x9f1   :  { %1848 = vmatpush1.bf16.msra.mxu0 %v9291_v34  ;;  %v9348_v34 = vld [vmem:[%s10663_s4 + $0x270] ss:$8 sps:$4 sm:$0xff]  }
 0x9f2   :  { %1849 = vmatprep.subr.bf16.mxu0 %v9296_v40  ;;  %v8237_v40 = vcombine.high %v1355_v60, %v1355_v60 }
 0x9f5   :  { %1850 = vmatpush1.bf16.msra.mxu0 %v9294_v44  ;;  %v8236_v44 = vcombine.low %v1355_v60, %v1355_v60 }
 0x9f6   :  { %1851 = vmatprep.subr.bf16.mxu0 %v9299_v47 }
 0x9f7   :  { %v1793_v47 = vsel %vm324_vm3, %v8236_v44, 0 }
 0x9f9   :  { %1852 = vmatpush1.bf16.msra.mxu0 %v9297_v21 }
 0x9fa   :  { %1853 = vmatprep.subr.bf16.mxu0 %v9302_v7 }
 0x9fd   :  { %1854 = vmatpush1.bf16.msra.mxu0 %v9300_v53 }
 0x9fe   :  { %1855 = vmatprep.subr.bf16.mxu0 %v9305_v33 }
 0xa01   :  { %1856 = vmatpush1.bf16.msra.mxu0 %v9303_v6 }
 0xa02   :  { %1857 = vmatprep.subr.bf16.mxu0 %v9308_v27 }
 0xa05   :  { %1858 = vmatpush1.bf16.msra.mxu0 %v9306_v12 }
 0xa06   :  { %1859 = vmatprep.subr.bf16.mxu0 %v9311_v4 }
 0xa09   :  { %1860 = vmatpush1.bf16.msra.mxu0 %v9309_v42 }
 0xa0a   :  { %1861 = vmatprep.subr.bf16.mxu0 %v9314_v37 }
 0xa0d   :  { %1862 = vmatpush1.bf16.msra.mxu0 %v9312_v23 }
 0xa0e   :  { %1863 = vmatprep.subr.bf16.mxu0 %v9317_v8 }
 0xa11   :  { %1864 = vmatpush1.bf16.msra.mxu0 %v9315_v9 }
 0xa12   :  { %1865 = vmatprep.subr.bf16.mxu0 %v9320_v19 }
 0xa15   :  { %1866 = vmatpush1.bf16.msra.mxu0 %v9318_v0 }
 0xa16   :  { %1867 = vmatprep.subr.bf16.mxu0 %v9323_v10 }
 0xa19   :  { %1868 = vmatpush1.bf16.msra.mxu0 %v9321_v50 }
 0xa1a   :  { %1869 = vmatprep.subr.bf16.mxu0 %v9326_v45 }
 0xa1d   :  { %1870 = vmatpush1.bf16.msra.mxu0 %v9324_v43 }
 0xa1e   :  { %1880 = vmatprep.subr.bf16.mxu0 %v9329_v59 }
 0xa58   :  { %v1369_v3 = vpop.permute.xlu1 %1368  ;;  %v1371_v52 = vpop.permute.xlu0 %1370 }
 0xa59   :  { %v1377_v63 = vsel %vm12443_vm6, %v1369_v3, %v1371_v52  ;;  %v1376_v35 = vsel %vm12443_vm6, %v10721_v22, %v1369_v3  ;;  %v9338_v22 = vld [vmem:[%s10663_s4 + $0x234] ss:$8 sps:$4 sm:$0xff]   ;;  %s10900_s4 = sld [smem:[%s12438_s0 + %s9975_s1]]   ;;  %s9981_s1 = smov 14  }
 0xa5a   :  { %1871 = vmatprep.mubr.bf16.mxu0 %v1377_v63 }
 0xa5b   :  { %1872 = vmatmul.mubr.bf16.vlgmr.msra.gmra.mrb[12].mxu0 %v1376_v35 }
 0xa5c   :  { %1881 = vmatpush1.bf16.msra.mxu0 %v9327_v11  ;;  %v1373_v14 = vpop.permute.xlu1 %1372 }
 0xa5d   :  { %8239 = vmatprep.mubr.msk.bf16.mxu0 %vm12439_vm12, %v1373_v14  ;;  %1882 = vmatprep.subr.bf16.mxu0 %v9332_v13  ;;  %v1378_v21 = vsel %vm12443_vm6, %v1371_v52, %v1373_v14  ;;  %vm1963_vm12 = vcmask 957440   ;;  %vm10881_vm6 = vmneg %vm1931_vm13 }
 0xa60   :  { %1883 = vmatpush1.bf16.msra.mxu0 %v9330_v48 }
 0xa61   :  { %1884 = vmatprep.subr.bf16.mxu0 %v9335_v1 }
 0xa64   :  { %1885 = vmatpush1.bf16.msra.mxu0 %v9333_v17 }
 0xa65   :  { %1886 = vmatprep.subr.bf16.mxu0 %v9338_v22 }
 0xa68   :  { %1887 = vmatpush1.bf16.msra.mxu0 %v9336_v55 }
 0xa69   :  { %1888 = vmatprep.subr.bf16.mxu0 %v9341_v41 }
 0xa6c   :  { %1889 = vmatpush1.bf16.msra.mxu0 %v9339_v20 }
 0xa6d   :  { %1890 = vmatprep.subr.bf16.mxu0 %v9344_v56 }
 0xa70   :  { %1891 = vmatpush1.bf16.msra.mxu0 %v9342_v5 }
 0xa71   :  { %1892 = vmatprep.subr.bf16.mxu0 %v9347_v15 }
 0xa74   :  { %1893 = vmatpush1.bf16.msra.mxu0 %v9345_v28 }
 0xa75   :  { %1894 = vmatprep.subr.bf16.mxu0 %v9350_v24 }
 0xa78   :  { %1895 = vmatpush1.bf16.msra.mxu0 %v9348_v34 }
 0xa79   :  { %8238 = vmatprep.subr.msk.bf16.mxu0 %vm324_vm3, %v8237_v40 }
 0xa7c   :  { %1897 = vmatpush1.bf16.msra.mxu0 %v1793_v47 }
 0xa7f   :  { %1913 = vmatmul.mubr.bf16.vlgmr.msra.gmra.mrb[12].mxu0 %v1378_v21 }
 0xb52   :  { %v1914_v7 = vpop.f32.mrb[12].mxu0 }
 0xb53   :  { %v1923_v53 = vpack.c.bf16 %v1914_v7, %v1914_v7  ;;  %v1916_v33 = vpop.f32.mrb[13].mxu0 }
 0xb54   :  { %v1924_v6 = vpack.c.bf16 %v1916_v33, %v1916_v33  ;;  %v1918_v27 = vpop.f32.mrb[14].mxu0  ;;  %v9353_v33 = vld [vmem:[%s10804_s18] sm:$0xff]   ;;  %s9984_s18 = smov 3  }
 0xb55   :  { %1927 = vrot.lane.b32.xlu0 %v1923_v53, %s9967_s5  ;;  %v1919_v12 = vpop.f32.mrb[15].mxu0 }
 0xb56   :  { %1929 = vrot.lane.b32.xlu1 %v1924_v6, %s9967_s5  ;;  %v126_v6 = vld [vmem:[%s8116_s26] sm:$0x3]  ;;  %s8117_s26 = sld [smem:[%s12438_s0 + %s9984_s18]]  }
 0xb57   :  { %v10839_v27 = vrot.slane %v126_v6, %v572_v29  ;;  %v10842_v12 = vrot.slane %v126_v6, %v10281_v26  ;;  %s11226_s18 = sld [smem:[%s12438_s0 + %s9991_s3]]  }
 0xbc7   :  { %v1928_v4 = vpop.permute.xlu0 %1927 }
 0xbc8   :  { %v1935_v42 = vsel %vm1931_vm13, 0, %v1928_v4  ;;  %v1930_v37 = vpop.permute.xlu1 %1929 }
 0xbc9   :  { %v1932_v23 = vsel %vm1931_vm13, %v1928_v4, %v1930_v37  ;;  %1948 = vrot.lane.b32.xlu0 %v1935_v42, %s9950_s7  ;;  %v1941_v9 = vrot.slane %v1935_v42, 4 }
 0xbca   :  { %v1938_v8 = vsel %vm1936_vm14, %v1932_v23, 0 }
 0xbcb   :  { %1950 = vrot.lane.b32.xlu1 %v1938_v8, %s9950_s7  ;;  %v1942_v19 = vrot.slane %v1938_v8, 4 }
 0xbcd   :  { %1959 = vrot.lane.b32.xlu0 %v1935_v42, %s9968_s15 }
 0xbcf   :  { %1961 = vrot.lane.b32.xlu1 %v1938_v8, %s9968_s15 }
 0xbd1   :  { %1971 = vrot.lane.b32.xlu0 %v1935_v42, %s9956_s13 }
 0xbd3   :  { %1973 = vrot.lane.b32.xlu1 %v1938_v8, %s9956_s13 }
 0xbd5   :  { %1943 = vrot.lane.b32.xlu0 %v1941_v9, %s9954_s11 }
 0xbd7   :  { %1945 = vrot.lane.b32.xlu1 %v1942_v19, %s9954_s11 }
 0xbd9   :  { %1953 = vrot.lane.b32.xlu0 %v1941_v9, %s9969_s19 }
 0xbdb   :  { %1955 = vrot.lane.b32.xlu1 %v1942_v19, %s9969_s19 }
 0xbdd   :  { %1965 = vrot.lane.b32.xlu0 %v1941_v9, %s9970_s20 }
 0xbdf   :  { %1967 = vrot.lane.b32.xlu1 %v1942_v19, %s9970_s20 }
 0xbe1   :  { %1976 = vrot.lane.b32.xlu0 %v1941_v9, %s9971_s21 }
 0xbe3   :  { %1978 = vrot.lane.b32.xlu1 %v1942_v19, %s9971_s21 }
 0xbe5   :  { %1982 = vrot.lane.b32.xlu0 %v1935_v42, %s9972_s22 }
 0xbe7   :  { %1984 = vrot.lane.b32.xlu1 %v1938_v8, %s9972_s22 }
 0xc3b   :  { %v1949_v0 = vpop.permute.xlu0 %1948 }
 0xc3d   :  { %v1951_v10 = vpop.permute.xlu1 %1950 }
 0xc3e   :  { %v1952_v48 = vsel %vm210_vm4, %v1949_v0, %v1951_v10 }
 0xc3f   :  { %v1960_v50 = vpop.permute.xlu0 %1959 }
 0xc41   :  { %v1962_v45 = vpop.permute.xlu1 %1961 }
 0xc42   :  { %v1964_v20 = vsel %vm1963_vm12, %v1960_v50, %v1962_v45 }
 0xc43   :  { %v1972_v43 = vpop.permute.xlu0 %1971 }
 0xc45   :  { %v1974_v59 = vpop.permute.xlu1 %1973 }
 0xc46   :  { %v1975_v60 = vsel %vm264_vm7, %v1972_v43, %v1974_v59 }
 0xc47   :  { %v1944_v3 = vpop.permute.xlu0 %1943 }
 0xc49   :  { %v1946_v52 = vpop.permute.xlu1 %1945 }
 0xc4a   :  { %v1947_v11 = vsel %vm192_vm2, %v1944_v3, %v1946_v52  ;;  %v1992_v63 = vsel %vm324_vm3, %v1938_v8, %v1946_v52 }
 0xc4b   :  { %v1954_v35 = vpop.permute.xlu0 %1953  ;;  %2034 = vmatprep.subr.bf16.mxu1 %v1992_v63  ;;  %v1989_v13 = vsel %vm324_vm3, %v1935_v42, %v1947_v11 }
 0xc4c   :  { %2035 = vmatpush1.bf16.msra.mxu1 %v1989_v13 }
 0xc4d   :  { %v1956_v14 = vpop.permute.xlu1 %1955 }
 0xc4e   :  { %v1958_v1 = vsel %vm1957_vm15, %v1954_v35, %v1956_v14  ;;  %v2000_v17 = vsel %vm324_vm3, %v1951_v10, %v1956_v14 }
 0xc4f   :  { %v1966_v22 = vpop.permute.xlu0 %1965  ;;  %2036 = vmatprep.subr.bf16.mxu1 %v2000_v17  ;;  %v1996_v55 = vsel %vm324_vm3, %v1952_v48, %v1958_v1 }
 0xc50   :  { %2037 = vmatpush1.bf16.msra.mxu1 %v1996_v55 }
 0xc51   :  { %v1968_v41 = vpop.permute.xlu1 %1967 }
 0xc52   :  { %v1970_v56 = vsel %vm1969_vm10, %v1966_v22, %v1968_v41  ;;  %v2008_v5 = vsel %vm324_vm3, %v1962_v45, %v1968_v41 }
 0xc53   :  { %v1977_v15 = vpop.permute.xlu0 %1976  ;;  %2038 = vmatprep.subr.bf16.mxu1 %v2008_v5  ;;  %v2004_v28 = vsel %vm324_vm3, %v1964_v20, %v1970_v56 }
 0xc54   :  { %2039 = vmatpush1.bf16.msra.mxu1 %v2004_v28 }
 0xc55   :  { %v1979_v24 = vpop.permute.xlu1 %1978 }
 0xc56   :  { %v1981_v34 = vsel %vm1980_vm9, %v1977_v15, %v1979_v24  ;;  %v2016_v40 = vsel %vm324_vm3, %v1974_v59, %v1979_v24 }
 0xc57   :  { %2040 = vmatprep.subr.bf16.mxu1 %v2016_v40  ;;  %v2012_v44 = vsel %vm324_vm3, %v1975_v60, %v1981_v34  ;;  %v1983_v47 = vpop.permute.xlu0 %1982 }
 0xc58   :  { %2041 = vmatpush1.bf16.msra.mxu1 %v2012_v44 }
 0xc59   :  { %v1985_v21 = vpop.permute.xlu1 %1984 }
 0xc5a   :  { %v1987_v7 = vsel %vm1986_vm8, %v1983_v47, %v1985_v21  ;;  %8241 = vmatprep.subr.msk.bf16.mxu1 %vm324_vm3, %v1985_v21  ;;  %v10859_v21 = vld [vmem:[%s8127_s30] sm:$0xff] }
 0xc5b   :  { %v2029_v53 = vsel %vm324_vm3, %v1987_v7, 0 }
 0xc5c   :  { %2043 = vmatpush1.bf16.msra.mxu1 %v2029_v53 }
 0xc5f   :  { %8242 = vmatmul.mubr.msk.bf16.vlgmr.msra.gmra.mrb[12].mxu1 %vm420_vm11, %v9353_v33  ;;  %v10862_v33 = vld [vmem:[%s8127_s30 + $0x8] sm:$0xff]  ;;  %s9980_s30 = smov 120  }
 0xd32   :  { %v2068_v4 = vpop.f32.mrb[12].mxu1 }
 0xd33   :  { %v2070_v42 = vpop.f32.mrb[13].mxu1  ;;  %v2088_v8 = vmul.f32 %v10842_v12, %v2068_v4 }
 0xd34   :  { %v2089_v37 = vmul.f32 %v10839_v27, %v2070_v42  ;;  %v2072_v23 = vpop.f32.mrb[14].mxu1 }
 0xd35   :  { %v2074_v9 = vpop.f32.mrb[15].mxu1  ;;  %v2090_v10 = vmul.f32 %v10842_v12, %v2072_v23 }
 0xd36   :  { %v2092_v19 = vsel %vm420_vm11, %v2089_v37, 0.0  ;;  %v2091_v0 = vmul.f32 %v10839_v27, %v2074_v9 }
 0xd37   :  { %v2093_v50 = vadd.f32 %v2092_v19, %v2088_v8 }
 0xd38   :  { %v2096_v29 = vsel %vm420_vm11, %v2091_v0, 0.0 }
 0xd39   :  { %2094 = vadd.xlane.f32.xlu0 %v2093_v50  ;;  %v2097_v45 = vadd.f32 %v2096_v29, %v2090_v10 }
 0xd3b   :  { %2098 = vadd.xlane.f32.xlu1 %v2097_v45 }
 0xdc6   :  { %v2095_v43 = vpop.xlane.xlu0 %2094 }
 0xdc7   :  { %v2100_v59 = vmul.f32 0.0078125, %v2095_v43 }
 0xdc8   :  { %v2099_v3 = vpop.xlane.xlu1 %2098 }
 0xdc9   :  { %v2102_v52 = vsub.f32 %v2068_v4, %v2100_v59  ;;  %v2103_v11 = vsub.f32 %v2070_v42, %v2100_v59  ;;  %v2101_v63 = vmul.f32 0.0078125, %v2099_v3 }
 0xdcb   :  { %v2106_v35 = vmul.f32 %v2102_v52, %v10842_v12  ;;  %v2107_v13 = vmul.f32 %v2103_v11, %v10839_v27  ;;  %v2104_v14 = vsub.f32 %v2072_v23, %v2101_v63  ;;  %v2105_v48 = vsub.f32 %v2074_v9, %v2101_v63 }
 0xdcd   :  { %v2108_v1 = vmul.f32 %v2104_v14, %v10842_v12  ;;  %v2109_v17 = vmul.f32 %v2105_v48, %v10839_v27  ;;  %v2110_v22 = vmul.f32 %v2106_v35, %v2106_v35  ;;  %v2111_v55 = vmul.f32 %v2107_v13, %v2107_v13 }
 0xdcf   :  { %v2114_v41 = vsel %vm420_vm11, %v2111_v55, 0.0  ;;  %v2113_v20 = vmul.f32 %v2109_v17, %v2109_v17  ;;  %v2112_v5 = vmul.f32 %v2108_v1, %v2108_v1 }
 0xdd0   :  { %v2115_v56 = vadd.f32 %v2114_v41, %v2110_v22 }
 0xdd1   :  { %v2118_v15 = vsel %vm420_vm11, %v2113_v20, 0.0 }
 0xdd2   :  { %2116 = vadd.xlane.f32.xlu0 %v2115_v56  ;;  %v2119_v28 = vadd.f32 %v2118_v15, %v2112_v5  ;;  %v9354_v5 = vld [vmem:[%s10900_s4 + $0x4] ss:$8 sps:$4 sm:$0xff]  }
 0xdd3   :  { %8248 = vmatprep.mubr.msk.bf16.mxu1 %vm2250_vm5, %v9354_v5 }
 0xdd6   :  { %2120 = vadd.xlane.f32.xlu0 %v2119_v28 }
 0xe5f   :  { %v2117_v24 = vpop.xlane.xlu0 %2116 }
 0xe60   :  { %v2122_v60 = vmul.f32 0.0078125, %v2117_v24 }
 0xe62   :  { %v2124_v34 = vadd.f32 1e-05, %v2122_v60 }
 0xe63   :  { %v2121_v40 = vpop.xlane.xlu0 %2120 }
 0xe64   :  { %9913 = vrsqrt.f32 %v2124_v34  ;;  %v2123_v44 = vmul.f32 0.0078125, %v2121_v40 }
 0xe66   :  { %v2125_v47 = vadd.f32 1e-05, %v2123_v44 }
 0xe68   :  { %9915 = vrsqrt.f32 %v2125_v47 }
 0xe6e   :  { %v9914_v7 = vpop.eup %9913 }
 0xe6f   :  { %v2128_v53 = vmul.f32 %v9914_v7, %v10859_v21 }
 0xe71   :  { %2132 = vperm.xlu1 %9172, %v2128_v53  }
 0xe72   :  { %v9916_v6 = vpop.eup %9915 }
 0xe73   :  { %v2129_v4 = vmul.f32 %v9916_v6, %v10862_v33 }
 0xe75   :  { %9174 = vset.pattern.permute.xlu1 %v9962_v38  ;;  %2137 = vperm.xlu0 %9173, %v2129_v4  }
 0xe76   :  { %2146 = vperm.xlu1 %9174, %v10859_v21  }
 0xe79   :  { %9176 = vset.pattern.permute.xlu0 %v9964_v18 }
 0xe7a   :  { %2151 = vperm.xlu1 %9174, %v10862_v33  }
 0xe7e   :  { %9175 = vset.pattern.permute.xlu1 %v9964_v18 }
 0xef0   :  { %v2133_v42 = vpop.permute.xlu1 %2132 }
 0xef1   :  { %v2140_v37 = vmul.f32 %v2133_v42, %v2106_v35  ;;  %v2141_v19 = vmul.f32 %v2133_v42, %v2107_v13 }
 0xef4   :  { %v2138_v23 = vpop.permute.xlu0 %2137 }
 0xef5   :  { %v2147_v8 = vpop.permute.xlu1 %2146  ;;  %v2142_v0 = vmul.f32 %v2138_v23, %v2108_v1  ;;  %v2143_v10 = vmul.f32 %v2138_v23, %v2109_v17 }
 0xef6   :  { %v2154_v9 = vadd.f32 %v2147_v8, %v2140_v37  ;;  %v2155_v29 = vadd.f32 %v2147_v8, %v2141_v19 }
 0xef8   :  { %v2158_v45 = vmax.f32 %v2154_v9, 0.0  ;;  %v2159_v11 = vmax.f32 %v2155_v29, 0.0 }
 0xef9   :  { %v2152_v50 = vpop.permute.xlu1 %2151 }
 0xefa   :  { %v2156_v43 = vadd.f32 %v2152_v50, %v2142_v0  ;;  %v2157_v59 = vadd.f32 %v2152_v50, %v2143_v10  ;;  %v2162_v63 = vmul.f32 %v2158_v45, %v10842_v12  ;;  %v2163_v22 = vmul.f32 %v2159_v11, %v10839_v27 }
 0xefc   :  { %v2160_v3 = vmax.f32 %v2156_v43, 0.0  ;;  %v2161_v52 = vmax.f32 %v2157_v59, 0.0  ;;  %v9356_v59 = vld [vmem:[%s10900_s4] ss:$8 sps:$4 sm:$0xff]   ;;  %s11034_s4 = sld [smem:[%s12438_s0 + %s9981_s1]]   ;;  %s9985_s1 = smov 16  }
 0xefe   :  { %v2164_v14 = vmul.f32 %v2160_v3, %v10842_v12  ;;  %v2165_v35 = vmul.f32 %v2161_v52, %v10839_v27 }
 0xf00   :  { %v2166_v48 = vpack.c.bf16 %v2164_v14, %v2162_v63  ;;  %v2167_v13 = vpack.c.bf16 %v2165_v35, %v2163_v22 }
 0xf02   :  { %2170 = vrot.lane.b32.xlu1 %v2166_v48, %s9967_s5 }
 0xf06   :  { %2172 = vrot.lane.b32.xlu1 %v2167_v13, %s9967_s5 }
 0xf74   :  { %v2171_v1 = vpop.permute.xlu1 %2170 }
 0xf75   :  { %v2176_v17 = vsel %vm1931_vm13, 0, %v2171_v1 }
 0xf76   :  { %2197 = vrot.lane.b32.xlu0 %v2176_v17, %s9969_s19  ;;  %2183 = vrot.lane.b32.xlu1 %v2176_v17, %s9954_s11 }
 0xf78   :  { %v2173_v55 = vpop.permute.xlu1 %2172 }
 0xf79   :  { %v2174_v41 = vsel %vm1931_vm13, %v2171_v1, %v2173_v55 }
 0xf7a   :  { %2204 = vrot.lane.b32.xlu0 %v2176_v17, %s9968_s15  ;;  %2190 = vrot.lane.b32.xlu1 %v2176_v17, %s9950_s7  ;;  %v2179_v56 = vsel %vm1936_vm14, %v2174_v41, 0 }
 0xf7b   :  { %8245 = vmatprep.subr.msk.bf16.mxu1 %vm1936_vm14, %v2174_v41 }
 0xf7c   :  { %8247 = vmatpush1.bf16.msk.msra.mxu1 %vm10881_vm6, %v2171_v1 }
 0xf7e   :  { %2211 = vrot.lane.b32.xlu0 %v2176_v17, %s9970_s20  ;;  %2185 = vrot.lane.b32.xlu1 %v2179_v56, %s9954_s11 }
 0xf82   :  { %2218 = vrot.lane.b32.xlu0 %v2176_v17, %s9956_s13  ;;  %2192 = vrot.lane.b32.xlu1 %v2179_v56, %s9950_s7 }
 0xf86   :  { %2225 = vrot.lane.b32.xlu0 %v2176_v17, %s9971_s21  ;;  %2199 = vrot.lane.b32.xlu1 %v2179_v56, %s9969_s19 }
 0xf8a   :  { %2232 = vrot.lane.b32.xlu0 %v2176_v17, %s9972_s22  ;;  %2206 = vrot.lane.b32.xlu1 %v2179_v56, %s9968_s15 }
 0xf8e   :  { %2213 = vrot.lane.b32.xlu1 %v2179_v56, %s9970_s20 }
 0xf92   :  { %2220 = vrot.lane.b32.xlu1 %v2179_v56, %s9956_s13 }
 0xf96   :  { %2227 = vrot.lane.b32.xlu1 %v2179_v56, %s9971_s21 }
 0xf9a   :  { %2234 = vrot.lane.b32.xlu1 %v2179_v56, %s9972_s22 }
 0xfe8   :  { %v2184_v15 = vpop.permute.xlu1 %2183  ;;  %v2198_v24 = vpop.permute.xlu0 %2197 }
 0xfec   :  { %v2191_v28 = vpop.permute.xlu1 %2190  ;;  %v2205_v40 = vpop.permute.xlu0 %2204 }
 0xff0   :  { %v2186_v60 = vpop.permute.xlu1 %2185  ;;  %v2212_v6 = vpop.permute.xlu0 %2211 }
 0xff1   :  { %2256 = vmatprep.subr.bf16.mxu1 %v2186_v60  ;;  %v2187_v34 = vsel %vm192_vm2, %v2184_v15, %v2186_v60 }
 0xff2   :  { %2257 = vmatpush1.bf16.msra.mxu1 %v2187_v34 }
 0xff4   :  { %v2193_v44 = vpop.permute.xlu1 %2192  ;;  %v2219_v37 = vpop.permute.xlu0 %2218 }
 0xff5   :  { %2258 = vmatprep.subr.bf16.mxu1 %v2193_v44  ;;  %v2194_v47 = vsel %vm210_vm4, %v2191_v28, %v2193_v44 }
 0xff6   :  { %2259 = vmatpush1.bf16.msra.mxu1 %v2194_v47 }
 0xff8   :  { %v2200_v7 = vpop.permute.xlu1 %2199  ;;  %v2226_v0 = vpop.permute.xlu0 %2225 }
 0xff9   :  { %2260 = vmatprep.subr.bf16.mxu1 %v2200_v7  ;;  %v2201_v53 = vsel %vm1957_vm15, %v2198_v24, %v2200_v7 }
 0xffa   :  { %2261 = vmatpush1.bf16.msra.mxu1 %v2201_v53 }
 0xffc   :  { %v2207_v4 = vpop.permute.xlu1 %2206  ;;  %v2233_v29 = vpop.permute.xlu0 %2232 }
 0xffd   :  { %2262 = vmatprep.subr.bf16.mxu1 %v2207_v4  ;;  %v2208_v42 = vsel %vm1963_vm12, %v2205_v40, %v2207_v4 }
 0xffe   :  { %2263 = vmatpush1.bf16.msra.mxu1 %v2208_v42 }
0x1000   :  { %v2214_v23 = vpop.permute.xlu1 %2213 }
0x1001   :  { %2264 = vmatprep.subr.bf16.mxu1 %v2214_v23  ;;  %v2215_v8 = vsel %vm1969_vm10, %v2212_v6, %v2214_v23 }
0x1002   :  { %2265 = vmatpush1.bf16.msra.mxu1 %v2215_v8 }
0x1004   :  { %v2221_v9 = vpop.permute.xlu1 %2220 }
0x1005   :  { %2266 = vmatprep.subr.bf16.mxu1 %v2221_v9  ;;  %v2222_v19 = vsel %vm264_vm7, %v2219_v37, %v2221_v9 }
0x1006   :  { %2267 = vmatpush1.bf16.msra.mxu1 %v2222_v19 }
0x1008   :  { %v2228_v10 = vpop.permute.xlu1 %2227 }
0x1009   :  { %2268 = vmatprep.subr.bf16.mxu1 %v2228_v10  ;;  %v2229_v50 = vsel %vm1980_vm9, %v2226_v0, %v2228_v10 }
0x100a   :  { %2269 = vmatpush1.bf16.msra.mxu1 %v2229_v50 }
0x100c   :  { %v2235_v45 = vpop.permute.xlu1 %2234 }
0x100d   :  { %2270 = vmatprep.subr.bf16.mxu1 %v2235_v45  ;;  %v2236_v43 = vsel %vm1986_vm8, %v2233_v29, %v2235_v45 }
0x100e   :  { %2271 = vmatpush1.bf16.msra.mxu1 %v2236_v43 }
0x100f   :  { %2556 = vmatprep.subr.bf16.mxu1 %v9958_v30 }
0x1011   :  { %2287 = vmatmul.mubr.bf16.vlgmr.msra.gmra.mrb[16].mxu1 %v9356_v59 }
0x10e4   :  { %v2288_v3 = vpop.f32.mrb[16].mxu1 }
0x10e5   :  { %v2290_v52 = vpop.f32.mrb[17].mxu1  ;;  %v2297_v14 = vmul.f32 %v2288_v3, %v10842_v12 }
0x10e6   :  { %v2298_v11 = vmul.f32 %v2290_v52, %v10839_v27  ;;  %v2292_v63 = vpop.f32.mrb[18].mxu1 }
0x10e7   :  { %v2294_v35 = vpop.f32.mrb[19].mxu1  ;;  %v2299_v13 = vmul.f32 %v2292_v63, %v10842_v12 }
0x10e8   :  { %v2301_v48 = vsel %vm420_vm11, %v2298_v11, 0.0  ;;  %v2300_v22 = vmul.f32 %v2294_v35, %v10839_v27 }
0x10e9   :  { %v2302_v1 = vadd.f32 %v2301_v48, %v2297_v14 }
0x10ea   :  { %v2305_v17 = vsel %vm420_vm11, %v2300_v22, 0.0 }
0x10eb   :  { %2303 = vadd.xlane.f32.xlu0 %v2302_v1  ;;  %v2306_v55 = vadd.f32 %v2305_v17, %v2299_v13 }
0x10ed   :  { %2307 = vadd.xlane.f32.xlu1 %v2306_v55 }
0x1178   :  { %v2304_v41 = vpop.xlane.xlu0 %2303 }
0x1179   :  { %v2309_v56 = vmul.f32 0.0078125, %v2304_v41 }
0x117a   :  { %v2308_v5 = vpop.xlane.xlu1 %2307 }
0x117b   :  { %v2311_v15 = vsub.f32 %v2288_v3, %v2309_v56  ;;  %v2312_v28 = vsub.f32 %v2290_v52, %v2309_v56  ;;  %v2310_v24 = vmul.f32 0.0078125, %v2308_v5 }
0x117d   :  { %v2315_v60 = vmul.f32 %v2311_v15, %v10842_v12  ;;  %v2316_v34 = vmul.f32 %v2312_v28, %v10839_v27  ;;  %v2313_v40 = vsub.f32 %v2292_v63, %v2310_v24  ;;  %v2314_v44 = vsub.f32 %v2294_v35, %v2310_v24 }
0x117f   :  { %v2317_v47 = vmul.f32 %v2313_v40, %v10842_v12  ;;  %v2318_v7 = vmul.f32 %v2314_v44, %v10839_v27  ;;  %v2319_v53 = vmul.f32 %v2315_v60, %v2315_v60  ;;  %v2320_v6 = vmul.f32 %v2316_v34, %v2316_v34 }
0x1181   :  { %v2323_v4 = vsel %vm420_vm11, %v2320_v6, 0.0  ;;  %v2322_v42 = vmul.f32 %v2318_v7, %v2318_v7  ;;  %v2321_v23 = vmul.f32 %v2317_v47, %v2317_v47 }
0x1182   :  { %v2324_v37 = vadd.f32 %v2323_v4, %v2319_v53 }
0x1183   :  { %v2327_v8 = vsel %vm420_vm11, %v2322_v42, 0.0 }
0x1184   :  { %2325 = vadd.xlane.f32.xlu0 %v2324_v37  ;;  %v2328_v9 = vadd.f32 %v2327_v8, %v2321_v23 }
0x1188   :  { %2329 = vadd.xlane.f32.xlu0 %v2328_v9 }
0x1211   :  { %v2326_v19 = vpop.xlane.xlu0 %2325 }
0x1212   :  { %v2331_v0 = vmul.f32 0.0078125, %v2326_v19 }
0x1214   :  { %v2333_v10 = vadd.f32 1e-05, %v2331_v0 }
0x1215   :  { %v2330_v50 = vpop.xlane.xlu0 %2329 }
0x1216   :  { %9917 = vrsqrt.f32 %v2333_v10  ;;  %v2332_v29 = vmul.f32 0.0078125, %v2330_v50 }
0x1218   :  { %v2334_v45 = vadd.f32 1e-05, %v2332_v29 }
0x121a   :  { %9919 = vrsqrt.f32 %v2334_v45 }
0x1220   :  { %v9918_v43 = vpop.eup %9917 }
0x1221   :  { %v2337_v59 = vmul.f32 %v9918_v43, %v10859_v21 }
0x1223   :  { %2341 = vperm.xlu1 %9175, %v2337_v59  }
0x1224   :  { %v9920_v3 = vpop.eup %9919 }
0x1225   :  { %v2338_v52 = vmul.f32 %v9920_v3, %v10862_v33 }
0x1227   :  { %9177 = vset.pattern.permute.xlu1 %v9965_v2  ;;  %2346 = vperm.xlu0 %9176, %v2338_v52  }
0x1228   :  { %2354 = vperm.xlu1 %9177, %v10859_v21  }
0x122b   :  { %9209 = vset.pattern.permute.xlu0 %v9958_v30 }
0x122c   :  { %2358 = vperm.xlu1 %9177, %v10862_v33  }
0x1230   :  { %9208 = vset.pattern.permute.xlu1 %v9958_v30 }
0x12a2   :  { %v2342_v11 = vpop.permute.xlu1 %2341 }
0x12a3   :  { %v2349_v63 = vmul.f32 %v2342_v11, %v2315_v60  ;;  %v2350_v14 = vmul.f32 %v2342_v11, %v2316_v34 }
0x12a6   :  { %v2347_v35 = vpop.permute.xlu0 %2346 }
0x12a7   :  { %v2355_v48 = vpop.permute.xlu1 %2354  ;;  %v2351_v1 = vmul.f32 %v2347_v35, %v2317_v47  ;;  %v2352_v17 = vmul.f32 %v2347_v35, %v2318_v7 }
0x12a8   :  { %v2361_v22 = vadd.f32 %v2355_v48, %v2349_v63  ;;  %v2362_v13 = vadd.f32 %v2355_v48, %v2350_v14 }
0x12aa   :  { %v2365_v55 = vmax.f32 %v2361_v22, 0.0  ;;  %v2366_v41 = vmax.f32 %v2362_v13, 0.0 }
0x12ab   :  { %v2359_v56 = vpop.permute.xlu1 %2358 }
0x12ac   :  { %v10940_v21 = vmul.f32 %v2365_v55, %v10842_v12  ;;  %v10943_v5 = vmul.f32 %v2366_v41, %v10839_v27  ;;  %v2363_v33 = vadd.f32 %v2359_v56, %v2351_v1  ;;  %v2364_v15 = vadd.f32 %v2359_v56, %v2352_v17  ;;  %v9357_v41 = vld [vmem:[%s10977_s23] sm:$0xff]   ;;  %v9358_v56 = vld [vmem:[%s10977_s23 + $0x8] sm:$0xff]  }
0x12ad   :  { %2557 = vmatpush1.bf16.msra.mxu1 %v9357_v41 }
0x12ae   :  { %v2367_v28 = vmax.f32 %v2363_v33, 0.0  ;;  %v2368_v24 = vmax.f32 %v2364_v15, 0.0  ;;  %v9178_v60 = vpack.i.bf16 %v10943_v5, %v10940_v21  ;;  %2558 = vmatprep.subr.bf16.mxu1 %v9958_v30  ;;  %v9359_v33 = vld [vmem:[%s10977_s23 + $0x10] sm:$0xff]   ;;  %v9360_v15 = vld [vmem:[%s10977_s23 + $0x18] sm:$0xff]  }
0x12b0   :  { %v10948_v34 = vmul.f32 %v2367_v28, %v10842_v12  ;;  %v10951_v40 = vmul.f32 %v2368_v24, %v10839_v27  ;;  %9179 = vrot.lane.b32.xlu1 %v9178_v60, %s9967_s5  ;;  %v9361_v28 = vld [vmem:[%s10977_s23 + $0x20] sm:$0xff]   ;;  %v9362_v24 = vld [vmem:[%s10977_s23 + $0x28] sm:$0xff]   ;;  %v9363_v60 = vld [vmem:[%s10977_s23 + $0x30] sm:$0xff]  }
0x12b1   :  { %2559 = vmatpush1.bf16.msra.mxu1 %v9358_v56 }
0x12b2   :  { %v9183_v44 = vpack.i.bf16 %v10951_v40, %v10948_v34  ;;  %v3826_v47 = vpack.c.bf16 %v10948_v34, %v10940_v21  ;;  %v3827_v7 = vpack.c.bf16 %v10951_v40, %v10943_v5  ;;  %2560 = vmatprep.subr.bf16.mxu1 %v9958_v30  ;;  %v9388_v21 = vld [vmem:[%s11226_s18 + $0x48] ss:$8 sps:$4 sm:$0xff]   ;;  %v9390_v34 = vld [vmem:[%s11226_s18 + $0x4c] ss:$8 sps:$4 sm:$0xff]  }
0x12b4   :  { %9184 = vrot.lane.b32.xlu1 %v9183_v44, %s9967_s5  ;;  %v9364_v44 = vld [vmem:[%s10977_s23 + $0x38] sm:$0xff]  }
0x12b5   :  { %2561 = vmatpush1.bf16.msra.mxu1 %v9359_v33 }
0x12b6   :  { %2562 = vmatprep.subr.bf16.mxu1 %v9958_v30 }
0x12b9   :  { %2563 = vmatpush1.bf16.msra.mxu1 %v9360_v15  ;;  %v9370_v15 = vld [vmem:[%s11034_s4 + $0x4] ss:$8 sps:$4 sm:$0xff]  }
0x12ba   :  { %2564 = vmatprep.subr.bf16.mxu1 %v9958_v30 }
0x12bd   :  { %2565 = vmatpush1.bf16.msra.mxu1 %v9361_v28 }
0x12be   :  { %2566 = vmatprep.subr.bf16.mxu1 %v9958_v30 }
0x12c1   :  { %2567 = vmatpush1.bf16.msra.mxu1 %v9362_v24 }
0x12c2   :  { %2568 = vmatprep.subr.bf16.mxu1 %v9958_v30 }
0x12c5   :  { %2569 = vmatpush1.bf16.msra.mxu1 %v9363_v60 }
0x12c6   :  { %2570 = vmatprep.subr.bf16.mxu1 %v9958_v30 }
0x12c9   :  { %2571 = vmatpush1.bf16.msra.mxu1 %v9364_v44 }
0x12ca   :  { %2572 = vmatprep.subr.bf16.mxu1 %v9958_v30 }
0x1322   :  { %v9180_v53 = vpop.permute.xlu1 %9179 }
0x1323   :  { %v9182_v6 = vunpack.i.h.bf16 %v9180_v53  ;;  %v9181_v4 = vunpack.i.l.bf16 %v9180_v53  ;;  %v9365_v53 = vld [vmem:[%s10977_s23 + $0x40] sm:$0xff]  }
0x1324   :  { %2573 = vmatpush1.bf16.msra.mxu1 %v9365_v53 }
0x1325   :  { %v2385_v42 = vsel %vm1931_vm13, %v9181_v4, %v9182_v6  ;;  %v2391_v37 = vsel %vm1931_vm13, 0.0, %v9181_v4  ;;  %v9366_v6 = vld [vmem:[%s10977_s23 + $0x48] sm:$0xff]   ;;  %2574 = vmatprep.subr.bf16.mxu1 %v9958_v30  ;;  %v9367_v4 = vld [vmem:[%s10977_s23 + $0x50] sm:$0xff]  }
0x1326   :  { %v2393_v23 = vsel %vm1936_vm14, %v2385_v42, 0.0  ;;  %v9185_v8 = vpop.permute.xlu1 %9184  ;;  %v9368_v42 = vld [vmem:[%s10977_s23 + $0x58] sm:$0xff]  }
0x1327   :  { %v9188_v9 = vpack.i.bf16 %v2393_v23, %v2391_v37  ;;  %v9187_v19 = vunpack.i.h.bf16 %v9185_v8  ;;  %v9186_v0 = vunpack.i.l.bf16 %v9185_v8 }
0x1328   :  { %2575 = vmatpush1.bf16.msra.mxu1 %v9366_v6 }
0x1329   :  { %v2386_v10 = vsel %vm1931_vm13, %v9186_v0, %v9187_v19  ;;  %v2392_v50 = vsel %vm1931_vm13, 0.0, %v9186_v0  ;;  %9189 = vrot.lane.b32.xlu1 %v9188_v9, %s9954_s11  ;;  %2576 = vmatprep.subr.bf16.mxu1 %v9958_v30 }
0x132a   :  { %v2394_v29 = vsel %vm1936_vm14, %v2386_v10, 0.0 }
0x132b   :  { %v9193_v45 = vpack.i.bf16 %v2394_v29, %v2392_v50 }
0x132c   :  { %2577 = vmatpush1.bf16.msra.mxu1 %v9367_v4 }
0x132d   :  { %9194 = vrot.lane.b32.xlu1 %v9193_v45, %s9954_s11  ;;  %2578 = vmatprep.subr.bf16.mxu1 %v9958_v30 }
0x1330   :  { %2579 = vmatpush1.bf16.msra.mxu1 %v9368_v42 }
0x1331   :  { %2580 = vmatprep.subr.bf16.mxu1 %v9958_v30 }
0x139b   :  { %v9190_v43 = vpop.permute.xlu1 %9189 }
0x139c   :  { %v9192_v59 = vunpack.i.h.bf16 %v9190_v43  ;;  %v9191_v3 = vunpack.i.l.bf16 %v9190_v43 }
0x139e   :  { %v2414_v52 = vmax.f32 %v2393_v23, %v9192_v59  ;;  %v2407_v11 = vsel %vm192_vm2, %v9191_v3, %v9192_v59 }
0x139f   :  { %v10970_v63 = vmax.f32 %v2391_v37, %v2407_v11  ;;  %v9195_v14 = vpop.permute.xlu1 %9194  ;;  %v9369_v37 = vld [vmem:[%s10977_s23 + $0x60] ss:$0 sps:$4 sm:$0xff]  }
0x13a0   :  { %v9197_v35 = vunpack.i.h.bf16 %v9195_v14  ;;  %v9196_v48 = vunpack.i.l.bf16 %v9195_v14  ;;  %v2554_v23 = vsel %vm324_vm3, %v9369_v37, 0  ;;  %v9372_v37 = vld [vmem:[%s11034_s4] ss:$8 sps:$4 sm:$0xff]  }
0x13a1   :  { %v9198_v22 = vpack.i.bf16 %v2414_v52, %v10970_v63  ;;  %2581 = vmatpush1.bf16.msra.mxu1 %v2554_v23  ;;  %v9373_v23 = vld [vmem:[%s11034_s4 + $0x14] ss:$8 sps:$4 sm:$0xff]  }
0x13a2   :  { %v2416_v13 = vmax.f32 %v2394_v29, %v9197_v35  ;;  %v2408_v1 = vsel %vm192_vm2, %v9196_v48, %v9197_v35  ;;  %2664 = vmatprep.subr.bf16.mxu1 %v9958_v30 }
0x13a3   :  { %v2415_v17 = vmax.f32 %v2392_v50, %v2408_v1  ;;  %9199 = vrot.lane.b32.xlu1 %v9198_v22, %s9969_s19 }
0x13a5   :  { %v9203_v55 = vpack.i.bf16 %v2416_v13, %v2415_v17 }
0x13a7   :  { %9204 = vrot.lane.b32.xlu0 %v9203_v55, %s9969_s19 }
0x1415   :  { %v9200_v8 = vpop.permute.xlu1 %9199 }
0x1416   :  { %v9202_v9 = vunpack.i.h.bf16 %v9200_v8  ;;  %v9201_v19 = vunpack.i.l.bf16 %v9200_v8  ;;  %v9375_v8 = vld [vmem:[%s11034_s4 + $0x10] ss:$8 sps:$4 sm:$0xff]   ;;  %s8130_s4 = sld [smem:[%s12438_s0 + %s9985_s1]]   ;;  %s10002_s1 = smov 29  }
0x1418   :  { %v2430_v10 = vsel %vm1957_vm15, %v9201_v19, %v9202_v9  ;;  %v2437_v45 = vmax.f32 %v2414_v52, %v9202_v9  ;;  %v11054_v9 = vld [vmem:[%s8117_s26] ss:$0 sm:$0xff] }
0x1419   :  { %v9205_v0 = vpop.permute.xlu0 %9204  ;;  %v2436_v3 = vmax.f32 %v10970_v63, %v2430_v10 }
0x141a   :  { %v9207_v50 = vunpack.i.h.bf16 %v9205_v0  ;;  %v9206_v29 = vunpack.i.l.bf16 %v9205_v0 }
0x141c   :  { %v2439_v43 = vmax.f32 %v2416_v13, %v9207_v50  ;;  %v2431_v59 = vsel %vm1957_vm15, %v9206_v29, %v9207_v50 }
0x141d   :  { %v2438_v11 = vmax.f32 %v2415_v17, %v2431_v59 }
0x141e   :  { %v2441_v14 = vpack.c.bf16 %v2439_v43, %v2437_v45 }
0x141f   :  { %v2440_v35 = vpack.c.bf16 %v2438_v11, %v2436_v3 }
0x1420   :  { %2471 = vrot.lane.b32.xlu0 %v2441_v14, %s9968_s15 }
0x1421   :  { %2469 = vrot.lane.b32.xlu1 %v2440_v35, %s9968_s15 }
0x1492   :  { %v2472_v48 = vpop.permute.xlu0 %2471 }
0x1493   :  { %8262 = vmatprep.mubr.msk.bf16.mxu1 %vm420_vm11, %v2472_v48  ;;  %v2470_v22 = vpop.permute.xlu1 %2469 }
0x1494   :  { %v2473_v1 = vsel %vm1963_vm12, %v2470_v22, %v2472_v48 }
0x1495   :  { %2589 = vmatmul.mubr.bf16.vlgmr.msra.gmra.mrb[20].mxu1 %v2473_v1 }
0x1496   :  { %8267 = vmatprep.mubr.msk.bf16.mxu1 %vm2250_vm5, %v9370_v15 }
0x1568   :  { %v2590_v52 = vpop.f32.mrb[20].mxu1 }
0x1569   :  { %v2592_v63 = vpop.f32.mrb[21].mxu1 }
0x156a   :  { %v2593_v13 = vpop.f32.mrb[22].mxu1 }
0x156b   :  { %v2601_v17 = vpack.c.bf16 %v2593_v13, %v2590_v52  ;;  %v2595_v55 = vpop.f32.mrb[23].mxu1 }
0x156d   :  { %2603 = vrot.lane.b32.xlu1 %v2601_v17, %s9977_s24 }
0x15df   :  { %v2604_v41 = vpop.permute.xlu1 %2603 }
0x15e0   :  { %v2607_v56 = vsel %vm2605_vm1, 0, %v2604_v41 }
0x15e1   :  { %v2609_v33 = vsel %vm2608_vm0, %v2607_v56, 0 }
0x15e2   :  { %2615 = vrot.lane.b32.xlu1 %v2609_v33, %s9950_s7  ;;  %2612 = vrot.lane.b32.xlu0 %v2609_v33, %s9954_s11 }
0x15e3   :  { %2665 = vmatpush1.bf16.msra.mxu1 %v2609_v33 }
0x15e4   :  { %2666 = vmatprep.subr.bf16.mxu1 %v9958_v30 }
0x15e6   :  { %2621 = vrot.lane.b32.xlu1 %v2609_v33, %s9978_s28  ;;  %2618 = vrot.lane.b32.xlu0 %v2609_v33, %s9979_s29 }
0x15ea   :  { %2627 = vrot.lane.b32.xlu1 %v2609_v33, %s9970_s20  ;;  %2624 = vrot.lane.b32.xlu0 %v2609_v33, %s9980_s30 }
0x15ee   :  { %2633 = vrot.lane.b32.xlu1 %v2609_v33, %s9982_s16  ;;  %2630 = vrot.lane.b32.xlu0 %v2609_v33, %s9983_s17 }
0x1654   :  { %v2613_v28 = vpop.permute.xlu0 %2612  ;;  %v2616_v24 = vpop.permute.xlu1 %2615 }
0x1655   :  { %2667 = vmatpush1.bf16.msra.mxu1 %v2613_v28 }
0x1656   :  { %2668 = vmatprep.subr.bf16.mxu1 %v9958_v30 }
0x1658   :  { %v2619_v60 = vpop.permute.xlu0 %2618  ;;  %v2622_v44 = vpop.permute.xlu1 %2621 }
0x1659   :  { %2669 = vmatpush1.bf16.msra.mxu1 %v2616_v24 }
0x165a   :  { %2670 = vmatprep.subr.bf16.mxu1 %v9958_v30 }
0x165c   :  { %v2625_v53 = vpop.permute.xlu0 %2624  ;;  %v2628_v6 = vpop.permute.xlu1 %2627 }
0x165d   :  { %2671 = vmatpush1.bf16.msra.mxu1 %v2619_v60 }
0x165e   :  { %2672 = vmatprep.subr.bf16.mxu1 %v9958_v30 }
0x1660   :  { %v2631_v4 = vpop.permute.xlu0 %2630  ;;  %v2634_v42 = vpop.permute.xlu1 %2633 }
0x1661   :  { %2673 = vmatpush1.bf16.msra.mxu1 %v2622_v44 }
0x1662   :  { %2674 = vmatprep.subr.bf16.mxu1 %v9958_v30 }
0x1665   :  { %2675 = vmatpush1.bf16.msra.mxu1 %v2625_v53 }
0x1666   :  { %2676 = vmatprep.subr.bf16.mxu1 %v9958_v30 }
0x1669   :  { %2677 = vmatpush1.bf16.msra.mxu1 %v2628_v6 }
0x166a   :  { %2678 = vmatprep.subr.bf16.mxu1 %v9958_v30 }
0x166d   :  { %2679 = vmatpush1.bf16.msra.mxu1 %v2631_v4 }
0x166e   :  { %2680 = vmatprep.subr.bf16.mxu1 %v9958_v30 }
0x1671   :  { %2681 = vmatpush1.bf16.msra.mxu1 %v2634_v42 }
0x1674   :  { %2697 = vmatmul.mubr.bf16.vlgmr.msra.gmra.mrb[24].mxu1 %v9372_v37 }
0x1675   :  { %8268 = vmatprep.mubr.msk.bf16.mxu1 %vm2250_vm5, %v9373_v23 }
0x167c   :  { %2705 = vmatmul.mubr.bf16.gmra.mrb[28].mxu1 %v9375_v8 }
0x1747   :  { %v2698_v19 = vpop.f32.mrb[24].mxu1 }
0x1748   :  { %v2719_v0 = vmul.f32 %v11054_v9, %v2698_v19  ;;  %v2700_v10 = vpop.f32.mrb[25].mxu1 }
0x1749   :  { %v2701_v50 = vpop.f32.mrb[26].mxu1 }
0x174a   :  { %v2720_v29 = vmul.f32 %v11054_v9, %v2701_v50  ;;  %v2703_v45 = vpop.f32.mrb[27].mxu1  ;;  %v2723_v43 = vsel %vm420_vm11, %v2719_v0, 0.0 }
0x174b   :  { %2724 = vadd.xlane.f32.xlu0 %v2723_v43 }
0x174c   :  { %v2726_v59 = vsel %vm420_vm11, %v2720_v29, 0.0 }
0x174d   :  { %2727 = vadd.xlane.f32.xlu1 %v2726_v59 }
0x174f   :  { %v2706_v3 = vpop.f32.mrb[28].mxu1 }
0x1750   :  { %v2721_v11 = vmul.f32 %v11054_v9, %v2706_v3  ;;  %v2708_v14 = vpop.f32.mrb[29].mxu1 }
0x1751   :  { %v2709_v35 = vpop.f32.mrb[30].mxu1 }
0x1752   :  { %v2729_v48 = vsel %vm420_vm11, %v2721_v11, 0.0  ;;  %v2722_v22 = vmul.f32 %v11054_v9, %v2709_v35  ;;  %v2711_v1 = vpop.f32.mrb[31].mxu1 }
0x1753   :  { %2730 = vadd.xlane.f32.xlu0 %v2729_v48 }
0x1754   :  { %v2732_v52 = vsel %vm420_vm11, %v2722_v22, 0.0  ;;  %v11091_v22 = vld [vmem:[%s8130_s4] sm:$0xff] }
0x1757   :  { %2733 = vadd.xlane.f32.xlu0 %v2732_v52 }
0x17d8   :  { %v2725_v63 = vpop.xlane.xlu0 %2724 }
0x17d9   :  { %v2735_v13 = vmul.f32 0.03125, %v2725_v63  ;;  %v11093_v63 = vld [vmem:[%s8130_s4 + $0x8] sm:$0xff] }
0x17da   :  { %v2728_v17 = vpop.xlane.xlu1 %2727 }
0x17db   :  { %v2739_v55 = vsub.f32 %v2698_v19, %v2735_v13  ;;  %v2736_v41 = vmul.f32 0.03125, %v2728_v17 }
0x17dd   :  { %v2740_v56 = vsub.f32 %v2701_v50, %v2736_v41  ;;  %v11065_v33 = vmul.f32 %v11054_v9, %v2739_v55 }
0x17df   :  { %v2747_v15 = vmul.f32 %v11065_v33, %v11065_v33  ;;  %v11070_v28 = vmul.f32 %v11054_v9, %v2740_v56 }
0x17e0   :  { %v2731_v24 = vpop.xlane.xlu0 %2730 }
0x17e1   :  { %v2737_v60 = vmul.f32 0.03125, %v2731_v24  ;;  %v2751_v44 = vsel %vm420_vm11, %v2747_v15, 0.0  ;;  %v2748_v53 = vmul.f32 %v11070_v28, %v11070_v28  ;;  %v11101_v24 = vld [vmem:[%s8130_s4 + $0x10] sm:$0xff] }
0x17e2   :  { %2752 = vadd.xlane.f32.xlu1 %v2751_v44 }
0x17e3   :  { %v2741_v6 = vsub.f32 %v2706_v3, %v2737_v60  ;;  %v2754_v4 = vsel %vm420_vm11, %v2748_v53, 0.0 }
0x17e4   :  { %2755 = vadd.xlane.f32.xlu0 %v2754_v4  ;;  %v2734_v42 = vpop.xlane.xlu0 %2733 }
0x17e5   :  { %v2738_v37 = vmul.f32 0.03125, %v2734_v42  ;;  %v11077_v23 = vmul.f32 %v11054_v9, %v2741_v6  ;;  %v11106_v6 = vld [vmem:[%s8130_s4 + $0x18] sm:$0xff] }
0x17e7   :  { %v2742_v8 = vsub.f32 %v2709_v35, %v2738_v37  ;;  %v2749_v19 = vmul.f32 %v11077_v23, %v11077_v23 }
0x17e9   :  { %v2757_v0 = vsel %vm420_vm11, %v2749_v19, 0.0  ;;  %v11083_v10 = vmul.f32 %v11054_v9, %v2742_v8 }
0x17ea   :  { %2758 = vadd.xlane.f32.xlu1 %v2757_v0 }
0x17eb   :  { %v2750_v50 = vmul.f32 %v11083_v10, %v11083_v10 }
0x17ed   :  { %v2760_v29 = vsel %vm420_vm11, %v2750_v50, 0.0 }
0x17ee   :  { %2761 = vadd.xlane.f32.xlu0 %v2760_v29 }
0x186f   :  { %v2753_v45 = vpop.xlane.xlu1 %2752 }
0x1870   :  { %v2763_v43 = vmul.f32 0.03125, %v2753_v45 }
0x1871   :  { %v2756_v59 = vpop.xlane.xlu0 %2755 }
0x1872   :  { %v2767_v3 = vadd.f32 1e-05, %v2763_v43  ;;  %v2764_v11 = vmul.f32 0.03125, %v2756_v59 }
0x1874   :  { %9921 = vrsqrt.f32 %v2767_v3  ;;  %v2768_v14 = vadd.f32 1e-05, %v2764_v11 }
0x1876   :  { %9923 = vrsqrt.f32 %v2768_v14 }
0x1877   :  { %v2759_v35 = vpop.xlane.xlu1 %2758 }
0x1878   :  { %v2765_v48 = vmul.f32 0.03125, %v2759_v35 }
0x187a   :  { %v2769_v55 = vadd.f32 1e-05, %v2765_v48 }
0x187b   :  { %v2762_v1 = vpop.xlane.xlu0 %2761 }
0x187c   :  { %v2766_v41 = vmul.f32 0.03125, %v2762_v1  ;;  %9925 = vrsqrt.f32 %v2769_v55 }
0x187e   :  { %v9922_v52 = vpop.eup %9921  ;;  %v2770_v15 = vadd.f32 1e-05, %v2766_v41 }
0x187f   :  { %v2775_v13 = vmul.f32 %v9922_v52, %v11091_v22 }
0x1880   :  { %v9924_v17 = vpop.eup %9923  ;;  %9927 = vrsqrt.f32 %v2770_v15 }
0x1881   :  { %2781 = vperm.xlu1 %9208, %v2775_v13   ;;  %v2776_v56 = vmul.f32 %v9924_v17, %v11093_v63 }
0x1883   :  { %2786 = vperm.xlu0 %9209, %v2776_v56  }
0x1885   :  { %9210 = vset.pattern.permute.xlu1 %v9962_v38 }
0x1886   :  { %2805 = vperm.xlu1 %9210, %v11091_v22   ;;  %v9926_v60 = vpop.eup %9925 }
0x1887   :  { %9214 = vset.pattern.permute.xlu0 %v9964_v18  ;;  %v2777_v44 = vmul.f32 %v9926_v60, %v11101_v24 }
0x188a   :  { %2810 = vperm.xlu1 %9210, %v11093_v63   ;;  %v9928_v53 = vpop.eup %9927 }
0x188b   :  { %v2778_v4 = vmul.f32 %v9928_v53, %v11106_v6 }
0x188e   :  { %2815 = vperm.xlu1 %9210, %v11101_v24  }
0x1892   :  { %9211 = vset.pattern.permute.xlu1 %v9958_v30 }
0x1893   :  { %2791 = vperm.xlu1 %9211, %v2777_v44  }
0x1897   :  { %2796 = vperm.xlu1 %9211, %v2778_v4  }
0x189b   :  { %9212 = vset.pattern.permute.xlu1 %v9962_v38 }
0x189c   :  { %2820 = vperm.xlu1 %9212, %v11106_v6  }
0x18a0   :  { %9213 = vset.pattern.permute.xlu1 %v9964_v18 }
0x1900   :  { %v2782_v42 = vpop.permute.xlu1 %2781 }
0x1901   :  { %v2799_v37 = vmul.f32 %v2782_v42, %v11065_v33 }
0x1902   :  { %v2787_v8 = vpop.permute.xlu0 %2786 }
0x1903   :  { %v2800_v50 = vmul.f32 %v2787_v8, %v11070_v28 }
0x1905   :  { %v2806_v19 = vpop.permute.xlu1 %2805 }
0x1906   :  { %v2823_v0 = vadd.f32 %v2806_v19, %v2799_v37 }
0x1908   :  { %v2827_v45 = vmax.f32 %v2823_v0, 0.0 }
0x1909   :  { %v2811_v29 = vpop.permute.xlu1 %2810 }
0x190a   :  { %v2824_v43 = vadd.f32 %v2811_v29, %v2800_v50  ;;  %v2831_v11 = vmul.f32 %v11054_v9, %v2827_v45 }
0x190c   :  { %v2828_v59 = vmax.f32 %v2824_v43, 0.0 }
0x190d   :  { %v2816_v3 = vpop.permute.xlu1 %2815 }
0x190e   :  { %v2832_v14 = vmul.f32 %v11054_v9, %v2828_v59 }
0x1910   :  { %v2835_v35 = vpack.c.bf16 %v2832_v14, %v2831_v11 }
0x1912   :  { %v2792_v48 = vpop.permute.xlu1 %2791  ;;  %2839 = vrot.lane.b32.xlu1 %v2835_v35, %s9977_s24 }
0x1913   :  { %v2801_v33 = vmul.f32 %v2792_v48, %v11077_v23 }
0x1915   :  { %v2825_v52 = vadd.f32 %v2816_v3, %v2801_v33 }
0x1916   :  { %v2797_v1 = vpop.permute.xlu1 %2796 }
0x1917   :  { %v2802_v13 = vmul.f32 %v2797_v1, %v11083_v10  ;;  %v2829_v17 = vmax.f32 %v2825_v52, 0.0 }
0x1919   :  { %v2833_v56 = vmul.f32 %v11054_v9, %v2829_v17 }
0x191b   :  { %v2821_v28 = vpop.permute.xlu1 %2820 }
0x191c   :  { %v2826_v55 = vadd.f32 %v2821_v28, %v2802_v13 }
0x191e   :  { %v2830_v41 = vmax.f32 %v2826_v55, 0.0 }
0x1920   :  { %v2834_v15 = vmul.f32 %v11054_v9, %v2830_v41 }
0x1922   :  { %v2836_v60 = vpack.c.bf16 %v2834_v15, %v2833_v56 }
0x1924   :  { %2841 = vrot.lane.b32.xlu1 %v2836_v60, %s9977_s24  ;;  %s9986_s24 = smov 15  }
0x1925   :  { %s11135_s25 = sld [smem:[%s12438_s0 + %s9986_s24]]  }
0x192b   :  { %v9378_v37 = vld [vmem:[%s11135_s25 + $0x4] ss:$12 sps:$4 sm:$0xff]   ;;  %v9379_v8 = vld [vmem:[%s11135_s25 + $0x8] ss:$12 sps:$4 sm:$0xff]   ;;  %v9376_v13 = vld [vmem:[%s11135_s25] ss:$12 sps:$4 sm:$0xff]  }
0x192c   :  { %2978 = vmatprep.mubr.bf16.mxu1 %v9378_v37  ;;  %v9381_v28 = vld [vmem:[%s11135_s25 + $0x1c] ss:$12 sps:$4 sm:$0xff]   ;;  %v9380_v55 = vld [vmem:[%s11135_s25 + $0x20] ss:$12 sps:$4 sm:$0xff]   ;;  %v9383_v41 = vld [vmem:[%s11135_s25 + $0x18] ss:$12 sps:$4 sm:$0xff]  }
0x1984   :  { %v2840_v44 = vpop.permute.xlu1 %2839 }
0x1985   :  { %v2844_v53 = vsel %vm2605_vm1, 0, %v2840_v44 }
0x1986   :  { %v2847_v23 = vsel %vm2608_vm0, %v2844_v53, 0 }
0x1987   :  { %2871 = vrot.lane.b32.xlu0 %v2847_v23, %s9978_s28 }
0x198b   :  { %2877 = vrot.lane.b32.xlu0 %v2847_v23, %s9980_s30 }
0x1996   :  { %v2842_v10 = vpop.permute.xlu1 %2841 }
0x1997   :  { %v2846_v4 = vsel %vm2605_vm1, 0, %v2842_v10  ;;  %vm9990_vm1 = vmmov 0  }
0x1998   :  { %v2849_v42 = vsel %vm2608_vm0, %v2846_v4, 0  ;;  %vm2939_vm0 = vcmask 261120  }
0x1999   :  { %2879 = vrot.lane.b32.xlu0 %v2849_v42, %s9980_s30  ;;  %2873 = vrot.lane.b32.xlu1 %v2849_v42, %s9978_s28  ;;  %s9988_s28 = smov 18  }
0x199a   :  { %9019 = vmatprep.mubr.msk.bf16.mxu0 %vm2939_vm0, %v9379_v8 }
0x199d   :  { %2883 = vrot.lane.b32.xlu0 %v2847_v23, %s9970_s20  ;;  %2853 = vrot.lane.b32.xlu1 %v2847_v23, %s9954_s11 }
0x19a1   :  { %2885 = vrot.lane.b32.xlu0 %v2849_v42, %s9970_s20  ;;  %2855 = vrot.lane.b32.xlu1 %v2849_v42, %s9954_s11 }
0x19a5   :  { %2889 = vrot.lane.b32.xlu0 %v2847_v23, %s9983_s17  ;;  %2859 = vrot.lane.b32.xlu1 %v2847_v23, %s9950_s7 }
0x19a9   :  { %2891 = vrot.lane.b32.xlu0 %v2849_v42, %s9983_s17  ;;  %2861 = vrot.lane.b32.xlu1 %v2849_v42, %s9950_s7  ;;  %s9989_s17 = smov 17  }
0x19aa   :  { %s11211_s2 = sld [smem:[%s12438_s0 + %s9989_s17]]  }
0x19ad   :  { %2895 = vrot.lane.b32.xlu0 %v2847_v23, %s9982_s16  ;;  %2865 = vrot.lane.b32.xlu1 %v2847_v23, %s9979_s29 }
0x19b1   :  { %2867 = vrot.lane.b32.xlu1 %v2849_v42, %s9979_s29  ;;  %s9992_s29 = smov 21  }
0x19b2   :  { %s8135_s17 = sld [smem:[%s12438_s0 + %s9992_s29]]  }
0x19b5   :  { %2897 = vrot.lane.b32.xlu1 %v2849_v42, %s9982_s16  ;;  %s11202_s16 = sld [smem:[%s12438_s0 + %s9988_s28]]  }
0x19b6   :  { %s11364_s28 = sld [smem:[%s12438_s0 + %s9949_s6]]  }
0x19f9   :  { %v2872_v19 = vpop.permute.xlu0 %2871 }
0x19fa   :  { %8971 = vmatprep.subr.bf16.mxu1 %v2872_v19 }
0x19fb   :  { %8972 = vmatpush3.bf16.msra.mxu1 %v2847_v23 }
0x19fd   :  { %v2878_v0 = vpop.permute.xlu0 %2877 }
0x1a0b   :  { %v2880_v50 = vpop.permute.xlu0 %2879  ;;  %v2874_v29 = vpop.permute.xlu1 %2873 }
0x1a0c   :  { %8973 = vmatprep.subr.bf16.mxu1 %v2874_v29 }
0x1a0d   :  { %8974 = vmatpush3.bf16.msra.mxu1 %v2849_v42 }
0x1a0e   :  { %8975 = vmatprep.subr.bf16.mxu1 %v2878_v0 }
0x1a0f   :  { %v2884_v45 = vpop.permute.xlu0 %2883  ;;  %v2854_v43 = vpop.permute.xlu1 %2853 }
0x1a11   :  { %8976 = vmatpush3.bf16.msra.mxu1 %v2854_v43 }
0x1a12   :  { %8977 = vmatprep.subr.bf16.mxu1 %v2880_v50 }
0x1a13   :  { %v2886_v59 = vpop.permute.xlu0 %2885  ;;  %v2856_v3 = vpop.permute.xlu1 %2855 }
0x1a15   :  { %8978 = vmatpush3.bf16.msra.mxu1 %v2856_v3 }
0x1a16   :  { %8979 = vmatprep.subr.bf16.mxu1 %v2884_v45 }
0x1a17   :  { %v2890_v11 = vpop.permute.xlu0 %2889  ;;  %v2860_v14 = vpop.permute.xlu1 %2859 }
0x1a19   :  { %8980 = vmatpush3.bf16.msra.mxu1 %v2860_v14 }
0x1a1a   :  { %8981 = vmatprep.subr.bf16.mxu1 %v2886_v59 }
0x1a1b   :  { %v2892_v35 = vpop.permute.xlu0 %2891  ;;  %v2862_v48 = vpop.permute.xlu1 %2861 }
0x1a1d   :  { %8982 = vmatpush3.bf16.msra.mxu1 %v2862_v48 }
0x1a1e   :  { %8983 = vmatprep.subr.bf16.mxu1 %v2890_v11 }
0x1a1f   :  { %v2896_v33 = vpop.permute.xlu0 %2895  ;;  %v2866_v1 = vpop.permute.xlu1 %2865 }
0x1a20   :  { %9015 = vmatprep.subr.bf16.mxu0 %v2896_v33 }
0x1a21   :  { %8984 = vmatpush3.bf16.msra.mxu1 %v2866_v1  ;;  %9016 = vmatpush3.bf16.msra.mxu0 %v2896_v33 }
0x1a22   :  { %8985 = vmatprep.subr.bf16.mxu1 %v2892_v35 }
0x1a23   :  { %v2868_v52 = vpop.permute.xlu1 %2867 }
0x1a25   :  { %8986 = vmatpush3.bf16.msra.mxu1 %v2868_v52 }
0x1a26   :  { %3336 = vmatprep.subr.bf16.mxu1 %v9390_v34 }
0x1a27   :  { %v2898_v17 = vpop.permute.xlu1 %2897 }
0x1a28   :  { %2979 = vmatmul.mubr.bf16.vlgmr.msra.gmra.mrb[32].mxu1 %v9376_v13  ;;  %9017 = vmatprep.subr.bf16.mxu0 %v2898_v17 }
0x1a29   :  { %9018 = vmatpush3.bf16.msra.mxu0 %v2898_v17  ;;  %2986 = vmatprep.mubr.bf16.mxu1 %v9381_v28 }
0x1a2a   :  { %3337 = vmatpush1.bf16.msra.mxu1 %v9388_v21  ;;  %v8292_v21 = vld [vmem:[%s11226_s18 + $0x88] sm:$0xff] }
0x1a2b   :  { %v8302_v34 = vcombine.high %v8292_v21, %v8292_v21 }
0x1a2c   :  { %9020 = vmatmul.mubr.msk.bf16.vlgmr.msra.gmra.mrb[16].mxu0 %vm2939_vm0, %v9380_v55 }
0x1a30   :  { %2987 = vmatmul.mubr.bf16.gmra.mrb[36].mxu1 %v9383_v41 }
0x1a31   :  { %3368 = vmatprep.mubr.bf16.mxu1 %v9958_v30 }
0x1afb   :  { %v8987_v56 = vpop.f32.mrb[32].mxu1 }
0x1afc   :  { %v8988_v15 = vpop.f32.mrb[33].mxu1 }
0x1afd   :  { %v8989_v60 = vadd.f32 %v8988_v15, %v8987_v56  ;;  %v8990_v44 = vpop.f32.mrb[34].mxu1 }
0x1afe   :  { %v8991_v53 = vpop.f32.mrb[35].mxu1 }
0x1aff   :  { %v8992_v23 = vadd.f32 %v8991_v53, %v8990_v44  ;;  %v9021_v10 = vpop.f32.mrb[16].mxu0 }
0x1b00   :  { %v3029_v4 = vpop.f32.mrb[17].mxu0 }
0x1b01   :  { %v3030_v42 = vadd.f32 %v8989_v60, %v3029_v4  ;;  %v9022_v37 = vpop.f32.mrb[18].mxu0 }
0x1b02   :  { %v3032_v8 = vpop.f32.mrb[19].mxu0 }
0x1b03   :  { %v3044_v19 = vmul.f32 %v11054_v9, %v3030_v42  ;;  %v3033_v0 = vadd.f32 %v8992_v23, %v3032_v8  ;;  %v8993_v50 = vpop.f32.mrb[36].mxu1 }
0x1b04   :  { %v8994_v29 = vpop.f32.mrb[37].mxu1 }
0x1b05   :  { %v3045_v45 = vmul.f32 %v11054_v9, %v3033_v0  ;;  %v8995_v43 = vadd.f32 %v8994_v29, %v8993_v50  ;;  %v8996_v59 = vpop.f32.mrb[38].mxu1  ;;  %v3048_v3 = vsel %vm420_vm11, %v3044_v19, 0.0 }
0x1b06   :  { %v8997_v11 = vpop.f32.mrb[39].mxu1  ;;  %3049 = vadd.xlane.f32.xlu0 %v3048_v3 }
0x1b07   :  { %v3038_v14 = vadd.f32 %v9021_v10, %v8995_v43  ;;  %v8998_v35 = vadd.f32 %v8997_v11, %v8996_v59  ;;  %v3051_v48 = vsel %vm420_vm11, %v3045_v45, 0.0 }
0x1b08   :  { %3052 = vadd.xlane.f32.xlu1 %v3051_v48 }
0x1b09   :  { %v3041_v33 = vadd.f32 %v9022_v37, %v8998_v35  ;;  %v3046_v1 = vmul.f32 %v11054_v9, %v3038_v14 }
0x1b0b   :  { %v3054_v52 = vsel %vm420_vm11, %v3046_v1, 0.0  ;;  %v3047_v13 = vmul.f32 %v11054_v9, %v3041_v33 }
0x1b0c   :  { %3055 = vadd.xlane.f32.xlu0 %v3054_v52 }
0x1b0d   :  { %v3057_v28 = vsel %vm420_vm11, %v3047_v13, 0.0 }
0x1b10   :  { %3058 = vadd.xlane.f32.xlu0 %v3057_v28 }
0x1b93   :  { %v3050_v17 = vpop.xlane.xlu0 %3049 }
0x1b94   :  { %v3060_v55 = vmul.f32 0.03125, %v3050_v17 }
0x1b95   :  { %v3053_v41 = vpop.xlane.xlu1 %3052 }
0x1b96   :  { %v3064_v56 = vsub.f32 %v3030_v42, %v3060_v55  ;;  %v3061_v15 = vmul.f32 0.03125, %v3053_v41 }
0x1b98   :  { %v3065_v60 = vsub.f32 %v3033_v0, %v3061_v15  ;;  %v11165_v44 = vmul.f32 %v11054_v9, %v3064_v56 }
0x1b99   :  { %v3056_v53 = vpop.xlane.xlu0 %3055 }
0x1b9a   :  { %v3062_v23 = vmul.f32 0.03125, %v3056_v53  ;;  %v3072_v10 = vmul.f32 %v11165_v44, %v11165_v44  ;;  %v11170_v4 = vmul.f32 %v11054_v9, %v3065_v60 }
0x1b9c   :  { %v3066_v37 = vsub.f32 %v3038_v14, %v3062_v23  ;;  %v3076_v8 = vsel %vm420_vm11, %v3072_v10, 0.0  ;;  %v3073_v19 = vmul.f32 %v11170_v4, %v11170_v4 }
0x1b9d   :  { %3077 = vadd.xlane.f32.xlu1 %v3076_v8  ;;  %v3059_v42 = vpop.xlane.xlu0 %3058 }
0x1b9e   :  { %v3063_v0 = vmul.f32 0.03125, %v3059_v42  ;;  %v3079_v50 = vsel %vm420_vm11, %v3073_v19, 0.0  ;;  %v11177_v29 = vmul.f32 %v11054_v9, %v3066_v37  ;;  %v9987_v19 = vmov 0.0  }
0x1b9f   :  { %3080 = vadd.xlane.f32.xlu0 %v3079_v50  ;;  %9023 = vmatprep.subr.bf16.mxu0 %v9987_v19 }
0x1ba0   :  { %v3067_v45 = vsub.f32 %v3041_v33, %v3063_v0  ;;  %v3074_v43 = vmul.f32 %v11177_v29, %v11177_v29  ;;  %9027 = vmatprep.mubr.msk.bf16.mxu0 %vm9990_vm1, %v9987_v19 }
0x1ba2   :  { %v3082_v59 = vsel %vm420_vm11, %v3074_v43, 0.0  ;;  %v11183_v3 = vmul.f32 %v11054_v9, %v3067_v45 }
0x1ba3   :  { %3083 = vadd.xlane.f32.xlu1 %v3082_v59 }
0x1ba4   :  { %v3075_v11 = vmul.f32 %v11183_v3, %v11183_v3 }
0x1ba6   :  { %v3085_v14 = vsel %vm420_vm11, %v3075_v11, 0.0 }
0x1ba7   :  { %3086 = vadd.xlane.f32.xlu0 %v3085_v14 }
0x1c2a   :  { %v3078_v35 = vpop.xlane.xlu1 %3077 }
0x1c2b   :  { %v3088_v48 = vmul.f32 0.03125, %v3078_v35 }
0x1c2c   :  { %v3081_v1 = vpop.xlane.xlu0 %3080 }
0x1c2d   :  { %v3092_v52 = vadd.f32 1e-05, %v3088_v48  ;;  %v3089_v33 = vmul.f32 0.03125, %v3081_v1 }
0x1c2f   :  { %9929 = vrsqrt.f32 %v3092_v52  ;;  %v3093_v13 = vadd.f32 1e-05, %v3089_v33 }
0x1c30   :  { %v3084_v28 = vpop.xlane.xlu1 %3083 }
0x1c31   :  { %9931 = vrsqrt.f32 %v3093_v13  ;;  %v3090_v17 = vmul.f32 0.03125, %v3084_v28 }
0x1c33   :  { %v3094_v60 = vadd.f32 1e-05, %v3090_v17 }
0x1c34   :  { %v3087_v55 = vpop.xlane.xlu0 %3086 }
0x1c35   :  { %v3091_v53 = vmul.f32 0.03125, %v3087_v55  ;;  %9933 = vrsqrt.f32 %v3094_v60 }
0x1c37   :  { %v3095_v10 = vadd.f32 1e-05, %v3091_v53  ;;  %v9384_v53 = vld [vmem:[%s11211_s2] sm:$0xff]  }
0x1c39   :  { %v9930_v41 = vpop.eup %9929  ;;  %9935 = vrsqrt.f32 %v3095_v10 }
0x1c3a   :  { %v3100_v56 = vmul.f32 %v9930_v41, %v11091_v22 }
0x1c3b   :  { %v9932_v15 = vpop.eup %9931 }
0x1c3c   :  { %3106 = vperm.xlu1 %9213, %v3100_v56   ;;  %v3101_v23 = vmul.f32 %v9932_v15, %v11093_v63 }
0x1c3e   :  { %3111 = vperm.xlu0 %9214, %v3101_v23   ;;  %v9386_v23 = vld [vmem:[%s11211_s2 + $0x10] sm:$0xff]  }
0x1c3f   :  { %v9934_v37 = vpop.eup %9933 }
0x1c40   :  { %9215 = vset.pattern.permute.xlu1 %v9965_v2  ;;  %v3102_v8 = vmul.f32 %v9934_v37, %v11101_v24  ;;  %v9387_v37 = vld [vmem:[%s11211_s2 + $0x18] sm:$0xff]  }
0x1c41   :  { %3129 = vperm.xlu1 %9215, %v11091_v22   ;;  %v3804_v22 = vld [vmem:[%s11202_s16] sm:$0xff] }
0x1c42   :  { %9219 = vset.pattern.permute.xlu0 %v9958_v30 }
0x1c43   :  { %v9936_v42 = vpop.eup %9935 }
0x1c44   :  { %v3103_v0 = vmul.f32 %v9936_v42, %v11106_v6  ;;  %v9396_v42 = vld [vmem:[%s11226_s18 + $0x6c] ss:$8 sps:$4 sm:$0xff]  }
0x1c45   :  { %3133 = vperm.xlu1 %9215, %v11093_v63   ;;  %v9393_v63 = vld [vmem:[%s11226_s18 + $0x5c] ss:$8 sps:$4 sm:$0xff]  }
0x1c46   :  { %3338 = vmatprep.subr.bf16.mxu1 %v9393_v63 }
0x1c49   :  { %3137 = vperm.xlu1 %9215, %v11101_v24  }
0x1c4d   :  { %9216 = vset.pattern.permute.xlu1 %v9964_v18 }
0x1c4e   :  { %3116 = vperm.xlu1 %9216, %v3102_v8  }
0x1c52   :  { %3121 = vperm.xlu1 %9216, %v3103_v0   ;;  %v9394_v0 = vld [vmem:[%s11226_s18 + $0x68] ss:$8 sps:$4 sm:$0xff]  }
0x1c56   :  { %9217 = vset.pattern.permute.xlu1 %v9965_v2 }
0x1c57   :  { %3141 = vperm.xlu1 %9217, %v11106_v6  }
0x1c5b   :  { %9218 = vset.pattern.permute.xlu1 %v9958_v30 }
0x1c5c   :  { %3808 = vperm.xlu1 %9218, %v3804_v22   ;;  %v9399_v22 = vld [vmem:[%s11226_s18 + $0x7c] ss:$8 sps:$4 sm:$0xff]  }
0x1c60   :  { %3834 = vrot.lane.b32.xlu1 %v3826_v47, %s9967_s5  ;;  %v9391_v47 = vld [vmem:[%s11226_s18 + $0x58] ss:$8 sps:$4 sm:$0xff]  }
0x1c61   :  { %3339 = vmatpush1.bf16.msra.mxu1 %v9391_v47  ;;  %v8301_v47 = vcombine.low %v8292_v21, %v8292_v21  ;;  %v9421_v21 = vld [vmem:[%s11226_s18 + $0xa4] ss:$8 sps:$4 sm:$0xff]  }
0x1c62   :  { %3340 = vmatprep.subr.bf16.mxu1 %v9396_v42  ;;  %v9418_v42 = vld [vmem:[%s11226_s18 + $0x94] ss:$8 sps:$4 sm:$0xff]  }
0x1c63   :  { %v3331_v63 = vsel %vm324_vm3, %v8301_v47, 0  ;;  %v9424_v47 = vld [vmem:[%s11226_s18 + $0xb4] ss:$8 sps:$4 sm:$0xff]  }
0x1c64   :  { %3836 = vrot.lane.b32.xlu1 %v3827_v7, %s9967_s5 }
0x1c65   :  { %3341 = vmatpush1.bf16.msra.mxu1 %v9394_v0 }
0x1c66   :  { %3342 = vmatprep.subr.bf16.mxu1 %v9399_v22  ;;  %v9416_v22 = vld [vmem:[%s11226_s18 + $0x90] ss:$8 sps:$4 sm:$0xff]  }
0x1cbb   :  { %v3107_v5 = vpop.permute.xlu1 %3106 }
0x1cbc   :  { %v3124_v40 = vmul.f32 %v3107_v5, %v11165_v44  ;;  %v9404_v5 = vld [vmem:[%s11226_s18 + $0x4] ss:$8 sps:$4 sm:$0xff]  }
0x1cbd   :  { %v3112_v7 = vpop.permute.xlu0 %3111 }
0x1cbe   :  { %v3125_v50 = vmul.f32 %v3112_v7, %v11170_v4 }
0x1cc0   :  { %v3130_v24 = vpop.permute.xlu1 %3129 }
0x1cc1   :  { %v3144_v6 = vadd.f32 %v3130_v24, %v3124_v40  ;;  %v3805_v40 = vld [vmem:[%s11202_s16 + $0x8] sm:$0xff] }
0x1cc2   :  { %3813 = vperm.xlu0 %9219, %v3805_v40   ;;  %v8329_v40 = vld [vmem:[%s11226_s18 + $0xd0] sm:$0xff] }
0x1cc3   :  { %v3148_v43 = vmax.f32 %v3144_v6, 0.0 }
0x1cc4   :  { %v3134_v45 = vpop.permute.xlu1 %3133 }
0x1cc5   :  { %v3145_v59 = vadd.f32 %v3134_v45, %v3125_v50  ;;  %v3152_v35 = vmul.f32 %v11054_v9, %v3148_v43 }
0x1cc7   :  { %v3149_v11 = vmax.f32 %v3145_v59, 0.0 }
0x1cc8   :  { %v3138_v14 = vpop.permute.xlu1 %3137 }
0x1cc9   :  { %v3153_v48 = vmul.f32 %v11054_v9, %v3149_v11 }
0x1ccb   :  { %v3156_v1 = vpack.c.bf16 %v3153_v48, %v3152_v35 }
0x1ccd   :  { %v3117_v52 = vpop.permute.xlu1 %3116  ;;  %9024 = vmatpush3.bf16.msra.mxu0 %v3156_v1 }
0x1cce   :  { %9025 = vmatprep.subr.bf16.mxu0 %v9987_v19  ;;  %v3126_v44 = vmul.f32 %v3117_v52, %v11177_v29  ;;  %v9385_v29 = vld [vmem:[%s11211_s2 + $0x8] sm:$0xff]   ;;  %v9405_v52 = vld [vmem:[%s11226_s18 + $0x10] ss:$8 sps:$4 sm:$0xff]  }
0x1cd0   :  { %v3146_v13 = vadd.f32 %v3138_v14, %v3126_v44  ;;  %v9402_v14 = vld [vmem:[%s11226_s18] ss:$8 sps:$4 sm:$0xff]   ;;  %v9410_v44 = vld [vmem:[%s11226_s18 + $0x24] ss:$8 sps:$4 sm:$0xff]  }
0x1cd1   :  { %v3122_v33 = vpop.permute.xlu1 %3121 }
0x1cd2   :  { %v3127_v4 = vmul.f32 %v3122_v33, %v11183_v3  ;;  %v3150_v17 = vmax.f32 %v3146_v13, 0.0 }
0x1cd4   :  { %v3154_v56 = vmul.f32 %v11054_v9, %v3150_v17  ;;  %v9413_v17 = vld [vmem:[%s11226_s18 + $0x34] ss:$8 sps:$4 sm:$0xff]  }
0x1cd6   :  { %v3142_v28 = vpop.permute.xlu1 %3141 }
0x1cd7   :  { %v3147_v55 = vadd.f32 %v3142_v28, %v3127_v4  ;;  %v9408_v4 = vld [vmem:[%s11226_s18 + $0x20] ss:$8 sps:$4 sm:$0xff]  }
0x1cd9   :  { %v3151_v41 = vmax.f32 %v3147_v55, 0.0 }
0x1cdb   :  { %v3155_v15 = vmul.f32 %v11054_v9, %v3151_v41  ;;  %v11248_v3 = vpop.permute.xlu1 %3808 }
0x1cdd   :  { %v3157_v60 = vpack.c.bf16 %v3155_v15, %v3154_v56  ;;  %v3218_v56 = vld [vmem:[%s11226_s18 + $0x40] sm:$0xff]  ;;  %v9411_v15 = vld [vmem:[%s11226_s18 + $0x30] ss:$8 sps:$4 sm:$0xff]  }
0x1cdf   :  { %9026 = vmatpush3.bf16.msra.mxu0 %v3157_v60  ;;  %v11255_v9 = vpop.permute.xlu1 %3834 }
0x1ce0   :  { %9031 = vmatprep.subr.bf16.mxu0 %v9987_v19 }
0x1ce2   :  { %9028 = vmatmul.mubr.msk.bf16.vlgmr.msra.gmra.mrb[20].mxu0 %vm2939_vm0, %v9384_v53  ;;  %v8313_v53 = vcombine.low %v3218_v56, %v3218_v56 }
0x1ce3   :  { %9032 = vmatpush3.bf16.msra.mxu0 %v3156_v1  ;;  %9035 = vmatprep.mubr.msk.bf16.mxu0 %vm9990_vm1, %v9987_v19  ;;  %v3837_v10 = vpop.permute.xlu1 %3836 }
0x1ce4   :  { %9033 = vmatprep.subr.bf16.mxu0 %v9987_v19  ;;  %v11266_v8 = vsel %vm1931_vm13, %v11255_v9, %v3837_v10 }
0x1ce7   :  { %9034 = vmatpush3.bf16.msra.mxu0 %v3157_v60 }
0x1ce8   :  { %9039 = vmatprep.subr.bf16.mxu0 %v9987_v19 }
0x1cea   :  { %9036 = vmatmul.mubr.msk.bf16.vlgmr.msra.gmra.mrb[24].mxu0 %vm2939_vm0, %v9385_v29 }
0x1ceb   :  { %9040 = vmatpush3.bf16.msra.mxu0 %v3156_v1  ;;  %9043 = vmatprep.mubr.msk.bf16.mxu0 %vm9990_vm1, %v9987_v19 }
0x1cec   :  { %9041 = vmatprep.subr.bf16.mxu0 %v9987_v19 }
0x1cef   :  { %9042 = vmatpush3.bf16.msra.mxu0 %v3157_v60 }
0x1cf0   :  { %9047 = vmatprep.subr.bf16.mxu0 %v9987_v19 }
0x1cf2   :  { %9044 = vmatmul.mubr.msk.bf16.vlgmr.msra.gmra.mrb[28].mxu0 %vm2939_vm0, %v9386_v23 }
0x1cf3   :  { %9048 = vmatpush3.bf16.msra.mxu0 %v3156_v1  ;;  %9051 = vmatprep.mubr.msk.bf16.mxu0 %vm9990_vm1, %v9987_v19  ;;  %v9407_v1 = vld [vmem:[%s11226_s18 + $0x14] ss:$8 sps:$4 sm:$0xff]   ;;  %vm12457_vm1 = vcmask 900096  }
0x1cf4   :  { %9049 = vmatprep.subr.bf16.mxu0 %v9987_v19  ;;  %v9397_v19 = vld [vmem:[%s11226_s18 + $0x78] ss:$8 sps:$4 sm:$0xff]  }
0x1cf5   :  { %3343 = vmatpush1.bf16.msra.mxu1 %v9397_v19 }
0x1cf6   :  { %8303 = vmatprep.subr.msk.bf16.mxu1 %vm324_vm3, %v8302_v34  ;;  %v9419_v34 = vld [vmem:[%s11226_s18 + $0xa0] ss:$8 sps:$4 sm:$0xff]  }
0x1cf7   :  { %9050 = vmatpush3.bf16.msra.mxu0 %v3157_v60  ;;  %v8314_v60 = vcombine.high %v3218_v56, %v3218_v56 }
0x1cf8   :  { %8370 = vmatprep.subr.msk.bf16.mxu0 %vm1936_vm14, %v11266_v8 }
0x1cf9   :  { %3345 = vmatpush1.bf16.msra.mxu1 %v3331_v63  ;;  %v9422_v63 = vld [vmem:[%s11226_s18 + $0xb0] ss:$8 sps:$4 sm:$0xff]  }
0x1cfa   :  { %9052 = vmatmul.mubr.msk.bf16.vlgmr.msra.gmra.mrb[32].mxu0 %vm2939_vm0, %v9387_v37  ;;  %3433 = vmatprep.subr.bf16.mxu1 %v9404_v5  ;;  %v3428_v37 = vsel %vm324_vm3, %v8313_v53, 0  ;;  %v9427_v5 = vld [vmem:[%s11226_s18 + $0xc4] ss:$8 sps:$4 sm:$0xff]  }
0x1cfb   :  { %8372 = vmatpush1.bf16.msk.msra.mxu0 %vm10881_vm6, %v11255_v9 }
0x1db5   :  { %v3202_v7 = vpop.f32.mrb[20].mxu0 }
0x1db6   :  { %v9029_v24 = vpop.f32.mrb[21].mxu0 }
0x1db7   :  { %v3205_v6 = vpop.f32.mrb[22].mxu0  ;;  %v8339_v24 = vcombine.high %v8329_v40, %v8329_v40 }
0x1db8   :  { %v3209_v50 = vpack.c.bf16 %v3205_v6, %v3202_v7  ;;  %v9030_v45 = vpop.f32.mrb[23].mxu0  ;;  %v9425_v7 = vld [vmem:[%s11226_s18 + $0xc0] ss:$8 sps:$4 sm:$0xff]   ;;  %v8338_v6 = vcombine.low %v8329_v40, %v8329_v40  ;;  %v9446_v40 = vld [vmem:[%s11364_s28 + $0x4] ss:$12 sps:$4 sm:$0xff]  }
0x1db9   :  { %v9432_v45 = vld [vmem:[%s11226_s18 + $0xdc] ss:$8 sps:$4 sm:$0xff]   ;;  %4026 = vmatprep.mubr.bf16.mxu0 %v9446_v40 }
0x1dbd   :  { %v3264_v43 = vpop.f32.mrb[24].mxu0 }
0x1dbe   :  { %v9037_v59 = vpop.f32.mrb[25].mxu0 }
0x1dbf   :  { %v3267_v11 = vpop.f32.mrb[26].mxu0  ;;  %v9435_v59 = vld [vmem:[%s11226_s18 + $0xec] ss:$8 sps:$4 sm:$0xff]  }
0x1dc0   :  { %v3271_v35 = vpack.c.bf16 %v3267_v11, %v3264_v43  ;;  %v9038_v48 = vpop.f32.mrb[27].mxu0  ;;  %v9430_v43 = vld [vmem:[%s11226_s18 + $0xd8] ss:$8 sps:$4 sm:$0xff]   ;;  %v9433_v11 = vld [vmem:[%s11226_s18 + $0xe8] ss:$8 sps:$4 sm:$0xff]  }
0x1dc1   :  { %v9441_v48 = vld [vmem:[%s11226_s18 + $0x10c] ss:$8 sps:$4 sm:$0xff]  }
0x1dc2   :  { %8304 = vmatmul.mubr.msk.bf16.vlgmr.msra.gmra.mrb[40].mxu1 %vm420_vm11, %v3271_v35  ;;  %v9436_v35 = vld [vmem:[%s11226_s18 + $0xf8] ss:$8 sps:$4 sm:$0xff]  }
0x1dc3   :  { %3434 = vmatpush1.bf16.msra.mxu1 %v9402_v14  ;;  %3465 = vmatprep.mubr.bf16.mxu1 %v9958_v30  ;;  %v9438_v14 = vld [vmem:[%s11226_s18 + $0xfc] ss:$8 sps:$4 sm:$0xff]  }
0x1dc4   :  { %3435 = vmatprep.subr.bf16.mxu1 %v9407_v1  ;;  %v8354_v1 = vld [vmem:[%s11226_s18 + $0x118] sm:$0xff] }
0x1dc5   :  { %v3521_v33 = vpop.f32.mrb[28].mxu0 }
0x1dc6   :  { %v9045_v13 = vpop.f32.mrb[29].mxu0 }
0x1dc7   :  { %3436 = vmatpush1.bf16.msra.mxu1 %v9405_v52  ;;  %v3524_v28 = vpop.f32.mrb[30].mxu0  ;;  %v9439_v52 = vld [vmem:[%s11226_s18 + $0x108] ss:$8 sps:$4 sm:$0xff]  }
0x1dc8   :  { %3437 = vmatprep.subr.bf16.mxu1 %v9410_v44  ;;  %v3528_v55 = vpack.c.bf16 %v3524_v28, %v3521_v33  ;;  %v9046_v41 = vpop.f32.mrb[31].mxu0  ;;  %v8364_v44 = vcombine.high %v8354_v1, %v8354_v1  ;;  %v8363_v33 = vcombine.low %v8354_v1, %v8354_v1  ;;  %v3816_v28 = vmul.f32 %v11248_v3, %v10842_v12 }
0x1dc9   :  { %v3817_v41 = vmul.f32 %v11248_v3, %v10839_v27  ;;  %v3851_v3 = vsel %vm1936_vm14, %v11266_v8, 0 }
0x1dca   :  { %v3752_v13 = vsel %vm324_vm3, %v8363_v33, 0 }
0x1dcb   :  { %3438 = vmatpush1.bf16.msra.mxu1 %v9408_v4  ;;  %v3814_v4 = vpop.permute.xlu0 %3813 }
0x1dcc   :  { %3439 = vmatprep.subr.bf16.mxu1 %v9413_v17  ;;  %v3818_v17 = vmul.f32 %v3814_v4, %v10842_v12  ;;  %v3819_v56 = vmul.f32 %v3814_v4, %v10839_v27 }
0x1dcd   :  { %v3685_v29 = vpop.f32.mrb[32].mxu0 }
0x1dce   :  { %v9053_v23 = vpop.f32.mrb[33].mxu0 }
0x1dcf   :  { %3440 = vmatpush1.bf16.msra.mxu1 %v9411_v15  ;;  %v3688_v10 = vpop.f32.mrb[34].mxu0 }
0x1dd0   :  { %8315 = vmatprep.subr.msk.bf16.mxu1 %vm324_vm3, %v8314_v60  ;;  %v3692_v0 = vpack.c.bf16 %v3688_v10, %v3685_v29  ;;  %v9054_v19 = vpop.f32.mrb[35].mxu0 }
0x1dd1   :  { %v3845_v19 = vsel %vm1931_vm13, 0, %v11255_v9 }
0x1dd3   :  { %3442 = vmatpush1.bf16.msra.mxu1 %v3428_v37 }
0x1dd4   :  { %3593 = vmatprep.subr.bf16.mxu1 %v9418_v42 }
0x1dd6   :  { %8316 = vmatmul.mubr.msk.bf16.vlgmr.msra.gmra.mrb[40].mxu1 %vm420_vm11, %v3209_v50  ;;  %v3588_v50 = vsel %vm324_vm3, %v8338_v6, 0 }
0x1dd7   :  { %3594 = vmatpush1.bf16.msra.mxu1 %v9416_v22  ;;  %3625 = vmatprep.mubr.bf16.mxu1 %v9958_v30 }
0x1dd8   :  { %3595 = vmatprep.subr.bf16.mxu1 %v9421_v21 }
0x1ddb   :  { %3596 = vmatpush1.bf16.msra.mxu1 %v9419_v34 }
0x1ddc   :  { %3597 = vmatprep.subr.bf16.mxu1 %v9424_v47 }
0x1ddf   :  { %3598 = vmatpush1.bf16.msra.mxu1 %v9422_v63 }
0x1de0   :  { %3599 = vmatprep.subr.bf16.mxu1 %v9427_v5 }
0x1de3   :  { %3600 = vmatpush1.bf16.msra.mxu1 %v9425_v7 }
0x1de4   :  { %8340 = vmatprep.subr.msk.bf16.mxu1 %vm324_vm3, %v8339_v24 }
0x1de7   :  { %3602 = vmatpush1.bf16.msra.mxu1 %v3588_v50 }
0x1de8   :  { %3757 = vmatprep.subr.bf16.mxu1 %v9432_v45 }
0x1dea   :  { %8341 = vmatmul.mubr.msk.bf16.vlgmr.msra.gmra.mrb[40].mxu1 %vm420_vm11, %v3528_v55 }
0x1deb   :  { %3758 = vmatpush1.bf16.msra.mxu1 %v9430_v43  ;;  %3789 = vmatprep.mubr.bf16.mxu1 %v9958_v30 }
0x1dec   :  { %3759 = vmatprep.subr.bf16.mxu1 %v9435_v59 }
0x1def   :  { %3760 = vmatpush1.bf16.msra.mxu1 %v9433_v11 }
0x1df0   :  { %3761 = vmatprep.subr.bf16.mxu1 %v9438_v14 }
0x1df3   :  { %3762 = vmatpush1.bf16.msra.mxu1 %v9436_v35 }
0x1df4   :  { %3763 = vmatprep.subr.bf16.mxu1 %v9441_v48 }
0x1df7   :  { %3764 = vmatpush1.bf16.msra.mxu1 %v9439_v52 }
0x1df8   :  { %8365 = vmatprep.subr.msk.bf16.mxu1 %vm324_vm3, %v8364_v44 }
0x1dfb   :  { %3766 = vmatpush1.bf16.msra.mxu1 %v3752_v13 }
0x1dfe   :  { %8366 = vmatmul.mubr.msk.bf16.vlgmr.msra.gmra.mrb[40].mxu1 %vm420_vm11, %v3692_v0 }
0x1ed1   :  { %v3791_v55 = vpop.f32.mrb[40].mxu1 }
0x1ed2   :  { %v3793_v15 = vpop.f32.mrb[41].mxu1  ;;  %v3820_v53 = vadd.f32 %v3816_v28, %v3791_v55 }
0x1ed3   :  { %v3795_v60 = vpop.f32.mrb[42].mxu1  ;;  %v3821_v10 = vadd.f32 %v3817_v41, %v3793_v15 }
0x1ed4   :  { %v3822_v29 = vadd.f32 %v3818_v17, %v3795_v60  ;;  %v3797_v23 = vpop.f32.mrb[43].mxu1 }
0x1ed5   :  { %v3823_v37 = vadd.f32 %v3819_v56, %v3797_v23 }
0x1ed6   :  { %v3828_v42 = vpack.c.bf16 %v3822_v29, %v3820_v53 }
0x1ed7   :  { %v3829_v0 = vpack.c.bf16 %v3823_v37, %v3821_v10 }
0x1ed8   :  { %3838 = vrot.lane.b32.xlu0 %v3828_v42, %s9967_s5 }
0x1ed9   :  { %3840 = vrot.lane.b32.xlu1 %v3829_v0, %s9967_s5 }
0x1edc   :  { %3860 = vrot.lane.b32.xlu0 %v3845_v19, %s9954_s11 }
0x1edd   :  { %3862 = vrot.lane.b32.xlu1 %v3851_v3, %s9954_s11 }
0x1f4a   :  { %v3839_v22 = vpop.permute.xlu0 %3838 }
0x1f4b   :  { %v3848_v21 = vsel %vm1931_vm13, 0, %v3839_v22  ;;  %v3841_v34 = vpop.permute.xlu1 %3840 }
0x1f4c   :  { %v3843_v47 = vsel %vm1931_vm13, %v3839_v22, %v3841_v34  ;;  %3864 = vrot.lane.b32.xlu0 %v3848_v21, %s9954_s11 }
0x1f4d   :  { %v3854_v63 = vsel %vm1936_vm14, %v3843_v47, 0  ;;  %8373 = vmatprep.subr.msk.bf16.mxu0 %vm1936_vm14, %v3843_v47 }
0x1f4e   :  { %8375 = vmatpush1.bf16.msk.msra.mxu0 %vm10881_vm6, %v3839_v22  ;;  %3866 = vrot.lane.b32.xlu1 %v3854_v63, %s9954_s11  ;;  %v3861_v9 = vpop.permute.xlu0 %3860 }
0x1f4f   :  { %v3863_v8 = vpop.permute.xlu1 %3862 }
0x1f50   :  { %3874 = vrot.lane.b32.xlu0 %v3845_v19, %s9950_s7  ;;  %3998 = vmatprep.subr.bf16.mxu0 %v3863_v8  ;;  %v3868_v5 = vsel %vm192_vm2, %v3861_v9, %v3863_v8  ;;  %v9444_v8 = vld [vmem:[%s11364_s28] ss:$12 sps:$4 sm:$0xff]  }
0x1f52   :  { %3876 = vrot.lane.b32.xlu1 %v3851_v3, %s9950_s7  ;;  %3999 = vmatpush1.bf16.msra.mxu0 %v3868_v5 }
0x1f54   :  { %3878 = vrot.lane.b32.xlu0 %v3848_v21, %s9950_s7 }
0x1f56   :  { %3880 = vrot.lane.b32.xlu1 %v3854_v63, %s9950_s7 }
0x1f58   :  { %3888 = vrot.lane.b32.xlu0 %v3845_v19, %s9969_s19 }
0x1f5a   :  { %3890 = vrot.lane.b32.xlu1 %v3851_v3, %s9969_s19 }
0x1f5c   :  { %3892 = vrot.lane.b32.xlu0 %v3848_v21, %s9969_s19 }
0x1f5e   :  { %3894 = vrot.lane.b32.xlu1 %v3854_v63, %s9969_s19 }
0x1f60   :  { %3902 = vrot.lane.b32.xlu0 %v3845_v19, %s9968_s15 }
0x1f62   :  { %3904 = vrot.lane.b32.xlu1 %v3851_v3, %s9968_s15 }
0x1f64   :  { %3906 = vrot.lane.b32.xlu0 %v3848_v21, %s9968_s15 }
0x1f66   :  { %3908 = vrot.lane.b32.xlu1 %v3854_v63, %s9968_s15 }
0x1f68   :  { %3916 = vrot.lane.b32.xlu0 %v3845_v19, %s9970_s20 }
0x1f6a   :  { %3918 = vrot.lane.b32.xlu1 %v3851_v3, %s9970_s20 }
0x1f6c   :  { %3920 = vrot.lane.b32.xlu0 %v3848_v21, %s9970_s20 }
0x1f6e   :  { %3922 = vrot.lane.b32.xlu1 %v3854_v63, %s9970_s20 }
0x1f70   :  { %3930 = vrot.lane.b32.xlu0 %v3845_v19, %s9956_s13 }
0x1f72   :  { %3932 = vrot.lane.b32.xlu1 %v3851_v3, %s9956_s13 }
0x1f74   :  { %3934 = vrot.lane.b32.xlu0 %v3848_v21, %s9956_s13 }
0x1f76   :  { %3936 = vrot.lane.b32.xlu1 %v3854_v63, %s9956_s13 }
0x1f78   :  { %3944 = vrot.lane.b32.xlu0 %v3845_v19, %s9971_s21 }
0x1f7a   :  { %3946 = vrot.lane.b32.xlu1 %v3851_v3, %s9971_s21 }
0x1f7c   :  { %3948 = vrot.lane.b32.xlu0 %v3848_v21, %s9971_s21 }
0x1f7e   :  { %3950 = vrot.lane.b32.xlu1 %v3854_v63, %s9971_s21 }
0x1f80   :  { %3958 = vrot.lane.b32.xlu0 %v3845_v19, %s9972_s22 }
0x1f82   :  { %3960 = vrot.lane.b32.xlu1 %v3851_v3, %s9972_s22 }
0x1f84   :  { %3962 = vrot.lane.b32.xlu0 %v3848_v21, %s9972_s22 }
0x1f86   :  { %3964 = vrot.lane.b32.xlu1 %v3854_v63, %s9972_s22 }
0x1fbe   :  { %v3865_v7 = vpop.permute.xlu0 %3864 }
0x1fc0   :  { %v3867_v24 = vpop.permute.xlu1 %3866 }
0x1fc1   :  { %4000 = vmatprep.subr.bf16.mxu0 %v3867_v24  ;;  %v3869_v6 = vsel %vm192_vm2, %v3865_v7, %v3867_v24 }
0x1fc2   :  { %4001 = vmatpush1.bf16.msra.mxu0 %v3869_v6  ;;  %v3875_v50 = vpop.permute.xlu0 %3874 }
0x1fc4   :  { %v3877_v45 = vpop.permute.xlu1 %3876 }
0x1fc5   :  { %4002 = vmatprep.subr.bf16.mxu0 %v3877_v45  ;;  %v3882_v43 = vsel %vm210_vm4, %v3875_v50, %v3877_v45  ;;  %v9447_v45 = vld [vmem:[%s11364_s28 + $0x8] ss:$12 sps:$4 sm:$0xff]   ;;  %s9997_s28 = smov 26  }
0x1fc6   :  { %4003 = vmatpush1.bf16.msra.mxu0 %v3882_v43  ;;  %v3879_v59 = vpop.permute.xlu0 %3878  ;;  %s8140_s16 = sld [smem:[%s12438_s0 + %s9997_s28]]  }
0x1fc8   :  { %v3881_v11 = vpop.permute.xlu1 %3880 }
0x1fc9   :  { %4004 = vmatprep.subr.bf16.mxu0 %v3881_v11  ;;  %v3883_v14 = vsel %vm210_vm4, %v3879_v59, %v3881_v11 }
0x1fca   :  { %4005 = vmatpush1.bf16.msra.mxu0 %v3883_v14  ;;  %v3889_v35 = vpop.permute.xlu0 %3888 }
0x1fcc   :  { %v3891_v48 = vpop.permute.xlu1 %3890 }
0x1fcd   :  { %4006 = vmatprep.subr.bf16.mxu0 %v3891_v48  ;;  %v3896_v1 = vsel %vm1957_vm15, %v3889_v35, %v3891_v48 }
0x1fce   :  { %4007 = vmatpush1.bf16.msra.mxu0 %v3896_v1  ;;  %v3893_v52 = vpop.permute.xlu0 %3892 }
0x1fd0   :  { %v3895_v44 = vpop.permute.xlu1 %3894 }
0x1fd1   :  { %4008 = vmatprep.subr.bf16.mxu0 %v3895_v44  ;;  %v3897_v33 = vsel %vm1957_vm15, %v3893_v52, %v3895_v44 }
0x1fd2   :  { %4009 = vmatpush1.bf16.msra.mxu0 %v3897_v33  ;;  %v3903_v13 = vpop.permute.xlu0 %3902 }
0x1fd4   :  { %v3905_v4 = vpop.permute.xlu1 %3904 }
0x1fd5   :  { %4010 = vmatprep.subr.bf16.mxu0 %v3905_v4  ;;  %v3910_v28 = vsel %vm1963_vm12, %v3903_v13, %v3905_v4 }
0x1fd6   :  { %4011 = vmatpush1.bf16.msra.mxu0 %v3910_v28  ;;  %v3907_v17 = vpop.permute.xlu0 %3906 }
0x1fd8   :  { %v3909_v55 = vpop.permute.xlu1 %3908 }
0x1fd9   :  { %4012 = vmatprep.subr.bf16.mxu0 %v3909_v55  ;;  %v3911_v41 = vsel %vm1963_vm12, %v3907_v17, %v3909_v55 }
0x1fda   :  { %4013 = vmatpush1.bf16.msra.mxu0 %v3911_v41  ;;  %v3917_v56 = vpop.permute.xlu0 %3916 }
0x1fdc   :  { %v3919_v15 = vpop.permute.xlu1 %3918 }
0x1fdd   :  { %4014 = vmatprep.subr.bf16.mxu0 %v3919_v15  ;;  %v3924_v60 = vsel %vm1969_vm10, %v3917_v56, %v3919_v15 }
0x1fde   :  { %4015 = vmatpush1.bf16.msra.mxu0 %v3924_v60  ;;  %v3921_v53 = vpop.permute.xlu0 %3920 }
0x1fe0   :  { %v3923_v29 = vpop.permute.xlu1 %3922 }
0x1fe1   :  { %4016 = vmatprep.subr.bf16.mxu0 %v3923_v29  ;;  %v3925_v23 = vsel %vm1969_vm10, %v3921_v53, %v3923_v29 }
0x1fe2   :  { %4017 = vmatpush1.bf16.msra.mxu0 %v3925_v23  ;;  %v3931_v10 = vpop.permute.xlu0 %3930 }
0x1fe4   :  { %v3933_v37 = vpop.permute.xlu1 %3932 }
0x1fe5   :  { %4018 = vmatprep.subr.bf16.mxu0 %v3933_v37  ;;  %v3938_v42 = vsel %vm264_vm7, %v3931_v10, %v3933_v37 }
0x1fe6   :  { %4019 = vmatpush1.bf16.msra.mxu0 %v3938_v42  ;;  %v3935_v0 = vpop.permute.xlu0 %3934 }
0x1fe8   :  { %v3937_v19 = vpop.permute.xlu1 %3936 }
0x1fe9   :  { %4020 = vmatprep.subr.bf16.mxu0 %v3937_v19  ;;  %v3939_v3 = vsel %vm264_vm7, %v3935_v0, %v3937_v19 }
0x1fea   :  { %4021 = vmatpush1.bf16.msra.mxu0 %v3939_v3  ;;  %v3945_v22 = vpop.permute.xlu0 %3944 }
0x1fec   :  { %v3947_v21 = vpop.permute.xlu1 %3946 }
0x1fed   :  { %4022 = vmatprep.subr.bf16.mxu0 %v3947_v21  ;;  %v3952_v34 = vsel %vm1980_vm9, %v3945_v22, %v3947_v21 }
0x1fee   :  { %4023 = vmatpush1.bf16.msra.mxu0 %v3952_v34  ;;  %v3949_v47 = vpop.permute.xlu0 %3948 }
0x1ff0   :  { %v3951_v63 = vpop.permute.xlu1 %3950 }
0x1ff1   :  { %4024 = vmatprep.subr.bf16.mxu0 %v3951_v63  ;;  %v3953_v9 = vsel %vm1980_vm9, %v3949_v47, %v3951_v63 }
0x1ff2   :  { %4025 = vmatpush1.bf16.msra.mxu0 %v3953_v9  ;;  %v3959_v5 = vpop.permute.xlu0 %3958 }
0x1ff4   :  { %v3961_v40 = vpop.permute.xlu1 %3960 }
0x1ff5   :  { %4027 = vmatmul.mubr.bf16.vlgmr.msra.gmra.mrb[36].mxu0 %v9444_v8  ;;  %4037 = vmatprep.subr.bf16.mxu0 %v3961_v40  ;;  %v3966_v7 = vsel %vm1986_vm8, %v3959_v5, %v3961_v40 }
0x1ff6   :  { %4038 = vmatpush1.bf16.msra.mxu0 %v3966_v7  ;;  %4069 = vmatprep.mubr.bf16.mxu0 %v9958_v30  ;;  %v3963_v24 = vpop.permute.xlu0 %3962 }
0x1ff8   :  { %v3965_v6 = vpop.permute.xlu1 %3964 }
0x1ff9   :  { %4039 = vmatprep.subr.bf16.mxu0 %v3965_v6  ;;  %v3967_v50 = vsel %vm1986_vm8, %v3963_v24, %v3965_v6  ;;  %v11415_v24 = vld [vmem:[%s8135_s17] sm:$0xff] }
0x1ffa   :  { %4040 = vmatpush1.bf16.msra.mxu0 %v3967_v50 }
0x2001   :  { %8376 = vmatmul.mubr.msk.bf16.vlgmr.msra.gmra.mrb[36].mxu0 %vm2939_vm0, %v9447_v45  ;;  %v11418_v45 = vld [vmem:[%s8135_s17 + $0x8] sm:$0xff]  ;;  %vm12456_vm0 = vcmask 220160  }
0x2002   :  { %4402 = vmatprep.mubr.bf16.mxu0 %v9958_v30 }
0x20d4   :  { %v4071_v43 = vpop.f32.mrb[36].mxu0 }
0x20d5   :  { %v4073_v59 = vpop.f32.mrb[37].mxu0  ;;  %v4080_v35 = vmul.f32 %v4071_v43, %v10842_v12 }
0x20d6   :  { %v4081_v11 = vmul.f32 %v4073_v59, %v10839_v27  ;;  %v4075_v14 = vpop.f32.mrb[38].mxu0 }
0x20d7   :  { %v4077_v48 = vpop.f32.mrb[39].mxu0  ;;  %v4082_v44 = vmul.f32 %v4075_v14, %v10842_v12 }
0x20d8   :  { %v4084_v1 = vsel %vm420_vm11, %v4081_v11, 0.0  ;;  %v4083_v52 = vmul.f32 %v4077_v48, %v10839_v27 }
0x20d9   :  { %v4085_v33 = vadd.f32 %v4084_v1, %v4080_v35 }
0x20da   :  { %v4088_v13 = vsel %vm420_vm11, %v4083_v52, 0.0 }
0x20db   :  { %4086 = vadd.xlane.f32.xlu0 %v4085_v33  ;;  %v4089_v4 = vadd.f32 %v4088_v13, %v4082_v44 }
0x20dd   :  { %4090 = vadd.xlane.f32.xlu1 %v4089_v4 }
0x2168   :  { %v4087_v28 = vpop.xlane.xlu0 %4086 }
0x2169   :  { %v4092_v17 = vmul.f32 0.0078125, %v4087_v28 }
0x216a   :  { %v4091_v55 = vpop.xlane.xlu1 %4090 }
0x216b   :  { %v4094_v41 = vsub.f32 %v4071_v43, %v4092_v17  ;;  %v4095_v56 = vsub.f32 %v4073_v59, %v4092_v17  ;;  %v4093_v15 = vmul.f32 0.0078125, %v4091_v55 }
0x216d   :  { %v4098_v60 = vmul.f32 %v4094_v41, %v10842_v12  ;;  %v4099_v53 = vmul.f32 %v4095_v56, %v10839_v27  ;;  %v4096_v29 = vsub.f32 %v4075_v14, %v4093_v15  ;;  %v4097_v23 = vsub.f32 %v4077_v48, %v4093_v15 }
0x216f   :  { %v4100_v10 = vmul.f32 %v4096_v29, %v10842_v12  ;;  %v4101_v37 = vmul.f32 %v4097_v23, %v10839_v27  ;;  %v4102_v42 = vmul.f32 %v4098_v60, %v4098_v60  ;;  %v4103_v0 = vmul.f32 %v4099_v53, %v4099_v53 }
0x2171   :  { %v4106_v19 = vsel %vm420_vm11, %v4103_v0, 0.0  ;;  %v4105_v3 = vmul.f32 %v4101_v37, %v4101_v37  ;;  %v4104_v21 = vmul.f32 %v4100_v10, %v4100_v10 }
0x2172   :  { %v4107_v22 = vadd.f32 %v4106_v19, %v4102_v42 }
0x2173   :  { %v4110_v34 = vsel %vm420_vm11, %v4105_v3, 0.0 }
0x2174   :  { %4108 = vadd.xlane.f32.xlu0 %v4107_v22  ;;  %v4111_v47 = vadd.f32 %v4110_v34, %v4104_v21 }
0x2178   :  { %4112 = vadd.xlane.f32.xlu0 %v4111_v47 }
0x2201   :  { %v4109_v63 = vpop.xlane.xlu0 %4108 }
0x2202   :  { %v4114_v9 = vmul.f32 0.0078125, %v4109_v63 }
0x2204   :  { %v4116_v8 = vadd.f32 1e-05, %v4114_v9 }
0x2205   :  { %v4113_v5 = vpop.xlane.xlu0 %4112 }
0x2206   :  { %9937 = vrsqrt.f32 %v4116_v8  ;;  %v4115_v40 = vmul.f32 0.0078125, %v4113_v5 }
0x2208   :  { %v4117_v7 = vadd.f32 1e-05, %v4115_v40 }
0x220a   :  { %9939 = vrsqrt.f32 %v4117_v7 }
0x2210   :  { %v9938_v6 = vpop.eup %9937 }
0x2211   :  { %v4120_v50 = vmul.f32 %v9938_v6, %v11415_v24 }
0x2213   :  { %4124 = vperm.xlu1 %9218, %v4120_v50  }
0x2214   :  { %v9940_v43 = vpop.eup %9939 }
0x2215   :  { %v4121_v59 = vmul.f32 %v9940_v43, %v11418_v45 }
0x2217   :  { %9220 = vset.pattern.permute.xlu1 %v9962_v38  ;;  %4129 = vperm.xlu0 %9219, %v4121_v59  }
0x2218   :  { %4138 = vperm.xlu1 %9220, %v11415_v24  }
0x221b   :  { %9222 = vset.pattern.permute.xlu0 %v9964_v18 }
0x221c   :  { %4143 = vperm.xlu1 %9220, %v11418_v45  }
0x2220   :  { %9221 = vset.pattern.permute.xlu1 %v9964_v18 }
0x2292   :  { %v4125_v11 = vpop.permute.xlu1 %4124 }
0x2293   :  { %v4132_v14 = vmul.f32 %v4125_v11, %v4098_v60  ;;  %v4133_v35 = vmul.f32 %v4125_v11, %v4099_v53 }
0x2296   :  { %v4130_v48 = vpop.permute.xlu0 %4129 }
0x2297   :  { %v4139_v1 = vpop.permute.xlu1 %4138  ;;  %v4134_v33 = vmul.f32 %v4130_v48, %v4100_v10  ;;  %v4135_v13 = vmul.f32 %v4130_v48, %v4101_v37 }
0x2298   :  { %v4146_v52 = vadd.f32 %v4139_v1, %v4132_v14  ;;  %v4147_v44 = vadd.f32 %v4139_v1, %v4133_v35 }
0x229a   :  { %v4150_v28 = vmax.f32 %v4146_v52, 0.0  ;;  %v4151_v17 = vmax.f32 %v4147_v44, 0.0 }
0x229b   :  { %v4144_v4 = vpop.permute.xlu1 %4143 }
0x229c   :  { %v4148_v55 = vadd.f32 %v4144_v4, %v4134_v33  ;;  %v4149_v41 = vadd.f32 %v4144_v4, %v4135_v13  ;;  %v4154_v29 = vmul.f32 %v4150_v28, %v10842_v12  ;;  %v4155_v23 = vmul.f32 %v4151_v17, %v10839_v27 }
0x229e   :  { %v4152_v56 = vmax.f32 %v4148_v55, 0.0  ;;  %v4153_v15 = vmax.f32 %v4149_v41, 0.0 }
0x22a0   :  { %v4156_v60 = vmul.f32 %v4152_v56, %v10842_v12  ;;  %v4157_v53 = vmul.f32 %v4153_v15, %v10839_v27 }
0x22a2   :  { %v4159_v42 = vpack.c.bf16 %v4157_v53, %v4155_v23  ;;  %v4158_v0 = vpack.c.bf16 %v4156_v60, %v4154_v29 }
0x22a4   :  { %4164 = vrot.lane.b32.xlu1 %v4159_v42, %s9967_s5  ;;  %4162 = vrot.lane.b32.xlu0 %v4158_v0, %s9967_s5  ;;  %s9993_s5 = smov 20  }
0x22a5   :  { %s11447_s2 = sld [smem:[%s12438_s0 + %s9993_s5]]  }
0x22ab   :  { %v9448_v20 = vld [vmem:[%s11447_s2 + $0x4] ss:$8 sps:$4 sm:$0xff]   ;;  %v9450_v17 = vld [vmem:[%s11447_s2] ss:$8 sps:$4 sm:$0xff]  }
0x22ac   :  { %8382 = vmatprep.mubr.msk.bf16.mxu1 %vm2250_vm5, %v9448_v20 }
0x2316   :  { %v4165_v10 = vpop.permute.xlu1 %4164  ;;  %v4163_v37 = vpop.permute.xlu0 %4162 }
0x2317   :  { %v4168_v19 = vsel %vm1931_vm13, 0, %v4163_v37  ;;  %v4166_v3 = vsel %vm1931_vm13, %v4163_v37, %v4165_v10 }
0x2318   :  { %4175 = vrot.lane.b32.xlu0 %v4168_v19, %s9954_s11  ;;  %v4171_v22 = vsel %vm1936_vm14, %v4166_v3, 0  ;;  %8379 = vmatprep.subr.msk.bf16.mxu1 %vm1936_vm14, %v4166_v3 }
0x2319   :  { %8381 = vmatpush1.bf16.msk.msra.mxu1 %vm10881_vm6, %v4163_v37  ;;  %4177 = vrot.lane.b32.xlu1 %v4171_v22, %s9954_s11  ;;  %vm12449_vm6 = vcmask 154624  }
0x231a   :  { %vm12453_vm13 = vmmov %vm12449_vm6 }
0x231b   :  { %vm12454_vm14 = vmmov %vm12449_vm6 }
0x231c   :  { %4182 = vrot.lane.b32.xlu0 %v4168_v19, %s9950_s7 }
0x231d   :  { %4184 = vrot.lane.b32.xlu1 %v4171_v22, %s9950_s7 }
0x2320   :  { %4189 = vrot.lane.b32.xlu0 %v4168_v19, %s9969_s19 }
0x2321   :  { %4191 = vrot.lane.b32.xlu1 %v4171_v22, %s9969_s19  ;;  %s8143_s19 = sld [smem:[%s12438_s0 + %s10002_s1]]  }
0x2324   :  { %4196 = vrot.lane.b32.xlu0 %v4168_v19, %s9968_s15 }
0x2325   :  { %4198 = vrot.lane.b32.xlu1 %v4171_v22, %s9968_s15  ;;  %s9994_s15 = smov 22  }
0x2328   :  { %4203 = vrot.lane.b32.xlu0 %v4168_v19, %s9970_s20 }
0x2329   :  { %4205 = vrot.lane.b32.xlu1 %v4171_v22, %s9970_s20 }
0x232c   :  { %4210 = vrot.lane.b32.xlu0 %v4168_v19, %s9956_s13 }
0x232d   :  { %4212 = vrot.lane.b32.xlu1 %v4171_v22, %s9956_s13 }
0x2330   :  { %4217 = vrot.lane.b32.xlu0 %v4168_v19, %s9971_s21 }
0x2331   :  { %4219 = vrot.lane.b32.xlu1 %v4171_v22, %s9971_s21  ;;  %s11532_s21 = sld [smem:[%s12438_s0 + %s9994_s15]]  }
0x2334   :  { %4224 = vrot.lane.b32.xlu0 %v4168_v19, %s9972_s22 }
0x2335   :  { %4226 = vrot.lane.b32.xlu1 %v4171_v22, %s9972_s22  ;;  %s9995_s22 = smov 23  }
0x2336   :  { %s8137_s24 = sld [smem:[%s12438_s0 + %s9995_s22]]  }
0x238a   :  { %v4176_v21 = vpop.permute.xlu0 %4175 }
0x238b   :  { %v4178_v34 = vpop.permute.xlu1 %4177 }
0x238c   :  { %4247 = vmatprep.subr.bf16.mxu1 %v4178_v34  ;;  %v4179_v47 = vsel %vm192_vm2, %v4176_v21, %v4178_v34 }
0x238d   :  { %4248 = vmatpush1.bf16.msra.mxu1 %v4179_v47 }
0x238e   :  { %v4183_v63 = vpop.permute.xlu0 %4182 }
0x238f   :  { %v4185_v9 = vpop.permute.xlu1 %4184 }
0x2390   :  { %4249 = vmatprep.subr.bf16.mxu1 %v4185_v9  ;;  %v4186_v8 = vsel %vm210_vm4, %v4183_v63, %v4185_v9 }
0x2391   :  { %4250 = vmatpush1.bf16.msra.mxu1 %v4186_v8 }
0x2392   :  { %v4190_v5 = vpop.permute.xlu0 %4189 }
0x2393   :  { %v4192_v40 = vpop.permute.xlu1 %4191 }
0x2394   :  { %4251 = vmatprep.subr.bf16.mxu1 %v4192_v40  ;;  %v4193_v7 = vsel %vm1957_vm15, %v4190_v5, %v4192_v40  ;;  %vm12455_vm15 = vmmov %vm12449_vm6 }
0x2395   :  { %4252 = vmatpush1.bf16.msra.mxu1 %v4193_v7 }
0x2396   :  { %v4197_v6 = vpop.permute.xlu0 %4196 }
0x2397   :  { %v4199_v50 = vpop.permute.xlu1 %4198 }
0x2398   :  { %4253 = vmatprep.subr.bf16.mxu1 %v4199_v50  ;;  %v4200_v43 = vsel %vm1963_vm12, %v4197_v6, %v4199_v50  ;;  %vm12452_vm12 = vmmov %vm12449_vm6 }
0x2399   :  { %4254 = vmatpush1.bf16.msra.mxu1 %v4200_v43 }
0x239a   :  { %v4204_v59 = vpop.permute.xlu0 %4203 }
0x239b   :  { %v4206_v11 = vpop.permute.xlu1 %4205 }
0x239c   :  { %4255 = vmatprep.subr.bf16.mxu1 %v4206_v11  ;;  %v4207_v14 = vsel %vm1969_vm10, %v4204_v59, %v4206_v11 }
0x239d   :  { %4256 = vmatpush1.bf16.msra.mxu1 %v4207_v14 }
0x239e   :  { %v4211_v35 = vpop.permute.xlu0 %4210 }
0x239f   :  { %v4213_v48 = vpop.permute.xlu1 %4212 }
0x23a0   :  { %4257 = vmatprep.subr.bf16.mxu1 %v4213_v48  ;;  %v4214_v1 = vsel %vm264_vm7, %v4211_v35, %v4213_v48 }
0x23a1   :  { %4258 = vmatpush1.bf16.msra.mxu1 %v4214_v1 }
0x23a2   :  { %v4218_v52 = vpop.permute.xlu0 %4217 }
0x23a3   :  { %v4220_v44 = vpop.permute.xlu1 %4219 }
0x23a4   :  { %4259 = vmatprep.subr.bf16.mxu1 %v4220_v44  ;;  %v4221_v33 = vsel %vm1980_vm9, %v4218_v52, %v4220_v44  ;;  %vm12451_vm9 = vmmov %vm12449_vm6 }
0x23a5   :  { %4260 = vmatpush1.bf16.msra.mxu1 %v4221_v33  ;;  %vm8953_vm10 = vmneg %vm12451_vm9 }
0x23a6   :  { %v4225_v13 = vpop.permute.xlu0 %4224 }
0x23a7   :  { %v4227_v4 = vpop.permute.xlu1 %4226 }
0x23a8   :  { %4261 = vmatprep.subr.bf16.mxu1 %v4227_v4  ;;  %v4228_v28 = vsel %vm1986_vm8, %v4225_v13, %v4227_v4  ;;  %vm12450_vm8 = vmmov %vm12449_vm6 }
0x23a9   :  { %4262 = vmatpush1.bf16.msra.mxu1 %v4228_v28 }
0x23ac   :  { %4278 = vmatmul.mubr.bf16.vlgmr.msra.gmra.mrb[44].mxu1 %v9450_v17 }
0x247f   :  { %v4279_v55 = vpop.f32.mrb[44].mxu1 }
0x2480   :  { %v4281_v41 = vpop.f32.mrb[45].mxu1  ;;  %v4288_v29 = vmul.f32 %v4279_v55, %v10842_v12 }
0x2481   :  { %v4289_v56 = vmul.f32 %v4281_v41, %v10839_v27  ;;  %v4283_v15 = vpop.f32.mrb[46].mxu1 }
0x2482   :  { %v4285_v23 = vpop.f32.mrb[47].mxu1  ;;  %v4290_v42 = vmul.f32 %v4283_v15, %v10842_v12 }
0x2483   :  { %v4292_v60 = vsel %vm420_vm11, %v4289_v56, 0.0  ;;  %v4291_v53 = vmul.f32 %v4285_v23, %v10839_v27  ;;  %v9456_v56 = vld [vmem:[%s11019_s27 + $0x264] ss:$24 sps:$4 sm:$0xff]  }
0x2484   :  { %v4293_v0 = vadd.f32 %v4292_v60, %v4288_v29  ;;  %5049 = vmatprep.subr.bf16.mxu1 %v9456_v56  ;;  %v9460_v29 = vld [vmem:[%s11019_s27 + $0x290] ss:$24 sps:$4 sm:$0xff]   ;;  %v9459_v56 = vld [vmem:[%s11019_s27 + $0x28c] ss:$24 sps:$4 sm:$0xff]  }
0x2485   :  { %v4296_v10 = vsel %vm420_vm11, %v4291_v53, 0.0  ;;  %v9472_v60 = vld [vmem:[%s11019_s27 + $0x2f0] ss:$24 sps:$4 sm:$0xff]   ;;  %v9480_v53 = vld [vmem:[%s11019_s27 + $0x324] ss:$24 sps:$4 sm:$0xff]  }
0x2486   :  { %4294 = vadd.xlane.f32.xlu0 %v4293_v0  ;;  %v4297_v37 = vadd.f32 %v4296_v10, %v4290_v42  ;;  %v9478_v42 = vld [vmem:[%s11019_s27 + $0x320] ss:$24 sps:$4 sm:$0xff]   ;;  %v9486_v0 = vld [vmem:[%s11019_s27 + $0x354] ss:$24 sps:$4 sm:$0xff]   ;;  %v9484_v10 = vld [vmem:[%s11019_s27 + $0x350] ss:$24 sps:$4 sm:$0xff]  }
0x2488   :  { %4298 = vadd.xlane.f32.xlu1 %v4297_v37  ;;  %v9492_v37 = vld [vmem:[%s11019_s27 + $0x384] ss:$24 sps:$4 sm:$0xff]  }
0x2513   :  { %v4295_v19 = vpop.xlane.xlu0 %4294 }
0x2514   :  { %v4300_v3 = vmul.f32 0.0078125, %v4295_v19  ;;  %v9490_v19 = vld [vmem:[%s11019_s27 + $0x380] ss:$24 sps:$4 sm:$0xff]  }
0x2515   :  { %v4299_v22 = vpop.xlane.xlu1 %4298 }
0x2516   :  { %v4302_v20 = vsub.f32 %v4279_v55, %v4300_v3  ;;  %v4303_v21 = vsub.f32 %v4281_v41, %v4300_v3  ;;  %v4301_v34 = vmul.f32 0.0078125, %v4299_v22  ;;  %v9454_v41 = vld [vmem:[%s11019_s27 + $0x260] ss:$24 sps:$4 sm:$0xff]   ;;  %v9498_v3 = vld [vmem:[%s11019_s27 + $0x3b4] ss:$24 sps:$4 sm:$0xff]  }
0x2517   :  { %5050 = vmatpush1.bf16.msra.mxu1 %v9454_v41  ;;  %v9496_v22 = vld [vmem:[%s11019_s27 + $0x3b0] ss:$24 sps:$4 sm:$0xff]   ;;  %v9453_v41 = vld [vmem:[%s11019_s27 + $0x25c] ss:$24 sps:$4 sm:$0xff]  }
0x2518   :  { %v11477_v47 = vmul.f32 %v4302_v20, %v10842_v12  ;;  %v11480_v63 = vmul.f32 %v4303_v21, %v10839_v27  ;;  %v4304_v9 = vsub.f32 %v4283_v15, %v4301_v34  ;;  %v4305_v8 = vsub.f32 %v4285_v23, %v4301_v34  ;;  %v9462_v15 = vld [vmem:[%s11019_s27 + $0x294] ss:$24 sps:$4 sm:$0xff]   ;;  %v9468_v23 = vld [vmem:[%s11019_s27 + $0x2c4] ss:$24 sps:$4 sm:$0xff]   ;;  %v9502_v21 = vld [vmem:[%s11019_s27 + $0x3e0] ss:$24 sps:$4 sm:$0xff]  }
0x2519   :  { %5051 = vmatprep.subr.bf16.mxu1 %v9462_v15  ;;  %v9504_v20 = vld [vmem:[%s11019_s27 + $0x3e4] ss:$24 sps:$4 sm:$0xff]   ;;  %v9510_v34 = vld [vmem:[%s11019_s27 + $0x414] ss:$24 sps:$4 sm:$0xff]   ;;  %v9457_v15 = vld [vmem:[%s11019_s27 + $0x288] ss:$24 sps:$4 sm:$0xff]  }
0x251a   :  { %v11483_v5 = vmul.f32 %v4304_v9, %v10842_v12  ;;  %v11486_v40 = vmul.f32 %v4305_v8, %v10839_v27  ;;  %v4310_v7 = vmul.f32 %v11477_v47, %v11477_v47  ;;  %v4311_v6 = vmul.f32 %v11480_v63, %v11480_v63  ;;  %v9508_v9 = vld [vmem:[%s11019_s27 + $0x410] ss:$24 sps:$4 sm:$0xff]  }
0x251b   :  { %5052 = vmatpush1.bf16.msra.mxu1 %v9460_v29  ;;  %v9465_v29 = vld [vmem:[%s11019_s27 + $0x2bc] ss:$24 sps:$4 sm:$0xff]  }
0x251c   :  { %v4314_v50 = vsel %vm420_vm11, %v4311_v6, 0.0  ;;  %v4313_v43 = vmul.f32 %v11486_v40, %v11486_v40  ;;  %v4312_v11 = vmul.f32 %v11483_v5, %v11483_v5  ;;  %5053 = vmatprep.subr.bf16.mxu1 %v9468_v23  ;;  %v9463_v23 = vld [vmem:[%s11019_s27 + $0x2b8] ss:$24 sps:$4 sm:$0xff]  }
0x251d   :  { %v4315_v59 = vadd.f32 %v4314_v50, %v4310_v7 }
0x251e   :  { %v4318_v14 = vsel %vm420_vm11, %v4313_v43, 0.0 }
0x251f   :  { %4316 = vadd.xlane.f32.xlu0 %v4315_v59  ;;  %v4319_v35 = vadd.f32 %v4318_v14, %v4312_v11 }
0x2523   :  { %4320 = vadd.xlane.f32.xlu0 %v4319_v35 }
0x25ac   :  { %v4317_v48 = vpop.xlane.xlu0 %4316 }
0x25ad   :  { %v4322_v1 = vmul.f32 0.0078125, %v4317_v48 }
0x25af   :  { %v4324_v52 = vadd.f32 1e-05, %v4322_v1 }
0x25b0   :  { %v4321_v44 = vpop.xlane.xlu0 %4320 }
0x25b1   :  { %9941 = vrsqrt.f32 %v4324_v52  ;;  %v4323_v33 = vmul.f32 0.0078125, %v4321_v44 }
0x25b3   :  { %v4325_v13 = vadd.f32 1e-05, %v4323_v33 }
0x25b5   :  { %9943 = vrsqrt.f32 %v4325_v13 }
0x25bb   :  { %v9942_v4 = vpop.eup %9941 }
0x25bc   :  { %v4328_v28 = vmul.f32 %v9942_v4, %v11415_v24 }
0x25be   :  { %4332 = vperm.xlu1 %9221, %v4328_v28  }
0x25bf   :  { %v9944_v17 = vpop.eup %9943 }
0x25c0   :  { %v4329_v55 = vmul.f32 %v9944_v17, %v11418_v45 }
0x25c2   :  { %9223 = vset.pattern.permute.xlu1 %v9965_v2  ;;  %4337 = vperm.xlu0 %9222, %v4329_v55   ;;  %v4366_v55 = vld [vmem:[%s11532_s21] sm:$0xf] }
0x25c3   :  { %4345 = vperm.xlu1 %9223, %v11415_v24   ;;  %v9466_v24 = vld [vmem:[%s11019_s27 + $0x2c0] ss:$24 sps:$4 sm:$0xff]  }
0x25c4   :  { %5054 = vmatpush1.bf16.msra.mxu1 %v9466_v24  ;;  %v9471_v24 = vld [vmem:[%s11019_s27 + $0x2ec] ss:$24 sps:$4 sm:$0xff]  }
0x25c6   :  { %9225 = vset.pattern.permute.xlu0 %v9958_v30 }
0x25c7   :  { %4349 = vperm.xlu1 %9223, %v11418_v45   ;;  %v9474_v45 = vld [vmem:[%s11019_s27 + $0x2f4] ss:$24 sps:$4 sm:$0xff]  }
0x25c8   :  { %5055 = vmatprep.subr.bf16.mxu1 %v9474_v45  ;;  %v9469_v45 = vld [vmem:[%s11019_s27 + $0x2e8] ss:$24 sps:$4 sm:$0xff]  }
0x25c9   :  { %5056 = vmatpush1.bf16.msra.mxu1 %v9472_v60  ;;  %v9477_v60 = vld [vmem:[%s11019_s27 + $0x31c] ss:$24 sps:$4 sm:$0xff]  }
0x25ca   :  { %5057 = vmatprep.subr.bf16.mxu1 %v9480_v53  ;;  %v9475_v53 = vld [vmem:[%s11019_s27 + $0x318] ss:$24 sps:$4 sm:$0xff]  }
0x25cb   :  { %9224 = vset.pattern.permute.xlu1 %v9958_v30 }
0x25cd   :  { %5058 = vmatpush1.bf16.msra.mxu1 %v9478_v42  ;;  %v9483_v42 = vld [vmem:[%s11019_s27 + $0x34c] ss:$24 sps:$4 sm:$0xff]  }
0x25ce   :  { %5059 = vmatprep.subr.bf16.mxu1 %v9486_v0  ;;  %v9481_v0 = vld [vmem:[%s11019_s27 + $0x348] ss:$24 sps:$4 sm:$0xff]  }
0x25d1   :  { %5060 = vmatpush1.bf16.msra.mxu1 %v9484_v10  ;;  %v9489_v10 = vld [vmem:[%s11019_s27 + $0x37c] ss:$24 sps:$4 sm:$0xff]  }
0x25d2   :  { %5061 = vmatprep.subr.bf16.mxu1 %v9492_v37  ;;  %v9487_v37 = vld [vmem:[%s11019_s27 + $0x378] ss:$24 sps:$4 sm:$0xff]  }
0x25d5   :  { %5062 = vmatpush1.bf16.msra.mxu1 %v9490_v19  ;;  %v9495_v19 = vld [vmem:[%s11019_s27 + $0x3ac] ss:$24 sps:$4 sm:$0xff]  }
0x25d6   :  { %5063 = vmatprep.subr.bf16.mxu1 %v9498_v3  ;;  %v9493_v3 = vld [vmem:[%s11019_s27 + $0x3a8] ss:$24 sps:$4 sm:$0xff]  }
0x25d9   :  { %5064 = vmatpush1.bf16.msra.mxu1 %v9496_v22  ;;  %v9501_v22 = vld [vmem:[%s11019_s27 + $0x3dc] ss:$24 sps:$4 sm:$0xff]  }
0x25da   :  { %5065 = vmatprep.subr.bf16.mxu1 %v9504_v20  ;;  %v9499_v20 = vld [vmem:[%s11019_s27 + $0x3d8] ss:$24 sps:$4 sm:$0xff]  }
0x25dd   :  { %5066 = vmatpush1.bf16.msra.mxu1 %v9502_v21  ;;  %v9507_v21 = vld [vmem:[%s11019_s27 + $0x40c] ss:$24 sps:$4 sm:$0xff]  }
0x25de   :  { %5067 = vmatprep.subr.bf16.mxu1 %v9510_v34  ;;  %v9505_v34 = vld [vmem:[%s11019_s27 + $0x408] ss:$24 sps:$4 sm:$0xff]  }
0x25e1   :  { %5068 = vmatpush1.bf16.msra.mxu1 %v9508_v9  ;;  %v9513_v9 = vld [vmem:[%s11019_s27 + $0x43c] ss:$24 sps:$4 sm:$0xff]  }
0x263d   :  { %v4333_v8 = vpop.permute.xlu1 %4332 }
0x263e   :  { %v4340_v7 = vmul.f32 %v4333_v8, %v11477_v47  ;;  %v4341_v6 = vmul.f32 %v4333_v8, %v11480_v63  ;;  %v9516_v8 = vld [vmem:[%s11019_s27 + $0x444] ss:$24 sps:$4 sm:$0xff]  }
0x263f   :  { %5069 = vmatprep.subr.bf16.mxu1 %v9516_v8  ;;  %v9556_v8 = vld [vmem:[%s11019_s27 + $0xc4] ss:$24 sps:$4 sm:$0xff]  }
0x2641   :  { %v4338_v50 = vpop.permute.xlu0 %4337 }
0x2642   :  { %v4346_v43 = vpop.permute.xlu1 %4345  ;;  %v4342_v14 = vmul.f32 %v4338_v50, %v11483_v5  ;;  %v4343_v35 = vmul.f32 %v4338_v50, %v11486_v40  ;;  %v9519_v50 = vld [vmem:[%s11019_s27 + $0x46c] ss:$24 sps:$4 sm:$0xff]  }
0x2643   :  { %v4352_v59 = vadd.f32 %v4346_v43, %v4340_v7  ;;  %v4353_v11 = vadd.f32 %v4346_v43, %v4341_v6  ;;  %v9511_v7 = vld [vmem:[%s11019_s27 + $0x438] ss:$24 sps:$4 sm:$0xff]   ;;  %v9522_v43 = vld [vmem:[%s11019_s27 + $0x474] ss:$24 sps:$4 sm:$0xff]  }
0x2644   :  { %v9514_v6 = vld [vmem:[%s11019_s27 + $0x440] ss:$24 sps:$4 sm:$0xff]  }
0x2645   :  { %v4356_v1 = vmax.f32 %v4352_v59, 0.0  ;;  %v4357_v52 = vmax.f32 %v4353_v11, 0.0  ;;  %5070 = vmatpush1.bf16.msra.mxu1 %v9514_v6  ;;  %v9517_v59 = vld [vmem:[%s11019_s27 + $0x468] ss:$24 sps:$4 sm:$0xff]  }
0x2646   :  { %v4350_v48 = vpop.permute.xlu1 %4349  ;;  %v9520_v11 = vld [vmem:[%s11019_s27 + $0x470] ss:$24 sps:$4 sm:$0xff]   ;;  %5071 = vmatprep.subr.bf16.mxu1 %v9522_v43  ;;  %v9554_v6 = vld [vmem:[%s11019_s27 + $0xc0] ss:$24 sps:$4 sm:$0xff]   ;;  %v9562_v43 = vld [vmem:[%s11019_s27 + $0xf4] ss:$24 sps:$4 sm:$0xff]  }
0x2647   :  { %v4354_v44 = vadd.f32 %v4350_v48, %v4342_v14  ;;  %v4355_v33 = vadd.f32 %v4350_v48, %v4343_v35  ;;  %v4360_v5 = vmul.f32 %v4356_v1, %v10842_v12  ;;  %v4361_v40 = vmul.f32 %v4357_v52, %v10839_v27  ;;  %v8458_v14 = vld [vmem:[%s11019_s27 + $0x498] sm:$0xff]  ;;  %v8459_v35 = vld [vmem:[%s11019_s27 + $0x4a0] sm:$0xff] }
0x2648   :  { %v8534_v48 = vcombine.high %v8458_v14, %v8458_v14  ;;  %v8536_v1 = vcombine.high %v8459_v35, %v8459_v35  ;;  %v8533_v52 = vcombine.low %v8458_v14, %v8458_v14  ;;  %v9565_v14 = vld [vmem:[%s11019_s27 + $0x38c] ss:$24 sps:$4 sm:$0xff]  }
0x2649   :  { %v4358_v47 = vmax.f32 %v4354_v44, 0.0  ;;  %v4359_v63 = vmax.f32 %v4355_v33, 0.0  ;;  %5072 = vmatpush1.bf16.msra.mxu1 %v9520_v11  ;;  %v8535_v44 = vcombine.low %v8459_v35, %v8459_v35  ;;  %v9560_v11 = vld [vmem:[%s11019_s27 + $0xf0] ss:$24 sps:$4 sm:$0xff]   ;;  %v9568_v35 = vld [vmem:[%s11019_s27 + $0x124] ss:$24 sps:$4 sm:$0xff]  }
0x264a   :  { %8541 = vmatprep.subr.msk.bf16.mxu1 %vm324_vm3, %v8536_v1  ;;  %v4991_v33 = vsel %vm324_vm3, %v8533_v52, 0  ;;  %v9566_v1 = vld [vmem:[%s11019_s27 + $0x120] ss:$24 sps:$4 sm:$0xff]   ;;  %v9571_v52 = vld [vmem:[%s11019_s27 + $0x3bc] ss:$24 sps:$4 sm:$0xff]  }
0x264b   :  { %v4362_v13 = vmul.f32 %v4358_v47, %v10842_v12  ;;  %v4363_v4 = vmul.f32 %v4359_v63, %v10839_v27  ;;  %v8384_v27 = vld [vmem:[%s11532_s21 + $0x4] sm:$0xf]  ;;  %v9451_v12 = vld [vmem:[%s11019_s27 + $0x258] ss:$24 sps:$4 sm:$0xff]   ;;  %v4997_v47 = vsel %vm324_vm3, %v8535_v44, 0 }
0x264c   :  { %v9529_v63 = vld [vmem:[%s11019_s27 + $0x26c] ss:$24 sps:$4 sm:$0xff]  }
0x264d   :  { %v11538_v28 = vpack.c.bf16 %v4363_v4, %v4361_v40  ;;  %v11540_v17 = vpack.c.bf16 %v4362_v13, %v4360_v5  ;;  %5074 = vmatpush1.bf16.msra.mxu1 %v4997_v47  ;;  %v9532_v5 = vld [vmem:[%s11019_s27 + $0x4] ss:$24 sps:$4 sm:$0xff]   ;;  %v9574_v44 = vld [vmem:[%s11019_s27 + $0x154] ss:$24 sps:$4 sm:$0xff]   ;;  %v9572_v47 = vld [vmem:[%s11019_s27 + $0x150] ss:$24 sps:$4 sm:$0xff]  }
0x264e   :  { %5527 = vmatprep.subr.bf16.mxu1 %v9532_v5  ;;  %v9580_v5 = vld [vmem:[%s11019_s27 + $0x184] ss:$24 sps:$4 sm:$0xff]  }
0x264f   :  { %4370 = vmatprep.subr.bf16.mxu0 %v11538_v28 }
0x2650   :  { %4371 = vmatpush1.bf16.msra.mxu0 %v11540_v17 }
0x2651   :  { %4493 = vmatprep.subr.bf16.mxu0 %v11538_v28 }
0x2653   :  { %8383 = vmatmul.mubr.msk.bf16.vlgmr.msra.gmra.mrb[40].mxu0 %vm2250_vm5, %v4366_v55 }
0x2654   :  { %4494 = vmatpush1.bf16.msra.mxu0 %v11540_v17  ;;  %4525 = vmatprep.mubr.bf16.mxu0 %v9958_v30 }
0x2655   :  { %5008 = vmatprep.subr.bf16.mxu0 %v9453_v41 }
0x265b   :  { %8385 = vmatmul.mubr.msk.bf16.vlgmr.msra.gmra.mrb[44].mxu0 %vm2250_vm5, %v8384_v27 }
0x265c   :  { %5009 = vmatpush1.bf16.msra.mxu0 %v9451_v12 }
0x265d   :  { %5010 = vmatprep.subr.bf16.mxu0 %v9459_v56 }
0x2660   :  { %5011 = vmatpush1.bf16.msra.mxu0 %v9457_v15  ;;  %v9527_v15 = vld [vmem:[%s11019_s27 + $0x268] ss:$24 sps:$4 sm:$0xff]  }
0x2661   :  { %5012 = vmatprep.subr.bf16.mxu0 %v9465_v29  ;;  %v9530_v29 = vld [vmem:[%s11019_s27] ss:$24 sps:$4 sm:$0xff]  }
0x2664   :  { %5013 = vmatpush1.bf16.msra.mxu0 %v9463_v23 }
0x2665   :  { %5014 = vmatprep.subr.bf16.mxu0 %v9471_v24 }
0x2668   :  { %5015 = vmatpush1.bf16.msra.mxu0 %v9469_v45  ;;  %v9535_v45 = vld [vmem:[%s11019_s27 + $0x29c] ss:$24 sps:$4 sm:$0xff]  }
0x2669   :  { %5016 = vmatprep.subr.bf16.mxu0 %v9477_v60  ;;  %v9538_v60 = vld [vmem:[%s11019_s27 + $0x34] ss:$24 sps:$4 sm:$0xff]  }
0x266c   :  { %5017 = vmatpush1.bf16.msra.mxu0 %v9475_v53 }
0x266d   :  { %5018 = vmatprep.subr.bf16.mxu0 %v9483_v42  ;;  %v9533_v42 = vld [vmem:[%s11019_s27 + $0x298] ss:$24 sps:$4 sm:$0xff]  }
0x2670   :  { %5019 = vmatpush1.bf16.msra.mxu0 %v9481_v0  ;;  %v9536_v0 = vld [vmem:[%s11019_s27 + $0x30] ss:$24 sps:$4 sm:$0xff]  }
0x2671   :  { %5020 = vmatprep.subr.bf16.mxu0 %v9489_v10  ;;  %v9541_v10 = vld [vmem:[%s11019_s27 + $0x2cc] ss:$24 sps:$4 sm:$0xff]  }
0x2674   :  { %5021 = vmatpush1.bf16.msra.mxu0 %v9487_v37  ;;  %v9544_v37 = vld [vmem:[%s11019_s27 + $0x64] ss:$24 sps:$4 sm:$0xff]  }
0x2675   :  { %5022 = vmatprep.subr.bf16.mxu0 %v9495_v19  ;;  %v9539_v19 = vld [vmem:[%s11019_s27 + $0x2c8] ss:$24 sps:$4 sm:$0xff]  }
0x2678   :  { %5023 = vmatpush1.bf16.msra.mxu0 %v9493_v3  ;;  %v9542_v3 = vld [vmem:[%s11019_s27 + $0x60] ss:$24 sps:$4 sm:$0xff]  }
0x2679   :  { %5024 = vmatprep.subr.bf16.mxu0 %v9501_v22  ;;  %v9547_v22 = vld [vmem:[%s11019_s27 + $0x2fc] ss:$24 sps:$4 sm:$0xff]  }
0x267c   :  { %5025 = vmatpush1.bf16.msra.mxu0 %v9499_v20  ;;  %v9550_v20 = vld [vmem:[%s11019_s27 + $0x94] ss:$24 sps:$4 sm:$0xff]  }
0x267d   :  { %5026 = vmatprep.subr.bf16.mxu0 %v9507_v21  ;;  %v9545_v21 = vld [vmem:[%s11019_s27 + $0x2f8] ss:$24 sps:$4 sm:$0xff]  }
0x2680   :  { %5027 = vmatpush1.bf16.msra.mxu0 %v9505_v34  ;;  %v9548_v34 = vld [vmem:[%s11019_s27 + $0x90] ss:$24 sps:$4 sm:$0xff]  }
0x2681   :  { %5028 = vmatprep.subr.bf16.mxu0 %v9513_v9  ;;  %v9553_v9 = vld [vmem:[%s11019_s27 + $0x32c] ss:$24 sps:$4 sm:$0xff]  }
0x2684   :  { %5029 = vmatpush1.bf16.msra.mxu0 %v9511_v7  ;;  %v9551_v7 = vld [vmem:[%s11019_s27 + $0x328] ss:$24 sps:$4 sm:$0xff]  }
0x2685   :  { %5030 = vmatprep.subr.bf16.mxu0 %v9519_v50  ;;  %v9559_v50 = vld [vmem:[%s11019_s27 + $0x35c] ss:$24 sps:$4 sm:$0xff]  }
0x2688   :  { %5031 = vmatpush1.bf16.msra.mxu0 %v9517_v59  ;;  %v9557_v59 = vld [vmem:[%s11019_s27 + $0x358] ss:$24 sps:$4 sm:$0xff]  }
0x2689   :  { %8539 = vmatprep.subr.msk.bf16.mxu0 %vm324_vm3, %v8534_v48  ;;  %v9563_v48 = vld [vmem:[%s11019_s27 + $0x388] ss:$24 sps:$4 sm:$0xff]  }
0x268c   :  { %5033 = vmatpush1.bf16.msra.mxu0 %v4991_v33  ;;  %v9569_v33 = vld [vmem:[%s11019_s27 + $0x3b8] ss:$24 sps:$4 sm:$0xff]  }
0x268d   :  { %5090 = vmatprep.subr.bf16.mxu0 %v9529_v63  ;;  %v9577_v63 = vld [vmem:[%s11019_s27 + $0x3ec] ss:$24 sps:$4 sm:$0xff]  }
0x2726   :  { %v11587_v40 = vpop.f32.mrb[40].mxu0 }
0x2727   :  { %v4406_v13 = vpop.f32.mrb[41].mxu0 }
0x2728   :  { %v4408_v4 = vpop.f32.mrb[42].mxu0  ;;  %v11597_v53 = vpack.c.bf16 %v4406_v13, %v4406_v13  ;;  %v9575_v13 = vld [vmem:[%s11019_s27 + $0x3e8] ss:$24 sps:$4 sm:$0xff]  }
0x2729   :  { %v4409_v55 = vpop.f32.mrb[43].mxu0  ;;  %v9578_v4 = vld [vmem:[%s11019_s27 + $0x180] ss:$24 sps:$4 sm:$0xff]  }
0x272a   :  { %v9583_v55 = vld [vmem:[%s11019_s27 + $0x41c] ss:$24 sps:$4 sm:$0xff]  }
0x272e   :  { %v4527_v41 = vpop.f32.mrb[44].mxu0 }
0x272f   :  { %v4529_v27 = vpop.f32.mrb[45].mxu0  ;;  %v11591_v23 = vpack.c.bf16 %v4527_v41, %v4527_v41  ;;  %v9586_v41 = vld [vmem:[%s11019_s27 + $0x1b4] ss:$24 sps:$4 sm:$0xff]  }
0x2730   :  { %v4535_v12 = vpack.c.bf16 %v4529_v27, %v4529_v27  ;;  %v4531_v56 = vpop.f32.mrb[46].mxu0  ;;  %v9581_v27 = vld [vmem:[%s11019_s27 + $0x418] ss:$24 sps:$4 sm:$0xff]  }
0x2731   :  { %v4532_v24 = vpop.f32.mrb[47].mxu0  ;;  %v9589_v56 = vld [vmem:[%s11019_s27 + $0x44c] ss:$24 sps:$4 sm:$0xff]  }
0x2732   :  { %8540 = vmatprep.mubr.msk.bf16.mxu0 %vm420_vm11, %v4535_v12  ;;  %8542 = vmatprep.mubr.msk.bf16.mxu1 %vm420_vm11, %v4535_v12  ;;  %v9590_v24 = vld [vmem:[%s11019_s27 + $0x1e0] ss:$24 sps:$4 sm:$0xff]  }
0x2733   :  { %5041 = vmatmul.mubr.bf16.vlgmr.msra.gmra.mrb[48].mxu0 %v11591_v23  ;;  %5082 = vmatmul.mubr.bf16.vlgmr.msra.gmra.mrb[48].mxu1 %v11591_v23 }
0x2734   :  { %5091 = vmatpush1.bf16.msra.mxu0 %v9527_v15  ;;  %5528 = vmatpush1.bf16.msra.mxu1 %v9530_v29  ;;  %v9592_v15 = vld [vmem:[%s11019_s27 + $0x1e4] ss:$24 sps:$4 sm:$0xff]   ;;  %v9587_v29 = vld [vmem:[%s11019_s27 + $0x448] ss:$24 sps:$4 sm:$0xff]  }
0x2735   :  { %8544 = vmatprep.mubr.msk.bf16.mxu0 %vm420_vm11, %v4535_v12  ;;  %8624 = vmatprep.mubr.msk.bf16.mxu1 %vm420_vm11, %v11597_v53  ;;  %v9584_v12 = vld [vmem:[%s11019_s27 + $0x1b0] ss:$24 sps:$4 sm:$0xff]  }
0x2736   :  { %5092 = vmatprep.subr.bf16.mxu0 %v9535_v45  ;;  %5529 = vmatprep.subr.bf16.mxu1 %v9538_v60  ;;  %v9595_v45 = vld [vmem:[%s11019_s27 + $0x47c] ss:$24 sps:$4 sm:$0xff]  }
0x2737   :  { %v9598_v60 = vld [vmem:[%s11019_s27 + $0x214] ss:$24 sps:$4 sm:$0xff]  }
0x2738   :  { %5093 = vmatpush1.bf16.msra.mxu0 %v9533_v42  ;;  %5530 = vmatpush1.bf16.msra.mxu1 %v9536_v0  ;;  %v8460_v42 = vld [vmem:[%s11019_s27 + $0x4a8] sm:$0xff]  ;;  %v4485_v0 = vld [vmem:[%s11019_s27 + $0x240] sm:$0xff] }
0x2739   :  { %5094 = vmatprep.subr.bf16.mxu0 %v9541_v10  ;;  %5531 = vmatprep.subr.bf16.mxu1 %v9544_v37  ;;  %v9593_v10 = vld [vmem:[%s11019_s27 + $0x478] ss:$24 sps:$4 sm:$0xff]  }
0x273a   :  { %v9596_v37 = vld [vmem:[%s11019_s27 + $0x210] ss:$24 sps:$4 sm:$0xff]  }
0x273c   :  { %5095 = vmatpush1.bf16.msra.mxu0 %v9539_v19  ;;  %5532 = vmatpush1.bf16.msra.mxu1 %v9542_v3  ;;  %v8538_v19 = vcombine.high %v8460_v42, %v8460_v42  ;;  %v8618_v3 = vcombine.high %v4485_v0, %v4485_v0 }
0x273d   :  { %5096 = vmatprep.subr.bf16.mxu0 %v9547_v22  ;;  %5533 = vmatprep.subr.bf16.mxu1 %v9550_v20  ;;  %v8537_v22 = vcombine.low %v8460_v42, %v8460_v42  ;;  %v8617_v20 = vcombine.low %v4485_v0, %v4485_v0  ;;  %v9653_v42 = vld [vmem:[%s11019_s27 + $0x18c] ss:$24 sps:$4 sm:$0xff]  }
0x273e   :  { %v9656_v0 = vld [vmem:[%s11019_s27 + $0x194] ss:$24 sps:$4 sm:$0xff]  }
0x2740   :  { %5097 = vmatpush1.bf16.msra.mxu0 %v9545_v21  ;;  %5534 = vmatpush1.bf16.msra.mxu1 %v9548_v34  ;;  %v5003_v21 = vsel %vm324_vm3, %v8537_v22, 0  ;;  %v5510_v34 = vsel %vm324_vm3, %v8617_v20, 0  ;;  %v9657_v22 = vld [vmem:[%s11019_s27 + $0x1b8] ss:$24 sps:$4 sm:$0xff]  }
0x2741   :  { %5098 = vmatprep.subr.bf16.mxu0 %v9553_v9  ;;  %5535 = vmatprep.subr.bf16.mxu1 %v9556_v8  ;;  %v9605_v9 = vld [vmem:[%s11019_s27 + $0xc] ss:$24 sps:$4 sm:$0xff]   ;;  %v9660_v20 = vld [vmem:[%s11019_s27 + $0x1c0] ss:$24 sps:$4 sm:$0xff]  }
0x2742   :  { %v9608_v8 = vld [vmem:[%s11019_s27 + $0x14] ss:$24 sps:$4 sm:$0xff]  }
0x2744   :  { %5099 = vmatpush1.bf16.msra.mxu0 %v9551_v7  ;;  %5536 = vmatpush1.bf16.msra.mxu1 %v9554_v6  ;;  %v9603_v7 = vld [vmem:[%s11019_s27 + $0x8] ss:$24 sps:$4 sm:$0xff]   ;;  %v11657_v6 = vpack.c.bf16 %v11587_v40, %v11587_v40  ;;  %v9609_v40 = vld [vmem:[%s11019_s27 + $0x38] ss:$24 sps:$4 sm:$0xff]  }
0x2745   :  { %5100 = vmatprep.subr.bf16.mxu0 %v9559_v50  ;;  %5537 = vmatprep.subr.bf16.mxu1 %v9562_v43  ;;  %v9606_v50 = vld [vmem:[%s11019_s27 + $0x10] ss:$24 sps:$4 sm:$0xff]   ;;  %v9611_v43 = vld [vmem:[%s11019_s27 + $0x3c] ss:$24 sps:$4 sm:$0xff]  }
0x2748   :  { %5101 = vmatpush1.bf16.msra.mxu0 %v9557_v59  ;;  %5538 = vmatpush1.bf16.msra.mxu1 %v9560_v11  ;;  %v9614_v59 = vld [vmem:[%s11019_s27 + $0x44] ss:$24 sps:$4 sm:$0xff]   ;;  %v9612_v11 = vld [vmem:[%s11019_s27 + $0x40] ss:$24 sps:$4 sm:$0xff]  }
0x2749   :  { %5102 = vmatprep.subr.bf16.mxu0 %v9565_v14  ;;  %5539 = vmatprep.subr.bf16.mxu1 %v9568_v35  ;;  %v9617_v14 = vld [vmem:[%s11019_s27 + $0x6c] ss:$24 sps:$4 sm:$0xff]   ;;  %v9615_v35 = vld [vmem:[%s11019_s27 + $0x68] ss:$24 sps:$4 sm:$0xff]  }
0x274c   :  { %5103 = vmatpush1.bf16.msra.mxu0 %v9563_v48  ;;  %5540 = vmatpush1.bf16.msra.mxu1 %v9566_v1  ;;  %v9618_v48 = vld [vmem:[%s11019_s27 + $0x70] ss:$24 sps:$4 sm:$0xff]   ;;  %v9623_v1 = vld [vmem:[%s11019_s27 + $0x9c] ss:$24 sps:$4 sm:$0xff]  }
0x274d   :  { %5104 = vmatprep.subr.bf16.mxu0 %v9571_v52  ;;  %5541 = vmatprep.subr.bf16.mxu1 %v9574_v44  ;;  %v9626_v52 = vld [vmem:[%s11019_s27 + $0xa4] ss:$24 sps:$4 sm:$0xff]   ;;  %v9624_v44 = vld [vmem:[%s11019_s27 + $0xa0] ss:$24 sps:$4 sm:$0xff]  }
0x2750   :  { %5105 = vmatpush1.bf16.msra.mxu0 %v9569_v33  ;;  %5542 = vmatpush1.bf16.msra.mxu1 %v9572_v47  ;;  %v9629_v33 = vld [vmem:[%s11019_s27 + $0xcc] ss:$24 sps:$4 sm:$0xff]  }
0x2751   :  { %5106 = vmatprep.subr.bf16.mxu0 %v9577_v63  ;;  %5543 = vmatprep.subr.bf16.mxu1 %v9580_v5  ;;  %v9632_v47 = vld [vmem:[%s11019_s27 + $0xd4] ss:$24 sps:$4 sm:$0xff]   ;;  %v9627_v63 = vld [vmem:[%s11019_s27 + $0xc8] ss:$24 sps:$4 sm:$0xff]  }
0x2752   :  { %v9630_v5 = vld [vmem:[%s11019_s27 + $0xd0] ss:$24 sps:$4 sm:$0xff]  }
0x2754   :  { %5107 = vmatpush1.bf16.msra.mxu0 %v9575_v13  ;;  %5544 = vmatpush1.bf16.msra.mxu1 %v9578_v4  ;;  %v9635_v13 = vld [vmem:[%s11019_s27 + $0xfc] ss:$24 sps:$4 sm:$0xff]  }
0x2755   :  { %5108 = vmatprep.subr.bf16.mxu0 %v9583_v55  ;;  %5545 = vmatprep.subr.bf16.mxu1 %v9586_v41  ;;  %v9638_v4 = vld [vmem:[%s11019_s27 + $0x104] ss:$24 sps:$4 sm:$0xff]   ;;  %v9633_v55 = vld [vmem:[%s11019_s27 + $0xf8] ss:$24 sps:$4 sm:$0xff]  }
0x2756   :  { %v9636_v41 = vld [vmem:[%s11019_s27 + $0x100] ss:$24 sps:$4 sm:$0xff]  }
0x2758   :  { %5109 = vmatpush1.bf16.msra.mxu0 %v9581_v27  ;;  %5546 = vmatpush1.bf16.msra.mxu1 %v9584_v12  ;;  %v9641_v27 = vld [vmem:[%s11019_s27 + $0x12c] ss:$24 sps:$4 sm:$0xff]  }
0x2759   :  { %5110 = vmatprep.subr.bf16.mxu0 %v9589_v56  ;;  %5547 = vmatprep.subr.bf16.mxu1 %v9592_v15  ;;  %v9644_v12 = vld [vmem:[%s11019_s27 + $0x134] ss:$24 sps:$4 sm:$0xff]   ;;  %v9639_v56 = vld [vmem:[%s11019_s27 + $0x128] ss:$24 sps:$4 sm:$0xff]  }
0x275a   :  { %v9642_v15 = vld [vmem:[%s11019_s27 + $0x130] ss:$24 sps:$4 sm:$0xff]  }
0x275c   :  { %5111 = vmatpush1.bf16.msra.mxu0 %v9587_v29  ;;  %5548 = vmatpush1.bf16.msra.mxu1 %v9590_v24  ;;  %v9647_v29 = vld [vmem:[%s11019_s27 + $0x15c] ss:$24 sps:$4 sm:$0xff]  }
0x275d   :  { %5112 = vmatprep.subr.bf16.mxu0 %v9595_v45  ;;  %5549 = vmatprep.subr.bf16.mxu1 %v9598_v60  ;;  %v9650_v24 = vld [vmem:[%s11019_s27 + $0x164] ss:$24 sps:$4 sm:$0xff]   ;;  %v9645_v45 = vld [vmem:[%s11019_s27 + $0x158] ss:$24 sps:$4 sm:$0xff]  }
0x275e   :  { %v9648_v60 = vld [vmem:[%s11019_s27 + $0x160] ss:$24 sps:$4 sm:$0xff]  }
0x2760   :  { %5113 = vmatpush1.bf16.msra.mxu0 %v9593_v10  ;;  %5550 = vmatpush1.bf16.msra.mxu1 %v9596_v37  ;;  %v9651_v10 = vld [vmem:[%s11019_s27 + $0x188] ss:$24 sps:$4 sm:$0xff]  }
0x2761   :  { %8543 = vmatprep.subr.msk.bf16.mxu0 %vm324_vm3, %v8538_v19  ;;  %8623 = vmatprep.subr.msk.bf16.mxu1 %vm324_vm3, %v8618_v3  ;;  %v9654_v37 = vld [vmem:[%s11019_s27 + $0x190] ss:$24 sps:$4 sm:$0xff]   ;;  %v9659_v19 = vld [vmem:[%s11019_s27 + $0x1bc] ss:$24 sps:$4 sm:$0xff]  }
0x2762   :  { %v9662_v3 = vld [vmem:[%s11019_s27 + $0x1c4] ss:$24 sps:$4 sm:$0xff]  }
0x2764   :  { %5115 = vmatpush1.bf16.msra.mxu0 %v5003_v21  ;;  %5552 = vmatpush1.bf16.msra.mxu1 %v5510_v34  ;;  %v9665_v21 = vld [vmem:[%s11019_s27 + $0x1ec] ss:$24 sps:$4 sm:$0xff]  }
0x2765   :  { %5568 = vmatprep.subr.bf16.mxu0 %v9605_v9  ;;  %5609 = vmatprep.subr.bf16.mxu1 %v9608_v8  ;;  %v9668_v34 = vld [vmem:[%s11019_s27 + $0x1f4] ss:$24 sps:$4 sm:$0xff]   ;;  %v9663_v9 = vld [vmem:[%s11019_s27 + $0x1e8] ss:$24 sps:$4 sm:$0xff]  }
0x2766   :  { %v9666_v8 = vld [vmem:[%s11019_s27 + $0x1f0] ss:$24 sps:$4 sm:$0xff]  }
0x2767   :  { %5123 = vmatmul.mubr.bf16.vlgmr.msra.gmra.mrb[52].mxu0 %v11591_v23  ;;  %5560 = vmatmul.mubr.bf16.vlgmr.msra.gmra.mrb[52].mxu1 %v11657_v6  ;;  %v9620_v23 = vld [vmem:[%s11019_s27 + $0x74] ss:$24 sps:$4 sm:$0xff]  }
0x2768   :  { %5569 = vmatpush1.bf16.msra.mxu0 %v9603_v7  ;;  %8626 = vmatprep.mubr.msk.bf16.mxu0 %vm420_vm11, %v11597_v53  ;;  %v9671_v7 = vld [vmem:[%s11019_s27 + $0x21c] ss:$24 sps:$4 sm:$0xff]  }
0x2769   :  { %5610 = vmatpush1.bf16.msra.mxu1 %v9606_v50  ;;  %8628 = vmatprep.mubr.msk.bf16.mxu1 %vm420_vm11, %v11597_v53  ;;  %v9621_v53 = vld [vmem:[%s11019_s27 + $0x98] ss:$24 sps:$4 sm:$0xff]   ;;  %v9674_v50 = vld [vmem:[%s11019_s27 + $0x224] ss:$24 sps:$4 sm:$0xff]  }
0x276a   :  { %5570 = vmatprep.subr.bf16.mxu0 %v9611_v43  ;;  %5611 = vmatprep.subr.bf16.mxu1 %v9614_v59  ;;  %v4486_v43 = vld [vmem:[%s11019_s27 + $0x248] sm:$0xff]  ;;  %v4487_v59 = vld [vmem:[%s11019_s27 + $0x250] sm:$0xff] }
0x276c   :  { %5571 = vmatpush1.bf16.msra.mxu0 %v9609_v40  ;;  %v9669_v40 = vld [vmem:[%s11019_s27 + $0x218] ss:$24 sps:$4 sm:$0xff]  }
0x276d   :  { %5612 = vmatpush1.bf16.msra.mxu1 %v9612_v11  ;;  %5572 = vmatprep.subr.bf16.mxu0 %v9617_v14  ;;  %v9672_v11 = vld [vmem:[%s11019_s27 + $0x220] ss:$24 sps:$4 sm:$0xff]   ;;  %v8620_v14 = vcombine.high %v4486_v43, %v4486_v43 }
0x276e   :  { %5613 = vmatprep.subr.bf16.mxu1 %v9620_v23  ;;  %v8619_v23 = vcombine.low %v4486_v43, %v4486_v43  ;;  %v8704_v43 = vld [vmem:[%s11019_s27 + $0x6f8] sm:$0xff] }
0x2770   :  { %5573 = vmatpush1.bf16.msra.mxu0 %v9615_v35  ;;  %v8622_v35 = vcombine.high %v4487_v59, %v4487_v59 }
0x2771   :  { %5614 = vmatpush1.bf16.msra.mxu1 %v9618_v48  ;;  %5574 = vmatprep.subr.bf16.mxu0 %v9623_v1  ;;  %v8621_v48 = vcombine.low %v4487_v59, %v4487_v59  ;;  %v5516_v1 = vsel %vm324_vm3, %v8619_v23, 0  ;;  %v9712_v59 = vld [vmem:[%s11019_s27 + $0x6c8] ss:$24 sps:$4 sm:$0xff]   ;;  %v9734_v23 = vld [vmem:[%s11019_s27 + $0x5a4] ss:$24 sps:$4 sm:$0xff]  }
0x2772   :  { %5615 = vmatprep.subr.bf16.mxu1 %v9626_v52 }
0x2773   :  { %v5522_v52 = vsel %vm324_vm3, %v8621_v48, 0 }
0x2774   :  { %5575 = vmatpush1.bf16.msra.mxu0 %v9621_v53  ;;  %v9681_v53 = vld [vmem:[%s11019_s27 + $0x4bc] ss:$24 sps:$4 sm:$0xff]  }
0x2775   :  { %5616 = vmatpush1.bf16.msra.mxu1 %v9624_v44  ;;  %5576 = vmatprep.subr.bf16.mxu0 %v9629_v33  ;;  %v9679_v44 = vld [vmem:[%s11019_s27 + $0x4b8] ss:$24 sps:$4 sm:$0xff]   ;;  %v8629_v33 = vld [vmem:[%s11532_s21 + $0x8] sm:$0xf] }
0x2776   :  { %5617 = vmatprep.subr.bf16.mxu1 %v9632_v47  ;;  %v9684_v47 = vld [vmem:[%s11019_s27 + $0x4ec] ss:$24 sps:$4 sm:$0xff]  }
0x2778   :  { %5577 = vmatpush1.bf16.msra.mxu0 %v9627_v63  ;;  %v9682_v63 = vld [vmem:[%s11019_s27 + $0x4e8] ss:$24 sps:$4 sm:$0xff]  }
0x2779   :  { %5618 = vmatpush1.bf16.msra.mxu1 %v9630_v5  ;;  %5578 = vmatprep.subr.bf16.mxu0 %v9635_v13  ;;  %v9687_v5 = vld [vmem:[%s11019_s27 + $0x51c] ss:$24 sps:$4 sm:$0xff]   ;;  %v9690_v13 = vld [vmem:[%s11019_s27 + $0x54c] ss:$24 sps:$4 sm:$0xff]  }
0x277a   :  { %5619 = vmatprep.subr.bf16.mxu1 %v9638_v4  ;;  %v9688_v4 = vld [vmem:[%s11019_s27 + $0x548] ss:$24 sps:$4 sm:$0xff]  }
0x277c   :  { %5579 = vmatpush1.bf16.msra.mxu0 %v9633_v55  ;;  %v9693_v55 = vld [vmem:[%s11019_s27 + $0x57c] ss:$24 sps:$4 sm:$0xff]  }
0x277d   :  { %5620 = vmatpush1.bf16.msra.mxu1 %v9636_v41  ;;  %5580 = vmatprep.subr.bf16.mxu0 %v9641_v27  ;;  %v9691_v41 = vld [vmem:[%s11019_s27 + $0x578] ss:$24 sps:$4 sm:$0xff]   ;;  %v9696_v27 = vld [vmem:[%s11019_s27 + $0x5ac] ss:$24 sps:$4 sm:$0xff]  }
0x277e   :  { %5621 = vmatprep.subr.bf16.mxu1 %v9644_v12  ;;  %v9694_v12 = vld [vmem:[%s11019_s27 + $0x5a8] ss:$24 sps:$4 sm:$0xff]  }
0x2780   :  { %5581 = vmatpush1.bf16.msra.mxu0 %v9639_v56  ;;  %v9699_v56 = vld [vmem:[%s11019_s27 + $0x5dc] ss:$24 sps:$4 sm:$0xff]  }
0x2781   :  { %5622 = vmatpush1.bf16.msra.mxu1 %v9642_v15  ;;  %5582 = vmatprep.subr.bf16.mxu0 %v9647_v29  ;;  %v9697_v15 = vld [vmem:[%s11019_s27 + $0x5d8] ss:$24 sps:$4 sm:$0xff]   ;;  %v9702_v29 = vld [vmem:[%s11019_s27 + $0x60c] ss:$24 sps:$4 sm:$0xff]  }
0x2782   :  { %5623 = vmatprep.subr.bf16.mxu1 %v9650_v24  ;;  %v9700_v24 = vld [vmem:[%s11019_s27 + $0x608] ss:$24 sps:$4 sm:$0xff]  }
0x2784   :  { %5583 = vmatpush1.bf16.msra.mxu0 %v9645_v45  ;;  %v9705_v45 = vld [vmem:[%s11019_s27 + $0x63c] ss:$24 sps:$4 sm:$0xff]  }
0x2785   :  { %5624 = vmatpush1.bf16.msra.mxu1 %v9648_v60  ;;  %5584 = vmatprep.subr.bf16.mxu0 %v9653_v42  ;;  %v9717_v60 = vld [vmem:[%s11019_s27 + $0x4b0] ss:$24 sps:$4 sm:$0xff]   ;;  %v9719_v42 = vld [vmem:[%s11019_s27 + $0x4b4] ss:$24 sps:$4 sm:$0xff]  }
0x2786   :  { %5625 = vmatprep.subr.bf16.mxu1 %v9656_v0  ;;  %v9722_v0 = vld [vmem:[%s11019_s27 + $0x4e4] ss:$24 sps:$4 sm:$0xff]  }
0x2788   :  { %5585 = vmatpush1.bf16.msra.mxu0 %v9651_v10  ;;  %v9703_v10 = vld [vmem:[%s11019_s27 + $0x638] ss:$24 sps:$4 sm:$0xff]  }
0x2789   :  { %5626 = vmatpush1.bf16.msra.mxu1 %v9654_v37  ;;  %5586 = vmatprep.subr.bf16.mxu0 %v9659_v19  ;;  %v9720_v37 = vld [vmem:[%s11019_s27 + $0x4e0] ss:$24 sps:$4 sm:$0xff]   ;;  %v9708_v19 = vld [vmem:[%s11019_s27 + $0x66c] ss:$24 sps:$4 sm:$0xff]  }
0x278a   :  { %5627 = vmatprep.subr.bf16.mxu1 %v9662_v3  ;;  %v9725_v3 = vld [vmem:[%s11019_s27 + $0x514] ss:$24 sps:$4 sm:$0xff]  }
0x278c   :  { %5587 = vmatpush1.bf16.msra.mxu0 %v9657_v22  ;;  %v9706_v22 = vld [vmem:[%s11019_s27 + $0x668] ss:$24 sps:$4 sm:$0xff]  }
0x278d   :  { %5628 = vmatpush1.bf16.msra.mxu1 %v9660_v20  ;;  %5588 = vmatprep.subr.bf16.mxu0 %v9665_v21  ;;  %v9723_v20 = vld [vmem:[%s11019_s27 + $0x510] ss:$24 sps:$4 sm:$0xff]   ;;  %v9711_v21 = vld [vmem:[%s11019_s27 + $0x69c] ss:$24 sps:$4 sm:$0xff]  }
0x278e   :  { %5629 = vmatprep.subr.bf16.mxu1 %v9668_v34  ;;  %v9728_v34 = vld [vmem:[%s11019_s27 + $0x544] ss:$24 sps:$4 sm:$0xff]  }
0x2790   :  { %5589 = vmatpush1.bf16.msra.mxu0 %v9663_v9  ;;  %v9709_v9 = vld [vmem:[%s11019_s27 + $0x698] ss:$24 sps:$4 sm:$0xff]  }
0x2791   :  { %5630 = vmatpush1.bf16.msra.mxu1 %v9666_v8  ;;  %5590 = vmatprep.subr.bf16.mxu0 %v9671_v7  ;;  %v9726_v8 = vld [vmem:[%s11019_s27 + $0x540] ss:$24 sps:$4 sm:$0xff]   ;;  %v9714_v7 = vld [vmem:[%s11019_s27 + $0x6cc] ss:$24 sps:$4 sm:$0xff]  }
0x2792   :  { %5631 = vmatprep.subr.bf16.mxu1 %v9674_v50  ;;  %v9731_v50 = vld [vmem:[%s11019_s27 + $0x574] ss:$24 sps:$4 sm:$0xff]  }
0x2794   :  { %5591 = vmatpush1.bf16.msra.mxu0 %v9669_v40  ;;  %v9729_v40 = vld [vmem:[%s11019_s27 + $0x570] ss:$24 sps:$4 sm:$0xff]  }
0x2795   :  { %5632 = vmatpush1.bf16.msra.mxu1 %v9672_v11  ;;  %8625 = vmatprep.subr.msk.bf16.mxu0 %vm324_vm3, %v8620_v14  ;;  %v8781_v11 = vcombine.high %v8704_v43, %v8704_v43  ;;  %v8780_v14 = vcombine.low %v8704_v43, %v8704_v43 }
0x2796   :  { %8627 = vmatprep.subr.msk.bf16.mxu1 %vm324_vm3, %v8622_v35  ;;  %v9732_v35 = vld [vmem:[%s11019_s27 + $0x5a0] ss:$24 sps:$4 sm:$0xff]  }
0x2797   :  { %v6159_v48 = vsel %vm324_vm3, %v8780_v14, 0 }
0x2798   :  { %5593 = vmatpush1.bf16.msra.mxu0 %v5516_v1  ;;  %v9737_v1 = vld [vmem:[%s11019_s27 + $0x5d4] ss:$24 sps:$4 sm:$0xff]  }
0x2799   :  { %5634 = vmatpush1.bf16.msra.mxu1 %v5522_v52  ;;  %5655 = vmatprep.subr.bf16.mxu0 %v11538_v28  ;;  %v9735_v52 = vld [vmem:[%s11019_s27 + $0x5d0] ss:$24 sps:$4 sm:$0xff]  }
0x279a   :  { %6170 = vmatprep.subr.bf16.mxu1 %v9719_v42 }
0x279b   :  { %5601 = vmatmul.mubr.bf16.vlgmr.msra.gmra.mrb[56].mxu0 %v11657_v6 }
0x279c   :  { %5642 = vmatmul.mubr.bf16.vlgmr.msra.gmra.mrb[56].mxu1 %v11657_v6  ;;  %5656 = vmatpush1.bf16.msra.mxu0 %v11540_v17  ;;  %v9685_v6 = vld [vmem:[%s11019_s27 + $0x518] ss:$24 sps:$4 sm:$0xff]  }
0x279d   :  { %5687 = vmatprep.mubr.bf16.mxu0 %v9958_v30  ;;  %6211 = vmatprep.subr.bf16.mxu0 %v9681_v53  ;;  %v9740_v53 = vld [vmem:[%s11019_s27 + $0x604] ss:$24 sps:$4 sm:$0xff]  }
0x279e   :  { %6171 = vmatpush1.bf16.msra.mxu1 %v9717_v60 }
0x279f   :  { %6172 = vmatprep.subr.bf16.mxu1 %v9722_v0 }
0x27a2   :  { %6173 = vmatpush1.bf16.msra.mxu1 %v9720_v37 }
0x27a3   :  { %8630 = vmatmul.mubr.msk.bf16.vlgmr.msra.gmra.mrb[60].mxu0 %vm2250_vm5, %v8629_v33  ;;  %6174 = vmatprep.subr.bf16.mxu1 %v9725_v3  ;;  %v9743_v33 = vld [vmem:[%s11019_s27 + $0x634] ss:$24 sps:$4 sm:$0xff]  }
0x27a4   :  { %6212 = vmatpush1.bf16.msra.mxu0 %v9679_v44  ;;  %v9738_v44 = vld [vmem:[%s11019_s27 + $0x600] ss:$24 sps:$4 sm:$0xff]  }
0x27a5   :  { %6213 = vmatprep.subr.bf16.mxu0 %v9684_v47  ;;  %v9741_v47 = vld [vmem:[%s11019_s27 + $0x630] ss:$24 sps:$4 sm:$0xff]  }
0x27a6   :  { %6175 = vmatpush1.bf16.msra.mxu1 %v9723_v20 }
0x27a7   :  { %6176 = vmatprep.subr.bf16.mxu1 %v9728_v34 }
0x27a8   :  { %6214 = vmatpush1.bf16.msra.mxu0 %v9682_v63  ;;  %v9746_v63 = vld [vmem:[%s11019_s27 + $0x664] ss:$24 sps:$4 sm:$0xff]  }
0x27a9   :  { %6215 = vmatprep.subr.bf16.mxu0 %v9687_v5  ;;  %v9744_v5 = vld [vmem:[%s11019_s27 + $0x660] ss:$24 sps:$4 sm:$0xff]  }
0x27aa   :  { %6177 = vmatpush1.bf16.msra.mxu1 %v9726_v8 }
0x27ab   :  { %6178 = vmatprep.subr.bf16.mxu1 %v9731_v50 }
0x27ac   :  { %6216 = vmatpush1.bf16.msra.mxu0 %v9685_v6  ;;  %v9747_v6 = vld [vmem:[%s11019_s27 + $0x690] ss:$24 sps:$4 sm:$0xff]  }
0x27ad   :  { %6217 = vmatprep.subr.bf16.mxu0 %v9690_v13  ;;  %v9752_v13 = vld [vmem:[%s11019_s27 + $0x6c4] ss:$24 sps:$4 sm:$0xff]  }
0x27ae   :  { %6179 = vmatpush1.bf16.msra.mxu1 %v9729_v40 }
0x27af   :  { %6180 = vmatprep.subr.bf16.mxu1 %v9734_v23 }
0x27b0   :  { %6218 = vmatpush1.bf16.msra.mxu0 %v9688_v4  ;;  %v9750_v4 = vld [vmem:[%s11019_s27 + $0x6c0] ss:$24 sps:$4 sm:$0xff]  }
0x27b1   :  { %6219 = vmatprep.subr.bf16.mxu0 %v9693_v55  ;;  %v8703_v55 = vld [vmem:[%s11019_s27 + $0x6f0] sm:$0xff] }
0x27b2   :  { %6181 = vmatpush1.bf16.msra.mxu1 %v9732_v35 }
0x27b3   :  { %6182 = vmatprep.subr.bf16.mxu1 %v9737_v1 }
0x27b4   :  { %6220 = vmatpush1.bf16.msra.mxu0 %v9691_v41  ;;  %v8779_v41 = vcombine.high %v8703_v55, %v8703_v55 }
0x27b5   :  { %6221 = vmatprep.subr.bf16.mxu0 %v9696_v27  ;;  %v8778_v27 = vcombine.low %v8703_v55, %v8703_v55  ;;  %v9758_v55 = vld [vmem:[%s11019_s27 + $0x4f0] ss:$24 sps:$4 sm:$0xff]  }
0x27b6   :  { %6183 = vmatpush1.bf16.msra.mxu1 %v9735_v52 }
0x27b7   :  { %6184 = vmatprep.subr.bf16.mxu1 %v9740_v53 }
0x27b8   :  { %6222 = vmatpush1.bf16.msra.mxu0 %v9694_v12  ;;  %v6153_v12 = vsel %vm324_vm3, %v8778_v27, 0  ;;  %v9761_v27 = vld [vmem:[%s11019_s27 + $0x520] ss:$24 sps:$4 sm:$0xff]  }
0x27b9   :  { %6223 = vmatprep.subr.bf16.mxu0 %v9699_v56  ;;  %v9757_v56 = vld [vmem:[%s11019_s27 + $0x4c4] ss:$24 sps:$4 sm:$0xff]  }
0x27ba   :  { %6185 = vmatpush1.bf16.msra.mxu1 %v9738_v44 }
0x27bb   :  { %6186 = vmatprep.subr.bf16.mxu1 %v9743_v33 }
0x27bc   :  { %6224 = vmatpush1.bf16.msra.mxu0 %v9697_v15 }
0x27bd   :  { %6225 = vmatprep.subr.bf16.mxu0 %v9702_v29 }
0x27be   :  { %6187 = vmatpush1.bf16.msra.mxu1 %v9741_v47 }
0x27bf   :  { %6188 = vmatprep.subr.bf16.mxu1 %v9746_v63 }
0x27c0   :  { %6226 = vmatpush1.bf16.msra.mxu0 %v9700_v24 }
0x27c1   :  { %6227 = vmatprep.subr.bf16.mxu0 %v9705_v45 }
0x27c2   :  { %6189 = vmatpush1.bf16.msra.mxu1 %v9744_v5  ;;  %v9755_v5 = vld [vmem:[%s11019_s27 + $0x4c0] ss:$24 sps:$4 sm:$0xff]  }
0x27c4   :  { %6228 = vmatpush1.bf16.msra.mxu0 %v9703_v10 }
0x27c5   :  { %6229 = vmatprep.subr.bf16.mxu0 %v9708_v19 }
0x27c8   :  { %6230 = vmatpush1.bf16.msra.mxu0 %v9706_v22 }
0x27c9   :  { %6231 = vmatprep.subr.bf16.mxu0 %v9711_v21 }
0x27cc   :  { %6232 = vmatpush1.bf16.msra.mxu0 %v9709_v9 }
0x27cd   :  { %6233 = vmatprep.subr.bf16.mxu0 %v9714_v7 }
0x27d0   :  { %6234 = vmatpush1.bf16.msra.mxu0 %v9712_v59 }
0x27d1   :  { %8786 = vmatprep.subr.msk.bf16.mxu0 %vm324_vm3, %v8781_v11 }
0x27d4   :  { %6236 = vmatpush1.bf16.msra.mxu0 %v6159_v48 }
0x27d5   :  { %6304 = vmatprep.subr.bf16.mxu0 %v11538_v28  ;;  %v9749_v28 = vld [vmem:[%s11019_s27 + $0x694] ss:$24 sps:$4 sm:$0xff]  }
0x27d6   :  { %6190 = vmatprep.subr.bf16.mxu1 %v9749_v28 }
0x27d7   :  { %6191 = vmatpush1.bf16.msra.mxu1 %v9747_v6 }
0x27d8   :  { %6192 = vmatprep.subr.bf16.mxu1 %v9752_v13  ;;  %v9760_v13 = vld [vmem:[%s11019_s27 + $0x4f4] ss:$24 sps:$4 sm:$0xff]  }
0x27db   :  { %6193 = vmatpush1.bf16.msra.mxu1 %v9750_v4  ;;  %v9795_v4 = vld [vmem:[%s11019_s27 + $0x70c] ss:$24 sps:$4 sm:$0xff]  }
0x27dc   :  { %8784 = vmatprep.subr.msk.bf16.mxu1 %vm324_vm3, %v8779_v41  ;;  %v9763_v41 = vld [vmem:[%s11019_s27 + $0x524] ss:$24 sps:$4 sm:$0xff]  }
0x27df   :  { %6195 = vmatpush1.bf16.msra.mxu1 %v6153_v12  ;;  %v8790_v12 = vld [vmem:[%s11532_s21 + $0xc] sm:$0xf] }
0x27e0   :  { %6252 = vmatprep.subr.bf16.mxu1 %v9757_v56  ;;  %v9793_v56 = vld [vmem:[%s11019_s27 + $0x708] ss:$24 sps:$4 sm:$0xff]  }
0x2806   :  { %v5042_v15 = vpop.f32.mrb[48].mxu0  ;;  %v5083_v29 = vpop.f32.mrb[48].mxu1 }
0x2807   :  { %v5044_v24 = vpop.f32.mrb[49].mxu0  ;;  %v5085_v45 = vpop.f32.mrb[49].mxu1 }
0x2808   :  { %v5046_v60 = vpop.f32.mrb[50].mxu0  ;;  %v5087_v42 = vpop.f32.mrb[50].mxu1 }
0x2809   :  { %v5047_v0 = vpop.f32.mrb[51].mxu0  ;;  %v5088_v10 = vpop.f32.mrb[51].mxu1  ;;  %v9807_v60 = vld [vmem:[%s11019_s27 + $0x76c] ss:$24 sps:$4 sm:$0xff]   ;;  %v9767_v42 = vld [vmem:[%s11019_s27 + $0x580] ss:$24 sps:$4 sm:$0xff]  }
0x280a   :  { %v9805_v0 = vld [vmem:[%s11019_s27 + $0x768] ss:$24 sps:$4 sm:$0xff]   ;;  %v9772_v10 = vld [vmem:[%s11019_s27 + $0x5b4] ss:$24 sps:$4 sm:$0xff]  }
0x283a   :  { %v5124_v37 = vpop.f32.mrb[52].mxu0  ;;  %v5561_v19 = vpop.f32.mrb[52].mxu1 }
0x283b   :  { %v11779_v3 = vadd.f32 %v5561_v19, %v5042_v15  ;;  %v5126_v22 = vpop.f32.mrb[53].mxu0  ;;  %v5563_v20 = vpop.f32.mrb[53].mxu1  ;;  %v9801_v15 = vld [vmem:[%s11019_s27 + $0x73c] ss:$24 sps:$4 sm:$0xff]   ;;  %v9770_v19 = vld [vmem:[%s11019_s27 + $0x5b0] ss:$24 sps:$4 sm:$0xff]  }
0x283c   :  { %v11781_v21 = vadd.f32 %v5563_v20, %v5044_v24  ;;  %v5128_v34 = vpop.f32.mrb[54].mxu0  ;;  %v5565_v9 = vpop.f32.mrb[54].mxu1  ;;  %v9799_v24 = vld [vmem:[%s11019_s27 + $0x738] ss:$24 sps:$4 sm:$0xff]   ;;  %v9775_v20 = vld [vmem:[%s11019_s27 + $0x5e4] ss:$24 sps:$4 sm:$0xff]  }
0x283d   :  { %v5129_v8 = vpop.f32.mrb[55].mxu0  ;;  %v5566_v7 = vpop.f32.mrb[55].mxu1  ;;  %v9819_v34 = vld [vmem:[%s11019_s27 + $0x7cc] ss:$24 sps:$4 sm:$0xff]   ;;  %v9773_v9 = vld [vmem:[%s11019_s27 + $0x5e0] ss:$24 sps:$4 sm:$0xff]  }
0x283e   :  { %v9817_v8 = vld [vmem:[%s11019_s27 + $0x7c8] ss:$24 sps:$4 sm:$0xff]   ;;  %v9778_v7 = vld [vmem:[%s11019_s27 + $0x614] ss:$24 sps:$4 sm:$0xff]  }
0x286e   :  { %v5602_v50 = vpop.f32.mrb[56].mxu0 }
0x286f   :  { %v11783_v43 = vadd.f32 %v5602_v50, %v5083_v29  ;;  %v5643_v59 = vpop.f32.mrb[56].mxu1  ;;  %v5604_v40 = vpop.f32.mrb[57].mxu0  ;;  %v9764_v29 = vld [vmem:[%s11019_s27 + $0x550] ss:$24 sps:$4 sm:$0xff]   ;;  %v9825_v50 = vld [vmem:[%s11019_s27 + $0x7fc] ss:$24 sps:$4 sm:$0xff]  }
0x2870   :  { %v11785_v11 = vadd.f32 %v5643_v59, %v5124_v37  ;;  %v11787_v14 = vadd.f32 %v5604_v40, %v5085_v45  ;;  %v5645_v23 = vpop.f32.mrb[57].mxu1  ;;  %v5606_v35 = vpop.f32.mrb[58].mxu0  ;;  %v9769_v45 = vld [vmem:[%s11019_s27 + $0x584] ss:$24 sps:$4 sm:$0xff]   ;;  %v9776_v59 = vld [vmem:[%s11019_s27 + $0x610] ss:$24 sps:$4 sm:$0xff]  }
0x2871   :  { %v11789_v48 = vadd.f32 %v5645_v23, %v5126_v22  ;;  %v5647_v1 = vpop.f32.mrb[58].mxu1  ;;  %v5607_v52 = vpop.f32.mrb[59].mxu0  ;;  %v9813_v37 = vld [vmem:[%s11019_s27 + $0x79c] ss:$24 sps:$4 sm:$0xff]   ;;  %v9811_v22 = vld [vmem:[%s11019_s27 + $0x798] ss:$24 sps:$4 sm:$0xff]  }
0x2872   :  { %v5648_v53 = vpop.f32.mrb[59].mxu1  ;;  %v9823_v40 = vld [vmem:[%s11019_s27 + $0x7f8] ss:$24 sps:$4 sm:$0xff]   ;;  %v9781_v23 = vld [vmem:[%s11019_s27 + $0x644] ss:$24 sps:$4 sm:$0xff]  }
0x2873   :  { %v9831_v35 = vld [vmem:[%s11019_s27 + $0x82c] ss:$24 sps:$4 sm:$0xff]   ;;  %v9779_v1 = vld [vmem:[%s11019_s27 + $0x640] ss:$24 sps:$4 sm:$0xff]  }
0x2874   :  { %v9829_v52 = vld [vmem:[%s11019_s27 + $0x828] ss:$24 sps:$4 sm:$0xff]   ;;  %v9784_v53 = vld [vmem:[%s11019_s27 + $0x674] ss:$24 sps:$4 sm:$0xff]  }
0x2876   :  { %v5689_v44 = vpop.f32.mrb[60].mxu0 }
0x2877   :  { %v5691_v33 = vpop.f32.mrb[61].mxu0  ;;  %v11792_v28 = vpack.c.bf16 %v5689_v44, %v5689_v44  ;;  %v9837_v44 = vld [vmem:[%s11019_s27 + $0x85c] ss:$24 sps:$4 sm:$0xff]  }
0x2878   :  { %v5697_v47 = vpack.c.bf16 %v5691_v33, %v5691_v33  ;;  %v5693_v63 = vpop.f32.mrb[62].mxu0  ;;  %v9782_v33 = vld [vmem:[%s11019_s27 + $0x670] ss:$24 sps:$4 sm:$0xff]  }
0x2879   :  { %v5694_v6 = vpop.f32.mrb[63].mxu0  ;;  %v9787_v63 = vld [vmem:[%s11019_s27 + $0x6a4] ss:$24 sps:$4 sm:$0xff]  }
0x287a   :  { %8785 = vmatprep.mubr.msk.bf16.mxu1 %vm420_vm11, %v5697_v47  ;;  %8787 = vmatprep.mubr.msk.bf16.mxu0 %vm420_vm11, %v5697_v47  ;;  %v9785_v6 = vld [vmem:[%s11019_s27 + $0x6a0] ss:$24 sps:$4 sm:$0xff]  }
0x287b   :  { %6203 = vmatmul.mubr.bf16.vlgmr.msra.gmra.mrb[60].mxu1 %v11792_v28  ;;  %6244 = vmatmul.mubr.bf16.vlgmr.msra.gmra.mrb[64].mxu0 %v11792_v28 }
0x287c   :  { %6253 = vmatpush1.bf16.msra.mxu1 %v9755_v5  ;;  %6305 = vmatpush1.bf16.msra.mxu0 %v11540_v17  ;;  %v9766_v17 = vld [vmem:[%s11019_s27 + $0x554] ss:$24 sps:$4 sm:$0xff]  }
0x287d   :  { %8789 = vmatprep.mubr.msk.bf16.mxu1 %vm420_vm11, %v5697_v47  ;;  %6254 = vmatprep.subr.bf16.mxu1 %v9760_v13  ;;  %v9835_v47 = vld [vmem:[%s11019_s27 + $0x858] ss:$24 sps:$4 sm:$0xff]   ;;  %v9843_v5 = vld [vmem:[%s11019_s27 + $0x88c] ss:$24 sps:$4 sm:$0xff]   ;;  %v9841_v13 = vld [vmem:[%s11019_s27 + $0x888] ss:$24 sps:$4 sm:$0xff]  }
0x287e   :  { %6336 = vmatprep.mubr.bf16.mxu0 %v9958_v30  ;;  %6819 = vmatprep.subr.bf16.mxu0 %v9795_v4  ;;  %v9790_v4 = vld [vmem:[%s11019_s27 + $0x6d4] ss:$24 sps:$4 sm:$0xff]  }
0x2880   :  { %6255 = vmatpush1.bf16.msra.mxu1 %v9758_v55  ;;  %v9849_v55 = vld [vmem:[%s11019_s27 + $0x8bc] ss:$24 sps:$4 sm:$0xff]  }
0x2881   :  { %6256 = vmatprep.subr.bf16.mxu1 %v9763_v41  ;;  %v8705_v41 = vld [vmem:[%s11019_s27 + $0x700] sm:$0xff] }
0x2883   :  { %8791 = vmatmul.mubr.msk.bf16.vlgmr.msra.gmra.mrb[68].mxu0 %vm2250_vm5, %v8790_v12  ;;  %v9847_v12 = vld [vmem:[%s11019_s27 + $0x8b8] ss:$24 sps:$4 sm:$0xff]  }
0x2884   :  { %6257 = vmatpush1.bf16.msra.mxu1 %v9761_v27  ;;  %6820 = vmatpush1.bf16.msra.mxu0 %v9793_v56  ;;  %v9788_v27 = vld [vmem:[%s11019_s27 + $0x6d0] ss:$24 sps:$4 sm:$0xff]   ;;  %v8783_v56 = vcombine.high %v8705_v41, %v8705_v41 }
0x2885   :  { %6258 = vmatprep.subr.bf16.mxu1 %v9766_v17  ;;  %6821 = vmatprep.subr.bf16.mxu0 %v9801_v15  ;;  %v8782_v17 = vcombine.low %v8705_v41, %v8705_v41 }
0x2887   :  { %v6165_v15 = vsel %vm324_vm3, %v8782_v17, 0  ;;  %v6948_v17 = vld [vmem:[%s8137_s24] sm:$0xff] }
0x2888   :  { %6259 = vmatpush1.bf16.msra.mxu1 %v9764_v29  ;;  %6822 = vmatpush1.bf16.msra.mxu0 %v9799_v24  ;;  %v9798_v29 = vld [vmem:[%s11019_s27 + $0x714] ss:$24 sps:$4 sm:$0xff]   ;;  %v9796_v24 = vld [vmem:[%s11019_s27 + $0x710] ss:$24 sps:$4 sm:$0xff]  }
0x2889   :  { %6260 = vmatprep.subr.bf16.mxu1 %v9769_v45  ;;  %6823 = vmatprep.subr.bf16.mxu0 %v9807_v60  ;;  %v9804_v45 = vld [vmem:[%s11019_s27 + $0x744] ss:$24 sps:$4 sm:$0xff]   ;;  %v9802_v60 = vld [vmem:[%s11019_s27 + $0x740] ss:$24 sps:$4 sm:$0xff]  }
0x288a   :  { %6951 = vperm.xlu1 %9224, %v6948_v17  }
0x288c   :  { %6261 = vmatpush1.bf16.msra.mxu1 %v9767_v42  ;;  %6824 = vmatpush1.bf16.msra.mxu0 %v9805_v0  ;;  %v9810_v42 = vld [vmem:[%s11019_s27 + $0x774] ss:$24 sps:$4 sm:$0xff]   ;;  %v9808_v0 = vld [vmem:[%s11019_s27 + $0x770] ss:$24 sps:$4 sm:$0xff]  }
0x288d   :  { %6262 = vmatprep.subr.bf16.mxu1 %v9772_v10  ;;  %6825 = vmatprep.subr.bf16.mxu0 %v9813_v37  ;;  %v9816_v10 = vld [vmem:[%s11019_s27 + $0x7a4] ss:$24 sps:$4 sm:$0xff]   ;;  %v9814_v37 = vld [vmem:[%s11019_s27 + $0x7a0] ss:$24 sps:$4 sm:$0xff]  }
0x288e   :  { %9226 = vset.pattern.permute.xlu1 %v9962_v38 }
0x2890   :  { %6263 = vmatpush1.bf16.msra.mxu1 %v9770_v19  ;;  %6826 = vmatpush1.bf16.msra.mxu0 %v9811_v22  ;;  %v9822_v19 = vld [vmem:[%s11019_s27 + $0x7d4] ss:$24 sps:$4 sm:$0xff]   ;;  %v9828_v22 = vld [vmem:[%s11019_s27 + $0x804] ss:$24 sps:$4 sm:$0xff]  }
0x2891   :  { %6264 = vmatprep.subr.bf16.mxu1 %v9775_v20  ;;  %6827 = vmatprep.subr.bf16.mxu0 %v9819_v34  ;;  %v9826_v20 = vld [vmem:[%s11019_s27 + $0x800] ss:$24 sps:$4 sm:$0xff]   ;;  %v9834_v34 = vld [vmem:[%s11019_s27 + $0x834] ss:$24 sps:$4 sm:$0xff]  }
0x2894   :  { %6265 = vmatpush1.bf16.msra.mxu1 %v9773_v9  ;;  %6828 = vmatpush1.bf16.msra.mxu0 %v9817_v8  ;;  %v9832_v9 = vld [vmem:[%s11019_s27 + $0x830] ss:$24 sps:$4 sm:$0xff]   ;;  %v9840_v8 = vld [vmem:[%s11019_s27 + $0x864] ss:$24 sps:$4 sm:$0xff]  }
0x2895   :  { %6266 = vmatprep.subr.bf16.mxu1 %v9778_v7  ;;  %6829 = vmatprep.subr.bf16.mxu0 %v9825_v50  ;;  %v9838_v7 = vld [vmem:[%s11019_s27 + $0x860] ss:$24 sps:$4 sm:$0xff]   ;;  %v9846_v50 = vld [vmem:[%s11019_s27 + $0x894] ss:$24 sps:$4 sm:$0xff]  }
0x2898   :  { %6267 = vmatpush1.bf16.msra.mxu1 %v9776_v59  ;;  %6830 = vmatpush1.bf16.msra.mxu0 %v9823_v40  ;;  %v9844_v59 = vld [vmem:[%s11019_s27 + $0x890] ss:$24 sps:$4 sm:$0xff]   ;;  %v9852_v40 = vld [vmem:[%s11019_s27 + $0x8c4] ss:$24 sps:$4 sm:$0xff]  }
0x2899   :  { %6268 = vmatprep.subr.bf16.mxu1 %v9781_v23  ;;  %6831 = vmatprep.subr.bf16.mxu0 %v9831_v35  ;;  %v9855_v23 = vld [vmem:[%s11019_s27 + $0x8ec] ss:$24 sps:$4 sm:$0xff]   ;;  %v9853_v35 = vld [vmem:[%s11019_s27 + $0x8e8] ss:$24 sps:$4 sm:$0xff]  }
0x289c   :  { %6269 = vmatpush1.bf16.msra.mxu1 %v9779_v1  ;;  %6832 = vmatpush1.bf16.msra.mxu0 %v9829_v52  ;;  %v9850_v1 = vld [vmem:[%s11019_s27 + $0x8c0] ss:$24 sps:$4 sm:$0xff]   ;;  %v9858_v52 = vld [vmem:[%s11019_s27 + $0x8f4] ss:$24 sps:$4 sm:$0xff]  }
0x289d   :  { %6270 = vmatprep.subr.bf16.mxu1 %v9784_v53  ;;  %6833 = vmatprep.subr.bf16.mxu0 %v9837_v44  ;;  %v9859_v53 = vld [vmem:[%s11019_s27 + $0x918] ss:$24 sps:$4 sm:$0xff]   ;;  %v9861_v44 = vld [vmem:[%s11019_s27 + $0x91c] ss:$24 sps:$4 sm:$0xff]  }
0x28a0   :  { %6271 = vmatpush1.bf16.msra.mxu1 %v9782_v33  ;;  %6834 = vmatpush1.bf16.msra.mxu0 %v9835_v47  ;;  %v9856_v33 = vld [vmem:[%s11019_s27 + $0x8f0] ss:$24 sps:$4 sm:$0xff]  }
0x28a1   :  { %6272 = vmatprep.subr.bf16.mxu1 %v9787_v63  ;;  %6835 = vmatprep.subr.bf16.mxu0 %v9843_v5  ;;  %v8864_v47 = vld [vmem:[%s11019_s27 + $0x948] sm:$0xff]  ;;  %v9864_v63 = vld [vmem:[%s11019_s27 + $0x924] ss:$24 sps:$4 sm:$0xff]  }
0x28a2   :  { %v8940_v5 = vcombine.high %v8864_v47, %v8864_v47 }
0x28a4   :  { %6273 = vmatpush1.bf16.msra.mxu1 %v9785_v6  ;;  %6836 = vmatpush1.bf16.msra.mxu0 %v9841_v13  ;;  %v8939_v6 = vcombine.low %v8864_v47, %v8864_v47  ;;  %v8865_v13 = vld [vmem:[%s11019_s27 + $0x950] sm:$0xff]  ;;  %v9890_v47 = vld [vmem:[%s11019_s27 + $0x868] ss:$24 sps:$4 sm:$0xff]  }
0x28a5   :  { %6274 = vmatprep.subr.bf16.mxu1 %v9790_v4  ;;  %6837 = vmatprep.subr.bf16.mxu0 %v9849_v55  ;;  %v9862_v55 = vld [vmem:[%s11019_s27 + $0x920] ss:$24 sps:$4 sm:$0xff]   ;;  %v8942_v41 = vcombine.high %v8865_v13, %v8865_v13 }
0x28a6   :  { %v6802_v4 = vsel %vm324_vm3, %v8939_v6, 0  ;;  %v9898_v6 = vld [vmem:[%s11019_s27 + $0x8cc] ss:$24 sps:$4 sm:$0xff]  }
0x28a8   :  { %6275 = vmatpush1.bf16.msra.mxu1 %v9788_v27  ;;  %6838 = vmatpush1.bf16.msra.mxu0 %v9847_v12  ;;  %v8941_v27 = vcombine.low %v8865_v13, %v8865_v13  ;;  %v9871_v12 = vld [vmem:[%s11019_s27 + $0x71c] ss:$24 sps:$4 sm:$0xff]   ;;  %v9896_v13 = vld [vmem:[%s11019_s27 + $0x8c8] ss:$24 sps:$4 sm:$0xff]  }
0x28a9   :  { %8788 = vmatprep.subr.msk.bf16.mxu1 %vm324_vm3, %v8783_v56  ;;  %6839 = vmatprep.subr.bf16.mxu0 %v9855_v23  ;;  %v9883_v23 = vld [vmem:[%s11019_s27 + $0x7dc] ss:$24 sps:$4 sm:$0xff]  }
0x28aa   :  { %v6808_v56 = vsel %vm324_vm3, %v8941_v27, 0 }
0x28ac   :  { %6277 = vmatpush1.bf16.msra.mxu1 %v6165_v15  ;;  %6840 = vmatpush1.bf16.msra.mxu0 %v9853_v35  ;;  %v9881_v35 = vld [vmem:[%s11019_s27 + $0x7d8] ss:$24 sps:$4 sm:$0xff]  }
0x28ad   :  { %6860 = vmatprep.subr.bf16.mxu1 %v9798_v29  ;;  %6841 = vmatprep.subr.bf16.mxu0 %v9861_v44  ;;  %v9887_v44 = vld [vmem:[%s11019_s27 + $0x838] ss:$24 sps:$4 sm:$0xff]  }
0x28af   :  { %6285 = vmatmul.mubr.bf16.vlgmr.msra.gmra.mrb[64].mxu1 %v11792_v28  ;;  %v9820_v28 = vld [vmem:[%s11019_s27 + $0x7d0] ss:$24 sps:$4 sm:$0xff]  }
0x28b0   :  { %6861 = vmatpush1.bf16.msra.mxu1 %v9796_v24  ;;  %6842 = vmatpush1.bf16.msra.mxu0 %v9859_v53  ;;  %v9889_v53 = vld [vmem:[%s11019_s27 + $0x83c] ss:$24 sps:$4 sm:$0xff]  }
0x28b1   :  { %6862 = vmatprep.subr.bf16.mxu1 %v9804_v45  ;;  %8945 = vmatprep.subr.msk.bf16.mxu0 %vm324_vm3, %v8940_v5  ;;  %v9893_v5 = vld [vmem:[%s11019_s27 + $0x898] ss:$24 sps:$4 sm:$0xff]  }
0x28b4   :  { %6863 = vmatpush1.bf16.msra.mxu1 %v9802_v60  ;;  %6844 = vmatpush1.bf16.msra.mxu0 %v6802_v4  ;;  %v9901_v4 = vld [vmem:[%s11019_s27 + $0x8fc] ss:$24 sps:$4 sm:$0xff]  }
0x28b5   :  { %6864 = vmatprep.subr.bf16.mxu1 %v9810_v42  ;;  %6901 = vmatprep.subr.bf16.mxu0 %v9871_v12  ;;  %v8866_v12 = vld [vmem:[%s11019_s27 + $0x958] sm:$0xff] }
0x28b8   :  { %6865 = vmatpush1.bf16.msra.mxu1 %v9808_v0 }
0x28b9   :  { %6866 = vmatprep.subr.bf16.mxu1 %v9816_v10 }
0x28bc   :  { %6867 = vmatpush1.bf16.msra.mxu1 %v9814_v37 }
0x28bd   :  { %6868 = vmatprep.subr.bf16.mxu1 %v9822_v19 }
0x28c0   :  { %6869 = vmatpush1.bf16.msra.mxu1 %v9820_v28 }
0x28c1   :  { %6870 = vmatprep.subr.bf16.mxu1 %v9828_v22 }
0x28c4   :  { %6871 = vmatpush1.bf16.msra.mxu1 %v9826_v20 }
0x28c5   :  { %6872 = vmatprep.subr.bf16.mxu1 %v9834_v34  ;;  %v9869_v34 = vld [vmem:[%s11019_s27 + $0x718] ss:$24 sps:$4 sm:$0xff]  }
0x28c8   :  { %6873 = vmatpush1.bf16.msra.mxu1 %v9832_v9 }
0x28c9   :  { %6874 = vmatprep.subr.bf16.mxu1 %v9840_v8  ;;  %v9874_v8 = vld [vmem:[%s11019_s27 + $0x74c] ss:$24 sps:$4 sm:$0xff]  }
0x28cc   :  { %6875 = vmatpush1.bf16.msra.mxu1 %v9838_v7  ;;  %v9877_v7 = vld [vmem:[%s11019_s27 + $0x77c] ss:$24 sps:$4 sm:$0xff]  }
0x28cd   :  { %6876 = vmatprep.subr.bf16.mxu1 %v9846_v50  ;;  %v9875_v50 = vld [vmem:[%s11019_s27 + $0x778] ss:$24 sps:$4 sm:$0xff]  }
0x28d0   :  { %6877 = vmatpush1.bf16.msra.mxu1 %v9844_v59  ;;  %v9880_v59 = vld [vmem:[%s11019_s27 + $0x7ac] ss:$24 sps:$4 sm:$0xff]  }
0x28d1   :  { %6878 = vmatprep.subr.bf16.mxu1 %v9852_v40  ;;  %v9878_v40 = vld [vmem:[%s11019_s27 + $0x7a8] ss:$24 sps:$4 sm:$0xff]  }
0x28d4   :  { %6879 = vmatpush1.bf16.msra.mxu1 %v9850_v1  ;;  %v9886_v1 = vld [vmem:[%s11019_s27 + $0x80c] ss:$24 sps:$4 sm:$0xff]  }
0x28d5   :  { %6880 = vmatprep.subr.bf16.mxu1 %v9858_v52  ;;  %v9884_v52 = vld [vmem:[%s11019_s27 + $0x808] ss:$24 sps:$4 sm:$0xff]  }
0x28d8   :  { %6881 = vmatpush1.bf16.msra.mxu1 %v9856_v33  ;;  %v9892_v33 = vld [vmem:[%s11019_s27 + $0x86c] ss:$24 sps:$4 sm:$0xff]  }
0x28d9   :  { %6882 = vmatprep.subr.bf16.mxu1 %v9864_v63  ;;  %v9895_v63 = vld [vmem:[%s11019_s27 + $0x89c] ss:$24 sps:$4 sm:$0xff]  }
0x28dc   :  { %6883 = vmatpush1.bf16.msra.mxu1 %v9862_v55  ;;  %v9899_v55 = vld [vmem:[%s11019_s27 + $0x8f8] ss:$24 sps:$4 sm:$0xff]  }
0x28dd   :  { %8947 = vmatprep.subr.msk.bf16.mxu1 %vm324_vm3, %v8942_v41  ;;  %v9904_v41 = vld [vmem:[%s11019_s27 + $0x92c] ss:$24 sps:$4 sm:$0xff]  }
0x28e0   :  { %6885 = vmatpush1.bf16.msra.mxu1 %v6808_v56 }
0x294e   :  { %v6204_v15 = vpop.f32.mrb[60].mxu1  ;;  %v6245_v29 = vpop.f32.mrb[64].mxu0 }
0x294f   :  { %v11889_v24 = vadd.f32 %v6204_v15, %v11779_v3  ;;  %v11892_v45 = vadd.f32 %v6245_v29, %v11783_v43  ;;  %v6206_v60 = vpop.f32.mrb[61].mxu1  ;;  %v6247_v42 = vpop.f32.mrb[65].mxu0 }
0x2950   :  { %v11895_v0 = vadd.f32 %v6206_v60, %v11781_v21  ;;  %v11898_v10 = vadd.f32 %v6247_v42, %v11787_v14  ;;  %v6208_v37 = vpop.f32.mrb[62].mxu1  ;;  %v6249_v38 = vpop.f32.mrb[66].mxu0  ;;  %v9872_v14 = vld [vmem:[%s11019_s27 + $0x748] ss:$24 sps:$4 sm:$0xff]  }
0x2951   :  { %v6209_v19 = vpop.f32.mrb[63].mxu1  ;;  %v6250_v28 = vpop.f32.mrb[67].mxu0  ;;  %v9902_v60 = vld [vmem:[%s11019_s27 + $0x928] ss:$24 sps:$4 sm:$0xff]   ;;  %v8944_v37 = vcombine.high %v8866_v12, %v8866_v12  ;;  %v8943_v38 = vcombine.low %v8866_v12, %v8866_v12  ;;  %s9996_s27 = smov 24  }
0x2952   :  { %v6952_v28 = vpop.permute.xlu1 %6951  ;;  %s8138_s25 = sld [smem:[%s12438_s0 + %s9996_s27]]  }
0x2953   :  { %v6814_v19 = vsel %vm324_vm3, %v8943_v38, 0 }
0x2956   :  { %v6338_v22 = vpop.f32.mrb[68].mxu0 }
0x2957   :  { %v6340_v3 = vpop.f32.mrb[69].mxu0  ;;  %v11901_v9 = vpack.c.bf16 %v6338_v22, %v6338_v22 }
0x2958   :  { %v6346_v20 = vpack.c.bf16 %v6340_v3, %v6340_v3  ;;  %v6342_v43 = vpop.f32.mrb[70].mxu0 }
0x2959   :  { %v6343_v21 = vpop.f32.mrb[71].mxu0 }
0x295a   :  { %8946 = vmatprep.mubr.msk.bf16.mxu0 %vm420_vm11, %v6346_v20  ;;  %8948 = vmatprep.mubr.msk.bf16.mxu1 %vm420_vm11, %v6346_v20 }
0x295b   :  { %6852 = vmatmul.mubr.bf16.vlgmr.msra.gmra.mrb[72].mxu0 %v11901_v9  ;;  %6893 = vmatmul.mubr.bf16.vlgmr.msra.gmra.mrb[68].mxu1 %v11901_v9 }
0x295c   :  { %6902 = vmatpush1.bf16.msra.mxu0 %v9869_v34  ;;  %8950 = vmatprep.mubr.msk.bf16.mxu0 %vm420_vm11, %v6346_v20  ;;  %v6955_v34 = vmul.f32 %v6952_v28, %v10289_v32 }
0x295d   :  { %6903 = vmatprep.subr.bf16.mxu0 %v9874_v8 }
0x2960   :  { %6904 = vmatpush1.bf16.msra.mxu0 %v9872_v14 }
0x2961   :  { %6905 = vmatprep.subr.bf16.mxu0 %v9877_v7 }
0x2964   :  { %6906 = vmatpush1.bf16.msra.mxu0 %v9875_v50 }
0x2965   :  { %6907 = vmatprep.subr.bf16.mxu0 %v9880_v59 }
0x2968   :  { %6908 = vmatpush1.bf16.msra.mxu0 %v9878_v40 }
0x2969   :  { %6909 = vmatprep.subr.bf16.mxu0 %v9883_v23 }
0x296c   :  { %6910 = vmatpush1.bf16.msra.mxu0 %v9881_v35 }
0x296d   :  { %6911 = vmatprep.subr.bf16.mxu0 %v9886_v1  ;;  %v6957_v1 = vmul.f32 %v6952_v28, %v10299_v57 }
0x2970   :  { %6912 = vmatpush1.bf16.msra.mxu0 %v9884_v52 }
0x2971   :  { %6913 = vmatprep.subr.bf16.mxu0 %v9889_v53 }
0x2974   :  { %6914 = vmatpush1.bf16.msra.mxu0 %v9887_v44 }
0x2975   :  { %6915 = vmatprep.subr.bf16.mxu0 %v9892_v33  ;;  %v6958_v33 = vmul.f32 %v6952_v28, %v10303_v58 }
0x2978   :  { %6916 = vmatpush1.bf16.msra.mxu0 %v9890_v47 }
0x2979   :  { %6917 = vmatprep.subr.bf16.mxu0 %v9895_v63  ;;  %v6959_v63 = vmul.f32 %v6952_v28, %v10301_v51 }
0x297c   :  { %6918 = vmatpush1.bf16.msra.mxu0 %v9893_v5 }
0x297d   :  { %6919 = vmatprep.subr.bf16.mxu0 %v9898_v6 }
0x2980   :  { %6920 = vmatpush1.bf16.msra.mxu0 %v9896_v13 }
0x2981   :  { %6921 = vmatprep.subr.bf16.mxu0 %v9901_v4 }
0x2982   :  { %v6286_v27 = vpop.f32.mrb[64].mxu1 }
0x2983   :  { %v6297_v56 = vadd.f32 %v6286_v27, %v11785_v11  ;;  %v6288_v17 = vpop.f32.mrb[65].mxu1  ;;  %v6954_v11 = vmul.f32 %v6952_v28, %v10285_v31 }
0x2984   :  { %v6298_v15 = vadd.f32 %v6288_v17, %v11789_v48  ;;  %v6290_v29 = vpop.f32.mrb[66].mxu1  ;;  %6922 = vmatpush1.bf16.msra.mxu0 %v9899_v55 }
0x2985   :  { %v6291_v42 = vpop.f32.mrb[67].mxu1  ;;  %6923 = vmatprep.subr.bf16.mxu0 %v9904_v41 }
0x2988   :  { %6924 = vmatpush1.bf16.msra.mxu0 %v9902_v60 }
0x2989   :  { %8949 = vmatprep.subr.msk.bf16.mxu0 %vm324_vm3, %v8944_v37 }
0x298c   :  { %6926 = vmatpush1.bf16.msra.mxu0 %v6814_v19 }
0x298f   :  { %6934 = vmatmul.mubr.bf16.vlgmr.msra.gmra.mrb[76].mxu0 %v11901_v9 }
0x2a2e   :  { %v6853_v22 = vpop.f32.mrb[72].mxu0  ;;  %v6894_v48 = vpop.f32.mrb[68].mxu1 }
0x2a2f   :  { %v6942_v3 = vadd.f32 %v6853_v22, %v11889_v24  ;;  %v6944_v20 = vadd.f32 %v6894_v48, %v11892_v45  ;;  %v6855_v43 = vpop.f32.mrb[73].mxu0  ;;  %v6896_v21 = vpop.f32.mrb[69].mxu1  ;;  %v6956_v24 = vmul.f32 %v6952_v28, %v10297_v16 }
0x2a30   :  { %v6943_v8 = vadd.f32 %v6855_v43, %v11895_v0  ;;  %v6945_v14 = vadd.f32 %v6896_v21, %v11898_v10  ;;  %v6857_v7 = vpop.f32.mrb[74].mxu0  ;;  %v6898_v50 = vpop.f32.mrb[70].mxu1 }
0x2a31   :  { %v6858_v9 = vpop.f32.mrb[75].mxu0  ;;  %v6899_v59 = vpop.f32.mrb[71].mxu1  ;;  %v6960_v40 = vadd.f32 %v6954_v11, %v6942_v3  ;;  %v6962_v52 = vadd.f32 %v6956_v24, %v6944_v20 }
0x2a32   :  { %v6961_v23 = vadd.f32 %v6955_v34, %v6943_v8  ;;  %v6963_v0 = vadd.f32 %v6957_v1, %v6945_v14 }
0x2a33   :  { %v6967_v35 = vpack.c.bf16 %v6960_v40, %v10600_v36  ;;  %v6969_v10 = vpack.c.bf16 %v6962_v52, %v10608_v61 }
0x2a34   :  { %v6968_v45 = vpack.c.bf16 %v6961_v23, %v10603_v39  ;;  %v6970_v53 = vpack.c.bf16 %v6963_v0, %v10611_v62 }
0x2a35   :  { %6979 = vrot.lane.b32.xlu1 %v6967_v35, %s9949_s6 }
0x2a39   :  { %6981 = vrot.lane.b32.xlu1 %v6968_v45, %s9949_s6 }
0x2a3d   :  { %6983 = vrot.lane.b32.xlu1 %v6969_v10, %s9949_s6 }
0x2a41   :  { %6985 = vrot.lane.b32.xlu1 %v6970_v53, %s9949_s6 }
0x2a62   :  { %v6935_v36 = vpop.f32.mrb[76].mxu0 }
0x2a63   :  { %v6946_v44 = vadd.f32 %v6935_v36, %v6297_v56  ;;  %v6937_v47 = vpop.f32.mrb[77].mxu0 }
0x2a64   :  { %v6947_v39 = vadd.f32 %v6937_v47, %v6298_v15  ;;  %v6939_v5 = vpop.f32.mrb[78].mxu0  ;;  %v11984_v15 = vld [vmem:[%s8138_s25] sm:$0xff] }
0x2a65   :  { %v6964_v6 = vadd.f32 %v6958_v33, %v6946_v44  ;;  %v6940_v13 = vpop.f32.mrb[79].mxu0  ;;  %v11988_v29 = vcombine.high %v11984_v15, %v11984_v15 }
0x2a66   :  { %v6965_v4 = vadd.f32 %v6959_v63, %v6947_v39 }
0x2a67   :  { %v6971_v61 = vpack.c.bf16 %v6964_v6, %v10618_v49  ;;  %8955 = vmatprep.mubr.msk.bf16.mxu1 %vm2250_vm5, %v11988_v29  ;;  %8956 = vmatprep.mubr.msk.bf16.mxu0 %vm2250_vm5, %v11988_v29 }
0x2a68   :  { %v6972_v55 = vpack.c.bf16 %v6965_v4, %v10634_v54 }
0x2a69   :  { %6987 = vrot.lane.b32.xlu1 %v6971_v61, %s9949_s6 }
0x2a6a   :  { %6989 = vrot.lane.b32.xlu0 %v6972_v55, %s9949_s6 }
0x2aa7   :  { %v6980_v62 = vpop.permute.xlu1 %6979 }
0x2aa8   :  { %v7001_v41 = vsel %vm12449_vm6, 0, %v6980_v62  ;;  %vm12458_vm6 = vmmov %vm12457_vm1 }
0x2aa9   :  { %7031 = vrot.lane.b32.xlu0 %v7001_v41, %s9950_s7  ;;  %7008 = vrot.lane.b32.xlu1 %v7001_v41, %s9954_s11 }
0x2aab   :  { %v6982_v27 = vpop.permute.xlu1 %6981 }
0x2aac   :  { %v6991_v12 = vsel %vm12450_vm8, %v6980_v62, %v6982_v27  ;;  %vm12459_vm8 = vcmask 891904  }
0x2aad   :  { %7077 = vrot.lane.b32.xlu0 %v7001_v41, %s9951_s8  ;;  %7054 = vrot.lane.b32.xlu1 %v7001_v41, %s9955_s12  ;;  %vm12460_vm9 = vmmov %vm12459_vm8 }
0x2aae   :  { %7202 = vmatprep.subr.bf16.mxu1 %v6991_v12 }
0x2aaf   :  { %8954 = vmatpush1.bf16.msk.msra.mxu1 %vm8953_vm10, %v6980_v62  ;;  %v6984_v49 = vpop.permute.xlu1 %6983  ;;  %vm12461_vm10 = vcmask 752640  }
0x2ab0   :  { %v6992_v17 = vsel %vm12453_vm13, %v6982_v27, %v6984_v49  ;;  %vm12463_vm13 = vcmask 744448  }
0x2ab1   :  { %7123 = vrot.lane.b32.xlu0 %v7001_v41, %s9952_s9  ;;  %7100 = vrot.lane.b32.xlu1 %v7001_v41, %s9956_s13 }
0x2ab3   :  { %v6986_v54 = vpop.permute.xlu1 %6985 }
0x2ab4   :  { %v6993_v56 = vsel %vm12452_vm12, %v6984_v49, %v6986_v54  ;;  %vm12462_vm12 = vmmov %vm12461_vm10 }
0x2ab5   :  { %7169 = vrot.lane.b32.xlu0 %v7001_v41, %s9953_s10  ;;  %7146 = vrot.lane.b32.xlu1 %v7001_v41, %s9957_s14 }
0x2ab6   :  { %7243 = vmatprep.subr.bf16.mxu0 %v6993_v56 }
0x2ab7   :  { %7244 = vmatpush1.bf16.msra.mxu0 %v6992_v17 }
0x2ab9   :  { %7010 = vrot.lane.b32.xlu1 %v6991_v12, %s9954_s11  ;;  %7012 = vrot.lane.b32.xlu0 %v6992_v17, %s9954_s11 }
0x2abd   :  { %7035 = vrot.lane.b32.xlu1 %v6992_v17, %s9950_s7  ;;  %7033 = vrot.lane.b32.xlu0 %v6991_v12, %s9950_s7 }
0x2ac1   :  { %7056 = vrot.lane.b32.xlu1 %v6991_v12, %s9955_s12  ;;  %7058 = vrot.lane.b32.xlu0 %v6992_v17, %s9955_s12 }
0x2ac5   :  { %7081 = vrot.lane.b32.xlu1 %v6992_v17, %s9951_s8  ;;  %7079 = vrot.lane.b32.xlu0 %v6991_v12, %s9951_s8 }
0x2ac9   :  { %7102 = vrot.lane.b32.xlu1 %v6991_v12, %s9956_s13  ;;  %7104 = vrot.lane.b32.xlu0 %v6992_v17, %s9956_s13 }
0x2acd   :  { %7127 = vrot.lane.b32.xlu1 %v6992_v17, %s9952_s9  ;;  %7125 = vrot.lane.b32.xlu0 %v6991_v12, %s9952_s9 }
0x2ad1   :  { %7148 = vrot.lane.b32.xlu1 %v6991_v12, %s9957_s14  ;;  %7150 = vrot.lane.b32.xlu0 %v6992_v17, %s9957_s14 }
0x2ad5   :  { %7173 = vrot.lane.b32.xlu1 %v6992_v17, %s9953_s10  ;;  %7171 = vrot.lane.b32.xlu0 %v6991_v12, %s9953_s10  ;;  %v12073_v12 = vcombine.low %v11984_v15, %v11984_v15 }
0x2ad9   :  { %7060 = vrot.lane.b32.xlu0 %v6993_v56, %s9955_s12  ;;  %7014 = vrot.lane.b32.xlu1 %v6993_v56, %s9954_s11 }
0x2adb   :  { %v6988_v60 = vpop.permute.xlu1 %6987 }
0x2adc   :  { %v12005_v42 = vsel %vm12454_vm14, %v6986_v54, %v6988_v60  ;;  %v6990_v37 = vpop.permute.xlu0 %6989  ;;  %vm12464_vm14 = vmmov %vm12463_vm13 }
0x2add   :  { %7106 = vrot.lane.b32.xlu0 %v6993_v56, %s9956_s13  ;;  %7037 = vrot.lane.b32.xlu1 %v6993_v56, %s9950_s7  ;;  %v12015_v38 = vsel %vm12455_vm15, %v6988_v60, %v6990_v37  ;;  %vm12465_vm15 = vcmask 736256  }
0x2ade   :  { %v7004_v19 = vsel %vm12456_vm0, %v12015_v38, 0  ;;  %vm12466_vm0 = vmmov %vm12465_vm15 }
0x2ae1   :  { %7083 = vrot.lane.b32.xlu1 %v6993_v56, %s9951_s8  ;;  %7016 = vrot.lane.b32.xlu0 %v12005_v42, %s9954_s11 }
0x2ae5   :  { %7062 = vrot.lane.b32.xlu1 %v12005_v42, %s9955_s12  ;;  %7039 = vrot.lane.b32.xlu0 %v12005_v42, %s9950_s7 }
0x2ae9   :  { %7108 = vrot.lane.b32.xlu1 %v12005_v42, %s9956_s13  ;;  %7085 = vrot.lane.b32.xlu0 %v12005_v42, %s9951_s8 }
0x2aed   :  { %7018 = vrot.lane.b32.xlu1 %v7004_v19, %s9954_s11  ;;  %7041 = vrot.lane.b32.xlu0 %v7004_v19, %s9950_s7 }
0x2af1   :  { %7129 = vrot.lane.b32.xlu1 %v6993_v56, %s9952_s9  ;;  %7131 = vrot.lane.b32.xlu0 %v12005_v42, %s9952_s9 }
0x2af5   :  { %7064 = vrot.lane.b32.xlu1 %v7004_v19, %s9955_s12  ;;  %7087 = vrot.lane.b32.xlu0 %v7004_v19, %s9951_s8 }
0x2af9   :  { %7154 = vrot.lane.b32.xlu1 %v12005_v42, %s9957_s14  ;;  %7152 = vrot.lane.b32.xlu0 %v6993_v56, %s9957_s14 }
0x2afd   :  { %7110 = vrot.lane.b32.xlu1 %v7004_v19, %s9956_s13  ;;  %7133 = vrot.lane.b32.xlu0 %v7004_v19, %s9952_s9 }
0x2b01   :  { %7175 = vrot.lane.b32.xlu1 %v6993_v56, %s9953_s10  ;;  %7177 = vrot.lane.b32.xlu0 %v12005_v42, %s9953_s10 }
0x2b05   :  { %7156 = vrot.lane.b32.xlu1 %v7004_v19, %s9957_s14  ;;  %7179 = vrot.lane.b32.xlu0 %v7004_v19, %s9953_s10 }
0x2b1b   :  { %v7032_v28 = vpop.permute.xlu0 %7031  ;;  %v7009_v11 = vpop.permute.xlu1 %7008 }
0x2b1f   :  { %v7078_v22 = vpop.permute.xlu0 %7077  ;;  %v7055_v48 = vpop.permute.xlu1 %7054 }
0x2b23   :  { %v7124_v3 = vpop.permute.xlu0 %7123  ;;  %v7101_v20 = vpop.permute.xlu1 %7100 }
0x2b27   :  { %v7170_v43 = vpop.permute.xlu0 %7169  ;;  %v7147_v34 = vpop.permute.xlu1 %7146 }
0x2b2b   :  { %v7013_v21 = vpop.permute.xlu0 %7012  ;;  %v7011_v8 = vpop.permute.xlu1 %7010 }
0x2b2c   :  { %v7021_v14 = vsel %vm192_vm2, %v7011_v8, %v7013_v21  ;;  %v7020_v7 = vsel %vm192_vm2, %v7009_v11, %v7011_v8 }
0x2b2d   :  { %7204 = vmatprep.subr.bf16.mxu1 %v7021_v14 }
0x2b2e   :  { %7205 = vmatpush1.bf16.msra.mxu1 %v7020_v7 }
0x2b2f   :  { %v7034_v50 = vpop.permute.xlu0 %7033  ;;  %v7036_v9 = vpop.permute.xlu1 %7035 }
0x2b30   :  { %v7043_v59 = vsel %vm210_vm4, %v7032_v28, %v7034_v50  ;;  %v7044_v40 = vsel %vm210_vm4, %v7034_v50, %v7036_v9 }
0x2b31   :  { %7206 = vmatprep.subr.bf16.mxu1 %v7044_v40 }
0x2b32   :  { %7207 = vmatpush1.bf16.msra.mxu1 %v7043_v59 }
0x2b33   :  { %v7059_v23 = vpop.permute.xlu0 %7058  ;;  %v7057_v35 = vpop.permute.xlu1 %7056 }
0x2b34   :  { %v7067_v24 = vsel %vm12457_vm1, %v7057_v35, %v7059_v23  ;;  %v7066_v45 = vsel %vm12458_vm6, %v7055_v48, %v7057_v35  ;;  %vm12467_vm1 = vcmask 220160  }
0x2b35   :  { %7208 = vmatprep.subr.bf16.mxu1 %v7067_v24 }
0x2b36   :  { %7209 = vmatpush1.bf16.msra.mxu1 %v7066_v45 }
0x2b37   :  { %v7080_v1 = vpop.permute.xlu0 %7079  ;;  %v12046_v52 = vpop.permute.xlu1 %7081 }
0x2b38   :  { %v7089_v0 = vsel %vm12459_vm8, %v7078_v22, %v7080_v1  ;;  %v7090_v10 = vsel %vm12460_vm9, %v7080_v1, %v12046_v52  ;;  %vm12469_vm9 = vmmov %vm12459_vm8 }
0x2b39   :  { %7210 = vmatprep.subr.bf16.mxu1 %v7090_v10 }
0x2b3a   :  { %7211 = vmatpush1.bf16.msra.mxu1 %v7089_v0 }
0x2b3b   :  { %v12051_v53 = vpop.permute.xlu0 %7104  ;;  %v7103_v36 = vpop.permute.xlu1 %7102 }
0x2b3c   :  { %v7113_v44 = vsel %vm264_vm7, %v7103_v36, %v12051_v53  ;;  %v7112_v33 = vsel %vm264_vm7, %v7101_v20, %v7103_v36 }
0x2b3d   :  { %7212 = vmatprep.subr.bf16.mxu1 %v7113_v44 }
0x2b3e   :  { %7213 = vmatpush1.bf16.msra.mxu1 %v7112_v33 }
0x2b3f   :  { %v7126_v47 = vpop.permute.xlu0 %7125  ;;  %v12056_v39 = vpop.permute.xlu1 %7127 }
0x2b40   :  { %v7135_v63 = vsel %vm12461_vm10, %v7124_v3, %v7126_v47  ;;  %v7136_v5 = vsel %vm12462_vm12, %v7126_v47, %v12056_v39 }
0x2b41   :  { %7214 = vmatprep.subr.bf16.mxu1 %v7136_v5 }
0x2b42   :  { %7215 = vmatpush1.bf16.msra.mxu1 %v7135_v63 }
0x2b43   :  { %v12061_v6 = vpop.permute.xlu0 %7150  ;;  %v7149_v13 = vpop.permute.xlu1 %7148 }
0x2b44   :  { %v7158_v4 = vsel %vm12463_vm13, %v7147_v34, %v7149_v13  ;;  %v7159_v61 = vsel %vm12464_vm14, %v7149_v13, %v12061_v6  ;;  %vm12471_vm13 = vmmov %vm12461_vm10 }
0x2b45   :  { %7216 = vmatprep.subr.bf16.mxu1 %v7159_v61  ;;  %vm12472_vm14 = vmmov %vm12459_vm8 }
0x2b46   :  { %7217 = vmatpush1.bf16.msra.mxu1 %v7158_v4 }
0x2b47   :  { %v7172_v55 = vpop.permute.xlu0 %7171  ;;  %v12066_v62 = vpop.permute.xlu1 %7173 }
0x2b48   :  { %v7181_v41 = vsel %vm12465_vm15, %v7170_v43, %v7172_v55  ;;  %v7182_v27 = vsel %vm12466_vm0, %v7172_v55, %v12066_v62  ;;  %vm12473_vm15 = vcmask 744448  }
0x2b49   :  { %7218 = vmatprep.subr.bf16.mxu1 %v7182_v27  ;;  %vm12474_vm0 = vmmov %vm12473_vm15 }
0x2b4a   :  { %7219 = vmatpush1.bf16.msra.mxu1 %v7181_v41 }
0x2b4b   :  { %v7061_v49 = vpop.permute.xlu0 %7060  ;;  %8957 = vmatprep.subr.msk.bf16.mxu1 %vm12467_vm1, %v12015_v38  ;;  %v7015_v54 = vpop.permute.xlu1 %7014  ;;  %vm12475_vm1 = vmmov %vm12461_vm10 }
0x2b4c   :  { %v7022_v19 = vsel %vm192_vm2, %v7013_v21, %v7015_v54 }
0x2b4d   :  { %7235 = vmatmul.mubr.bf16.vlgmr.msra.gmra.mrb[72].mxu1 %v12073_v12 }
0x2b4e   :  { %7285 = vmatpush1.bf16.msra.mxu1 %v12005_v42  ;;  %8958 = vmatprep.mubr.msk.bf16.mxu1 %vm2250_vm5, %v11988_v29  ;;  %vm12468_vm5 = vmmov %vm12458_vm6 }
0x2b4f   :  { %v7107_v56 = vpop.permute.xlu0 %7106  ;;  %v7038_v17 = vpop.permute.xlu1 %7037  ;;  %v7068_v3 = vsel %vm12468_vm5, %v7059_v23, %v7061_v49  ;;  %vm12470_vm12 = vmmov %vm12468_vm5 }
0x2b50   :  { %v7045_v22 = vsel %vm210_vm4, %v7036_v9, %v7038_v17  ;;  %v7114_v59 = vsel %vm264_vm7, %v12051_v53, %v7107_v56 }
0x2b53   :  { %v7017_v60 = vpop.permute.xlu0 %7016  ;;  %v7084_v37 = vpop.permute.xlu1 %7083 }
0x2b54   :  { %v7023_v15 = vsel %vm192_vm2, %v7015_v54, %v7017_v60  ;;  %v7091_v8 = vsel %vm12469_vm9, %v12046_v52, %v7084_v37 }
0x2b55   :  { %7245 = vmatprep.subr.bf16.mxu0 %v7023_v15 }
0x2b56   :  { %7246 = vmatpush1.bf16.msra.mxu0 %v7022_v19 }
0x2b57   :  { %v7040_v28 = vpop.permute.xlu0 %7039  ;;  %v7063_v38 = vpop.permute.xlu1 %7062 }
0x2b58   :  { %v7046_v11 = vsel %vm210_vm4, %v7038_v17, %v7040_v28  ;;  %v7069_v29 = vsel %vm12458_vm6, %v7061_v49, %v7063_v38  ;;  %vm12476_vm6 = vcmask 736256  }
0x2b59   :  { %7247 = vmatprep.subr.bf16.mxu0 %v7046_v11  ;;  %vm12477_vm5 = vmmov %vm12476_vm6 }
0x2b5a   :  { %7248 = vmatpush1.bf16.msra.mxu0 %v7045_v22  ;;  %vm12479_vm9 = vmmov %vm12477_vm5 }
0x2b5b   :  { %v7086_v42 = vpop.permute.xlu0 %7085  ;;  %7249 = vmatprep.subr.bf16.mxu0 %v7069_v29  ;;  %v7109_v48 = vpop.permute.xlu1 %7108 }
0x2b5c   :  { %v7092_v20 = vsel %vm12459_vm8, %v7084_v37, %v7086_v42  ;;  %v7115_v14 = vsel %vm264_vm7, %v7107_v56, %v7109_v48  ;;  %vm12478_vm8 = vmmov %vm12474_vm0 }
0x2b5e   :  { %7250 = vmatpush1.bf16.msra.mxu0 %v7068_v3 }
0x2b5f   :  { %v7042_v43 = vpop.permute.xlu0 %7041  ;;  %7251 = vmatprep.subr.bf16.mxu0 %v7092_v20  ;;  %v7019_v34 = vpop.permute.xlu1 %7018 }
0x2b60   :  { %v7024_v21 = vsel %vm192_vm2, %v7017_v60, %v7019_v34  ;;  %7286 = vmatprep.subr.bf16.mxu1 %v7019_v34  ;;  %v7047_v9 = vsel %vm210_vm4, %v7040_v28, %v7042_v43 }
0x2b61   :  { %7287 = vmatpush1.bf16.msra.mxu1 %v7024_v21 }
0x2b62   :  { %7252 = vmatpush1.bf16.msra.mxu0 %v7091_v8  ;;  %7288 = vmatprep.subr.bf16.mxu1 %v7042_v43 }
0x2b63   :  { %v7132_v7 = vpop.permute.xlu0 %7131  ;;  %7253 = vmatprep.subr.bf16.mxu0 %v7115_v14  ;;  %v7130_v50 = vpop.permute.xlu1 %7129 }
0x2b64   :  { %v7138_v40 = vsel %vm12461_vm10, %v7130_v50, %v7132_v7  ;;  %v7137_v45 = vsel %vm12471_vm13, %v12056_v39, %v7130_v50  ;;  %vm12480_vm10 = vcmask 64512   ;;  %vm12482_vm13 = vcmask 154624  }
0x2b65   :  { %7289 = vmatpush1.bf16.msra.mxu1 %v7047_v9 }
0x2b66   :  { %7254 = vmatpush1.bf16.msra.mxu0 %v7114_v59 }
0x2b67   :  { %v7088_v23 = vpop.permute.xlu0 %7087  ;;  %7255 = vmatprep.subr.bf16.mxu0 %v7138_v40  ;;  %v7065_v35 = vpop.permute.xlu1 %7064 }
0x2b68   :  { %v7070_v24 = vsel %vm12470_vm12, %v7063_v38, %v7065_v35  ;;  %7290 = vmatprep.subr.bf16.mxu1 %v7065_v35  ;;  %v7093_v0 = vsel %vm12472_vm14, %v7086_v42, %v7088_v23  ;;  %vm12481_vm12 = vmmov %vm12480_vm10 }
0x2b69   :  { %7291 = vmatpush1.bf16.msra.mxu1 %v7070_v24  ;;  %vm12483_vm14 = vmmov %vm12482_vm13 }
0x2b6a   :  { %7256 = vmatpush1.bf16.msra.mxu0 %v7137_v45  ;;  %7292 = vmatprep.subr.bf16.mxu1 %v7088_v23 }
0x2b6b   :  { %v7153_v1 = vpop.permute.xlu0 %7152  ;;  %v7155_v52 = vpop.permute.xlu1 %7154 }
0x2b6c   :  { %v7160_v10 = vsel %vm12473_vm15, %v12061_v6, %v7153_v1  ;;  %v7161_v53 = vsel %vm12474_vm0, %v7153_v1, %v7155_v52  ;;  %vm12484_vm15 = vmmov %vm12482_vm13 }
0x2b6d   :  { %7257 = vmatprep.subr.bf16.mxu0 %v7161_v53  ;;  %7293 = vmatpush1.bf16.msra.mxu1 %v7093_v0  ;;  %vm12485_vm0 = vmmov %vm12482_vm13 }
0x2b6e   :  { %7258 = vmatpush1.bf16.msra.mxu0 %v7160_v10 }
0x2b6f   :  { %v7134_v36 = vpop.permute.xlu0 %7133  ;;  %v7111_v44 = vpop.permute.xlu1 %7110 }
0x2b70   :  { %v7116_v33 = vsel %vm264_vm7, %v7109_v48, %v7111_v44  ;;  %7294 = vmatprep.subr.bf16.mxu1 %v7111_v44  ;;  %v7139_v63 = vsel %vm12475_vm1, %v7132_v7, %v7134_v36  ;;  %vm12486_vm1 = vmmov %vm12485_vm0 }
0x2b71   :  { %7295 = vmatpush1.bf16.msra.mxu1 %v7116_v33 }
0x2b72   :  { %7296 = vmatprep.subr.bf16.mxu1 %v7134_v36 }
0x2b73   :  { %v7178_v47 = vpop.permute.xlu0 %7177  ;;  %v7176_v39 = vpop.permute.xlu1 %7175 }
0x2b74   :  { %v7183_v5 = vsel %vm12476_vm6, %v12066_v62, %v7176_v39  ;;  %v7184_v6 = vsel %vm12477_vm5, %v7176_v39, %v7178_v47  ;;  %vm12487_vm6 = vmmov %vm12485_vm0  ;;  %vm12488_vm5 = vcmask 220160  }
0x2b75   :  { %7259 = vmatprep.subr.bf16.mxu0 %v7184_v6  ;;  %7297 = vmatpush1.bf16.msra.mxu1 %v7139_v63 }
0x2b76   :  { %7260 = vmatpush1.bf16.msra.mxu0 %v7183_v5 }
0x2b77   :  { %v7157_v13 = vpop.permute.xlu1 %7156  ;;  %v7180_v61 = vpop.permute.xlu0 %7179 }
0x2b78   :  { %v7162_v4 = vsel %vm12478_vm8, %v7155_v52, %v7157_v13  ;;  %7298 = vmatprep.subr.bf16.mxu1 %v7157_v13  ;;  %v7185_v55 = vsel %vm12479_vm9, %v7178_v47, %v7180_v61  ;;  %vm12489_vm8 = vcmask 900096  }
0x2b79   :  { %7276 = vmatmul.mubr.bf16.vlgmr.msra.gmra.mrb[80].mxu0 %v12073_v12  ;;  %7299 = vmatpush1.bf16.msra.mxu1 %v7162_v4  ;;  %vm12490_vm9 = vmmov %vm12489_vm8 }
0x2b7a   :  { %7300 = vmatprep.subr.bf16.mxu1 %v7180_v61  ;;  %7729 = vmatprep.mubr.bf16.mxu0 %v9958_v30  ;;  %v12131_v61 = vld [vmem:[%s8140_s16] sm:$0xff] }
0x2b7d   :  { %7301 = vmatpush1.bf16.msra.mxu1 %v7185_v55 }
0x2b80   :  { %7317 = vmatmul.mubr.bf16.vlgmr.msra.gmra.mrb[76].mxu1 %v12073_v12 }
0x2b81   :  { %7811 = vmatprep.mubr.bf16.mxu1 %v9958_v30 }
0x2c20   :  { %v7236_v62 = vpop.f32.mrb[72].mxu1 }
0x2c21   :  { %v7325_v41 = vmul.f32 %v7236_v62, %v10285_v31  ;;  %v7238_v27 = vpop.f32.mrb[73].mxu1 }
0x2c22   :  { %v7326_v49 = vmul.f32 %v7238_v27, %v10289_v32  ;;  %v7240_v54 = vpop.f32.mrb[74].mxu1 }
0x2c23   :  { %v7241_v56 = vpop.f32.mrb[75].mxu1 }
0x2c24   :  { %v7331_v17 = vadd.f32 %v7326_v49, %v7325_v41 }
0x2c4c   :  { %v7277_v60 = vpop.f32.mrb[80].mxu0 }
0x2c4d   :  { %v7327_v37 = vmul.f32 %v7277_v60, %v10297_v16  ;;  %v7279_v15 = vpop.f32.mrb[81].mxu0 }
0x2c4e   :  { %v7328_v19 = vmul.f32 %v7279_v15, %v10299_v57  ;;  %v7281_v28 = vpop.f32.mrb[82].mxu0 }
0x2c4f   :  { %v7332_v38 = vadd.f32 %v7331_v17, %v7327_v37  ;;  %v7282_v12 = vpop.f32.mrb[83].mxu0 }
0x2c51   :  { %v7333_v11 = vadd.f32 %v7332_v38, %v7328_v19 }
0x2c53   :  { %v7318_v22 = vpop.f32.mrb[76].mxu1 }
0x2c54   :  { %v7329_v29 = vmul.f32 %v7318_v22, %v10303_v58  ;;  %v7320_v42 = vpop.f32.mrb[77].mxu1 }
0x2c55   :  { %v7330_v48 = vmul.f32 %v7320_v42, %v10301_v51  ;;  %v7322_v3 = vpop.f32.mrb[78].mxu1 }
0x2c56   :  { %v7334_v20 = vadd.f32 %v7333_v11, %v7329_v29  ;;  %v7323_v43 = vpop.f32.mrb[79].mxu1 }
0x2c57   :  { %v7335_v34 = vsel %vm12480_vm10, %v7330_v48, 0.0  ;;  %vm12491_vm10 = vcmask 891904  }
0x2c58   :  { %v7336_v21 = vadd.f32 %v7335_v34, %v7334_v20 }
0x2c5a   :  { %7337 = vadd.xlane.f32.xlu1 %v7336_v21 }
0x2c6b   :  { %7383 = vperm.xlu1 %9226, %v12131_v61  }
0x2c6f   :  { %9228 = vset.pattern.permute.xlu1 %v9965_v2 }
0x2ce7   :  { %v7338_v8 = vpop.xlane.xlu1 %7337 }
0x2ce8   :  { %v7339_v14 = vmul.f32 0.001953125, %v7338_v8 }
0x2cea   :  { %v7340_v7 = vsub.f32 %v7236_v62, %v7339_v14  ;;  %v7341_v50 = vsub.f32 %v7238_v27, %v7339_v14  ;;  %v7342_v9 = vsub.f32 %v7277_v60, %v7339_v14  ;;  %v7343_v59 = vsub.f32 %v7279_v15, %v7339_v14 }
0x2ceb   :  { %v7345_v40 = vsub.f32 %v7320_v42, %v7339_v14  ;;  %v7344_v23 = vsub.f32 %v7318_v22, %v7339_v14  ;;  %v7384_v56 = vpop.permute.xlu1 %7383 }
0x2cec   :  { %v7346_v35 = vmul.f32 %v7340_v7, %v10285_v31  ;;  %v7347_v24 = vmul.f32 %v7341_v50, %v10289_v32  ;;  %v7348_v45 = vmul.f32 %v7342_v9, %v10297_v16  ;;  %v7349_v1 = vmul.f32 %v7343_v59, %v10299_v57 }
0x2ced   :  { %v7351_v10 = vmul.f32 %v7345_v40, %v10301_v51  ;;  %v7350_v53 = vmul.f32 %v7344_v23, %v10303_v58 }
0x2cee   :  { %v7352_v52 = vmul.f32 %v7346_v35, %v7346_v35  ;;  %v7353_v0 = vmul.f32 %v7347_v24, %v7347_v24  ;;  %v7354_v36 = vmul.f32 %v7348_v45, %v7348_v45  ;;  %v7355_v33 = vmul.f32 %v7349_v1, %v7349_v1 }
0x2cef   :  { %v7357_v39 = vmul.f32 %v7351_v10, %v7351_v10  ;;  %v7356_v63 = vmul.f32 %v7350_v53, %v7350_v53 }
0x2cf0   :  { %v7358_v44 = vadd.f32 %v7353_v0, %v7352_v52 }
0x2cf1   :  { %v7362_v13 = vsel %vm12481_vm12, %v7357_v39, 0.0  ;;  %vm12492_vm12 = vmmov %vm12491_vm10 }
0x2cf2   :  { %v7359_v47 = vadd.f32 %v7358_v44, %v7354_v36 }
0x2cf4   :  { %v7360_v5 = vadd.f32 %v7359_v47, %v7355_v33 }
0x2cf6   :  { %v7361_v6 = vadd.f32 %v7360_v5, %v7356_v63 }
0x2cf8   :  { %v7363_v4 = vadd.f32 %v7362_v13, %v7361_v6 }
0x2cfa   :  { %7364 = vadd.xlane.f32.xlu0 %v7363_v4 }
0x2d87   :  { %v7365_v55 = vpop.xlane.xlu0 %7364 }
0x2d88   :  { %v7366_v62 = vmul.f32 0.001953125, %v7365_v55 }
0x2d8a   :  { %v7367_v41 = vadd.f32 1e-05, %v7366_v62 }
0x2d8c   :  { %9945 = vrsqrt.f32 %v7367_v41 }
0x2d96   :  { %v9946_v27 = vpop.eup %9945 }
0x2d97   :  { %v7369_v49 = vmul.f32 %v9946_v27, %v12131_v61 }
0x2d99   :  { %7372 = vperm.xlu0 %9225, %v7369_v49  }
0x2d9d   :  { %9227 = vset.pattern.permute.xlu0 %v9964_v18 }
0x2e18   :  { %v7373_v54 = vpop.permute.xlu0 %7372 }
0x2e19   :  { %v7375_v17 = vmul.f32 %v7373_v54, %v7346_v35  ;;  %v7376_v60 = vmul.f32 %v7373_v54, %v7347_v24  ;;  %v7377_v37 = vmul.f32 %v7373_v54, %v7348_v45  ;;  %v7378_v28 = vmul.f32 %v7373_v54, %v7349_v1 }
0x2e1a   :  { %v7379_v22 = vmul.f32 %v7373_v54, %v7350_v53  ;;  %v7380_v18 = vmul.f32 %v7373_v54, %v7351_v10 }
0x2e1b   :  { %v7386_v15 = vadd.f32 %v7384_v56, %v7375_v17  ;;  %v7387_v19 = vadd.f32 %v7384_v56, %v7376_v60  ;;  %v7388_v12 = vadd.f32 %v7384_v56, %v7377_v37  ;;  %v7389_v3 = vadd.f32 %v7384_v56, %v7378_v28 }
0x2e1c   :  { %v7390_v21 = vadd.f32 %v7384_v56, %v7379_v22  ;;  %v7391_v50 = vadd.f32 %v7384_v56, %v7380_v18 }
0x2e1d   :  { %v7392_v38 = vmax.f32 %v7386_v15, 0.0  ;;  %v7393_v2 = vmax.f32 %v7387_v19, 0.0  ;;  %v7394_v48 = vmax.f32 %v7388_v12, 0.0  ;;  %v7395_v34 = vmax.f32 %v7389_v3, 0.0 }
0x2e1e   :  { %v7396_v7 = vmax.f32 %v7390_v21, 0.0  ;;  %v7397_v40 = vmax.f32 %v7391_v50, 0.0 }
0x2e1f   :  { %v7398_v11 = vmul.f32 %v7392_v38, %v10285_v31  ;;  %v7399_v42 = vmul.f32 %v7393_v2, %v10289_v32  ;;  %v7400_v43 = vmul.f32 %v7394_v48, %v10297_v16  ;;  %v7401_v14 = vmul.f32 %v7395_v34, %v10299_v57 }
0x2e20   :  { %v7402_v59 = vmul.f32 %v7396_v7, %v10303_v58  ;;  %v7403_v35 = vmul.f32 %v7397_v40, %v10301_v51 }
0x2e21   :  { %v7404_v29 = vpack.c.bf16 %v7398_v11, %v7398_v11  ;;  %v7405_v20 = vpack.c.bf16 %v7399_v42, %v7399_v42  ;;  %v7406_v8 = vpack.c.bf16 %v7400_v43, %v7400_v43  ;;  %v7407_v9 = vpack.c.bf16 %v7401_v14, %v7401_v14 }
0x2e22   :  { %v7408_v23 = vpack.c.bf16 %v7402_v59, %v7402_v59  ;;  %v7409_v24 = vpack.c.bf16 %v7403_v35, %v7403_v35 }
0x2e23   :  { %7416 = vrot.lane.b32.xlu1 %v7404_v29, %s9949_s6 }
0x2e27   :  { %7418 = vrot.lane.b32.xlu1 %v7405_v20, %s9949_s6 }
0x2e2b   :  { %7420 = vrot.lane.b32.xlu1 %v7406_v8, %s9949_s6 }
0x2e2f   :  { %7422 = vrot.lane.b32.xlu1 %v7407_v9, %s9949_s6 }
0x2e33   :  { %7424 = vrot.lane.b32.xlu1 %v7408_v23, %s9949_s6 }
0x2e37   :  { %7426 = vrot.lane.b32.xlu1 %v7409_v24, %s9949_s6  ;;  %s9998_s6 = smov 25  }
0x2e95   :  { %v7417_v45 = vpop.permute.xlu1 %7416 }
0x2e96   :  { %v12155_v10 = vsel %vm12483_vm14, 0, %v7417_v45 }
0x2e97   :  { %v7439_v63 = vrot.slane %v12155_v10, 4 }
0x2e99   :  { %v7419_v1 = vpop.permute.xlu1 %7418 }
0x2e9a   :  { %v12150_v52 = vsel %vm12482_vm13, %v7417_v45, %v7419_v1  ;;  %vm12493_vm13 = vcmask 752640  }
0x2e9b   :  { %7464 = vrot.lane.b32.xlu1 %v12150_v52, %s9950_s7  ;;  %v7440_v39 = vrot.slane %v12150_v52, 4  ;;  %vm12494_vm14 = vmmov %vm12493_vm13 }
0x2e9d   :  { %v7421_v0 = vpop.permute.xlu1 %7420 }
0x2e9e   :  { %v12158_v53 = vsel %vm12484_vm15, %v7419_v1, %v7421_v0  ;;  %vm12495_vm15 = vcmask 744448  }
0x2e9f   :  { %7462 = vrot.lane.b32.xlu1 %v12155_v10, %s9950_s7  ;;  %7466 = vrot.lane.b32.xlu0 %v12158_v53, %s9950_s7  ;;  %v7441_v6 = vrot.slane %v12158_v53, 4 }
0x2ea1   :  { %v7423_v36 = vpop.permute.xlu1 %7422 }
0x2ea2   :  { %v12177_v44 = vsel %vm12485_vm0, %v7421_v0, %v7423_v36  ;;  %vm12496_vm0 = vmmov %vm12495_vm15 }
0x2ea3   :  { %7498 = vrot.lane.b32.xlu1 %v12150_v52, %s9951_s8  ;;  %7500 = vrot.lane.b32.xlu0 %v12158_v53, %s9951_s8  ;;  %v7442_v55 = vrot.slane %v12177_v44, 4 }
0x2ea5   :  { %v7425_v33 = vpop.permute.xlu1 %7424 }
0x2ea6   :  { %v12184_v47 = vsel %vm12486_vm1, %v7423_v36, %v7425_v33  ;;  %vm12497_vm1 = vcmask 736256  }
0x2ea7   :  { %7496 = vrot.lane.b32.xlu1 %v12155_v10, %s9951_s8  ;;  %7534 = vrot.lane.b32.xlu0 %v12158_v53, %s9952_s9  ;;  %v7443_v62 = vrot.slane %v12184_v47, 4 }
0x2ea9   :  { %v7427_v5 = vpop.permute.xlu1 %7426 }
0x2eaa   :  { %v7432_v13 = vsel %vm12487_vm6, %v7425_v33, %v7427_v5  ;;  %vm12498_vm6 = vmmov %vm12497_vm1 }
0x2eab   :  { %7532 = vrot.lane.b32.xlu1 %v12150_v52, %s9952_s9  ;;  %7566 = vrot.lane.b32.xlu0 %v12150_v52, %s9953_s10  ;;  %v12208_v4 = vsel %vm12488_vm5, %v7432_v13, 0  ;;  %vm12499_vm5 = vmmov %vm12489_vm8 }
0x2eac   :  { %v7444_v41 = vrot.slane %v12208_v4, 4 }
0x2eaf   :  { %7530 = vrot.lane.b32.xlu1 %v12155_v10, %s9952_s9  ;;  %7468 = vrot.lane.b32.xlu0 %v12177_v44, %s9950_s7 }
0x2eb3   :  { %7564 = vrot.lane.b32.xlu1 %v12155_v10, %s9953_s10  ;;  %7504 = vrot.lane.b32.xlu0 %v12184_v47, %s9951_s8 }
0x2eb7   :  { %7568 = vrot.lane.b32.xlu1 %v12158_v53, %s9953_s10  ;;  %7538 = vrot.lane.b32.xlu0 %v12184_v47, %s9952_s9 }
0x2ebb   :  { %7447 = vrot.lane.b32.xlu0 %v7440_v39, %s9954_s11  ;;  %7470 = vrot.lane.b32.xlu1 %v12184_v47, %s9950_s7 }
0x2ebf   :  { %7445 = vrot.lane.b32.xlu0 %v7439_v63, %s9954_s11  ;;  %7502 = vrot.lane.b32.xlu1 %v12177_v44, %s9951_s8 }
0x2ec3   :  { %7483 = vrot.lane.b32.xlu0 %v7441_v6, %s9955_s12  ;;  %7536 = vrot.lane.b32.xlu1 %v12177_v44, %s9952_s9 }
0x2ec7   :  { %7479 = vrot.lane.b32.xlu0 %v7439_v63, %s9955_s12  ;;  %7472 = vrot.lane.b32.xlu1 %v12208_v4, %s9950_s7 }
0x2ecb   :  { %7517 = vrot.lane.b32.xlu0 %v7441_v6, %s9956_s13  ;;  %7449 = vrot.lane.b32.xlu1 %v7441_v6, %s9954_s11 }
0x2ecf   :  { %7513 = vrot.lane.b32.xlu0 %v7439_v63, %s9956_s13  ;;  %7481 = vrot.lane.b32.xlu1 %v7440_v39, %s9955_s12 }
0x2ed3   :  { %7551 = vrot.lane.b32.xlu0 %v7441_v6, %s9957_s14  ;;  %7515 = vrot.lane.b32.xlu1 %v7440_v39, %s9956_s13 }
0x2ed7   :  { %7547 = vrot.lane.b32.xlu0 %v7439_v63, %s9957_s14  ;;  %7549 = vrot.lane.b32.xlu1 %v7440_v39, %s9957_s14 }
0x2edb   :  { %7451 = vrot.lane.b32.xlu0 %v7442_v55, %s9954_s11  ;;  %7506 = vrot.lane.b32.xlu1 %v12208_v4, %s9951_s8 }
0x2edf   :  { %7485 = vrot.lane.b32.xlu0 %v7442_v55, %s9955_s12  ;;  %7453 = vrot.lane.b32.xlu1 %v7443_v62, %s9954_s11 }
0x2ee3   :  { %7521 = vrot.lane.b32.xlu0 %v7443_v62, %s9956_s13  ;;  %7487 = vrot.lane.b32.xlu1 %v7443_v62, %s9955_s12 }
0x2ee7   :  { %7555 = vrot.lane.b32.xlu0 %v7443_v62, %s9957_s14  ;;  %7519 = vrot.lane.b32.xlu1 %v7442_v55, %s9956_s13 }
0x2eeb   :  { %7553 = vrot.lane.b32.xlu1 %v7442_v55, %s9957_s14  ;;  %7455 = vrot.lane.b32.xlu0 %v7444_v41, %s9954_s11 }
0x2eef   :  { %7540 = vrot.lane.b32.xlu1 %v12208_v4, %s9952_s9  ;;  %7489 = vrot.lane.b32.xlu0 %v7444_v41, %s9955_s12  ;;  %s8139_s9 = sld [smem:[%s12438_s0 + %s9998_s6]]  }
0x2ef3   :  { %7570 = vrot.lane.b32.xlu1 %v12177_v44, %s9953_s10  ;;  %7523 = vrot.lane.b32.xlu0 %v7444_v41, %s9956_s13 }
0x2ef7   :  { %7574 = vrot.lane.b32.xlu1 %v12208_v4, %s9953_s10  ;;  %7557 = vrot.lane.b32.xlu0 %v7444_v41, %s9957_s14  ;;  %s10000_s14 = smov 27  }
0x2ef8   :  { %s8141_s26 = sld [smem:[%s12438_s0 + %s10000_s14]]  }
0x2efb   :  { %7572 = vrot.lane.b32.xlu0 %v12184_v47, %s9953_s10  ;;  %s9999_s10 = smov 28  }
0x2efc   :  { %s8142_s13 = sld [smem:[%s12438_s0 + %s9999_s10]]  }
0x2f0d   :  { %v7465_v27 = vpop.permute.xlu1 %7464 }
0x2f11   :  { %v12246_v49 = vpop.permute.xlu0 %7466  ;;  %v7463_v54 = vpop.permute.xlu1 %7462 }
0x2f12   :  { %v7475_v23 = vsel %vm210_vm4, %v7465_v27, %v12246_v49  ;;  %v7474_v35 = vsel %vm210_vm4, %v7463_v54, %v7465_v27 }
0x2f15   :  { %v12248_v56 = vpop.permute.xlu0 %7500  ;;  %v7499_v17 = vpop.permute.xlu1 %7498 }
0x2f16   :  { %v7509_v36 = vsel %vm12491_vm10, %v7499_v17, %v12248_v56 }
0x2f19   :  { %v12250_v60 = vpop.permute.xlu0 %7534  ;;  %v7497_v37 = vpop.permute.xlu1 %7496 }
0x2f1a   :  { %v7508_v33 = vsel %vm12492_vm12, %v7497_v37, %v7499_v17  ;;  %vm12503_vm12 = vmmov %vm12493_vm13 }
0x2f1d   :  { %v7567_v15 = vpop.permute.xlu0 %7566  ;;  %v7533_v19 = vpop.permute.xlu1 %7532 }
0x2f1e   :  { %v7543_v62 = vsel %vm12493_vm13, %v7533_v19, %v12250_v60  ;;  %vm12504_vm13 = vmmov %vm12503_vm12 }
0x2f21   :  { %v12252_v28 = vpop.permute.xlu0 %7468  ;;  %v7531_v38 = vpop.permute.xlu1 %7530 }
0x2f22   :  { %v7542_v41 = vsel %vm12494_vm14, %v7531_v38, %v7533_v19  ;;  %vm12505_vm14 = vmmov %vm12496_vm0 }
0x2f25   :  { %v12254_v2 = vpop.permute.xlu0 %7504  ;;  %v7565_v12 = vpop.permute.xlu1 %7564 }
0x2f29   :  { %v12256_v11 = vpop.permute.xlu0 %7538  ;;  %v12258_v22 = vpop.permute.xlu1 %7568 }
0x2f2d   :  { %v7448_v29 = vpop.permute.xlu0 %7447  ;;  %v12260_v42 = vpop.permute.xlu1 %7470 }
0x2f31   :  { %v7446_v48 = vpop.permute.xlu0 %7445  ;;  %v12262_v3 = vpop.permute.xlu1 %7502 }
0x2f32   :  { %v7457_v21 = vsel %vm192_vm2, %v7446_v48, %v7448_v29  ;;  %v7577_v48 = vsel %vm12498_vm6, %v7567_v15, %v12258_v22 }
0x2f33   :  { %v7582_v9 = vsel %vm324_vm3, %v12155_v10, %v7457_v21 }
0x2f35   :  { %v7484_v18 = vpop.permute.xlu0 %7483  ;;  %v12264_v20 = vpop.permute.xlu1 %7536 }
0x2f39   :  { %v7480_v43 = vpop.permute.xlu0 %7479  ;;  %v12266_v34 = vpop.permute.xlu1 %7472 }
0x2f3d   :  { %v12269_v8 = vpop.permute.xlu0 %7517  ;;  %v7450_v14 = vpop.permute.xlu1 %7449 }
0x2f3e   :  { %v7458_v7 = vsel %vm192_vm2, %v7448_v29, %v7450_v14  ;;  %v7576_v29 = vsel %vm12497_vm1, %v7565_v12, %v7567_v15  ;;  %vm12510_vm1 = vmmov %vm12505_vm14 }
0x2f3f   :  { %v7586_v50 = vsel %vm324_vm3, %v12150_v52, %v7458_v7  ;;  %v7680_v19 = vsel %vm324_vm3, %v7576_v29, 0 }
0x2f40   :  { %7697 = vmatprep.subr.bf16.mxu0 %v7586_v50 }
0x2f41   :  { %v7514_v59 = vpop.permute.xlu0 %7513  ;;  %7698 = vmatpush1.bf16.msra.mxu0 %v7582_v9  ;;  %v7482_v40 = vpop.permute.xlu1 %7481  ;;  %v12312_v9 = vld [vmem:[%s8139_s9] sm:$0xf] }
0x2f42   :  { %v7491_v24 = vsel %vm12489_vm8, %v7480_v43, %v7482_v40  ;;  %v7492_v45 = vsel %vm12490_vm9, %v7482_v40, %v7484_v18  ;;  %vm12500_vm8 = vmmov %vm12499_vm5 }
0x2f43   :  { %v7609_v1 = vsel %vm324_vm3, %v7475_v23, %v7492_v45  ;;  %v7605_v52 = vsel %vm324_vm3, %v7474_v35, %v7491_v24  ;;  %v7477_v35 = vsel %vm210_vm4, %v12252_v28, %v12260_v42  ;;  %v7476_v24 = vsel %vm210_vm4, %v12246_v49, %v12252_v28  ;;  %vm12501_vm9 = vmmov %vm12491_vm10 }
0x2f44   :  { %7699 = vmatprep.subr.bf16.mxu0 %v7609_v1  ;;  %vm12502_vm10 = vmmov %vm12501_vm9 }
0x2f45   :  { %v12283_v0 = vpop.permute.xlu0 %7551  ;;  %7700 = vmatpush1.bf16.msra.mxu0 %v7605_v52  ;;  %v7516_v10 = vpop.permute.xlu1 %7515  ;;  %v7510_v52 = vsel %vm12501_vm9, %v12248_v56, %v12262_v3  ;;  %v7545_v56 = vsel %vm12504_vm13, %v12264_v20, %v12256_v11 }
0x2f46   :  { %v7525_v39 = vsel %vm264_vm7, %v7514_v59, %v7516_v10  ;;  %v7526_v63 = vsel %vm264_vm7, %v7516_v10, %v12269_v8  ;;  %v7511_v10 = vsel %vm12502_vm10, %v12262_v3, %v12254_v2 }
0x2f47   :  { %v7633_v5 = vsel %vm324_vm3, %v7509_v36, %v7526_v63  ;;  %v7629_v6 = vsel %vm324_vm3, %v7508_v33, %v7525_v39  ;;  %v7544_v39 = vsel %vm12503_vm12, %v12250_v60, %v12264_v20 }
0x2f48   :  { %7701 = vmatprep.subr.bf16.mxu0 %v7633_v5 }
0x2f49   :  { %v7548_v13 = vpop.permute.xlu0 %7547  ;;  %7702 = vmatpush1.bf16.msra.mxu0 %v7629_v6  ;;  %v7550_v55 = vpop.permute.xlu1 %7549 }
0x2f4a   :  { %v7559_v27 = vsel %vm12495_vm15, %v7548_v13, %v7550_v55  ;;  %v7560_v54 = vsel %vm12496_vm0, %v7550_v55, %v12283_v0  ;;  %vm12506_vm15 = vmmov %vm12496_vm0 }
0x2f4b   :  { %v7657_v17 = vsel %vm324_vm3, %v7543_v62, %v7560_v54  ;;  %v7653_v37 = vsel %vm324_vm3, %v7542_v41, %v7559_v27  ;;  %vm12508_vm0 = vmmov %vm12501_vm9 }
0x2f4c   :  { %7703 = vmatprep.subr.bf16.mxu0 %v7657_v17 }
0x2f4d   :  { %v7452_v43 = vpop.permute.xlu0 %7451  ;;  %7704 = vmatpush1.bf16.msra.mxu0 %v7653_v37  ;;  %v12307_v21 = vpop.permute.xlu1 %7506 }
0x2f4e   :  { %8959 = vmatprep.subr.msk.bf16.mxu0 %vm324_vm3, %v7577_v48  ;;  %v7459_v38 = vsel %vm192_vm2, %v7450_v14, %v7452_v43  ;;  %v7512_v17 = vsel %vm12508_vm0, %v12254_v2, %v12307_v21 }
0x2f4f   :  { %v7590_v59 = vsel %vm324_vm3, %v12158_v53, %v7459_v38 }
0x2f51   :  { %v7486_v7 = vpop.permute.xlu0 %7485  ;;  %7706 = vmatpush1.bf16.msra.mxu0 %v7680_v19  ;;  %v7454_v50 = vpop.permute.xlu1 %7453 }
0x2f52   :  { %v7460_v12 = vsel %vm192_vm2, %v7452_v43, %v7454_v50  ;;  %v7493_v40 = vsel %vm12499_vm5, %v7484_v18, %v7486_v7 }
0x2f53   :  { %v7594_v15 = vsel %vm324_vm3, %v12177_v44, %v7460_v12  ;;  %v7613_v53 = vsel %vm324_vm3, %v7476_v24, %v7493_v40 }
0x2f54   :  { %7738 = vmatprep.subr.bf16.mxu0 %v7594_v15  ;;  %8960 = vmatmul.mubr.msk.bf16.vlgmr.msra.gmra.mrb[84].mxu0 %vm420_vm11, %v12312_v9 }
0x2f55   :  { %v7522_v14 = vpop.permute.xlu0 %7521  ;;  %7739 = vmatpush1.bf16.msra.mxu0 %v7590_v59  ;;  %v7488_v23 = vpop.permute.xlu1 %7487  ;;  %7770 = vmatprep.mubr.bf16.mxu0 %v9958_v30 }
0x2f56   :  { %v7494_v44 = vsel %vm12500_vm8, %v7486_v7, %v7488_v23 }
0x2f57   :  { %v7617_v45 = vsel %vm324_vm3, %v7477_v35, %v7494_v44 }
0x2f58   :  { %7740 = vmatprep.subr.bf16.mxu0 %v7617_v45 }
0x2f59   :  { %v7556_v18 = vpop.permute.xlu0 %7555  ;;  %7741 = vmatpush1.bf16.msra.mxu0 %v7613_v53  ;;  %v7520_v1 = vpop.permute.xlu1 %7519 }
0x2f5a   :  { %v7527_v36 = vsel %vm264_vm7, %v12269_v8, %v7520_v1  ;;  %v7528_v49 = vsel %vm264_vm7, %v7520_v1, %v7522_v14 }
0x2f5b   :  { %v7641_v28 = vsel %vm324_vm3, %v7511_v10, %v7528_v49  ;;  %v7637_v33 = vsel %vm324_vm3, %v7510_v52, %v7527_v36 }
0x2f5c   :  { %7742 = vmatprep.subr.bf16.mxu0 %v7641_v28 }
0x2f5d   :  { %v7456_v63 = vpop.permute.xlu0 %7455  ;;  %7743 = vmatpush1.bf16.msra.mxu0 %v7637_v33  ;;  %v7554_v3 = vpop.permute.xlu1 %7553 }
0x2f5e   :  { %v7461_v8 = vsel %vm192_vm2, %v7454_v50, %v7456_v63  ;;  %v7561_v5 = vsel %vm12505_vm14, %v12283_v0, %v7554_v3  ;;  %v7562_v6 = vsel %vm12506_vm15, %v7554_v3, %v7556_v18  ;;  %v7601_v13 = vsel %vm324_vm3, %v12208_v4, %v7456_v63  ;;  %vm12507_vm2 = vmmov %vm12499_vm5 }
0x2f5f   :  { %7779 = vmatprep.subr.bf16.mxu1 %v7601_v13  ;;  %v7665_v60 = vsel %vm324_vm3, %v7545_v56, %v7562_v6  ;;  %v7598_v55 = vsel %vm324_vm3, %v12184_v47, %v7461_v8  ;;  %v7661_v20 = vsel %vm324_vm3, %v7544_v39, %v7561_v5  ;;  %v7478_v0 = vsel %vm210_vm4, %v12260_v42, %v12266_v34  ;;  %vm12509_vm4 = vmmov %vm12503_vm12 }
0x2f60   :  { %7744 = vmatprep.subr.bf16.mxu0 %v7665_v60  ;;  %7780 = vmatpush1.bf16.msra.mxu1 %v7598_v55  ;;  %vm12512_vm5 = vmmov %vm12498_vm6 }
0x2f61   :  { %v7490_v62 = vpop.permute.xlu0 %7489  ;;  %7745 = vmatpush1.bf16.msra.mxu0 %v7661_v20  ;;  %v7541_v41 = vpop.permute.xlu1 %7540 }
0x2f62   :  { %v7495_v27 = vsel %vm12507_vm2, %v7488_v23, %v7490_v62  ;;  %v7625_v4 = vsel %vm324_vm3, %v12266_v34, %v7490_v62  ;;  %v7546_v43 = vsel %vm12509_vm4, %v12256_v11, %v7541_v41 }
0x2f63   :  { %7781 = vmatprep.subr.bf16.mxu1 %v7625_v4  ;;  %v7621_v54 = vsel %vm324_vm3, %v7478_v0, %v7495_v27 }
0x2f64   :  { %7782 = vmatpush1.bf16.msra.mxu1 %v7621_v54 }
0x2f65   :  { %v7524_v47 = vpop.permute.xlu0 %7523  ;;  %v7571_v29 = vpop.permute.xlu1 %7570 }
0x2f66   :  { %v7529_v37 = vsel %vm264_vm7, %v7522_v14, %v7524_v47  ;;  %v7649_v42 = vsel %vm324_vm3, %v12307_v21, %v7524_v47  ;;  %vm12511_vm7 = vmmov %vm12498_vm6 }
0x2f67   :  { %7783 = vmatprep.subr.bf16.mxu1 %v7649_v42  ;;  %v7645_v48 = vsel %vm324_vm3, %v7512_v17, %v7529_v37  ;;  %v7578_v7 = vsel %vm12511_vm7, %v12258_v22, %v7571_v29 }
0x2f68   :  { %7784 = vmatpush1.bf16.msra.mxu1 %v7645_v48  ;;  %v7686_v11 = vsel %vm324_vm3, %v7578_v7, 0 }
0x2f69   :  { %v7558_v34 = vpop.permute.xlu0 %7557  ;;  %v7575_v50 = vpop.permute.xlu1 %7574 }
0x2f6a   :  { %v7563_v19 = vsel %vm12510_vm1, %v7556_v18, %v7558_v34  ;;  %v7673_v38 = vsel %vm324_vm3, %v7541_v41, %v7558_v34 }
0x2f6b   :  { %7785 = vmatprep.subr.bf16.mxu1 %v7673_v38  ;;  %v7669_v2 = vsel %vm324_vm3, %v7546_v43, %v7563_v19 }
0x2f6c   :  { %7786 = vmatpush1.bf16.msra.mxu1 %v7669_v2 }
0x2f6d   :  { %v7573_v21 = vpop.permute.xlu0 %7572  ;;  %8963 = vmatprep.subr.msk.bf16.mxu1 %vm324_vm3, %v7575_v50 }
0x2f6e   :  { %v7579_v12 = vsel %vm12498_vm6, %v7571_v29, %v7573_v21  ;;  %v7580_v15 = vsel %vm12512_vm5, %v7573_v21, %v7575_v50 }
0x2f6f   :  { %v7692_v59 = vsel %vm324_vm3, %v7580_v15, 0  ;;  %8961 = vmatprep.subr.msk.bf16.mxu0 %vm324_vm3, %v7579_v12 }
0x2f70   :  { %7747 = vmatpush1.bf16.msra.mxu0 %v7686_v11  ;;  %7788 = vmatpush1.bf16.msra.mxu1 %v7692_v59 }
0x2f73   :  { %8962 = vmatmul.mubr.msk.bf16.vlgmr.msra.gmra.mrb[88].mxu0 %vm420_vm11, %v12312_v9  ;;  %8964 = vmatmul.mubr.msk.bf16.vlgmr.msra.gmra.mrb[80].mxu1 %vm420_vm11, %v12312_v9  ;;  %vm12513_vm11 = vcmask 64512  }
0x2f74   :  { %7968 = vmatprep.mubr.bf16.mxu0 %v9958_v30  ;;  %8009 = vmatprep.mubr.bf16.mxu1 %v9958_v30  ;;  %vm12514_vm8 = vmmov %vm12513_vm11 }
0x2f75   :  { %vm12515_vm9 = vmmov %vm12514_vm8 }
0x2f76   :  { %vm12516_vm10 = vmmov %vm12514_vm8 }
0x2f77   :  { %vm12517_vm12 = vmmov %vm12514_vm8 }
0x3027   :  { %v7731_v22 = vpop.f32.mrb[84].mxu0 }
0x3028   :  { %v7820_v40 = vmul.f32 %v7731_v22, %v10285_v31  ;;  %v7733_v14 = vpop.f32.mrb[85].mxu0 }
0x3029   :  { %v7821_v23 = vmul.f32 %v7733_v14, %v10289_v32  ;;  %v7735_v35 = vpop.f32.mrb[86].mxu0 }
0x302a   :  { %v7736_v44 = vpop.f32.mrb[87].mxu0 }
0x302b   :  { %v7826_v24 = vadd.f32 %v7821_v23, %v7820_v40 }
0x3046   :  { %v7772_v45 = vpop.f32.mrb[88].mxu0  ;;  %v7813_v53 = vpop.f32.mrb[80].mxu1 }
0x3047   :  { %v7822_v18 = vmul.f32 %v7772_v45, %v10297_v16  ;;  %v7774_v1 = vpop.f32.mrb[89].mxu0  ;;  %v7815_v52 = vpop.f32.mrb[81].mxu1  ;;  %v7824_v33 = vmul.f32 %v7813_v53, %v10303_v58 }
0x3048   :  { %v7823_v9 = vmul.f32 %v7774_v1, %v10299_v57  ;;  %v7776_v10 = vpop.f32.mrb[90].mxu0  ;;  %v7825_v36 = vmul.f32 %v7815_v52, %v10301_v51  ;;  %v7817_v49 = vpop.f32.mrb[82].mxu1 }
0x3049   :  { %v7827_v28 = vadd.f32 %v7826_v24, %v7822_v18  ;;  %v7777_v39 = vpop.f32.mrb[91].mxu0  ;;  %v7818_v56 = vpop.f32.mrb[83].mxu1 }
0x304a   :  { %v7830_v3 = vsel %vm12513_vm11, %v7825_v36, 0.0 }
0x304b   :  { %v7828_v63 = vadd.f32 %v7827_v28, %v7823_v9 }
0x304d   :  { %v7829_v8 = vadd.f32 %v7828_v63, %v7824_v33 }
0x304f   :  { %v7831_v5 = vadd.f32 %v7830_v3, %v7829_v8 }
0x3051   :  { %7832 = vadd.xlane.f32.xlu0 %v7831_v5 }
0x30de   :  { %v7833_v6 = vpop.xlane.xlu0 %7832 }
0x30df   :  { %v7834_v13 = vmul.f32 0.001953125, %v7833_v6 }
0x30e1   :  { %v7835_v60 = vsub.f32 %v7731_v22, %v7834_v13  ;;  %v7836_v55 = vsub.f32 %v7733_v14, %v7834_v13  ;;  %v7837_v20 = vsub.f32 %v7772_v45, %v7834_v13  ;;  %v7838_v62 = vsub.f32 %v7774_v1, %v7834_v13 }
0x30e2   :  { %v7840_v41 = vsub.f32 %v7815_v52, %v7834_v13  ;;  %v7839_v0 = vsub.f32 %v7813_v53, %v7834_v13  ;;  %v64_v14 = vstv %s8142_s13 }
0x30e3   :  { %v7841_v27 = vmul.f32 %v7835_v60, %v10285_v31  ;;  %v7842_v4 = vmul.f32 %v7836_v55, %v10289_v32  ;;  %v7843_v54 = vmul.f32 %v7837_v20, %v10297_v16  ;;  %v7844_v47 = vmul.f32 %v7838_v62, %v10299_v57  ;;  %65 = vst [vmem:[#allocation2] sm:$0x1] %v64_v14 }
0x30e4   :  { %v7846_v29 = vmul.f32 %v7840_v41, %v10301_v51  ;;  %v7845_v42 = vmul.f32 %v7839_v0, %v10303_v58 }
0x30e5   :  { %v7847_v17 = vmul.f32 %v7841_v27, %v7841_v27  ;;  %v7848_v37 = vmul.f32 %v7842_v4, %v7842_v4  ;;  %v7849_v48 = vmul.f32 %v7843_v54, %v7843_v54  ;;  %v7850_v43 = vmul.f32 %v7844_v47, %v7844_v47 }
0x30e6   :  { %v7852_v38 = vmul.f32 %v7846_v29, %v7846_v29  ;;  %v7851_v2 = vmul.f32 %v7845_v42, %v7845_v42 }
0x30e7   :  { %v7853_v34 = vadd.f32 %v7848_v37, %v7847_v17 }
0x30e8   :  { %v7857_v21 = vsel %vm12514_vm8, %v7852_v38, 0.0 }
0x30e9   :  { %v7854_v19 = vadd.f32 %v7853_v34, %v7849_v48 }
0x30ea   :  { %v7905_v23 = vld [vmem:[#allocation2] sm:$0x1] }
0x30eb   :  { %v7855_v7 = vadd.f32 %v7854_v19, %v7850_v43 }
0x30ed   :  { %v7856_v50 = vadd.f32 %v7855_v7, %v7851_v2 }
0x30ef   :  { %v7858_v12 = vadd.f32 %v7857_v21, %v7856_v50 }
0x30f1   :  { %7859 = vadd.xlane.f32.xlu1 %v7858_v12 }
0x3102   :  { %7877 = vperm.xlu1 %9228, %v12131_v61  }
0x3106   :  { %9229 = vset.pattern.permute.xlu1 %v9958_v30 }
0x3107   :  { %7908 = vperm.xlu1 %9229, %v7905_v23  }
0x317e   :  { %v7860_v15 = vpop.xlane.xlu1 %7859 }
0x317f   :  { %v7861_v11 = vmul.f32 0.001953125, %v7860_v15 }
0x3181   :  { %v7862_v59 = vadd.f32 1e-05, %v7861_v11 }
0x3182   :  { %v7878_v44 = vpop.permute.xlu1 %7877 }
0x3183   :  { %9947 = vrsqrt.f32 %v7862_v59 }
0x318d   :  { %v9948_v22 = vpop.eup %9947 }
0x318e   :  { %v7864_v40 = vmul.f32 %v9948_v22, %v12131_v61 }
0x3190   :  { %7867 = vperm.xlu0 %9227, %v7864_v40  }
0x3194   :  { %9230 = vset.pattern.permute.xlu0 %v9958_v30 }
0x320f   :  { %v7868_v35 = vpop.permute.xlu0 %7867 }
0x3210   :  { %v7870_v24 = vmul.f32 %v7868_v35, %v7841_v27  ;;  %v7871_v45 = vmul.f32 %v7868_v35, %v7842_v4  ;;  %v7872_v53 = vmul.f32 %v7868_v35, %v7843_v54  ;;  %v7873_v18 = vmul.f32 %v7868_v35, %v7844_v47 }
0x3211   :  { %v7874_v1 = vmul.f32 %v7868_v35, %v7845_v42  ;;  %v7875_v61 = vmul.f32 %v7868_v35, %v7846_v29  ;;  %v10001_v54 = vmov 1966171168  }
0x3212   :  { %v7881_v52 = vadd.f32 %v7878_v44, %v7871_v45  ;;  %v7883_v9 = vadd.f32 %v7878_v44, %v7873_v18  ;;  %v7880_v10 = vadd.f32 %v7878_v44, %v7870_v24  ;;  %v7882_v36 = vadd.f32 %v7878_v44, %v7872_v53 }
0x3213   :  { %v7885_v49 = vadd.f32 %v7878_v44, %v7875_v61  ;;  %v7884_v28 = vadd.f32 %v7878_v44, %v7874_v1  ;;  %v8069_v47 = vunpack.c.l.s4 %v10001_v54 }
0x3214   :  { %v7887_v33 = vmax.f32 %v7881_v52, 0.0  ;;  %v7889_v39 = vmax.f32 %v7883_v9, 0.0  ;;  %v7886_v56 = vmax.f32 %v7880_v10, 0.0  ;;  %v7888_v63 = vmax.f32 %v7882_v36, 0.0 }
0x3215   :  { %v7891_v3 = vmax.f32 %v7885_v49, 0.0  ;;  %v7890_v8 = vmax.f32 %v7884_v28, 0.0  ;;  %v8070_v37 = vunpack.c.0.s8 %v8069_v47 }
0x3216   :  { %v7893_v5 = vmul.f32 %v7887_v33, %v10289_v32  ;;  %v7895_v6 = vmul.f32 %v7889_v39, %v10299_v57  ;;  %v7892_v13 = vmul.f32 %v7886_v56, %v10285_v31  ;;  %v7894_v60 = vmul.f32 %v7888_v63, %v10297_v16  ;;  %v7898_v16 = vld [vmem:[%s8141_s26] sm:$0x1] }
0x3217   :  { %v7897_v55 = vmul.f32 %v7891_v3, %v10301_v51  ;;  %v7896_v20 = vmul.f32 %v7890_v8, %v10303_v58  ;;  %v7909_v58 = vpop.permute.xlu1 %7908  ;;  %v8073_v50 = vsub.s32 %v8070_v37, %v10278_v25 }
0x3218   :  { %v7900_v62 = vpack.c.bf16 %v7893_v5, %v7893_v5  ;;  %v7902_v41 = vpack.c.bf16 %v7895_v6, %v7895_v6  ;;  %v7899_v0 = vpack.c.bf16 %v7892_v13, %v7892_v13  ;;  %v7901_v27 = vpack.c.bf16 %v7894_v60, %v7894_v60 }
0x3219   :  { %v7904_v4 = vpack.c.bf16 %v7897_v55, %v7897_v55  ;;  %v7903_v31 = vpack.c.bf16 %v7896_v20, %v7896_v20  ;;  %v7914_v17 = vrot.slane %v7909_v58, %v10281_v26 }
0x321a   :  { %8965 = vmatprep.subr.msk.bf16.mxu0 %vm324_vm3, %v7900_v62  ;;  %8967 = vmatprep.subr.msk.bf16.mxu1 %vm324_vm3, %v7902_v41  ;;  %v7919_v32 = vsel %vm324_vm3, %v7899_v0, 0  ;;  %v7925_v57 = vsel %vm324_vm3, %v7901_v27, 0 }
0x321b   :  { %7937 = vmatpush1.bf16.msra.mxu0 %v7919_v32  ;;  %7978 = vmatpush1.bf16.msra.mxu1 %v7925_v57  ;;  %v7931_v51 = vsel %vm324_vm3, %v7903_v31, 0 }
0x321c   :  { %8969 = vmatprep.subr.msk.bf16.mxu0 %vm324_vm3, %v7904_v4  ;;  %vm8108_vm3 = vcmp.lt.s32.totalorder %v566_v46, 648 }
0x321e   :  { %8966 = vmatmul.mubr.msk.bf16.vlgmr.msra.gmra.mrb[92].mxu0 %vm12515_vm9, %v7898_v16  ;;  %8968 = vmatmul.mubr.msk.bf16.vlgmr.msra.gmra.mrb[84].mxu1 %vm12516_vm10, %v7898_v16 }
0x321f   :  { %8019 = vmatpush1.bf16.msra.mxu0 %v7931_v51  ;;  %8050 = vmatprep.mubr.bf16.mxu0 %v9958_v30 }
0x3226   :  { %8970 = vmatmul.mubr.msk.bf16.vlgmr.msra.gmra.mrb[96].mxu0 %vm12517_vm12, %v7898_v16 }
0x32f1   :  { %v7970_v29 = vpop.f32.mrb[92].mxu0  ;;  %v8011_v42 = vpop.f32.mrb[84].mxu1 }
0x32f2   :  { %v7972_v48 = vpop.f32.mrb[93].mxu0  ;;  %v8012_v34 = vadd.f32 %v8011_v42, %v7914_v17  ;;  %v7971_v43 = vadd.f32 %v7970_v29, %v7914_v17  ;;  %v8013_v19 = vpop.f32.mrb[85].mxu1 }
0x32f3   :  { %v7974_v38 = vpop.f32.mrb[94].mxu0  ;;  %v7973_v2 = vadd.f32 %v7972_v48, %v7914_v17  ;;  %v8014_v7 = vadd.f32 %v8013_v19, %v7914_v17  ;;  %v8015_v30 = vpop.f32.mrb[86].mxu1 }
0x32f4   :  { %v7975_v21 = vpop.f32.mrb[95].mxu0  ;;  %v8016_v12 = vpop.f32.mrb[87].mxu1 }
0x32f5   :  { %v8065_v15 = vcombine.low %v7971_v43, %v7973_v2  ;;  %v8066_v11 = vcombine.low %v8012_v34, %v8014_v7 }
0x32f7   :  { %v8074_v59 = vrot.slane %v8065_v15, %v8073_v50  ;;  %v8081_v22 = vrot.slane %v8066_v11, %v8073_v50 }
0x32f9   :  { %v8089_v26 = vcombine.low %v8074_v59, %v8081_v22  ;;  %v8052_v40 = vpop.f32.mrb[96].mxu0 }
0x32fa   :  { %v8053_v14 = vadd.f32 %v8052_v40, %v7914_v17  ;;  %v8054_v23 = vpop.f32.mrb[97].mxu0 }
0x32fb   :  { %v8055_v35 = vadd.f32 %v8054_v23, %v7914_v17  ;;  %v8056_v44 = vpop.f32.mrb[98].mxu0  ;;  %v8096_v53 = vrot.slane %v8089_v26, %v8073_v50 }
0x32fc   :  { %v8057_v24 = vpop.f32.mrb[99].mxu0 }
0x32fd   :  { %v8067_v25 = vcombine.low %v8053_v14, %v8055_v35 }
0x32ff   :  { %v8088_v45 = vrot.slane %v8067_v25, %v8073_v50 }
0x3301   :  { %v8103_v18 = vrot.slane %v8088_v45, %v8073_v50 }
0x3303   :  { %v8104_v1 = vcombine.low %v8096_v53, %v8103_v18 }
0x3305   :  { %8110 = vst.msk [vmem:[%s8143_s19] sm:$0x3f] %vm8108_vm3, %v8104_v1 }

</bundles_post_ra>
